<compile_context>
chip_gen: v6e
topology: v6e:2x2x1
jax: 0.10.0
libtpu: 0.0.40
codegen_flags: <defaults>
</compile_context>

<pallas_src>
import numpy as np
import jax
import jax.numpy as jnp
from jax import lax
from jax.experimental import pallas as pl
from jax.experimental.pallas import tpu as pltpu

KSIZE = 5  # every Conv1d uses kernel_size=5, padding=2


# ----------------------------------------------------------------------------
# Host-side one-time parameter preparation (re-layout + BN folding + bf16 cast)
# ----------------------------------------------------------------------------
def prepare_params(p, seq_len, b_blk=8, dtype=jnp.bfloat16):
    """Re-layout weights for the fused kernel (runs once, outside the kernel)."""
    assert seq_len % 4 == 0, "seq_len must be divisible by 4 (two MaxPool1d(2,2))"
    assert b_blk % 8 == 0, "b_blk must be a multiple of 8 (sublane tile)"
    l3 = seq_len // 4
    eps = 1e-5

    def taps(w):   # torch Conv1d weight (Cout, Cin, K) -> (K, Cin, Cout)
        return jnp.transpose(w, (2, 1, 0))

    # Eval-mode BatchNorm folded into conv3 weights + per-channel shift.
    scale = p["bn_gamma"] / jnp.sqrt(p["bn_var"] + eps)
    w3t = taps(p["w4"]) * scale[None, None, :]
    t3 = (scale * (p["b4"] - p["bn_mean"]) + p["bn_beta"])[None, :]

    # Linear(200*l3, 100): wl1[c*l3 + pos, j]  ->  wm1[pos, c, j]
    wm1 = p["wl1"].reshape(200, l3, 100).transpose(1, 0, 2)

    c = lambda a: a.astype(dtype)
    f = lambda a: a.astype(jnp.float32)
    return {
        "b_blk": b_blk, "l3": l3, "dtype": dtype,
        "w0": c(taps(p["w1"])), "t0": f(p["b1"][None, :]),
        "w1": c(taps(p["w2"])), "t1": f(p["b2"][None, :]),
        "w2": c(taps(p["w3"])), "t2": f(p["b3"][None, :]),
        "w3": c(w3t),           "t3": f(t3),
        "wm1": c(wm1),          "bm1": f(p["bl1"][None, :]),
        "wm2": c(p["wl2"]),     "bm2": f(p["bl2"][None, :]),
    }


# ----------------------------------------------------------------------------
# Fused Pallas kernel: whole forward for one batch group (b_blk samples)
# ----------------------------------------------------------------------------
def _fused_cnn_kernel(x_ref,
                      w0_ref, t0_ref, w1_ref, t1_ref,
                      w2_ref, t2_ref, w3_ref, t3_ref,
                      wm1_ref, bm1_ref, wm2_ref, bm2_ref,
                      o_ref):
    f32 = jnp.float32
    cdt = w0_ref.dtype            # matmul compute dtype (bfloat16)
    bb = o_ref.shape[0]           # samples per group, folded on the sublane axis

    # Activations: (L*bb, C) float32, row r = m*bb + b  (spatial-major).
    def tap_shift(a, d):
        """shifted[r, :] = a[r + d*bb, :], zero outside the slab (conv padding)."""
        if d == 0:
            return a
        w = a.shape[0]
        z = jnp.zeros((abs(d) * bb, a.shape[1]), a.dtype)
        if d > 0:
            return jnp.concatenate([a[d * bb:, :], z], axis=0)
        return jnp.concatenate([z, a[:w + d * bb, :]], axis=0)

    def conv(a, w_ref, t_ref):
        """Conv1d(k=5, pad=2) + bias/BN shift + ReLU; per-tap bf16 MXU matmuls."""
        acc = None
        for k in range(KSIZE):
            t = jnp.dot(tap_shift(a, k - 2).astype(cdt), w_ref[k],
                        preferred_element_type=f32)
            acc = t if acc is None else acc + t
        return jnp.maximum(acc + t_ref[...], 0.0)

    def pool(y):
        """MaxPool1d(2,2) over the spatial axis: free tile regroup + max."""
        w, ch = y.shape
        return jnp.max(y.reshape(w // (2 * bb), 2, bb, ch), axis=1).reshape(w // 2, ch)

    h = conv(x_ref[...], w0_ref, t0_ref)            # (L*bb,   100)  conv0 + ReLU
    h = pool(conv(h, w1_ref, t1_ref))               # (L/2*bb, 100)  conv1 + ReLU + pool
    h = pool(conv(h, w2_ref, t2_ref))               # (L/4*bb, 200)  conv2 + ReLU + pool
    h = conv(h, w3_ref, t3_ref)                     # (L/4*bb, 200)  conv3 + BN + ReLU

    # Flatten + Linear(200*l3, 100) + ReLU + Linear(100, 1).
    l3 = wm1_ref.shape[0]
    acc = jnp.zeros((bb, wm1_ref.shape[2]), f32)
    for pos in range(l3):                            # aligned 8-row slices
        acc = acc + jnp.dot(h[pos * bb:(pos + 1) * bb, :].astype(cdt),
                            wm1_ref[pos], preferred_element_type=f32)
    hidden = jnp.maximum(acc + bm1_ref[...], 0.0)    # (bb, 100)
    o_ref[...] = (jnp.dot(hidden.astype(cdt), wm2_ref[...],
                          preferred_element_type=f32) + bm2_ref[...])   # (bb, 1)


# ----------------------------------------------------------------------------
# Wrapper
# ----------------------------------------------------------------------------
def cnn_forward(x, prep):
    """x: (B, seq_len, 4) float32 -> (B, 1) float32."""
    b, l0, cin = x.shape
    bb = prep["b_blk"]
    assert l0 % 4 == 0, "seq_len must be divisible by 4"
    assert b % bb == 0, "batch must be divisible by b_blk"
    ng = b // bb
    w0 = l0 * bb

    # (B, L, 4) -> (NG, L*bb, 4): spatial-major, batch-inner on sublanes.
    xt = (x.astype(jnp.float32)
            .reshape(ng, bb, l0, cin)
            .transpose(0, 2, 1, 3)
            .reshape(ng, w0, cin))

    weights = (prep["w0"], prep["t0"], prep["w1"], prep["t1"],
               prep["w2"], prep["t2"], prep["w3"], prep["t3"],
               prep["wm1"], prep["bm1"], prep["wm2"], prep["bm2"])

    def const_spec(a):
        nd = a.ndim
        return pl.BlockSpec(a.shape, lambda g, nd=nd: (0,) * nd)

    in_specs = [pl.BlockSpec((None, w0, cin), lambda g: (g, 0, 0))]
    in_specs += [const_spec(a) for a in weights]

    out = pl.pallas_call(
        _fused_cnn_kernel,
        out_shape=jax.ShapeDtypeStruct((ng, bb, 1), jnp.float32),
        grid=(ng,),
        in_specs=in_specs,
        out_specs=pl.BlockSpec((None, bb, 1), lambda g: (g, 0, 0)),
        compiler_params=pltpu.CompilerParams(
            dimension_semantics=("parallel",)),
    )(xt, *weights)
    return out.reshape(b, 1)


# ----------------------------------------------------------------------------
# Parameters (deterministic, in-script; shapes from CNN.__init__)
# ----------------------------------------------------------------------------
def init_params(key, seq_len):
    ks = jax.random.split(key, 16)
    f32 = jnp.float32

    def conv_w(k, cout, cin, ksz=5):
        return jax.random.normal(k, (cout, cin, ksz), f32) / np.sqrt(cin * ksz)

    def vec(k, n, scale=0.05):
        return scale * jax.random.normal(k, (n,), f32)

    F = 200 * (seq_len // 4)
    return {
        "w1": conv_w(ks[0], 100, 4),   "b1": vec(ks[1], 100),
        "w2": conv_w(ks[2], 100, 100), "b2": vec(ks[3], 100),
        "w3": conv_w(ks[4], 200, 100), "b3": vec(ks[5], 200),
        "w4": conv_w(ks[6], 200, 200), "b4": vec(ks[7], 200),
        "bn_gamma": 1.0 + vec(ks[8], 200),
        "bn_beta": vec(ks[9], 200),
        "bn_mean": vec(ks[10], 200),
        "bn_var": 1.0 + jnp.abs(vec(ks[11], 200)),
        "wl1": jax.random.normal(ks[12], (F, 100), f32) / np.sqrt(F),
        "bl1": vec(ks[13], 100),
        "wl2": jax.random.normal(ks[14], (100, 1), f32) / np.sqrt(100),
        "bl2": vec(ks[15], 1),
    }


# ----------------------------------------------------------------------------
# Pure-JAX reference for validation
# ----------------------------------------------------------------------------
def cnn_reference(x, p):
    h = jnp.transpose(x, (0, 2, 1))

    def conv(a, w, bias):
        y = lax.conv_general_dilated(a, w, (1,), [(2, 2)],
                                     dimension_numbers=("NCH", "OIH", "NCH"))
        return y + bias[None, :, None]

    h = jax.nn.relu(conv(h, p["w1"], p["b1"]))
    h = jax.nn.relu(conv(h, p["w2"], p["b2"]))
    B, C, L = h.shape
    h = jnp.max(h.reshape(B, C, L // 2, 2), axis=-1)
    h = jax.nn.relu(conv(h, p["w3"], p["b3"]))
    B, C, L = h.shape
    h = jnp.max(h.reshape(B, C, L // 2, 2), axis=-1)
    h = conv(h, p["w4"], p["b4"])
    eps = 1e-5
    scale = p["bn_gamma"] / jnp.sqrt(p["bn_var"] + eps)
    shift = p["bn_beta"] - p["bn_mean"] * scale
    h = jax.nn.relu(h * scale[None, :, None] + shift[None, :, None])
    h = h.reshape(h.shape[0], -1)
    h = jax.nn.relu(h @ p["wl1"] + p["bl1"])
    return h @ p["wl2"] + p["bl2"]


# TODO(synk): Dropout is identity (inference) and BatchNorm1d uses running
# statistics; training-mode stochastic dropout / batch-stat BN not implemented.

if __name__ == "__main__":
    seq_len = 44   # module default; divisible by 4
    batch = 8
    b_blk = 8      # one sublane group per sample fold -> grid=(1,) at batch=8

    key = jax.random.PRNGKey(0)
    kx, kp = jax.random.split(key)
    x = jax.random.normal(kx, (batch, seq_len, 4), jnp.float32)
    params = init_params(kp, seq_len)
    prep = prepare_params(params, seq_len, b_blk)   # one-time weight re-layout

    fwd = jax.jit(lambda xx: cnn_forward(xx, prep))
    out = jax.block_until_ready(fwd(x))
    assert out.shape == (batch, 1), out.shape

    ref = cnn_reference(x, params)
    # bf16 MXU inputs with f32 accumulation -> slightly relaxed tolerance.
    np.testing.assert_allclose(np.asarray(out), np.asarray(ref),
                               rtol=5e-2, atol=5e-2)
    print("KERNEL_OK")
</pallas_src>

<mosaic_0001>
module attributes {stable_mosaic.version = 11 : i64} {
  func.func @_fused_cnn_kernel(%arg0: i32, %arg1: memref<1x352x4xf32, #tpu.memory_space<vmem>>, %arg2: memref<5x4x100xbf16, #tpu.memory_space<vmem>>, %arg3: memref<1x100xf32, #tpu.memory_space<vmem>>, %arg4: memref<5x100x100xbf16, #tpu.memory_space<vmem>>, %arg5: memref<1x100xf32, #tpu.memory_space<vmem>>, %arg6: memref<5x100x200xbf16, #tpu.memory_space<vmem>>, %arg7: memref<1x200xf32, #tpu.memory_space<vmem>>, %arg8: memref<5x200x200xbf16, #tpu.memory_space<vmem>>, %arg9: memref<1x200xf32, #tpu.memory_space<vmem>>, %arg10: memref<11x200x100xbf16, #tpu.memory_space<vmem>>, %arg11: memref<1x100xf32, #tpu.memory_space<vmem>>, %arg12: memref<100x1xbf16, #tpu.memory_space<vmem>>, %arg13: memref<1x1xf32, #tpu.memory_space<vmem>>, %arg14: memref<1x8x1xf32, #tpu.memory_space<vmem>>) attributes {dimension_semantics = [#tpu.dimension_semantics<parallel>], iteration_bounds = array<i64: 1>, scalar_prefetch = 0 : i64, scratch_operands = 0 : i64, tpu.core_type = #tpu.core_type<tc>, window_params = [{transform_indices = @transform_0, window_bounds = array<i64: 1, 352, 4>}, {pipeline_mode = #tpu.pipeline_mode<synchronous>, transform_indices = @transform_1, window_bounds = array<i64: 5, 4, 100>}, {pipeline_mode = #tpu.pipeline_mode<synchronous>, transform_indices = @transform_2, window_bounds = array<i64: 1, 100>}, {pipeline_mode = #tpu.pipeline_mode<synchronous>, transform_indices = @transform_3, window_bounds = array<i64: 5, 100, 100>}, {pipeline_mode = #tpu.pipeline_mode<synchronous>, transform_indices = @transform_4, window_bounds = array<i64: 1, 100>}, {pipeline_mode = #tpu.pipeline_mode<synchronous>, transform_indices = @transform_5, window_bounds = array<i64: 5, 100, 200>}, {pipeline_mode = #tpu.pipeline_mode<synchronous>, transform_indices = @transform_6, window_bounds = array<i64: 1, 200>}, {pipeline_mode = #tpu.pipeline_mode<synchronous>, transform_indices = @transform_7, window_bounds = array<i64: 5, 200, 200>}, {pipeline_mode = #tpu.pipeline_mode<synchronous>, transform_indices = @transform_8, window_bounds = array<i64: 1, 200>}, {pipeline_mode = #tpu.pipeline_mode<synchronous>, transform_indices = @transform_9, window_bounds = array<i64: 11, 200, 100>}, {pipeline_mode = #tpu.pipeline_mode<synchronous>, transform_indices = @transform_10, window_bounds = array<i64: 1, 100>}, {pipeline_mode = #tpu.pipeline_mode<synchronous>, transform_indices = @transform_11, window_bounds = array<i64: 100, 1>}, {pipeline_mode = #tpu.pipeline_mode<synchronous>, transform_indices = @transform_12, window_bounds = array<i64: 1, 1>}, {transform_indices = @transform_13, window_bounds = array<i64: 1, 8, 1>}]} {
    %c0 = arith.constant 0 : index
    %c0_0 = arith.constant 0 : index
    %c0_1 = arith.constant 0 : index
    %0 = vector.load %arg1[%c0, %c0_0, %c0_1] : memref<1x352x4xf32, #tpu.memory_space<vmem>>, vector<1x352x4xf32>
    %1 = vector.shape_cast %0 : vector<1x352x4xf32> to vector<352x4xf32>
    %cst = arith.constant 0.000000e+00 : f32
    %2 = vector.broadcast %cst : f32 to vector<16x4xf32>
    %3 = vector.extract_strided_slice %1 {offsets = [0, 0], sizes = [336, 4], strides = [1, 1]} : vector<352x4xf32> to vector<336x4xf32>
    %4 = tpu.concatenate %2, %3 in 0 : vector<16x4xf32>, vector<336x4xf32> -> vector<352x4xf32>
    %5 = arith.truncf %4 : vector<352x4xf32> to vector<352x4xbf16>
    %c0_2 = arith.constant 0 : index
    %c0_3 = arith.constant 0 : index
    %c0_4 = arith.constant 0 : index
    %6 = vector.load %arg2[%c0_2, %c0_3, %c0_4] : memref<5x4x100xbf16, #tpu.memory_space<vmem>>, vector<1x4x100xbf16>
    %7 = vector.shape_cast %6 : vector<1x4x100xbf16> to vector<4x100xbf16>
    %cst_5 = arith.constant dense<0.000000e+00> : vector<352x100xf32>
    %8 = tpu.matmul %5, %7, %cst_5 {dimension_numbers = #tpu.dot_dimension_numbers<[1], [0], [0], [1], [0, 0, 1, 1], [], []>} : vector<352x4xbf16>, vector<4x100xbf16>, vector<352x100xf32> -> vector<352x100xf32>
    %cst_6 = arith.constant 0.000000e+00 : f32
    %9 = vector.broadcast %cst_6 : f32 to vector<8x4xf32>
    %10 = vector.extract_strided_slice %1 {offsets = [0, 0], sizes = [344, 4], strides = [1, 1]} : vector<352x4xf32> to vector<344x4xf32>
    %11 = tpu.concatenate %9, %10 in 0 : vector<8x4xf32>, vector<344x4xf32> -> vector<352x4xf32>
    %12 = arith.truncf %11 : vector<352x4xf32> to vector<352x4xbf16>
    %c1 = arith.constant 1 : index
    %c0_7 = arith.constant 0 : index
    %c0_8 = arith.constant 0 : index
    %13 = vector.load %arg2[%c1, %c0_7, %c0_8] : memref<5x4x100xbf16, #tpu.memory_space<vmem>>, vector<1x4x100xbf16>
    %14 = vector.shape_cast %13 : vector<1x4x100xbf16> to vector<4x100xbf16>
    %cst_9 = arith.constant dense<0.000000e+00> : vector<352x100xf32>
    %15 = tpu.matmul %12, %14, %cst_9 {dimension_numbers = #tpu.dot_dimension_numbers<[1], [0], [0], [1], [0, 0, 1, 1], [], []>} : vector<352x4xbf16>, vector<4x100xbf16>, vector<352x100xf32> -> vector<352x100xf32>
    %16 = arith.addf %8, %15 : vector<352x100xf32>
    %17 = arith.truncf %1 : vector<352x4xf32> to vector<352x4xbf16>
    %c2 = arith.constant 2 : index
    %c0_10 = arith.constant 0 : index
    %c0_11 = arith.constant 0 : index
    %18 = vector.load %arg2[%c2, %c0_10, %c0_11] : memref<5x4x100xbf16, #tpu.memory_space<vmem>>, vector<1x4x100xbf16>
    %19 = vector.shape_cast %18 : vector<1x4x100xbf16> to vector<4x100xbf16>
    %cst_12 = arith.constant dense<0.000000e+00> : vector<352x100xf32>
    %20 = tpu.matmul %17, %19, %cst_12 {dimension_numbers = #tpu.dot_dimension_numbers<[1], [0], [0], [1], [0, 0, 1, 1], [], []>} : vector<352x4xbf16>, vector<4x100xbf16>, vector<352x100xf32> -> vector<352x100xf32>
    %21 = arith.addf %16, %20 : vector<352x100xf32>
    %cst_13 = arith.constant 0.000000e+00 : f32
    %22 = vector.broadcast %cst_13 : f32 to vector<8x4xf32>
    %23 = vector.extract_strided_slice %1 {offsets = [8, 0], sizes = [344, 4], strides = [1, 1]} : vector<352x4xf32> to vector<344x4xf32>
    %24 = tpu.concatenate %23, %22 in 0 : vector<344x4xf32>, vector<8x4xf32> -> vector<352x4xf32>
    %25 = arith.truncf %24 : vector<352x4xf32> to vector<352x4xbf16>
    %c3 = arith.constant 3 : index
    %c0_14 = arith.constant 0 : index
    %c0_15 = arith.constant 0 : index
    %26 = vector.load %arg2[%c3, %c0_14, %c0_15] : memref<5x4x100xbf16, #tpu.memory_space<vmem>>, vector<1x4x100xbf16>
    %27 = vector.shape_cast %26 : vector<1x4x100xbf16> to vector<4x100xbf16>
    %cst_16 = arith.constant dense<0.000000e+00> : vector<352x100xf32>
    %28 = tpu.matmul %25, %27, %cst_16 {dimension_numbers = #tpu.dot_dimension_numbers<[1], [0], [0], [1], [0, 0, 1, 1], [], []>} : vector<352x4xbf16>, vector<4x100xbf16>, vector<352x100xf32> -> vector<352x100xf32>
    %29 = arith.addf %21, %28 : vector<352x100xf32>
    %cst_17 = arith.constant 0.000000e+00 : f32
    %30 = vector.broadcast %cst_17 : f32 to vector<16x4xf32>
    %31 = vector.extract_strided_slice %1 {offsets = [16, 0], sizes = [336, 4], strides = [1, 1]} : vector<352x4xf32> to vector<336x4xf32>
    %32 = tpu.concatenate %31, %30 in 0 : vector<336x4xf32>, vector<16x4xf32> -> vector<352x4xf32>
    %33 = arith.truncf %32 : vector<352x4xf32> to vector<352x4xbf16>
    %c4 = arith.constant 4 : index
    %c0_18 = arith.constant 0 : index
    %c0_19 = arith.constant 0 : index
    %34 = vector.load %arg2[%c4, %c0_18, %c0_19] : memref<5x4x100xbf16, #tpu.memory_space<vmem>>, vector<1x4x100xbf16>
    %35 = vector.shape_cast %34 : vector<1x4x100xbf16> to vector<4x100xbf16>
    %cst_20 = arith.constant dense<0.000000e+00> : vector<352x100xf32>
    %36 = tpu.matmul %33, %35, %cst_20 {dimension_numbers = #tpu.dot_dimension_numbers<[1], [0], [0], [1], [0, 0, 1, 1], [], []>} : vector<352x4xbf16>, vector<4x100xbf16>, vector<352x100xf32> -> vector<352x100xf32>
    %37 = arith.addf %29, %36 : vector<352x100xf32>
    %c0_21 = arith.constant 0 : index
    %c0_22 = arith.constant 0 : index
    %38 = vector.load %arg3[%c0_21, %c0_22] : memref<1x100xf32, #tpu.memory_space<vmem>>, vector<1x100xf32>
    %39 = vector.broadcast %38 : vector<1x100xf32> to vector<352x100xf32>
    %40 = arith.addf %37, %39 : vector<352x100xf32>
    %cst_23 = arith.constant 0.000000e+00 : f32
    %41 = vector.broadcast %cst_23 : f32 to vector<352x100xf32>
    %42 = arith.maximumf %40, %41 : vector<352x100xf32>
    %cst_24 = arith.constant 0.000000e+00 : f32
    %43 = vector.broadcast %cst_24 : f32 to vector<16x100xf32>
    %44 = vector.extract_strided_slice %42 {offsets = [0, 0], sizes = [336, 100], strides = [1, 1]} : vector<352x100xf32> to vector<336x100xf32>
    %45 = tpu.concatenate %43, %44 in 0 : vector<16x100xf32>, vector<336x100xf32> -> vector<352x100xf32>
    %46 = arith.truncf %45 : vector<352x100xf32> to vector<352x100xbf16>
    %c0_25 = arith.constant 0 : index
    %c0_26 = arith.constant 0 : index
    %c0_27 = arith.constant 0 : index
    %47 = vector.load %arg4[%c0_25, %c0_26, %c0_27] : memref<5x100x100xbf16, #tpu.memory_space<vmem>>, vector<1x100x100xbf16>
    %48 = vector.shape_cast %47 : vector<1x100x100xbf16> to vector<100x100xbf16>
    %cst_28 = arith.constant dense<0.000000e+00> : vector<352x100xf32>
    %49 = tpu.matmul %46, %48, %cst_28 {dimension_numbers = #tpu.dot_dimension_numbers<[1], [0], [0], [1], [0, 0, 1, 1], [], []>} : vector<352x100xbf16>, vector<100x100xbf16>, vector<352x100xf32> -> vector<352x100xf32>
    %cst_29 = arith.constant 0.000000e+00 : f32
    %50 = vector.broadcast %cst_29 : f32 to vector<8x100xf32>
    %51 = vector.extract_strided_slice %42 {offsets = [0, 0], sizes = [344, 100], strides = [1, 1]} : vector<352x100xf32> to vector<344x100xf32>
    %52 = tpu.concatenate %50, %51 in 0 : vector<8x100xf32>, vector<344x100xf32> -> vector<352x100xf32>
    %53 = arith.truncf %52 : vector<352x100xf32> to vector<352x100xbf16>
    %c1_30 = arith.constant 1 : index
    %c0_31 = arith.constant 0 : index
    %c0_32 = arith.constant 0 : index
    %54 = vector.load %arg4[%c1_30, %c0_31, %c0_32] : memref<5x100x100xbf16, #tpu.memory_space<vmem>>, vector<1x100x100xbf16>
    %55 = vector.shape_cast %54 : vector<1x100x100xbf16> to vector<100x100xbf16>
    %cst_33 = arith.constant dense<0.000000e+00> : vector<352x100xf32>
    %56 = tpu.matmul %53, %55, %cst_33 {dimension_numbers = #tpu.dot_dimension_numbers<[1], [0], [0], [1], [0, 0, 1, 1], [], []>} : vector<352x100xbf16>, vector<100x100xbf16>, vector<352x100xf32> -> vector<352x100xf32>
    %57 = arith.addf %49, %56 : vector<352x100xf32>
    %58 = arith.truncf %42 : vector<352x100xf32> to vector<352x100xbf16>
    %c2_34 = arith.constant 2 : index
    %c0_35 = arith.constant 0 : index
    %c0_36 = arith.constant 0 : index
    %59 = vector.load %arg4[%c2_34, %c0_35, %c0_36] : memref<5x100x100xbf16, #tpu.memory_space<vmem>>, vector<1x100x100xbf16>
    %60 = vector.shape_cast %59 : vector<1x100x100xbf16> to vector<100x100xbf16>
    %cst_37 = arith.constant dense<0.000000e+00> : vector<352x100xf32>
    %61 = tpu.matmul %58, %60, %cst_37 {dimension_numbers = #tpu.dot_dimension_numbers<[1], [0], [0], [1], [0, 0, 1, 1], [], []>} : vector<352x100xbf16>, vector<100x100xbf16>, vector<352x100xf32> -> vector<352x100xf32>
    %62 = arith.addf %57, %61 : vector<352x100xf32>
    %cst_38 = arith.constant 0.000000e+00 : f32
    %63 = vector.broadcast %cst_38 : f32 to vector<8x100xf32>
    %64 = vector.extract_strided_slice %42 {offsets = [8, 0], sizes = [344, 100], strides = [1, 1]} : vector<352x100xf32> to vector<344x100xf32>
    %65 = tpu.concatenate %64, %63 in 0 : vector<344x100xf32>, vector<8x100xf32> -> vector<352x100xf32>
    %66 = arith.truncf %65 : vector<352x100xf32> to vector<352x100xbf16>
    %c3_39 = arith.constant 3 : index
    %c0_40 = arith.constant 0 : index
    %c0_41 = arith.constant 0 : index
    %67 = vector.load %arg4[%c3_39, %c0_40, %c0_41] : memref<5x100x100xbf16, #tpu.memory_space<vmem>>, vector<1x100x100xbf16>
    %68 = vector.shape_cast %67 : vector<1x100x100xbf16> to vector<100x100xbf16>
    %cst_42 = arith.constant dense<0.000000e+00> : vector<352x100xf32>
    %69 = tpu.matmul %66, %68, %cst_42 {dimension_numbers = #tpu.dot_dimension_numbers<[1], [0], [0], [1], [0, 0, 1, 1], [], []>} : vector<352x100xbf16>, vector<100x100xbf16>, vector<352x100xf32> -> vector<352x100xf32>
    %70 = arith.addf %62, %69 : vector<352x100xf32>
    %cst_43 = arith.constant 0.000000e+00 : f32
    %71 = vector.broadcast %cst_43 : f32 to vector<16x100xf32>
    %72 = vector.extract_strided_slice %42 {offsets = [16, 0], sizes = [336, 100], strides = [1, 1]} : vector<352x100xf32> to vector<336x100xf32>
    %73 = tpu.concatenate %72, %71 in 0 : vector<336x100xf32>, vector<16x100xf32> -> vector<352x100xf32>
    %74 = arith.truncf %73 : vector<352x100xf32> to vector<352x100xbf16>
    %c4_44 = arith.constant 4 : index
    %c0_45 = arith.constant 0 : index
    %c0_46 = arith.constant 0 : index
    %75 = vector.load %arg4[%c4_44, %c0_45, %c0_46] : memref<5x100x100xbf16, #tpu.memory_space<vmem>>, vector<1x100x100xbf16>
    %76 = vector.shape_cast %75 : vector<1x100x100xbf16> to vector<100x100xbf16>
    %cst_47 = arith.constant dense<0.000000e+00> : vector<352x100xf32>
    %77 = tpu.matmul %74, %76, %cst_47 {dimension_numbers = #tpu.dot_dimension_numbers<[1], [0], [0], [1], [0, 0, 1, 1], [], []>} : vector<352x100xbf16>, vector<100x100xbf16>, vector<352x100xf32> -> vector<352x100xf32>
    %78 = arith.addf %70, %77 : vector<352x100xf32>
    %c0_48 = arith.constant 0 : index
    %c0_49 = arith.constant 0 : index
    %79 = vector.load %arg5[%c0_48, %c0_49] : memref<1x100xf32, #tpu.memory_space<vmem>>, vector<1x100xf32>
    %80 = vector.broadcast %79 : vector<1x100xf32> to vector<352x100xf32>
    %81 = arith.addf %78, %80 : vector<352x100xf32>
    %cst_50 = arith.constant 0.000000e+00 : f32
    %82 = vector.broadcast %cst_50 : f32 to vector<352x100xf32>
    %83 = arith.maximumf %81, %82 : vector<352x100xf32>
    %84 = vector.shape_cast %83 : vector<352x100xf32> to vector<22x2x8x100xf32>
    %cst_51 = arith.constant dense<0xFF800000> : vector<22x8x100xf32>
    %85 = vector.multi_reduction <maximumf>, %84, %cst_51 [1] : vector<22x2x8x100xf32> to vector<22x8x100xf32>
    %86 = vector.shape_cast %85 : vector<22x8x100xf32> to vector<176x100xf32>
    %cst_52 = arith.constant 0.000000e+00 : f32
    %87 = vector.broadcast %cst_52 : f32 to vector<16x100xf32>
    %88 = vector.extract_strided_slice %86 {offsets = [0, 0], sizes = [160, 100], strides = [1, 1]} : vector<176x100xf32> to vector<160x100xf32>
    %89 = tpu.concatenate %87, %88 in 0 : vector<16x100xf32>, vector<160x100xf32> -> vector<176x100xf32>
    %90 = arith.truncf %89 : vector<176x100xf32> to vector<176x100xbf16>
    %c0_53 = arith.constant 0 : index
    %c0_54 = arith.constant 0 : index
    %c0_55 = arith.constant 0 : index
    %91 = vector.load %arg6[%c0_53, %c0_54, %c0_55] : memref<5x100x200xbf16, #tpu.memory_space<vmem>>, vector<1x100x200xbf16>
    %92 = vector.shape_cast %91 : vector<1x100x200xbf16> to vector<100x200xbf16>
    %cst_56 = arith.constant dense<0.000000e+00> : vector<176x200xf32>
    %93 = tpu.matmul %90, %92, %cst_56 {dimension_numbers = #tpu.dot_dimension_numbers<[1], [0], [0], [1], [0, 0, 1, 1], [], []>} : vector<176x100xbf16>, vector<100x200xbf16>, vector<176x200xf32> -> vector<176x200xf32>
    %cst_57 = arith.constant 0.000000e+00 : f32
    %94 = vector.broadcast %cst_57 : f32 to vector<8x100xf32>
    %95 = vector.extract_strided_slice %86 {offsets = [0, 0], sizes = [168, 100], strides = [1, 1]} : vector<176x100xf32> to vector<168x100xf32>
    %96 = tpu.concatenate %94, %95 in 0 : vector<8x100xf32>, vector<168x100xf32> -> vector<176x100xf32>
    %97 = arith.truncf %96 : vector<176x100xf32> to vector<176x100xbf16>
    %c1_58 = arith.constant 1 : index
    %c0_59 = arith.constant 0 : index
    %c0_60 = arith.constant 0 : index
    %98 = vector.load %arg6[%c1_58, %c0_59, %c0_60] : memref<5x100x200xbf16, #tpu.memory_space<vmem>>, vector<1x100x200xbf16>
    %99 = vector.shape_cast %98 : vector<1x100x200xbf16> to vector<100x200xbf16>
    %cst_61 = arith.constant dense<0.000000e+00> : vector<176x200xf32>
    %100 = tpu.matmul %97, %99, %cst_61 {dimension_numbers = #tpu.dot_dimension_numbers<[1], [0], [0], [1], [0, 0, 1, 1], [], []>} : vector<176x100xbf16>, vector<100x200xbf16>, vector<176x200xf32> -> vector<176x200xf32>
    %101 = arith.addf %93, %100 : vector<176x200xf32>
    %102 = arith.truncf %86 : vector<176x100xf32> to vector<176x100xbf16>
    %c2_62 = arith.constant 2 : index
    %c0_63 = arith.constant 0 : index
    %c0_64 = arith.constant 0 : index
    %103 = vector.load %arg6[%c2_62, %c0_63, %c0_64] : memref<5x100x200xbf16, #tpu.memory_space<vmem>>, vector<1x100x200xbf16>
    %104 = vector.shape_cast %103 : vector<1x100x200xbf16> to vector<100x200xbf16>
    %cst_65 = arith.constant dense<0.000000e+00> : vector<176x200xf32>
    %105 = tpu.matmul %102, %104, %cst_65 {dimension_numbers = #tpu.dot_dimension_numbers<[1], [0], [0], [1], [0, 0, 1, 1], [], []>} : vector<176x100xbf16>, vector<100x200xbf16>, vector<176x200xf32> -> vector<176x200xf32>
    %106 = arith.addf %101, %105 : vector<176x200xf32>
    %cst_66 = arith.constant 0.000000e+00 : f32
    %107 = vector.broadcast %cst_66 : f32 to vector<8x100xf32>
    %108 = vector.extract_strided_slice %86 {offsets = [8, 0], sizes = [168, 100], strides = [1, 1]} : vector<176x100xf32> to vector<168x100xf32>
    %109 = tpu.concatenate %108, %107 in 0 : vector<168x100xf32>, vector<8x100xf32> -> vector<176x100xf32>
    %110 = arith.truncf %109 : vector<176x100xf32> to vector<176x100xbf16>
    %c3_67 = arith.constant 3 : index
    %c0_68 = arith.constant 0 : index
    %c0_69 = arith.constant 0 : index
    %111 = vector.load %arg6[%c3_67, %c0_68, %c0_69] : memref<5x100x200xbf16, #tpu.memory_space<vmem>>, vector<1x100x200xbf16>
    %112 = vector.shape_cast %111 : vector<1x100x200xbf16> to vector<100x200xbf16>
    %cst_70 = arith.constant dense<0.000000e+00> : vector<176x200xf32>
    %113 = tpu.matmul %110, %112, %cst_70 {dimension_numbers = #tpu.dot_dimension_numbers<[1], [0], [0], [1], [0, 0, 1, 1], [], []>} : vector<176x100xbf16>, vector<100x200xbf16>, vector<176x200xf32> -> vector<176x200xf32>
    %114 = arith.addf %106, %113 : vector<176x200xf32>
    %cst_71 = arith.constant 0.000000e+00 : f32
    %115 = vector.broadcast %cst_71 : f32 to vector<16x100xf32>
    %116 = vector.extract_strided_slice %86 {offsets = [16, 0], sizes = [160, 100], strides = [1, 1]} : vector<176x100xf32> to vector<160x100xf32>
    %117 = tpu.concatenate %116, %115 in 0 : vector<160x100xf32>, vector<16x100xf32> -> vector<176x100xf32>
    %118 = arith.truncf %117 : vector<176x100xf32> to vector<176x100xbf16>
    %c4_72 = arith.constant 4 : index
    %c0_73 = arith.constant 0 : index
    %c0_74 = arith.constant 0 : index
    %119 = vector.load %arg6[%c4_72, %c0_73, %c0_74] : memref<5x100x200xbf16, #tpu.memory_space<vmem>>, vector<1x100x200xbf16>
    %120 = vector.shape_cast %119 : vector<1x100x200xbf16> to vector<100x200xbf16>
    %cst_75 = arith.constant dense<0.000000e+00> : vector<176x200xf32>
    %121 = tpu.matmul %118, %120, %cst_75 {dimension_numbers = #tpu.dot_dimension_numbers<[1], [0], [0], [1], [0, 0, 1, 1], [], []>} : vector<176x100xbf16>, vector<100x200xbf16>, vector<176x200xf32> -> vector<176x200xf32>
    %122 = arith.addf %114, %121 : vector<176x200xf32>
    %c0_76 = arith.constant 0 : index
    %c0_77 = arith.constant 0 : index
    %123 = vector.load %arg7[%c0_76, %c0_77] : memref<1x200xf32, #tpu.memory_space<vmem>>, vector<1x200xf32>
    %124 = vector.broadcast %123 : vector<1x200xf32> to vector<176x200xf32>
    %125 = arith.addf %122, %124 : vector<176x200xf32>
    %cst_78 = arith.constant 0.000000e+00 : f32
    %126 = vector.broadcast %cst_78 : f32 to vector<176x200xf32>
    %127 = arith.maximumf %125, %126 : vector<176x200xf32>
    %128 = vector.shape_cast %127 : vector<176x200xf32> to vector<11x2x8x200xf32>
    %cst_79 = arith.constant dense<0xFF800000> : vector<11x8x200xf32>
    %129 = vector.multi_reduction <maximumf>, %128, %cst_79 [1] : vector<11x2x8x200xf32> to vector<11x8x200xf32>
    %130 = vector.shape_cast %129 : vector<11x8x200xf32> to vector<88x200xf32>
    %cst_80 = arith.constant 0.000000e+00 : f32
    %131 = vector.broadcast %cst_80 : f32 to vector<16x200xf32>
    %132 = vector.extract_strided_slice %130 {offsets = [0, 0], sizes = [72, 200], strides = [1, 1]} : vector<88x200xf32> to vector<72x200xf32>
    %133 = tpu.concatenate %131, %132 in 0 : vector<16x200xf32>, vector<72x200xf32> -> vector<88x200xf32>
    %134 = arith.truncf %133 : vector<88x200xf32> to vector<88x200xbf16>
    %c0_81 = arith.constant 0 : index
    %c0_82 = arith.constant 0 : index
    %c0_83 = arith.constant 0 : index
    %135 = vector.load %arg8[%c0_81, %c0_82, %c0_83] : memref<5x200x200xbf16, #tpu.memory_space<vmem>>, vector<1x200x200xbf16>
    %136 = vector.shape_cast %135 : vector<1x200x200xbf16> to vector<200x200xbf16>
    %cst_84 = arith.constant dense<0.000000e+00> : vector<88x200xf32>
    %137 = tpu.matmul %134, %136, %cst_84 {dimension_numbers = #tpu.dot_dimension_numbers<[1], [0], [0], [1], [0, 0, 1, 1], [], []>} : vector<88x200xbf16>, vector<200x200xbf16>, vector<88x200xf32> -> vector<88x200xf32>
    %cst_85 = arith.constant 0.000000e+00 : f32
    %138 = vector.broadcast %cst_85 : f32 to vector<8x200xf32>
    %139 = vector.extract_strided_slice %130 {offsets = [0, 0], sizes = [80, 200], strides = [1, 1]} : vector<88x200xf32> to vector<80x200xf32>
    %140 = tpu.concatenate %138, %139 in 0 : vector<8x200xf32>, vector<80x200xf32> -> vector<88x200xf32>
    %141 = arith.truncf %140 : vector<88x200xf32> to vector<88x200xbf16>
    %c1_86 = arith.constant 1 : index
    %c0_87 = arith.constant 0 : index
    %c0_88 = arith.constant 0 : index
    %142 = vector.load %arg8[%c1_86, %c0_87, %c0_88] : memref<5x200x200xbf16, #tpu.memory_space<vmem>>, vector<1x200x200xbf16>
    %143 = vector.shape_cast %142 : vector<1x200x200xbf16> to vector<200x200xbf16>
    %cst_89 = arith.constant dense<0.000000e+00> : vector<88x200xf32>
    %144 = tpu.matmul %141, %143, %cst_89 {dimension_numbers = #tpu.dot_dimension_numbers<[1], [0], [0], [1], [0, 0, 1, 1], [], []>} : vector<88x200xbf16>, vector<200x200xbf16>, vector<88x200xf32> -> vector<88x200xf32>
    %145 = arith.addf %137, %144 : vector<88x200xf32>
    %146 = arith.truncf %130 : vector<88x200xf32> to vector<88x200xbf16>
    %c2_90 = arith.constant 2 : index
    %c0_91 = arith.constant 0 : index
    %c0_92 = arith.constant 0 : index
    %147 = vector.load %arg8[%c2_90, %c0_91, %c0_92] : memref<5x200x200xbf16, #tpu.memory_space<vmem>>, vector<1x200x200xbf16>
    %148 = vector.shape_cast %147 : vector<1x200x200xbf16> to vector<200x200xbf16>
    %cst_93 = arith.constant dense<0.000000e+00> : vector<88x200xf32>
    %149 = tpu.matmul %146, %148, %cst_93 {dimension_numbers = #tpu.dot_dimension_numbers<[1], [0], [0], [1], [0, 0, 1, 1], [], []>} : vector<88x200xbf16>, vector<200x200xbf16>, vector<88x200xf32> -> vector<88x200xf32>
    %150 = arith.addf %145, %149 : vector<88x200xf32>
    %cst_94 = arith.constant 0.000000e+00 : f32
    %151 = vector.broadcast %cst_94 : f32 to vector<8x200xf32>
    %152 = vector.extract_strided_slice %130 {offsets = [8, 0], sizes = [80, 200], strides = [1, 1]} : vector<88x200xf32> to vector<80x200xf32>
    %153 = tpu.concatenate %152, %151 in 0 : vector<80x200xf32>, vector<8x200xf32> -> vector<88x200xf32>
    %154 = arith.truncf %153 : vector<88x200xf32> to vector<88x200xbf16>
    %c3_95 = arith.constant 3 : index
    %c0_96 = arith.constant 0 : index
    %c0_97 = arith.constant 0 : index
    %155 = vector.load %arg8[%c3_95, %c0_96, %c0_97] : memref<5x200x200xbf16, #tpu.memory_space<vmem>>, vector<1x200x200xbf16>
    %156 = vector.shape_cast %155 : vector<1x200x200xbf16> to vector<200x200xbf16>
    %cst_98 = arith.constant dense<0.000000e+00> : vector<88x200xf32>
    %157 = tpu.matmul %154, %156, %cst_98 {dimension_numbers = #tpu.dot_dimension_numbers<[1], [0], [0], [1], [0, 0, 1, 1], [], []>} : vector<88x200xbf16>, vector<200x200xbf16>, vector<88x200xf32> -> vector<88x200xf32>
    %158 = arith.addf %150, %157 : vector<88x200xf32>
    %cst_99 = arith.constant 0.000000e+00 : f32
    %159 = vector.broadcast %cst_99 : f32 to vector<16x200xf32>
    %160 = vector.extract_strided_slice %130 {offsets = [16, 0], sizes = [72, 200], strides = [1, 1]} : vector<88x200xf32> to vector<72x200xf32>
    %161 = tpu.concatenate %160, %159 in 0 : vector<72x200xf32>, vector<16x200xf32> -> vector<88x200xf32>
    %162 = arith.truncf %161 : vector<88x200xf32> to vector<88x200xbf16>
    %c4_100 = arith.constant 4 : index
    %c0_101 = arith.constant 0 : index
    %c0_102 = arith.constant 0 : index
    %163 = vector.load %arg8[%c4_100, %c0_101, %c0_102] : memref<5x200x200xbf16, #tpu.memory_space<vmem>>, vector<1x200x200xbf16>
    %164 = vector.shape_cast %163 : vector<1x200x200xbf16> to vector<200x200xbf16>
    %cst_103 = arith.constant dense<0.000000e+00> : vector<88x200xf32>
    %165 = tpu.matmul %162, %164, %cst_103 {dimension_numbers = #tpu.dot_dimension_numbers<[1], [0], [0], [1], [0, 0, 1, 1], [], []>} : vector<88x200xbf16>, vector<200x200xbf16>, vector<88x200xf32> -> vector<88x200xf32>
    %166 = arith.addf %158, %165 : vector<88x200xf32>
    %c0_104 = arith.constant 0 : index
    %c0_105 = arith.constant 0 : index
    %167 = vector.load %arg9[%c0_104, %c0_105] : memref<1x200xf32, #tpu.memory_space<vmem>>, vector<1x200xf32>
    %168 = vector.broadcast %167 : vector<1x200xf32> to vector<88x200xf32>
    %169 = arith.addf %166, %168 : vector<88x200xf32>
    %cst_106 = arith.constant 0.000000e+00 : f32
    %170 = vector.broadcast %cst_106 : f32 to vector<88x200xf32>
    %171 = arith.maximumf %169, %170 : vector<88x200xf32>
    %cst_107 = arith.constant 0.000000e+00 : f32
    %172 = vector.broadcast %cst_107 : f32 to vector<8x100xf32>
    %173 = vector.extract_strided_slice %171 {offsets = [0, 0], sizes = [8, 200], strides = [1, 1]} : vector<88x200xf32> to vector<8x200xf32>
    %174 = arith.truncf %173 : vector<8x200xf32> to vector<8x200xbf16>
    %c0_108 = arith.constant 0 : index
    %c0_109 = arith.constant 0 : index
    %c0_110 = arith.constant 0 : index
    %175 = vector.load %arg10[%c0_108, %c0_109, %c0_110] : memref<11x200x100xbf16, #tpu.memory_space<vmem>>, vector<1x200x100xbf16>
    %176 = vector.shape_cast %175 : vector<1x200x100xbf16> to vector<200x100xbf16>
    %cst_111 = arith.constant dense<0.000000e+00> : vector<8x100xf32>
    %177 = tpu.matmul %174, %176, %cst_111 {dimension_numbers = #tpu.dot_dimension_numbers<[1], [0], [0], [1], [0, 0, 1, 1], [], []>} : vector<8x200xbf16>, vector<200x100xbf16>, vector<8x100xf32> -> vector<8x100xf32>
    %178 = arith.addf %172, %177 : vector<8x100xf32>
    %179 = vector.extract_strided_slice %171 {offsets = [8, 0], sizes = [8, 200], strides = [1, 1]} : vector<88x200xf32> to vector<8x200xf32>
    %180 = arith.truncf %179 : vector<8x200xf32> to vector<8x200xbf16>
    %c1_112 = arith.constant 1 : index
    %c0_113 = arith.constant 0 : index
    %c0_114 = arith.constant 0 : index
    %181 = vector.load %arg10[%c1_112, %c0_113, %c0_114] : memref<11x200x100xbf16, #tpu.memory_space<vmem>>, vector<1x200x100xbf16>
    %182 = vector.shape_cast %181 : vector<1x200x100xbf16> to vector<200x100xbf16>
    %cst_115 = arith.constant dense<0.000000e+00> : vector<8x100xf32>
    %183 = tpu.matmul %180, %182, %cst_115 {dimension_numbers = #tpu.dot_dimension_numbers<[1], [0], [0], [1], [0, 0, 1, 1], [], []>} : vector<8x200xbf16>, vector<200x100xbf16>, vector<8x100xf32> -> vector<8x100xf32>
    %184 = arith.addf %178, %183 : vector<8x100xf32>
    %185 = vector.extract_strided_slice %171 {offsets = [16, 0], sizes = [8, 200], strides = [1, 1]} : vector<88x200xf32> to vector<8x200xf32>
    %186 = arith.truncf %185 : vector<8x200xf32> to vector<8x200xbf16>
    %c2_116 = arith.constant 2 : index
    %c0_117 = arith.constant 0 : index
    %c0_118 = arith.constant 0 : index
    %187 = vector.load %arg10[%c2_116, %c0_117, %c0_118] : memref<11x200x100xbf16, #tpu.memory_space<vmem>>, vector<1x200x100xbf16>
    %188 = vector.shape_cast %187 : vector<1x200x100xbf16> to vector<200x100xbf16>
    %cst_119 = arith.constant dense<0.000000e+00> : vector<8x100xf32>
    %189 = tpu.matmul %186, %188, %cst_119 {dimension_numbers = #tpu.dot_dimension_numbers<[1], [0], [0], [1], [0, 0, 1, 1], [], []>} : vector<8x200xbf16>, vector<200x100xbf16>, vector<8x100xf32> -> vector<8x100xf32>
    %190 = arith.addf %184, %189 : vector<8x100xf32>
    %191 = vector.extract_strided_slice %171 {offsets = [24, 0], sizes = [8, 200], strides = [1, 1]} : vector<88x200xf32> to vector<8x200xf32>
    %192 = arith.truncf %191 : vector<8x200xf32> to vector<8x200xbf16>
    %c3_120 = arith.constant 3 : index
    %c0_121 = arith.constant 0 : index
    %c0_122 = arith.constant 0 : index
    %193 = vector.load %arg10[%c3_120, %c0_121, %c0_122] : memref<11x200x100xbf16, #tpu.memory_space<vmem>>, vector<1x200x100xbf16>
    %194 = vector.shape_cast %193 : vector<1x200x100xbf16> to vector<200x100xbf16>
    %cst_123 = arith.constant dense<0.000000e+00> : vector<8x100xf32>
    %195 = tpu.matmul %192, %194, %cst_123 {dimension_numbers = #tpu.dot_dimension_numbers<[1], [0], [0], [1], [0, 0, 1, 1], [], []>} : vector<8x200xbf16>, vector<200x100xbf16>, vector<8x100xf32> -> vector<8x100xf32>
    %196 = arith.addf %190, %195 : vector<8x100xf32>
    %197 = vector.extract_strided_slice %171 {offsets = [32, 0], sizes = [8, 200], strides = [1, 1]} : vector<88x200xf32> to vector<8x200xf32>
    %198 = arith.truncf %197 : vector<8x200xf32> to vector<8x200xbf16>
    %c4_124 = arith.constant 4 : index
    %c0_125 = arith.constant 0 : index
    %c0_126 = arith.constant 0 : index
    %199 = vector.load %arg10[%c4_124, %c0_125, %c0_126] : memref<11x200x100xbf16, #tpu.memory_space<vmem>>, vector<1x200x100xbf16>
    %200 = vector.shape_cast %199 : vector<1x200x100xbf16> to vector<200x100xbf16>
    %cst_127 = arith.constant dense<0.000000e+00> : vector<8x100xf32>
    %201 = tpu.matmul %198, %200, %cst_127 {dimension_numbers = #tpu.dot_dimension_numbers<[1], [0], [0], [1], [0, 0, 1, 1], [], []>} : vector<8x200xbf16>, vector<200x100xbf16>, vector<8x100xf32> -> vector<8x100xf32>
    %202 = arith.addf %196, %201 : vector<8x100xf32>
    %203 = vector.extract_strided_slice %171 {offsets = [40, 0], sizes = [8, 200], strides = [1, 1]} : vector<88x200xf32> to vector<8x200xf32>
    %204 = arith.truncf %203 : vector<8x200xf32> to vector<8x200xbf16>
    %c5 = arith.constant 5 : index
    %c0_128 = arith.constant 0 : index
    %c0_129 = arith.constant 0 : index
    %205 = vector.load %arg10[%c5, %c0_128, %c0_129] : memref<11x200x100xbf16, #tpu.memory_space<vmem>>, vector<1x200x100xbf16>
    %206 = vector.shape_cast %205 : vector<1x200x100xbf16> to vector<200x100xbf16>
    %cst_130 = arith.constant dense<0.000000e+00> : vector<8x100xf32>
    %207 = tpu.matmul %204, %206, %cst_130 {dimension_numbers = #tpu.dot_dimension_numbers<[1], [0], [0], [1], [0, 0, 1, 1], [], []>} : vector<8x200xbf16>, vector<200x100xbf16>, vector<8x100xf32> -> vector<8x100xf32>
    %208 = arith.addf %202, %207 : vector<8x100xf32>
    %209 = vector.extract_strided_slice %171 {offsets = [48, 0], sizes = [8, 200], strides = [1, 1]} : vector<88x200xf32> to vector<8x200xf32>
    %210 = arith.truncf %209 : vector<8x200xf32> to vector<8x200xbf16>
    %c6 = arith.constant 6 : index
    %c0_131 = arith.constant 0 : index
    %c0_132 = arith.constant 0 : index
    %211 = vector.load %arg10[%c6, %c0_131, %c0_132] : memref<11x200x100xbf16, #tpu.memory_space<vmem>>, vector<1x200x100xbf16>
    %212 = vector.shape_cast %211 : vector<1x200x100xbf16> to vector<200x100xbf16>
    %cst_133 = arith.constant dense<0.000000e+00> : vector<8x100xf32>
    %213 = tpu.matmul %210, %212, %cst_133 {dimension_numbers = #tpu.dot_dimension_numbers<[1], [0], [0], [1], [0, 0, 1, 1], [], []>} : vector<8x200xbf16>, vector<200x100xbf16>, vector<8x100xf32> -> vector<8x100xf32>
    %214 = arith.addf %208, %213 : vector<8x100xf32>
    %215 = vector.extract_strided_slice %171 {offsets = [56, 0], sizes = [8, 200], strides = [1, 1]} : vector<88x200xf32> to vector<8x200xf32>
    %216 = arith.truncf %215 : vector<8x200xf32> to vector<8x200xbf16>
    %c7 = arith.constant 7 : index
    %c0_134 = arith.constant 0 : index
    %c0_135 = arith.constant 0 : index
    %217 = vector.load %arg10[%c7, %c0_134, %c0_135] : memref<11x200x100xbf16, #tpu.memory_space<vmem>>, vector<1x200x100xbf16>
    %218 = vector.shape_cast %217 : vector<1x200x100xbf16> to vector<200x100xbf16>
    %cst_136 = arith.constant dense<0.000000e+00> : vector<8x100xf32>
    %219 = tpu.matmul %216, %218, %cst_136 {dimension_numbers = #tpu.dot_dimension_numbers<[1], [0], [0], [1], [0, 0, 1, 1], [], []>} : vector<8x200xbf16>, vector<200x100xbf16>, vector<8x100xf32> -> vector<8x100xf32>
    %220 = arith.addf %214, %219 : vector<8x100xf32>
    %221 = vector.extract_strided_slice %171 {offsets = [64, 0], sizes = [8, 200], strides = [1, 1]} : vector<88x200xf32> to vector<8x200xf32>
    %222 = arith.truncf %221 : vector<8x200xf32> to vector<8x200xbf16>
    %c8 = arith.constant 8 : index
    %c0_137 = arith.constant 0 : index
    %c0_138 = arith.constant 0 : index
    %223 = vector.load %arg10[%c8, %c0_137, %c0_138] : memref<11x200x100xbf16, #tpu.memory_space<vmem>>, vector<1x200x100xbf16>
    %224 = vector.shape_cast %223 : vector<1x200x100xbf16> to vector<200x100xbf16>
    %cst_139 = arith.constant dense<0.000000e+00> : vector<8x100xf32>
    %225 = tpu.matmul %222, %224, %cst_139 {dimension_numbers = #tpu.dot_dimension_numbers<[1], [0], [0], [1], [0, 0, 1, 1], [], []>} : vector<8x200xbf16>, vector<200x100xbf16>, vector<8x100xf32> -> vector<8x100xf32>
    %226 = arith.addf %220, %225 : vector<8x100xf32>
    %227 = vector.extract_strided_slice %171 {offsets = [72, 0], sizes = [8, 200], strides = [1, 1]} : vector<88x200xf32> to vector<8x200xf32>
    %228 = arith.truncf %227 : vector<8x200xf32> to vector<8x200xbf16>
    %c9 = arith.constant 9 : index
    %c0_140 = arith.constant 0 : index
    %c0_141 = arith.constant 0 : index
    %229 = vector.load %arg10[%c9, %c0_140, %c0_141] : memref<11x200x100xbf16, #tpu.memory_space<vmem>>, vector<1x200x100xbf16>
    %230 = vector.shape_cast %229 : vector<1x200x100xbf16> to vector<200x100xbf16>
    %cst_142 = arith.constant dense<0.000000e+00> : vector<8x100xf32>
    %231 = tpu.matmul %228, %230, %cst_142 {dimension_numbers = #tpu.dot_dimension_numbers<[1], [0], [0], [1], [0, 0, 1, 1], [], []>} : vector<8x200xbf16>, vector<200x100xbf16>, vector<8x100xf32> -> vector<8x100xf32>
    %232 = arith.addf %226, %231 : vector<8x100xf32>
    %233 = vector.extract_strided_slice %171 {offsets = [80, 0], sizes = [8, 200], strides = [1, 1]} : vector<88x200xf32> to vector<8x200xf32>
    %234 = arith.truncf %233 : vector<8x200xf32> to vector<8x200xbf16>
    %c10 = arith.constant 10 : index
    %c0_143 = arith.constant 0 : index
    %c0_144 = arith.constant 0 : index
    %235 = vector.load %arg10[%c10, %c0_143, %c0_144] : memref<11x200x100xbf16, #tpu.memory_space<vmem>>, vector<1x200x100xbf16>
    %236 = vector.shape_cast %235 : vector<1x200x100xbf16> to vector<200x100xbf16>
    %cst_145 = arith.constant dense<0.000000e+00> : vector<8x100xf32>
    %237 = tpu.matmul %234, %236, %cst_145 {dimension_numbers = #tpu.dot_dimension_numbers<[1], [0], [0], [1], [0, 0, 1, 1], [], []>} : vector<8x200xbf16>, vector<200x100xbf16>, vector<8x100xf32> -> vector<8x100xf32>
    %238 = arith.addf %232, %237 : vector<8x100xf32>
    %c0_146 = arith.constant 0 : index
    %c0_147 = arith.constant 0 : index
    %239 = vector.load %arg11[%c0_146, %c0_147] : memref<1x100xf32, #tpu.memory_space<vmem>>, vector<1x100xf32>
    %240 = vector.broadcast %239 : vector<1x100xf32> to vector<8x100xf32>
    %241 = arith.addf %238, %240 : vector<8x100xf32>
    %cst_148 = arith.constant 0.000000e+00 : f32
    %242 = vector.broadcast %cst_148 : f32 to vector<8x100xf32>
    %243 = arith.maximumf %241, %242 : vector<8x100xf32>
    %244 = arith.truncf %243 : vector<8x100xf32> to vector<8x100xbf16>
    %c0_149 = arith.constant 0 : index
    %c0_150 = arith.constant 0 : index
    %245 = vector.load %arg12[%c0_149, %c0_150] : memref<100x1xbf16, #tpu.memory_space<vmem>>, vector<100x1xbf16>
    %cst_151 = arith.constant dense<0.000000e+00> : vector<8x1xf32>
    %246 = tpu.matmul %244, %245, %cst_151 {dimension_numbers = #tpu.dot_dimension_numbers<[1], [0], [0], [1], [0, 0, 1, 1], [], []>} : vector<8x100xbf16>, vector<100x1xbf16>, vector<8x1xf32> -> vector<8x1xf32>
    %c0_152 = arith.constant 0 : index
    %c0_153 = arith.constant 0 : index
    %247 = vector.load %arg13[%c0_152, %c0_153] : memref<1x1xf32, #tpu.memory_space<vmem>>, vector<1x1xf32>
    %248 = vector.broadcast %247 : vector<1x1xf32> to vector<8x1xf32>
    %249 = arith.addf %246, %248 : vector<8x1xf32>
    %c0_154 = arith.constant 0 : index
    %c0_155 = arith.constant 0 : index
    %c0_156 = arith.constant 0 : index
    %250 = vector.load %arg14[%c0_154, %c0_155, %c0_156] : memref<1x8x1xf32, #tpu.memory_space<vmem>>, vector<1x8x1xf32>
    %251 = vector.shape_cast %250 : vector<1x8x1xf32> to vector<8x1xf32>
    %252 = vector.shape_cast %249 : vector<8x1xf32> to vector<1x8x1xf32>
    tpu.vector_store %arg14[%c0_154, %c0_155, %c0_156], %252 {strides = array<i32>} : memref<1x8x1xf32, #tpu.memory_space<vmem>>, vector<1x8x1xf32>,
    return
  }
  func.func @transform_0(%arg0: i32) -> (i32, i32, i32) {
    %c0_i32 = arith.constant 0 : i32
    %c0_i32_0 = arith.constant 0 : i32
    %c0_i32_1 = arith.constant 0 : i32
    return %arg0, %c0_i32, %c0_i32_0 : i32, i32, i32
  }
  func.func @transform_1(%arg0: i32) -> (i32, i32, i32) {
    %c0_i32 = arith.constant 0 : i32
    %c0_i32_0 = arith.constant 0 : i32
    %c0_i32_1 = arith.constant 0 : i32
    %c0_i32_2 = arith.constant 0 : i32
    return %c0_i32, %c0_i32_0, %c0_i32_1 : i32, i32, i32
  }
  func.func @transform_2(%arg0: i32) -> (i32, i32) {
    %c0_i32 = arith.constant 0 : i32
    %c0_i32_0 = arith.constant 0 : i32
    %c0_i32_1 = arith.constant 0 : i32
    return %c0_i32, %c0_i32_0 : i32, i32
  }
  func.func @transform_3(%arg0: i32) -> (i32, i32, i32) {
    %c0_i32 = arith.constant 0 : i32
    %c0_i32_0 = arith.constant 0 : i32
    %c0_i32_1 = arith.constant 0 : i32
    %c0_i32_2 = arith.constant 0 : i32
    return %c0_i32, %c0_i32_0, %c0_i32_1 : i32, i32, i32
  }
  func.func @transform_4(%arg0: i32) -> (i32, i32) {
    %c0_i32 = arith.constant 0 : i32
    %c0_i32_0 = arith.constant 0 : i32
    %c0_i32_1 = arith.constant 0 : i32
    return %c0_i32, %c0_i32_0 : i32, i32
  }
  func.func @transform_5(%arg0: i32) -> (i32, i32, i32) {
    %c0_i32 = arith.constant 0 : i32
    %c0_i32_0 = arith.constant 0 : i32
    %c0_i32_1 = arith.constant 0 : i32
    %c0_i32_2 = arith.constant 0 : i32
    return %c0_i32, %c0_i32_0, %c0_i32_1 : i32, i32, i32
  }
  func.func @transform_6(%arg0: i32) -> (i32, i32) {
    %c0_i32 = arith.constant 0 : i32
    %c0_i32_0 = arith.constant 0 : i32
    %c0_i32_1 = arith.constant 0 : i32
    return %c0_i32, %c0_i32_0 : i32, i32
  }
  func.func @transform_7(%arg0: i32) -> (i32, i32, i32) {
    %c0_i32 = arith.constant 0 : i32
    %c0_i32_0 = arith.constant 0 : i32
    %c0_i32_1 = arith.constant 0 : i32
    %c0_i32_2 = arith.constant 0 : i32
    return %c0_i32, %c0_i32_0, %c0_i32_1 : i32, i32, i32
  }
  func.func @transform_8(%arg0: i32) -> (i32, i32) {
    %c0_i32 = arith.constant 0 : i32
    %c0_i32_0 = arith.constant 0 : i32
    %c0_i32_1 = arith.constant 0 : i32
    return %c0_i32, %c0_i32_0 : i32, i32
  }
  func.func @transform_9(%arg0: i32) -> (i32, i32, i32) {
    %c0_i32 = arith.constant 0 : i32
    %c0_i32_0 = arith.constant 0 : i32
    %c0_i32_1 = arith.constant 0 : i32
    %c0_i32_2 = arith.constant 0 : i32
    return %c0_i32, %c0_i32_0, %c0_i32_1 : i32, i32, i32
  }
  func.func @transform_10(%arg0: i32) -> (i32, i32) {
    %c0_i32 = arith.constant 0 : i32
    %c0_i32_0 = arith.constant 0 : i32
    %c0_i32_1 = arith.constant 0 : i32
    return %c0_i32, %c0_i32_0 : i32, i32
  }
  func.func @transform_11(%arg0: i32) -> (i32, i32) {
    %c0_i32 = arith.constant 0 : i32
    %c0_i32_0 = arith.constant 0 : i32
    %c0_i32_1 = arith.constant 0 : i32
    return %c0_i32, %c0_i32_0 : i32, i32
  }
  func.func @transform_12(%arg0: i32) -> (i32, i32) {
    %c0_i32 = arith.constant 0 : i32
    %c0_i32_0 = arith.constant 0 : i32
    %c0_i32_1 = arith.constant 0 : i32
    return %c0_i32, %c0_i32_0 : i32, i32
  }
  func.func @transform_13(%arg0: i32) -> (i32, i32, i32) {
    %c0_i32 = arith.constant 0 : i32
    %c0_i32_0 = arith.constant 0 : i32
    %c0_i32_1 = arith.constant 0 : i32
    return %arg0, %c0_i32, %c0_i32_0 : i32, i32, i32
  }
}

</mosaic_0001>

<bundles_post_ra>
// kernel: _lambda_.1
= control target key start
LH: loop header
LB: loop body
LE: loop exit
PB: predicated region body
PF: predicated region fallthrough
CT: control target
= control target key end

     0   :  { %s13638_s0 = inlined_call_operand.vmem [shape: f32[1,352,4], index: 0, kind: input, shape index: {}]   ;;  %s13639_s1 = inlined_call_operand.vmem [shape: bf16[5,4,100], index: 1, kind: input, shape index: {}]   ;;  %s13640_s2 = inlined_call_operand.vmem [shape: f32[1,100], index: 2, kind: input, shape index: {}]   ;;  %s13641_s3 = inlined_call_operand.vmem [shape: bf16[5,100,100], index: 3, kind: input, shape index: {}]   ;;  %s13642_s4 = inlined_call_operand.vmem [shape: f32[1,100], index: 4, kind: input, shape index: {}]   ;;  %s13643_s5 = inlined_call_operand.hbm [shape: bf16[5,100,200], index: 5, kind: input, shape index: {}]   ;;  %s13644_s6 = inlined_call_operand.vmem [shape: f32[1,200], index: 6, kind: input, shape index: {}]   ;;  %s13645_s7 = inlined_call_operand.hbm [shape: bf16[5,200,200], index: 7, kind: input, shape index: {}]   ;;  %s13646_s8 = inlined_call_operand.vmem [shape: f32[1,200], index: 8, kind: input, shape index: {}]   ;;  %s13647_s9 = inlined_call_operand.hbm [shape: bf16[11,200,100], index: 9, kind: input, shape index: {}]   ;;  %s13648_s10 = inlined_call_operand.vmem [shape: f32[1,100], index: 10, kind: input, shape index: {}]   ;;  %s13649_s11 = inlined_call_operand.vmem [shape: bf16[100,1], index: 11, kind: input, shape index: {}]   ;;  %s13650_s12 = inlined_call_operand.<no memory space> [shape: f32[1,1], index: 12, kind: input, shape index: {}]   ;;  %s13651_s13 = inlined_call_operand.vmem [shape: f32[1,8,1], index: 13, kind: output, shape index: {}]  }
   0x1   :  { %v18_v0 = vstv %s13650_s12 }
   0x2   :  { %19 = vst [vmem:[#allocation2] sm:$0x1] %v18_v0 }
   0x3   :  { %20 = vsyncpa [#allocation4], 0 }
   0x4   :  { %21 = vsyncpa [#allocation6], 0  ;;  %s10260_s27 = smov [#allocation5]   ;;  %s10261_s29 = smov [#allocation3]  }
   0x5   :  { %s51_s28 = sshll.u32 %s10260_s27, 4  ;;  %s37_s30 = sshll.u32 %s10261_s29, 4  ;;  %s52_s28 = int_to_ptr.vmem [resolvable:$true] %s51_s28  ;;  %s38_s30 = int_to_ptr.vmem [resolvable:$true] %s37_s30 }
   0x6   :  { %s10204_s14 = scalar_lea.vmem %s52_s28, 16000  ;;  %p10209_p1 = scmp.lt.s32.totalorder %s52_s28, %s52_s28 }
   0x7   :  { %p10205_p0 = scmp.ne.s32.totalorder %s52_s28, %s10204_s14  ;;  %p10210_p2 = scmp.lt.s32.totalorder %s10204_s14, %s10204_s14 }
   0x9   :  { %p10211_p3 = por %p10210_p2, %p10209_p1 }
   0xb   :  { %p10212_p4 = pnand %p10211_p3, %p10205_p0 }
   0xd   :  { %10215 = shalt.err (!%p10212_p4)
}
   0xe   :  { %s10262_s15 = smov 128   ;;  %s10263_s16 = smov 8  }
   0xf   :  { %57 = dma.hbm_to_vmem [thread:$0]  %s13645_s7, 16000, %s52_s28, [#allocation6], %s10262_s15, %s10262_s15, %s10263_s16  }
  0x10   :  { %s10224_s18 = scalar_lea.vmem %s38_s30, 8320  ;;  %p10229_p6 = scmp.lt.s32.totalorder %s38_s30, %s38_s30 }
  0x11   :  { %p10225_p5 = scmp.ne.s32.totalorder %s38_s30, %s10224_s18  ;;  %p10230_p7 = scmp.lt.s32.totalorder %s10224_s18, %s10224_s18 }
  0x13   :  { %p10231_p8 = por %p10230_p7, %p10229_p6 }
  0x15   :  { %p10232_p9 = pnand %p10231_p8, %p10225_p5 }
  0x17   :  { %10235 = shalt.err (!%p10232_p9)
}
  0x18   :  { %43 = dma.hbm_to_vmem [thread:$0]  %s13643_s5, 8320, %s38_s30, [#allocation4], %s10262_s15, %s10262_s15, %s10263_s16  }
  0x19   :  { %s10264_s21 = smov [#allocation7]  }
  0x1a   :  { %s65_s22 = sshll.u32 %s10264_s21, 4  ;;  %s66_s22 = int_to_ptr.vmem [resolvable:$true] %s65_s22 }
  0x1b   :  { %s10244_s23 = scalar_lea.vmem %s66_s22, 17600  ;;  %p10249_p11 = scmp.lt.s32.totalorder %s66_s22, %s66_s22 }
  0x1c   :  { %p10245_p10 = scmp.ne.s32.totalorder %s66_s22, %s10244_s23  ;;  %p10250_p12 = scmp.lt.s32.totalorder %s10244_s23, %s10244_s23 }
  0x1e   :  { %p10251_p13 = por %p10250_p12, %p10249_p11 }
  0x20   :  { %p10252_p0 = pnand %p10251_p13, %p10245_p10 }
  0x22   :  { %10255 = shalt.err (!%p10252_p0)
}
  0x23   :  { %s10265_s7 = smov 64   ;;  %s10266_s24 = smov 4  }
  0x24   :  { %71 = dma.hbm_to_vmem [thread:$0]  %s13647_s9, 17600, %s66_s22, [#allocation6], %s10265_s7, %s10265_s7, %s10266_s24  }
  0x25   :  { %10256 = dma.done.wait [#allocation4], 8320  }
  0x26   :  { %10257 = vsyncadd [#allocation4], 4294958976 }
  0x27   :  { %10258 = dma.done.wait [#allocation6], 33600  }
  0x28   :  { %10259 = vsyncadd [#allocation6], 4294933696  ;;  %v13652_v1 = vmov 0.0|0.0   ;;  %vm246_vm0 = vcmask 1041408   ;;  %v8131_v2 = vld [vmem:[%s13639_s1 + $0x2] sm:$0x3] }
  0x29   :  { %9210 = vmatprep.mubr.bf16.mxu1 %v13652_v1  ;;  %v154_v3 = vld [vmem:[%s13639_s1] sm:$0x3]  ;;  %vm179_vm1 = vcmask 31744   ;;  %9700 = vmatprep.subr.msk.bf16.mxu0 %vm246_vm0, %v8131_v2  ;;  %v248_v5 = vsel %vm246_vm0, %v8131_v2, 0  ;;  %v89_v7 = vld [vmem:[%s13638_s0 + $0x8] sm:$0xff]  ;;  %v90_v8 = vld [vmem:[%s13638_s0 + $0x10] sm:$0xff] }
  0x2a   :  { %v88_v4 = vld [vmem:[%s13638_s0] sm:$0xff]  ;;  %9701 = vmatprep.subr.msk.bf16.mxu1 %vm246_vm0, %v154_v3  ;;  %v526_v6 = vsel %vm246_vm0, %v154_v3, 0  ;;  %v13654_v9 = vmov 0.0   ;;  %9163 = vmatpush3.bf16.msra.mxu0 %v248_v5  ;;  %v10379_v13 = vpack.c.bf16 %v90_v8, %v89_v7  ;;  %v91_v14 = vld [vmem:[%s13638_s0 + $0x18] sm:$0xff]  ;;  %v93_v19 = vld [vmem:[%s13638_s0 + $0x28] sm:$0xff]  ;;  %vm1723_vm2 = vcmask 818176  }
  0x2b   :  { %v155_v10 = vpack.c.bf16 %v88_v4, %v13654_v9  ;;  %v8175_v11 = vld [vmem:[%s13639_s1 + $0x4] sm:$0x3]  ;;  %9209 = vmatpush3.bf16.msra.mxu1 %v526_v6  ;;  %v10377_v12 = vpack.c.bf16 %v89_v7, %v88_v4  ;;  %v10392_v18 = vpack.c.bf16 %v91_v14, %v90_v8  ;;  %v94_v20 = vld [vmem:[%s13638_s0 + $0x30] sm:$0xff]  ;;  %v95_v21 = vld [vmem:[%s13638_s0 + $0x38] sm:$0xff]  ;;  %vm5138_vm3 = vcmask 1043456  }
  0x2c   :  { %v92_v15 = vld [vmem:[%s13638_s0 + $0x20] sm:$0xff]  ;;  %9702 = vmatprep.subr.msk.bf16.mxu0 %vm246_vm0, %v8175_v11  ;;  %v744_v16 = vsel %vm246_vm0, %v8175_v11, 0  ;;  %v10414_v23 = vpack.c.bf16 %v94_v20, %v93_v19  ;;  %v10420_v26 = vpack.c.bf16 %v95_v21, %v94_v20  ;;  %v97_v27 = vld [vmem:[%s13638_s0 + $0x48] sm:$0xff]  ;;  %v98_v28 = vld [vmem:[%s13638_s0 + $0x50] sm:$0xff]  ;;  %vm4878_vm4 = vcmask 588800  }
  0x2d   :  { %9164 = vmatprep.mubr.msk.bf16.mxu0 %vm179_vm1, %v155_v10  ;;  %v10390_v17 = vpack.c.bf16 %v92_v15, %v91_v14  ;;  %v96_v22 = vld [vmem:[%s13638_s0 + $0x40] sm:$0xff]  ;;  %v10416_v24 = vpack.c.bf16 %v93_v19, %v92_v15  ;;  %v99_v29 = vld [vmem:[%s13638_s0 + $0x58] sm:$0xff]  ;;  %v10448_v32 = vld [vmem:[%s13639_s1 + $0x8] sm:$0x3]  ;;  %v10454_v34 = vpack.c.bf16 %v98_v28, %v97_v27  ;;  %vm10270_vm5 = vmmov 0  }
  0x2e   :  { %9165 = vmatmul.mubr.msk.bf16.vlgmr.msra.gmra.mxu0 %vm179_vm1, %v10379_v13  ;;  %9211 = vmatmul.mubr.msk.bf16.vlgmr.msra.gmra.mxu1 %vm179_vm1, %v10377_v12  ;;  %v10418_v25 = vpack.c.bf16 %v96_v22, %v95_v21  ;;  %v100_v30 = vld [vmem:[%s13638_s0 + $0x60] sm:$0xff]  ;;  %v10456_v35 = vpack.c.bf16 %v97_v27, %v96_v22  ;;  %v10460_v37 = vpack.c.bf16 %v99_v29, %v98_v28  ;;  %v101_v38 = vld [vmem:[%s13638_s0 + $0x68] sm:$0xff]  ;;  %v102_v39 = vld [vmem:[%s13638_s0 + $0x70] sm:$0xff]  ;;  %vm8123_vm6 = vcmask 7168  }
  0x2f   :  { %9255 = vmatpush3.bf16.msra.mxu0 %v744_v16  ;;  %9168 = vmatprep.mubr.msk.bf16.mxu0 %vm179_vm1, %v10390_v17  ;;  %v8198_v31 = vld [vmem:[%s13639_s1 + $0x6] sm:$0x3]  ;;  %v10458_v36 = vpack.c.bf16 %v100_v30, %v99_v29  ;;  %v103_v40 = vld [vmem:[%s13638_s0 + $0x78] sm:$0xff]  ;;  %v10482_v42 = vpack.c.bf16 %v102_v39, %v101_v38  ;;  %v10484_v43 = vpack.c.bf16 %v101_v38, %v100_v30  ;;  %v105_v46 = vld [vmem:[%s13638_s0 + $0x88] sm:$0xff] }
  0x30   :  { %9214 = vmatprep.mubr.msk.bf16.mxu1 %vm179_vm1, %v10392_v18  ;;  %9703 = vmatprep.subr.msk.bf16.mxu1 %vm246_vm0, %v8198_v31  ;;  %v1006_v33 = vsel %vm246_vm0, %v8198_v31, 0  ;;  %v104_v41 = vld [vmem:[%s13638_s0 + $0x80] sm:$0xff]  ;;  %v10488_v45 = vpack.c.bf16 %v103_v40, %v102_v39  ;;  %v106_v47 = vld [vmem:[%s13638_s0 + $0x90] sm:$0xff]  ;;  %v107_v48 = vld [vmem:[%s13638_s0 + $0x98] sm:$0xff] }
  0x31   :  { %9704 = vmatprep.subr.msk.bf16.mxu0 %vm246_vm0, %v10448_v32  ;;  %9301 = vmatpush3.bf16.msra.mxu1 %v1006_v33  ;;  %v10486_v44 = vpack.c.bf16 %v104_v41, %v103_v40  ;;  %v108_v49 = vld [vmem:[%s13638_s0 + $0xa0] sm:$0xff]  ;;  %v10510_v50 = vpack.c.bf16 %v106_v47, %v105_v46  ;;  %v10512_v51 = vpack.c.bf16 %v105_v46, %v104_v41  ;;  %v109_v54 = vld [vmem:[%s13638_s0 + $0xa8] sm:$0xff]  ;;  %v110_v55 = vld [vmem:[%s13638_s0 + $0xb0] sm:$0xff] }
  0x32   :  { %v10514_v52 = vpack.c.bf16 %v108_v49, %v107_v48  ;;  %v10516_v53 = vpack.c.bf16 %v107_v48, %v106_v47  ;;  %v111_v56 = vld [vmem:[%s13638_s0 + $0xb8] sm:$0xff]  ;;  %v112_v57 = vld [vmem:[%s13638_s0 + $0xc0] sm:$0xff]  ;;  %v10538_v58 = vpack.c.bf16 %v110_v55, %v109_v54  ;;  %v10540_v59 = vpack.c.bf16 %v109_v54, %v108_v49  ;;  %v113_v62 = vld [vmem:[%s13638_s0 + $0xc8] sm:$0xff] }
  0x33   :  { %v10542_v60 = vpack.c.bf16 %v112_v57, %v111_v56  ;;  %v10544_v61 = vpack.c.bf16 %v111_v56, %v110_v55  ;;  %v114_v63 = vld [vmem:[%s13638_s0 + $0xd0] sm:$0xff]  ;;  %v115_v0 = vld [vmem:[%s13638_s0 + $0xd8] sm:$0xff]  ;;  %v116_v2 = vld [vmem:[%s13638_s0 + $0xe0] sm:$0xff]  ;;  %v10568_v4 = vpack.c.bf16 %v113_v62, %v112_v57  ;;  %v1264_v57 = vsel %vm246_vm0, %v10448_v32, 0 }
  0x34   :  { %v10566_v3 = vpack.c.bf16 %v114_v63, %v113_v62  ;;  %v10570_v5 = vpack.c.bf16 %v116_v2, %v115_v0  ;;  %v10572_v6 = vpack.c.bf16 %v115_v0, %v114_v63  ;;  %v117_v7 = vld [vmem:[%s13638_s0 + $0xe8] sm:$0xff]  ;;  %v118_v8 = vld [vmem:[%s13638_s0 + $0xf0] sm:$0xff]  ;;  %v119_v10 = vld [vmem:[%s13638_s0 + $0xf8] sm:$0xff] }
  0x35   :  { %v120_v11 = vld [vmem:[%s13638_s0 + $0x100] sm:$0xff]  ;;  %v10594_v14 = vpack.c.bf16 %v118_v8, %v117_v7  ;;  %v10596_v15 = vpack.c.bf16 %v117_v7, %v116_v2  ;;  %v10600_v19 = vpack.c.bf16 %v119_v10, %v118_v8  ;;  %v121_v20 = vld [vmem:[%s13638_s0 + $0x108] sm:$0xff]  ;;  %v122_v21 = vld [vmem:[%s13638_s0 + $0x110] sm:$0xff] }
  0x36   :  { %9169 = vmatmul.mubr.msk.bf16.gmra.mxu0 %vm179_vm1, %v10414_v23  ;;  %9215 = vmatmul.mubr.msk.bf16.gmra.mxu1 %vm179_vm1, %v10416_v24  ;;  %v10598_v16 = vpack.c.bf16 %v120_v11, %v119_v10  ;;  %v123_v22 = vld [vmem:[%s13638_s0 + $0x118] sm:$0xff]  ;;  %v124_v27 = vld [vmem:[%s13638_s0 + $0x120] sm:$0xff]  ;;  %v172_v28 = vpack.c.bf16 %v122_v21, %v121_v20  ;;  %v10622_v29 = vpack.c.bf16 %v121_v20, %v120_v11  ;;  %v125_v33 = vld [vmem:[%s13638_s0 + $0x128] sm:$0xff] }
  0x37   :  { %9172 = vmatprep.mubr.msk.bf16.mxu0 %vm179_vm1, %v10418_v25  ;;  %9218 = vmatprep.mubr.msk.bf16.mxu1 %vm179_vm1, %v10420_v26  ;;  %v173_v30 = vpack.c.bf16 %v124_v27, %v123_v22  ;;  %v10624_v31 = vpack.c.bf16 %v123_v22, %v122_v21  ;;  %v126_v38 = vld [vmem:[%s13638_s0 + $0x130] sm:$0xff]  ;;  %v127_v39 = vld [vmem:[%s13638_s0 + $0x138] sm:$0xff]  ;;  %v128_v40 = vld [vmem:[%s13638_s0 + $0x140] sm:$0xff]  ;;  %v10644_v46 = vpack.c.bf16 %v125_v33, %v124_v27 }
  0x38   :  { %v174_v41 = vpack.c.bf16 %v126_v38, %v125_v33  ;;  %v175_v47 = vpack.c.bf16 %v128_v40, %v127_v39  ;;  %v10646_v48 = vpack.c.bf16 %v127_v39, %v126_v38  ;;  %v129_v49 = vld [vmem:[%s13638_s0 + $0x148] sm:$0xff]  ;;  %v130_v54 = vld [vmem:[%s13638_s0 + $0x150] sm:$0xff]  ;;  %v9722_v32 = vld [vmem:[%s13641_s3 + $0x5c] sm:$0xff]  }
  0x39   :  { %v176_v55 = vpack.c.bf16 %v130_v54, %v129_v49  ;;  %v10660_v56 = vpack.c.bf16 %v129_v49, %v128_v40  ;;  %v9724_v7 = vld [vmem:[%s13641_s3 + $0x4c] sm:$0xff]  }
  0x3e   :  { %9173 = vmatmul.mubr.msk.bf16.gmra.mxu0 %vm179_vm1, %v10454_v34  ;;  %9219 = vmatmul.mubr.msk.bf16.gmra.mxu1 %vm179_vm1, %v10456_v35 }
  0x3f   :  { %9176 = vmatprep.mubr.msk.bf16.mxu0 %vm179_vm1, %v10458_v36  ;;  %9222 = vmatprep.mubr.msk.bf16.mxu1 %vm179_vm1, %v10460_v37 }
  0x46   :  { %9177 = vmatmul.mubr.msk.bf16.gmra.mxu0 %vm179_vm1, %v10482_v42  ;;  %9223 = vmatmul.mubr.msk.bf16.gmra.mxu1 %vm179_vm1, %v10484_v43 }
  0x47   :  { %9180 = vmatprep.mubr.msk.bf16.mxu0 %vm179_vm1, %v10486_v44  ;;  %9226 = vmatprep.mubr.msk.bf16.mxu1 %vm179_vm1, %v10488_v45 }
  0x4e   :  { %9181 = vmatmul.mubr.msk.bf16.gmra.mxu0 %vm179_vm1, %v10510_v50  ;;  %9227 = vmatmul.mubr.msk.bf16.gmra.mxu1 %vm179_vm1, %v10512_v51 }
  0x4f   :  { %9184 = vmatprep.mubr.msk.bf16.mxu0 %vm179_vm1, %v10514_v52  ;;  %9230 = vmatprep.mubr.msk.bf16.mxu1 %vm179_vm1, %v10516_v53 }
  0x56   :  { %9185 = vmatmul.mubr.msk.bf16.gmra.mxu0 %vm179_vm1, %v10538_v58  ;;  %9231 = vmatmul.mubr.msk.bf16.gmra.mxu1 %vm179_vm1, %v10540_v59 }
  0x57   :  { %9188 = vmatprep.mubr.msk.bf16.mxu0 %vm179_vm1, %v10542_v60  ;;  %9234 = vmatprep.mubr.msk.bf16.mxu1 %vm179_vm1, %v10544_v61 }
  0x5e   :  { %9189 = vmatmul.mubr.msk.bf16.gmra.mxu0 %vm179_vm1, %v10566_v3  ;;  %9235 = vmatmul.mubr.msk.bf16.gmra.mxu1 %vm179_vm1, %v10568_v4 }
  0x5f   :  { %9192 = vmatprep.mubr.msk.bf16.mxu0 %vm179_vm1, %v10570_v5  ;;  %9238 = vmatprep.mubr.msk.bf16.mxu1 %vm179_vm1, %v10572_v6 }
  0x66   :  { %9193 = vmatmul.mubr.msk.bf16.gmra.mxu0 %vm179_vm1, %v10594_v14  ;;  %9239 = vmatmul.mubr.msk.bf16.gmra.mxu1 %vm179_vm1, %v10596_v15 }
  0x67   :  { %9196 = vmatprep.mubr.msk.bf16.mxu0 %vm179_vm1, %v10598_v16  ;;  %9242 = vmatprep.mubr.msk.bf16.mxu1 %vm179_vm1, %v10600_v19 }
  0x6e   :  { %9197 = vmatmul.mubr.msk.bf16.gmra.mxu0 %vm179_vm1, %v172_v28  ;;  %9243 = vmatmul.mubr.msk.bf16.gmra.mxu1 %vm179_vm1, %v10622_v29 }
  0x6f   :  { %9200 = vmatprep.mubr.msk.bf16.mxu0 %vm179_vm1, %v173_v30  ;;  %9246 = vmatprep.mubr.msk.bf16.mxu1 %vm179_vm1, %v10624_v31 }
  0x76   :  { %9201 = vmatmul.mubr.msk.bf16.gmra.mxu0 %vm179_vm1, %v174_v41  ;;  %9247 = vmatmul.mubr.msk.bf16.gmra.mxu1 %vm179_vm1, %v10644_v46 }
  0x77   :  { %9204 = vmatprep.mubr.msk.bf16.mxu0 %vm179_vm1, %v175_v47  ;;  %9250 = vmatprep.mubr.msk.bf16.mxu1 %vm179_vm1, %v10646_v48 }
  0x7e   :  { %9205 = vmatmul.mubr.msk.bf16.gmra.mxu0 %vm179_vm1, %v176_v55  ;;  %9251 = vmatmul.mubr.msk.bf16.gmra.mxu1 %vm179_vm1, %v10660_v56 }
  0x7f   :  { %9256 = vmatprep.mubr.msk.bf16.mxu0 %vm179_vm1, %v10377_v12  ;;  %9302 = vmatprep.mubr.msk.bf16.mxu1 %vm179_vm1, %v10379_v13  ;;  %v131_v12 = vld [vmem:[%s13638_s0 + $0x158] sm:$0xff] }
  0x80   :  { %v10749_v13 = vpack.c.bf16 %v131_v12, %v130_v54 }
  0x86   :  { %9257 = vmatmul.mubr.msk.bf16.vlgmr.msra.gmra.mxu0 %vm179_vm1, %v10392_v18  ;;  %9303 = vmatmul.mubr.msk.bf16.vlgmr.msra.gmra.mxu1 %vm179_vm1, %v10390_v17  ;;  %v999_v17 = vpack.c.bf16 %v13654_v9, %v131_v12 }
  0x87   :  { %9347 = vmatpush3.bf16.msra.mxu0 %v1264_v57  ;;  %9260 = vmatprep.mubr.msk.bf16.mxu0 %vm179_vm1, %v10416_v24 }
  0x88   :  { %9306 = vmatprep.mubr.msk.bf16.mxu1 %vm179_vm1, %v10414_v23  ;;  %v9721_v23 = vld [vmem:[%s13641_s3 + $0x64] ss:$0 sps:$4 sm:$0x33]  }
  0x89   :  { %9705 = vmatprep.subr.msk.bf16.mxu1 %vm246_vm0, %v9721_v23 }
  0x8e   :  { %9261 = vmatmul.mubr.msk.bf16.gmra.mxu0 %vm179_vm1, %v10420_v26  ;;  %9307 = vmatmul.mubr.msk.bf16.gmra.mxu1 %vm179_vm1, %v10418_v25  ;;  %v1791_v25 = vsel %vm246_vm0, %v9721_v23, 0 }
  0x8f   :  { %9264 = vmatprep.mubr.msk.bf16.mxu0 %vm179_vm1, %v10456_v35  ;;  %9310 = vmatprep.mubr.msk.bf16.mxu1 %vm179_vm1, %v10454_v34 }
  0x90   :  { %9393 = vmatpush3.bf16.msra.mxu1 %v1791_v25 }
  0x91   :  { %9394 = vmatprep.subr.bf16.mxu1 %v9722_v32 }
  0x94   :  { %9395 = vmatpush3.bf16.msra.mxu1 %v9722_v32 }
  0x96   :  { %9265 = vmatmul.mubr.msk.bf16.gmra.mxu0 %vm179_vm1, %v10460_v37  ;;  %9311 = vmatmul.mubr.msk.bf16.gmra.mxu1 %vm179_vm1, %v10458_v36 }
  0x97   :  { %9268 = vmatprep.mubr.msk.bf16.mxu0 %vm179_vm1, %v10484_v43  ;;  %9314 = vmatprep.mubr.msk.bf16.mxu1 %vm179_vm1, %v10482_v42 }
  0x9e   :  { %9269 = vmatmul.mubr.msk.bf16.gmra.mxu0 %vm179_vm1, %v10488_v45  ;;  %9315 = vmatmul.mubr.msk.bf16.gmra.mxu1 %vm179_vm1, %v10486_v44 }
  0x9f   :  { %9272 = vmatprep.mubr.msk.bf16.mxu0 %vm179_vm1, %v10512_v51  ;;  %9318 = vmatprep.mubr.msk.bf16.mxu1 %vm179_vm1, %v10510_v50 }
  0xa6   :  { %9273 = vmatmul.mubr.msk.bf16.gmra.mxu0 %vm179_vm1, %v10516_v53  ;;  %9319 = vmatmul.mubr.msk.bf16.gmra.mxu1 %vm179_vm1, %v10514_v52 }
  0xa7   :  { %9276 = vmatprep.mubr.msk.bf16.mxu0 %vm179_vm1, %v10540_v59  ;;  %9322 = vmatprep.mubr.msk.bf16.mxu1 %vm179_vm1, %v10538_v58 }
  0xae   :  { %9277 = vmatmul.mubr.msk.bf16.gmra.mxu0 %vm179_vm1, %v10544_v61  ;;  %9323 = vmatmul.mubr.msk.bf16.gmra.mxu1 %vm179_vm1, %v10542_v60 }
  0xaf   :  { %9280 = vmatprep.mubr.msk.bf16.mxu0 %vm179_vm1, %v10568_v4  ;;  %9326 = vmatprep.mubr.msk.bf16.mxu1 %vm179_vm1, %v10566_v3 }
  0xb6   :  { %9281 = vmatmul.mubr.msk.bf16.gmra.mxu0 %vm179_vm1, %v10572_v6  ;;  %9327 = vmatmul.mubr.msk.bf16.gmra.mxu1 %vm179_vm1, %v10570_v5 }
  0xb7   :  { %9284 = vmatprep.mubr.msk.bf16.mxu0 %vm179_vm1, %v10596_v15  ;;  %9330 = vmatprep.mubr.msk.bf16.mxu1 %vm179_vm1, %v10594_v14 }
  0xbe   :  { %9285 = vmatmul.mubr.msk.bf16.gmra.mxu0 %vm179_vm1, %v10600_v19  ;;  %9331 = vmatmul.mubr.msk.bf16.gmra.mxu1 %vm179_vm1, %v10598_v16 }
  0xbf   :  { %9288 = vmatprep.mubr.msk.bf16.mxu0 %vm179_vm1, %v10622_v29  ;;  %9334 = vmatprep.mubr.msk.bf16.mxu1 %vm179_vm1, %v172_v28 }
  0xc6   :  { %9289 = vmatmul.mubr.msk.bf16.gmra.mxu0 %vm179_vm1, %v10624_v31  ;;  %9335 = vmatmul.mubr.msk.bf16.gmra.mxu1 %vm179_vm1, %v173_v30 }
  0xc7   :  { %9292 = vmatprep.mubr.msk.bf16.mxu0 %vm179_vm1, %v10644_v46  ;;  %9338 = vmatprep.mubr.msk.bf16.mxu1 %vm179_vm1, %v174_v41  ;;  %v9725_v41 = vld [vmem:[%s13641_s3 + $0x44] sm:$0xff]  }
  0xce   :  { %9293 = vmatmul.mubr.msk.bf16.gmra.mxu0 %vm179_vm1, %v10646_v48  ;;  %9339 = vmatmul.mubr.msk.bf16.gmra.mxu1 %vm179_vm1, %v175_v47 }
  0xcf   :  { %9296 = vmatprep.mubr.msk.bf16.mxu0 %vm179_vm1, %v10660_v56  ;;  %9342 = vmatprep.mubr.msk.bf16.mxu1 %vm179_vm1, %v176_v55 }
  0xd6   :  { %9297 = vmatmul.mubr.msk.bf16.gmra.mxu0 %vm179_vm1, %v10749_v13  ;;  %9343 = vmatmul.mubr.msk.bf16.gmra.mxu1 %vm179_vm1, %v999_v17  ;;  %v9726_v17 = vld [vmem:[%s13641_s3 + $0x30] ss:$0 sps:$4 sm:$0x33]  }
  0xd7   :  { %9348 = vmatprep.mubr.msk.bf16.mxu0 %vm179_vm1, %v10392_v18  ;;  %9706 = vmatprep.subr.msk.bf16.mxu0 %vm246_vm0, %v9726_v17 }
  0xde   :  { %9349 = vmatmul.mubr.msk.bf16.vlgmr.msra.gmra.mxu0 %vm179_vm1, %v10416_v24 }
  0xdf   :  { %9352 = vmatprep.mubr.msk.bf16.mxu0 %vm179_vm1, %v10420_v26  ;;  %v9723_v26 = vld [vmem:[%s13641_s3 + $0x54] sm:$0xff]  }
  0xe0   :  { %9396 = vmatprep.subr.bf16.mxu1 %v9723_v26 }
  0xe1   :  { %9397 = vmatpush3.bf16.msra.mxu1 %v9723_v26 }
  0xe2   :  { %9398 = vmatprep.subr.bf16.mxu1 %v9724_v7 }
  0xe5   :  { %9399 = vmatpush3.bf16.msra.mxu1 %v9724_v7 }
  0xe6   :  { %9353 = vmatmul.mubr.msk.bf16.gmra.mxu0 %vm179_vm1, %v10456_v35  ;;  %9400 = vmatprep.subr.bf16.mxu1 %v9725_v41 }
  0xe7   :  { %9356 = vmatprep.mubr.msk.bf16.mxu0 %vm179_vm1, %v10460_v37 }
  0xe9   :  { %9401 = vmatpush3.bf16.msra.mxu1 %v9725_v41 }
  0xee   :  { %v9166_v18 = vpop.f32.mrf.mxu0  ;;  %v9212_v34 = vpop.f32.mrf.mxu1  ;;  %9357 = vmatmul.mubr.msk.bf16.gmra.mxu0 %vm179_vm1, %v10484_v43 }
  0xef   :  { %v10775_v24 = vadd.f32 %v9212_v34, %v9166_v18  ;;  %9360 = vmatprep.mubr.msk.bf16.mxu0 %vm179_vm1, %v10488_v45  ;;  %v2107_v18 = vsel %vm246_vm0, %v9726_v17, 0 }
  0xf0   :  { %v284_v36 = vpop.f32.mrf.mxu0  ;;  %v562_v35 = vpop.f32.mrf.mxu1  ;;  %9451 = vmatpush3.bf16.msra.mxu0 %v2107_v18  ;;  %v9734_v18 = vld [vmem:[%s13641_s3] sm:$0xff]  }
  0xf1   :  { %v10782_v42 = vadd.f32 %v562_v35, %v284_v36 }
  0xf2   :  { %v9167_v37 = vpop.f32.mrf.mxu0  ;;  %v9213_v44 = vpop.f32.mrf.mxu1 }
  0xf3   :  { %v10784_v50 = vadd.f32 %v9213_v44, %v9167_v37  ;;  %v9727_v37 = vld [vmem:[%s13641_s3 + $0x3c] sm:$0xff]  }
  0xf4   :  { %v10786_v43 = vpop.f32.mrf.mxu0  ;;  %v10788_v52 = vpop.f32.mrf.mxu1  ;;  %9402 = vmatprep.subr.bf16.mxu1 %v9727_v37 }
  0xf5   :  { %9403 = vmatpush3.bf16.msra.mxu1 %v9727_v37 }
  0xf6   :  { %v9170_v58 = vpop.f32.mrf.mxu0  ;;  %v9216_v45 = vpop.f32.mrf.mxu1  ;;  %9361 = vmatmul.mubr.msk.bf16.gmra.mxu0 %vm179_vm1, %v10512_v51 }
  0xf7   :  { %v10792_v60 = vadd.f32 %v9216_v45, %v9170_v58  ;;  %9364 = vmatprep.mubr.msk.bf16.mxu0 %vm179_vm1, %v10516_v53 }
  0xf8   :  { %v300_v62 = vpop.f32.mrf.mxu0  ;;  %v578_v63 = vpop.f32.mrf.mxu1 }
  0xf9   :  { %v10796_v0 = vadd.f32 %v578_v63, %v300_v62  ;;  %v9729_v62 = vld [vmem:[%s13641_s3 + $0x20] sm:$0xff]  }
  0xfa   :  { %v9171_v2 = vpop.f32.mrf.mxu0  ;;  %v9217_v3 = vpop.f32.mrf.mxu1 }
  0xfb   :  { %v10798_v5 = vadd.f32 %v9217_v3, %v9171_v2 }
  0xfc   :  { %v10803_v8 = vpop.f32.mrf.mxu0  ;;  %v10805_v51 = vpop.f32.mrf.mxu1 }
  0xfe   :  { %v9174_v10 = vpop.f32.mrf.mxu0  ;;  %v9220_v11 = vpop.f32.mrf.mxu1  ;;  %9365 = vmatmul.mubr.msk.bf16.gmra.mxu0 %vm179_vm1, %v10540_v59 }
  0xff   :  { %v10809_v53 = vadd.f32 %v9220_v11, %v9174_v10  ;;  %9368 = vmatprep.mubr.msk.bf16.mxu0 %vm179_vm1, %v10544_v61 }
 0x100   :  { %v316_v14 = vpop.f32.mrf.mxu0  ;;  %v594_v16 = vpop.f32.mrf.mxu1 }
 0x101   :  { %v10813_v20 = vadd.f32 %v594_v16, %v316_v14 }
 0x102   :  { %v9175_v21 = vpop.f32.mrf.mxu0  ;;  %v9221_v22 = vpop.f32.mrf.mxu1 }
 0x103   :  { %v10815_v27 = vadd.f32 %v9221_v22, %v9175_v21 }
 0x104   :  { %v10817_v28 = vpop.f32.mrf.mxu0  ;;  %v10819_v30 = vpop.f32.mrf.mxu1 }
 0x106   :  { %v9178_v33 = vpop.f32.mrf.mxu0  ;;  %v9224_v59 = vpop.f32.mrf.mxu1  ;;  %9369 = vmatmul.mubr.msk.bf16.gmra.mxu0 %vm179_vm1, %v10568_v4 }
 0x107   :  { %v10823_v38 = vadd.f32 %v9224_v59, %v9178_v33  ;;  %9372 = vmatprep.mubr.msk.bf16.mxu0 %vm179_vm1, %v10572_v6  ;;  %v9732_v33 = vld [vmem:[%s13641_s3 + $0x10] sm:$0xff]  }
 0x108   :  { %v332_v61 = vpop.f32.mrf.mxu0  ;;  %v610_v39 = vpop.f32.mrf.mxu1 }
 0x109   :  { %v10827_v40 = vadd.f32 %v610_v39, %v332_v61 }
 0x10a   :  { %v9179_v47 = vpop.f32.mrf.mxu0  ;;  %v9225_v49 = vpop.f32.mrf.mxu1 }
 0x10b   :  { %v10832_v54 = vadd.f32 %v9225_v49, %v9179_v47 }
 0x10c   :  { %v10834_v55 = vpop.f32.mrf.mxu0  ;;  %v10836_v4 = vpop.f32.mrf.mxu1 }
 0x10d   :  { %13664 = vst [vmem:[#allocation10_spill] sm:$0xff] %v10834_v55  ;;  %13665 = vst [vmem:[#allocation11_spill] sm:$0xff] %v10836_v4 }
 0x10e   :  { %v9182_v57 = vpop.f32.mrf.mxu0  ;;  %v9228_v6 = vpop.f32.mrf.mxu1  ;;  %9373 = vmatmul.mubr.msk.bf16.gmra.mxu0 %vm179_vm1, %v10596_v15 }
 0x10f   :  { %v10840_v12 = vadd.f32 %v9228_v6, %v9182_v57  ;;  %9376 = vmatprep.mubr.msk.bf16.mxu0 %vm179_vm1, %v10600_v19  ;;  %v9728_v19 = vld [vmem:[%s13641_s3 + $0x28] sm:$0xff]  }
 0x110   :  { %v348_v23 = vpop.f32.mrf.mxu0  ;;  %v626_v25 = vpop.f32.mrf.mxu1  ;;  %9452 = vmatprep.subr.bf16.mxu0 %v9728_v19 }
 0x111   :  { %v10847_v32 = vadd.f32 %v626_v25, %v348_v23  ;;  %9453 = vmatpush3.bf16.msra.mxu0 %v9728_v19  ;;  %v9731_v25 = vld [vmem:[%s13641_s3 + $0x34] sm:$0xff]  }
 0x112   :  { %v9183_v34 = vpop.f32.mrf.mxu0  ;;  %v9229_v26 = vpop.f32.mrf.mxu1  ;;  %9454 = vmatprep.subr.bf16.mxu0 %v9729_v62  ;;  %9404 = vmatprep.subr.bf16.mxu1 %v9731_v25 }
 0x113   :  { %v10851_v15 = vadd.f32 %v9229_v26, %v9183_v34  ;;  %9405 = vmatpush3.bf16.msra.mxu1 %v9731_v25 }
 0x114   :  { %v10856_v36 = vpop.f32.mrf.mxu0  ;;  %v10858_v35 = vpop.f32.mrf.mxu1 }
 0x115   :  { %13666 = vst [vmem:[#allocation12_spill] sm:$0xff] %v10856_v36  ;;  %13667 = vst [vmem:[#allocation13_spill] sm:$0xff] %v10858_v35  ;;  %9455 = vmatpush3.bf16.msra.mxu0 %v9729_v62 }
 0x116   :  { %v9186_v44 = vpop.f32.mrf.mxu0  ;;  %v9232_v58 = vpop.f32.mrf.mxu1  ;;  %9377 = vmatmul.mubr.msk.bf16.gmra.mxu0 %vm179_vm1, %v10622_v29 }
 0x117   :  { %v10865_v45 = vadd.f32 %v9232_v58, %v9186_v44  ;;  %9380 = vmatprep.mubr.msk.bf16.mxu0 %vm179_vm1, %v10624_v31  ;;  %v9730_v31 = vld [vmem:[%s13641_s3 + $0x18] sm:$0xff]  }
 0x118   :  { %v364_v63 = vpop.f32.mrf.mxu0  ;;  %v642_v2 = vpop.f32.mrf.mxu1  ;;  %9456 = vmatprep.subr.bf16.mxu0 %v9730_v31 }
 0x119   :  { %v10872_v3 = vadd.f32 %v642_v2, %v364_v63  ;;  %9457 = vmatpush3.bf16.msra.mxu0 %v9730_v31 }
 0x11a   :  { %v9187_v7 = vpop.f32.mrf.mxu0  ;;  %v9233_v10 = vpop.f32.mrf.mxu1  ;;  %9458 = vmatprep.subr.bf16.mxu0 %v9732_v33 }
 0x11b   :  { %v10874_v29 = vadd.f32 %v9233_v10, %v9187_v7 }
 0x11c   :  { %v10879_v11 = vpop.f32.mrf.mxu0  ;;  %v10881_v14 = vpop.f32.mrf.mxu1 }
 0x11d   :  { %13668 = vst [vmem:[#allocation14_spill] sm:$0xff] %v10879_v11  ;;  %13669 = vst [vmem:[#allocation15_spill] sm:$0xff] %v10881_v14  ;;  %9459 = vmatpush3.bf16.msra.mxu0 %v9732_v33 }
 0x11e   :  { %v9190_v16 = vpop.f32.mrf.mxu0  ;;  %v9236_v21 = vpop.f32.mrf.mxu1  ;;  %9381 = vmatmul.mubr.msk.bf16.gmra.mxu0 %vm179_vm1, %v10644_v46  ;;  %v9733_v46 = vld [vmem:[%s13641_s3 + $0x8] sm:$0xff]  }
 0x11f   :  { %v10885_v22 = vadd.f32 %v9236_v21, %v9190_v16  ;;  %9384 = vmatprep.mubr.msk.bf16.mxu0 %vm179_vm1, %v10646_v48  ;;  %9460 = vmatprep.subr.bf16.mxu0 %v9733_v46 }
 0x120   :  { %v380_v59 = vpop.f32.mrf.mxu0  ;;  %v658_v61 = vpop.f32.mrf.mxu1 }
 0x121   :  { %v10892_v39 = vadd.f32 %v658_v61, %v380_v59  ;;  %9461 = vmatpush3.bf16.msra.mxu0 %v9733_v46  ;;  %v10934_v59 = vld [vmem:[%s13641_s3 + $0x98] ss:$0 sps:$4 sm:$0x33]  }
 0x122   :  { %v9191_v41 = vpop.f32.mrf.mxu0  ;;  %v9237_v47 = vpop.f32.mrf.mxu1  ;;  %9462 = vmatprep.subr.bf16.mxu0 %v9734_v18  ;;  %9707 = vmatprep.subr.msk.bf16.mxu1 %vm246_vm0, %v10934_v59 }
 0x123   :  { %v10894_v49 = vadd.f32 %v9237_v47, %v9191_v41 }
 0x124   :  { %v10899_v57 = vpop.f32.mrf.mxu0  ;;  %v10901_v48 = vpop.f32.mrf.mxu1 }
 0x125   :  { %13670 = vst [vmem:[#allocation16_spill] sm:$0xff] %v10899_v57  ;;  %13671 = vst [vmem:[#allocation17_spill] sm:$0xff] %v10901_v48  ;;  %9463 = vmatpush3.bf16.msra.mxu0 %v9734_v18 }
 0x126   :  { %v9194_v6 = vpop.f32.mrf.mxu0  ;;  %v9240_v17 = vpop.f32.mrf.mxu1  ;;  %9385 = vmatmul.mubr.msk.bf16.gmra.mxu0 %vm179_vm1, %v10660_v56 }
 0x127   :  { %v10905_v23 = vadd.f32 %v9240_v17, %v9194_v6  ;;  %9388 = vmatprep.mubr.msk.bf16.mxu0 %vm179_vm1, %v10749_v13 }
 0x128   :  { %v396_v34 = vpop.f32.mrf.mxu0  ;;  %v674_v26 = vpop.f32.mrf.mxu1 }
 0x129   :  { %v10915_v19 = vadd.f32 %v674_v26, %v396_v34 }
 0x12a   :  { %v9195_v56 = vpop.f32.mrf.mxu0  ;;  %v9241_v37 = vpop.f32.mrf.mxu1 }
 0x12b   :  { %v10917_v44 = vadd.f32 %v9241_v37, %v9195_v56 }
 0x12c   :  { %v10919_v13 = vpop.f32.mrf.mxu0  ;;  %v10921_v58 = vpop.f32.mrf.mxu1 }
 0x12d   :  { %13672 = vst [vmem:[#allocation18_spill] sm:$0xff] %v10919_v13  ;;  %13673 = vst [vmem:[#allocation19_spill] sm:$0xff] %v10921_v58 }
 0x12e   :  { %v9198_v62 = vpop.f32.mrf.mxu0  ;;  %v9244_v63 = vpop.f32.mrf.mxu1  ;;  %9389 = vmatmul.mubr.bf16.gmra.mxu0 %v13652_v1 }
 0x12f   :  { %v10924_v2 = vadd.f32 %v9244_v63, %v9198_v62  ;;  %9464 = vmatprep.mubr.bf16.mxu0 %v13652_v1 }
 0x130   :  { %v412_v7 = vpop.f32.mrf.mxu0  ;;  %v690_v10 = vpop.f32.mrf.mxu1 }
 0x131   :  { %v10927_v31 = vadd.f32 %v690_v10, %v412_v7 }
 0x132   :  { %v9199_v16 = vpop.f32.mrf.mxu0  ;;  %v9245_v21 = vpop.f32.mrf.mxu1 }
 0x133   :  { %v10929_v33 = vadd.f32 %v9245_v21, %v9199_v16 }
 0x134   :  { %v10936_v61 = vpop.f32.mrf.mxu0  ;;  %v10938_v41 = vpop.f32.mrf.mxu1 }
 0x135   :  { %13674 = vst [vmem:[#allocation20_spill] sm:$0xff] %v10936_v61  ;;  %13675 = vst [vmem:[#allocation21_spill] sm:$0xff] %v10938_v41 }
 0x136   :  { %v9202_v47 = vpop.f32.mrf.mxu0  ;;  %v9248_v46 = vpop.f32.mrf.mxu1 }
 0x137   :  { %v10942_v6 = vadd.f32 %v9248_v46, %v9202_v47 }
 0x138   :  { %v428_v17 = vpop.f32.mrf.mxu0  ;;  %v706_v25 = vpop.f32.mrf.mxu1 }
 0x139   :  { %v10944_v18 = vadd.f32 %v706_v25, %v428_v17 }
 0x13a   :  { %v9203_v34 = vpop.f32.mrf.mxu0  ;;  %v9249_v26 = vpop.f32.mrf.mxu1 }
 0x13b   :  { %v10946_v56 = vadd.f32 %v9249_v26, %v9203_v34 }
 0x13c   :  { %v10948_v37 = vpop.f32.mrf.mxu0  ;;  %v10950_v62 = vpop.f32.mrf.mxu1 }
 0x13d   :  { %13676 = vst [vmem:[#allocation22_spill] sm:$0xff] %v10948_v37  ;;  %13677 = vst [vmem:[#allocation23_spill] sm:$0xff] %v10950_v62 }
 0x13e   :  { %v9206_v63 = vpop.f32.mrf.mxu0  ;;  %v9252_v7 = vpop.f32.mrf.mxu1 }
 0x13f   :  { %v10952_v10 = vadd.f32 %v9252_v7, %v9206_v63 }
 0x140   :  { %v444_v16 = vpop.f32.mrf.mxu0  ;;  %v722_v21 = vpop.f32.mrf.mxu1 }
 0x141   :  { %v10954_v47 = vadd.f32 %v722_v21, %v444_v16 }
 0x142   :  { %v9207_v46 = vpop.f32.mrf.mxu0  ;;  %v9253_v1 = vpop.f32.mrf.mxu1 }
 0x143   :  { %v10956_v17 = vadd.f32 %v9253_v1, %v9207_v46 }
 0x144   :  { %v10958_v25 = vpop.f32.mrf.mxu0  ;;  %v10960_v34 = vpop.f32.mrf.mxu1 }
 0x145   :  { %13678 = vst [vmem:[#allocation24_spill] sm:$0xff] %v10958_v25  ;;  %13679 = vst [vmem:[#allocation25_spill] sm:$0xff] %v10960_v34 }
 0x146   :  { %v9258_v26 = vpop.f32.mrf.mxu0  ;;  %v10962_v9 = vpop.f32.mrf.mxu1 }
 0x147   :  { %v10965_v62 = vadd.f32 %v9258_v26, %v10775_v24 }
 0x148   :  { %v780_v63 = vpop.f32.mrf.mxu0  ;;  %v10967_v7 = vpop.f32.mrf.mxu1 }
 0x149   :  { %v10970_v16 = vadd.f32 %v780_v63, %v10782_v42 }
 0x14a   :  { %v9259_v21 = vpop.f32.mrf.mxu0  ;;  %v10972_v37 = vpop.f32.mrf.mxu1 }
 0x14b   :  { %v10975_v1 = vadd.f32 %v9259_v21, %v10784_v50 }
 0x14c   :  { %v10977_v46 = vpop.f32.mrf.mxu0  ;;  %v10979_v34 = vpop.f32.mrf.mxu1 }
 0x14e   :  { %v9262_v25 = vpop.f32.mrf.mxu0  ;;  %v10981_v41 = vpop.f32.mrf.mxu1 }
 0x14f   :  { %v10984_v24 = vadd.f32 %v9262_v25, %v10792_v60 }
 0x150   :  { %v796_v26 = vpop.f32.mrf.mxu0  ;;  %v10986_v61 = vpop.f32.mrf.mxu1 }
 0x151   :  { %v10989_v42 = vadd.f32 %v796_v26, %v10796_v0 }
 0x152   :  { %v9263_v63 = vpop.f32.mrf.mxu0  ;;  %v10991_v58 = vpop.f32.mrf.mxu1 }
 0x153   :  { %v10994_v50 = vadd.f32 %v9263_v63, %v10798_v5 }
 0x154   :  { %v10996_v21 = vpop.f32.mrf.mxu0  ;;  %v10998_v13 = vpop.f32.mrf.mxu1 }
 0x156   :  { %v9266_v48 = vpop.f32.mrf.mxu0  ;;  %v11000_v57 = vpop.f32.mrf.mxu1 }
 0x157   :  { %v11003_v60 = vadd.f32 %v9266_v48, %v10809_v53 }
 0x158   :  { %v812_v25 = vpop.f32.mrf.mxu0  ;;  %v11005_v14 = vpop.f32.mrf.mxu1 }
 0x159   :  { %v11008_v0 = vadd.f32 %v812_v25, %v10813_v20 }
 0x15a   :  { %v9267_v26 = vpop.f32.mrf.mxu0  ;;  %v11010_v11 = vpop.f32.mrf.mxu1 }
 0x15b   :  { %13680 = vst [vmem:[#allocation26_spill] sm:$0xff] %v11010_v11  ;;  %v11013_v5 = vadd.f32 %v9267_v26, %v10815_v27 }
 0x15c   :  { %v11015_v63 = vpop.f32.mrf.mxu0  ;;  %v11017_v35 = vpop.f32.mrf.mxu1 }
 0x15d   :  { %13681 = vst [vmem:[#allocation27_spill] sm:$0xff] %v11013_v5  ;;  %13682 = vst [vmem:[#allocation28_spill] sm:$0xff] %v11017_v35 }
 0x15e   :  { %v9270_v36 = vpop.f32.mrf.mxu0  ;;  %v11019_v4 = vpop.f32.mrf.mxu1 }
 0x15f   :  { %13683 = vst [vmem:[#allocation29_spill] sm:$0xff] %v11019_v4  ;;  %v11022_v53 = vadd.f32 %v9270_v36, %v10823_v38 }
 0x160   :  { %v828_v48 = vpop.f32.mrf.mxu0  ;;  %v11024_v55 = vpop.f32.mrf.mxu1 }
 0x161   :  { %13684 = vst [vmem:[#allocation30_spill] sm:$0xff] %v11024_v55  ;;  %v11027_v20 = vadd.f32 %v828_v48, %v10827_v40  ;;  %v11048_v40 = vld [vmem:[%s13641_s3 + $0xcc] ss:$0 sps:$4 sm:$0x33]  }
 0x162   :  { %v9271_v25 = vpop.f32.mrf.mxu0  ;;  %v11029_v11 = vpop.f32.mrf.mxu1  ;;  %9708 = vmatprep.subr.msk.bf16.mxu0 %vm246_vm0, %v11048_v40 }
 0x163   :  { %13685 = vst [vmem:[#allocation31_spill] sm:$0xff] %v11029_v11  ;;  %v11032_v27 = vadd.f32 %v9271_v25, %v10832_v54 }
 0x164   :  { %v11034_v26 = vpop.f32.mrf.mxu0  ;;  %v11036_v35 = vpop.f32.mrf.mxu1 }
 0x165   :  { %13686 = vst [vmem:[#allocation32_spill] sm:$0xff] %v11036_v35 }
 0x166   :  { %v9274_v4 = vpop.f32.mrf.mxu0  ;;  %v11038_v5 = vpop.f32.mrf.mxu1 }
 0x167   :  { %13687 = vst [vmem:[#allocation33_spill] sm:$0xff] %v11038_v5  ;;  %v11041_v38 = vadd.f32 %v9274_v4, %v10840_v12 }
 0x168   :  { %v844_v36 = vpop.f32.mrf.mxu0  ;;  %v11043_v55 = vpop.f32.mrf.mxu1 }
 0x169   :  { %13688 = vst [vmem:[#allocation34_spill] sm:$0xff] %v11041_v38  ;;  %13689 = vst [vmem:[#allocation35_spill] sm:$0xff] %v11043_v55  ;;  %v11051_v54 = vadd.f32 %v844_v36, %v10847_v32 }
 0x16a   :  { %v9275_v48 = vpop.f32.mrf.mxu0  ;;  %v11053_v25 = vpop.f32.mrf.mxu1 }
 0x16b   :  { %13690 = vst [vmem:[#allocation36_spill] sm:$0xff] %v11051_v54  ;;  %13691 = vst [vmem:[#allocation37_spill] sm:$0xff] %v11053_v25  ;;  %v11058_v4 = vadd.f32 %v9275_v48, %v10851_v15 }
 0x16c   :  { %v11060_v12 = vpop.f32.mrf.mxu0  ;;  %v11062_v55 = vpop.f32.mrf.mxu1 }
 0x16d   :  { %13692 = vst [vmem:[#allocation38_spill] sm:$0xff] %v11058_v4  ;;  %13693 = vst [vmem:[#allocation39_spill] sm:$0xff] %v11062_v55 }
 0x16e   :  { %v9278_v5 = vpop.f32.mrf.mxu0  ;;  %v11064_v38 = vpop.f32.mrf.mxu1 }
 0x16f   :  { %13694 = vst [vmem:[#allocation40_spill] sm:$0xff] %v11064_v38  ;;  %v11067_v35 = vadd.f32 %v9278_v5, %v10865_v45 }
 0x170   :  { %v860_v32 = vpop.f32.mrf.mxu0  ;;  %v11069_v36 = vpop.f32.mrf.mxu1 }
 0x171   :  { %13695 = vst [vmem:[#allocation41_spill] sm:$0xff] %v11069_v36  ;;  %v11072_v25 = vadd.f32 %v860_v32, %v10872_v3 }
 0x172   :  { %v9279_v54 = vpop.f32.mrf.mxu0  ;;  %v11074_v11 = vpop.f32.mrf.mxu1 }
 0x173   :  { %13696 = vst [vmem:[#allocation42_spill] sm:$0xff] %v11074_v11  ;;  %v11077_v15 = vadd.f32 %v9279_v54, %v10874_v29 }
 0x174   :  { %v11079_v48 = vpop.f32.mrf.mxu0  ;;  %v11081_v55 = vpop.f32.mrf.mxu1 }
 0x175   :  { %13697 = vst [vmem:[#allocation43_spill] sm:$0xff] %v11077_v15  ;;  %13698 = vst [vmem:[#allocation44_spill] sm:$0xff] %v11081_v55 }
 0x176   :  { %v9282_v38 = vpop.f32.mrf.mxu0  ;;  %v11083_v4 = vpop.f32.mrf.mxu1 }
 0x177   :  { %13699 = vst [vmem:[#allocation45_spill] sm:$0xff] %v11083_v4  ;;  %v11086_v45 = vadd.f32 %v9282_v38, %v10885_v22 }
 0x178   :  { %v876_v5 = vpop.f32.mrf.mxu0  ;;  %v11088_v36 = vpop.f32.mrf.mxu1 }
 0x179   :  { %13700 = vst [vmem:[#allocation46_spill] sm:$0xff] %v11088_v36  ;;  %v11091_v3 = vadd.f32 %v876_v5, %v10892_v39 }
 0x17a   :  { %v9283_v32 = vpop.f32.mrf.mxu0  ;;  %v11093_v11 = vpop.f32.mrf.mxu1 }
 0x17b   :  { %13701 = vst [vmem:[#allocation47_spill] sm:$0xff] %v11093_v11  ;;  %v11096_v29 = vadd.f32 %v9283_v32, %v10894_v49 }
 0x17c   :  { %v11098_v54 = vpop.f32.mrf.mxu0  ;;  %v11100_v55 = vpop.f32.mrf.mxu1 }
 0x17d   :  { %13702 = vst [vmem:[#allocation48_spill] sm:$0xff] %v11096_v29  ;;  %13703 = vst [vmem:[#allocation49_spill] sm:$0xff] %v11100_v55 }
 0x17e   :  { %v9286_v4 = vpop.f32.mrf.mxu0  ;;  %v11102_v15 = vpop.f32.mrf.mxu1 }
 0x17f   :  { %13704 = vst [vmem:[#allocation50_spill] sm:$0xff] %v11102_v15  ;;  %v11105_v22 = vadd.f32 %v9286_v4, %v10905_v23 }
 0x180   :  { %v892_v38 = vpop.f32.mrf.mxu0  ;;  %v11107_v36 = vpop.f32.mrf.mxu1 }
 0x181   :  { %13705 = vst [vmem:[#allocation51_spill] sm:$0xff] %v11107_v36  ;;  %v11110_v39 = vadd.f32 %v892_v38, %v10915_v19 }
 0x182   :  { %v9287_v5 = vpop.f32.mrf.mxu0  ;;  %v11112_v11 = vpop.f32.mrf.mxu1 }
 0x183   :  { %13706 = vst [vmem:[#allocation52_spill] sm:$0xff] %v11112_v11  ;;  %v11115_v49 = vadd.f32 %v9287_v5, %v10917_v44 }
 0x184   :  { %v11117_v32 = vpop.f32.mrf.mxu0  ;;  %v11119_v55 = vpop.f32.mrf.mxu1 }
 0x185   :  { %13707 = vst [vmem:[#allocation53_spill] sm:$0xff] %v11115_v49  ;;  %13708 = vst [vmem:[#allocation54_spill] sm:$0xff] %v11119_v55 }
 0x186   :  { %v9290_v15 = vpop.f32.mrf.mxu0  ;;  %v11121_v29 = vpop.f32.mrf.mxu1 }
 0x187   :  { %13709 = vst [vmem:[#allocation55_spill] sm:$0xff] %v11121_v29  ;;  %v11124_v23 = vadd.f32 %v9290_v15, %v10924_v2 }
 0x188   :  { %v908_v4 = vpop.f32.mrf.mxu0  ;;  %v11126_v36 = vpop.f32.mrf.mxu1 }
 0x189   :  { %13710 = vst [vmem:[#allocation56_spill] sm:$0xff] %v11126_v36  ;;  %v11129_v19 = vadd.f32 %v908_v4, %v10927_v31 }
 0x18a   :  { %v9291_v38 = vpop.f32.mrf.mxu0  ;;  %v11131_v11 = vpop.f32.mrf.mxu1 }
 0x18b   :  { %13711 = vst [vmem:[#allocation57_spill] sm:$0xff] %v11131_v11  ;;  %v11134_v44 = vadd.f32 %v9291_v38, %v10929_v33 }
 0x18c   :  { %v11136_v5 = vpop.f32.mrf.mxu0  ;;  %v11138_v55 = vpop.f32.mrf.mxu1 }
 0x18d   :  { %13712 = vst [vmem:[#allocation58_spill] sm:$0xff] %v11134_v44  ;;  %13713 = vst [vmem:[#allocation59_spill] sm:$0xff] %v11138_v55 }
 0x18e   :  { %v9294_v29 = vpop.f32.mrf.mxu0  ;;  %v11140_v49 = vpop.f32.mrf.mxu1 }
 0x18f   :  { %13714 = vst [vmem:[#allocation60_spill] sm:$0xff] %v11140_v49  ;;  %v11143_v2 = vadd.f32 %v9294_v29, %v10942_v6 }
 0x190   :  { %v924_v15 = vpop.f32.mrf.mxu0  ;;  %v11145_v36 = vpop.f32.mrf.mxu1 }
 0x191   :  { %13715 = vst [vmem:[#allocation61_spill] sm:$0xff] %v11145_v36  ;;  %v11148_v31 = vadd.f32 %v924_v15, %v10944_v18 }
 0x192   :  { %v9295_v4 = vpop.f32.mrf.mxu0  ;;  %v11150_v11 = vpop.f32.mrf.mxu1 }
 0x193   :  { %13716 = vst [vmem:[#allocation62_spill] sm:$0xff] %v11150_v11  ;;  %v11153_v33 = vadd.f32 %v9295_v4, %v10946_v56 }
 0x194   :  { %v11155_v38 = vpop.f32.mrf.mxu0  ;;  %v11157_v55 = vpop.f32.mrf.mxu1 }
 0x195   :  { %13717 = vst [vmem:[#allocation63_spill] sm:$0xff] %v11157_v55  ;;  %v566_v55 = vadd.f32 %v10788_v52, %v10786_v43  ;;  %v1220_v43 = vadd.f32 %v10972_v37, %v10975_v1  ;;  %v1223_v37 = vadd.f32 %v10981_v41, %v10984_v24  ;;  %v1221_v1 = vadd.f32 %v10986_v61, %v10989_v42 }
 0x196   :  { %v9298_v49 = vpop.f32.mrf.mxu0  ;;  %v11159_v44 = vpop.f32.mrf.mxu1  ;;  %v1224_v61 = vadd.f32 %v10991_v58, %v10994_v50  ;;  %v2376_v24 = vsel %vm246_vm0, %v10934_v59, 0  ;;  %v9742_v59 = vld [vmem:[%s13641_s3 + $0xc4] sm:$0xff]  }
 0x197   :  { %13718 = vst [vmem:[#allocation64_spill] sm:$0xff] %v11159_v44  ;;  %v11162_v6 = vadd.f32 %v9298_v49, %v10952_v10  ;;  %v1219_v44 = vadd.f32 %v10962_v9, %v10965_v62 }
 0x198   :  { %v940_v29 = vpop.f32.mrf.mxu0  ;;  %v11164_v36 = vpop.f32.mrf.mxu1 }
 0x199   :  { %13719 = vst [vmem:[#allocation65_spill] sm:$0xff] %v11164_v36  ;;  %v11167_v18 = vadd.f32 %v940_v29, %v10954_v47  ;;  %v1217_v36 = vadd.f32 %v10967_v7, %v10970_v16  ;;  %v956_v47 = vadd.f32 %v10977_v46, %v566_v55  ;;  %v582_v55 = vadd.f32 %v10805_v51, %v10803_v8 }
 0x19a   :  { %v9299_v15 = vpop.f32.mrf.mxu0  ;;  %v9345_v11 = vpop.f32.mrf.mxu1 }
 0x19b   :  { %v998_v56 = vadd.f32 %v9299_v15, %v10956_v17  ;;  %v11184_v17 = vld [vmem:[%s13640_s2] ss:$0 sm:$0xff] }
 0x19c   :  { %v11170_v4 = vpop.f32.mrf.mxu0 }
 0x19d   :  { %v11176_v10 = vadd.f32 %v9345_v11, %v998_v56  ;;  %v1218_v11 = vadd.f32 %v10979_v34, %v956_v47  ;;  %v960_v34 = vadd.f32 %v10996_v21, %v582_v55  ;;  %v9736_v55 = vld [vmem:[%s13641_s3 + $0x90] sm:$0xff]  }
 0x19e   :  { %v9350_v49 = vpop.f32.mrf.mxu0 }
 0x19f   :  { %v1477_v29 = vadd.f32 %v9350_v49, %v1219_v44  ;;  %v1222_v42 = vadd.f32 %v10998_v13, %v960_v34  ;;  %v2689_v13 = vsel %vm246_vm0, %v11048_v40, 0 }
 0x1a0   :  { %v1300_v15 = vpop.f32.mrf.mxu0 }
 0x1a1   :  { %v1475_v52 = vadd.f32 %v1300_v15, %v1217_v36  ;;  %v1528_v62 = vadd.f32 %v11184_v17, %v1477_v29  ;;  %v13720_v29 = vmov 0.0  }
 0x1a2   :  { %v9351_v9 = vpop.f32.mrf.mxu0 }
 0x1a3   :  { %v1526_v7 = vadd.f32 %v11184_v17, %v1475_v52  ;;  %v1478_v16 = vadd.f32 %v9351_v9, %v1220_v43  ;;  %v1572_v47 = vmax.f32 %v1528_v62, 0.0 }
 0x1a4   :  { %v1303_v46 = vpop.f32.mrf.mxu0 }
 0x1a5   :  { %v1570_v44 = vmax.f32 %v1526_v7, 0.0  ;;  %v1529_v56 = vadd.f32 %v11184_v17, %v1478_v16  ;;  %v1476_v49 = vadd.f32 %v1303_v46, %v1218_v11  ;;  %v598_v46 = vadd.f32 %v10819_v30, %v10817_v28 }
 0x1a6   :  { %v9354_v36 = vpop.f32.mrf.mxu0  ;;  %v1227_v28 = vadd.f32 %v11000_v57, %v11003_v60  ;;  %v9737_v57 = vld [vmem:[%s13641_s3 + $0x88] sm:$0xff]  }
 0x1a7   :  { %v1648_v15 = vpack.c.bf16 %v1570_v44, %v13720_v29  ;;  %v1573_v43 = vmax.f32 %v1529_v56, 0.0  ;;  %v1527_v8 = vadd.f32 %v11184_v17, %v1476_v49  ;;  %v1481_v51 = vadd.f32 %v9354_v36, %v1223_v37 }
 0x1a8   :  { %v1316_v52 = vpop.f32.mrf.mxu0  ;;  %v964_v30 = vadd.f32 %v11015_v63, %v598_v46  ;;  %v9738_v46 = vld [vmem:[%s13641_s3 + $0x80] sm:$0xff]  }
 0x1a9   :  { %v11201_v9 = vpack.c.bf16 %v1573_v43, %v1572_v47  ;;  %v1571_v11 = vmax.f32 %v1527_v8, 0.0  ;;  %v1479_v7 = vadd.f32 %v1316_v52, %v1221_v1  ;;  %9406 = vmatprep.mubr.msk.bf16.mxu1 %vm1723_vm2, %v1648_v15  ;;  %v1532_v58 = vadd.f32 %v11184_v17, %v1481_v51  ;;  %v9743_v8 = vld [vmem:[%s13641_s3 + $0xbc] sm:$0xff]  }
 0x1aa   :  { %v9355_v41 = vpop.f32.mrf.mxu0  ;;  %v1225_v1 = vadd.f32 %v11005_v14, %v11008_v0  ;;  %v13722_v51 = vld [vmem:[#allocation26_spill] sm:$0xff] }
 0x1ab   :  { %v11209_v21 = vpack.c.bf16 %v1571_v11, %v1570_v44  ;;  %v11211_v62 = vpack.c.bf16 %v1572_v47, %v1571_v11  ;;  %v1530_v16 = vadd.f32 %v11184_v17, %v1479_v7  ;;  %v1482_v50 = vadd.f32 %v9355_v41, %v1224_v61  ;;  %v13723_v11 = vld [vmem:[#allocation28_spill] sm:$0xff] }
 0x1ac   :  { %v1319_v56 = vpop.f32.mrf.mxu0  ;;  %v1576_v60 = vmax.f32 %v1532_v58, 0.0  ;;  %v1226_v7 = vadd.f32 %v13723_v11, %v964_v30  ;;  %v13724_v58 = vld [vmem:[#allocation10_spill] sm:$0xff] }
 0x1ad   :  { %v1574_v44 = vmax.f32 %v1530_v16, 0.0  ;;  %v1480_v49 = vadd.f32 %v1319_v56, %v1222_v42  ;;  %9407 = vmatmul.mubr.msk.bf16.vlgmr.msra.gmra.mxu1 %vm1723_vm2, %v11211_v62  ;;  %9465 = vmatmul.mubr.msk.bf16.vlgmr.msra.gmra.mxu0 %vm1723_vm2, %v11209_v21  ;;  %v1533_v37 = vadd.f32 %v11184_v17, %v1482_v50  ;;  %v13725_v50 = vld [vmem:[#allocation11_spill] sm:$0xff] }
 0x1ae   :  { %v9358_v40 = vpop.f32.mrf.mxu0  ;;  %9468 = vmatprep.mubr.msk.bf16.mxu0 %vm1723_vm2, %v11201_v9  ;;  %9509 = vmatpush3.bf16.msra.mxu1 %v2376_v24  ;;  %v614_v56 = vadd.f32 %v13725_v50, %v13724_v58 }
 0x1af   :  { %v11237_v34 = vpack.c.bf16 %v1574_v44, %v1573_v43  ;;  %v1531_v36 = vadd.f32 %v11184_v17, %v1480_v49  ;;  %9510 = vmatprep.subr.bf16.mxu1 %v9736_v55  ;;  %9567 = vmatpush3.bf16.msra.mxu0 %v2689_v13  ;;  %v1577_v63 = vmax.f32 %v1533_v37, 0.0  ;;  %v1485_v47 = vadd.f32 %v9358_v40, %v1227_v28  ;;  %v13721_v43 = vld [vmem:[#allocation27_spill] sm:$0xff] }
 0x1b0   :  { %v1332_v15 = vpop.f32.mrf.mxu0  ;;  %9568 = vmatprep.subr.bf16.mxu0 %v9742_v59  ;;  %v1228_v52 = vadd.f32 %v13722_v51, %v13721_v43  ;;  %v968_v40 = vadd.f32 %v11034_v26, %v614_v56 }
 0x1b1   :  { %v1575_v14 = vmax.f32 %v1531_v36, 0.0  ;;  %v1483_v0 = vadd.f32 %v1332_v15, %v1225_v1  ;;  %9410 = vmatprep.mubr.msk.bf16.mxu1 %vm1723_vm2, %v11237_v34  ;;  %v11251_v61 = vpack.c.bf16 %v1577_v63, %v1576_v60  ;;  %v1536_v13 = vadd.f32 %v11184_v17, %v1485_v47 }
 0x1b2   :  { %v9359_v41 = vpop.f32.mrf.mxu0  ;;  %9511 = vmatpush3.bf16.msra.mxu1 %v9736_v55  ;;  %v9744_v55 = vld [vmem:[%s13641_s3 + $0xb4] sm:$0xff]  }
 0x1b3   :  { %v11253_v24 = vpack.c.bf16 %v1575_v14, %v1574_v44  ;;  %v11255_v42 = vpack.c.bf16 %v1576_v60, %v1575_v14  ;;  %v1534_v16 = vadd.f32 %v11184_v17, %v1483_v0  ;;  %9512 = vmatprep.subr.bf16.mxu1 %v9737_v57  ;;  %9569 = vmatpush3.bf16.msra.mxu0 %v9742_v59  ;;  %v13726_v59 = vld [vmem:[#allocation29_spill] sm:$0xff]  ;;  %v13727_v60 = vld [vmem:[#allocation30_spill] sm:$0xff]  ;;  %v1580_v26 = vmax.f32 %v1536_v13, 0.0 }
 0x1b4   :  { %v1486_v49 = vadd.f32 %v9359_v41, %v1228_v52  ;;  %v1335_v28 = vpop.f32.mrf.mxu0  ;;  %9570 = vmatprep.subr.bf16.mxu0 %v9743_v8  ;;  %v1231_v37 = vadd.f32 %v13726_v59, %v11022_v53  ;;  %v1229_v47 = vadd.f32 %v13727_v60, %v11027_v20  ;;  %v9739_v53 = vld [vmem:[%s13641_s3 + $0x78] sm:$0xff]   ;;  %v13728_v52 = vld [vmem:[#allocation31_spill] sm:$0xff]  ;;  %v9741_v13 = vld [vmem:[%s13641_s3 + $0x70] sm:$0xff]  }
 0x1b5   :  { %v1578_v44 = vmax.f32 %v1534_v16, 0.0  ;;  %v1484_v30 = vadd.f32 %v1335_v28, %v1226_v7  ;;  %9411 = vmatmul.mubr.msk.bf16.gmra.mxu1 %vm1723_vm2, %v11255_v42  ;;  %9469 = vmatmul.mubr.msk.bf16.gmra.mxu0 %vm1723_vm2, %v11253_v24  ;;  %v1232_v11 = vadd.f32 %v13728_v52, %v11032_v27  ;;  %v13729_v7 = vld [vmem:[#allocation32_spill] sm:$0xff]  ;;  %v13731_v27 = vld [vmem:[#allocation13_spill] sm:$0xff] }
 0x1b6   :  { %v1537_v1 = vadd.f32 %v11184_v17, %v1486_v49  ;;  %v9362_v36 = vpop.f32.mrf.mxu0  ;;  %9472 = vmatprep.mubr.msk.bf16.mxu0 %vm1723_vm2, %v11251_v61  ;;  %9513 = vmatpush3.bf16.msra.mxu1 %v9737_v57  ;;  %v9746_v57 = vld [vmem:[%s13641_s3 + $0xac] sm:$0xff]   ;;  %v1230_v41 = vadd.f32 %v13729_v7, %v968_v40 }
 0x1b7   :  { %v11279_v15 = vpack.c.bf16 %v1578_v44, %v1577_v63  ;;  %v1535_v14 = vadd.f32 %v11184_v17, %v1484_v30  ;;  %9514 = vmatprep.subr.bf16.mxu1 %v9738_v46  ;;  %9571 = vmatpush3.bf16.msra.mxu0 %v9743_v8  ;;  %v1489_v43 = vadd.f32 %v9362_v36, %v1231_v37  ;;  %v13730_v49 = vld [vmem:[#allocation12_spill] sm:$0xff] }
 0x1b8   :  { %v1581_v0 = vmax.f32 %v1537_v1, 0.0  ;;  %v1348_v51 = vpop.f32.mrf.mxu0  ;;  %9572 = vmatprep.subr.bf16.mxu0 %v9744_v55  ;;  %v630_v28 = vadd.f32 %v13731_v27, %v13730_v49  ;;  %v13733_v1 = vld [vmem:[#allocation33_spill] sm:$0xff]  ;;  %v9745_v52 = vld [vmem:[%s13641_s3 + $0x68] sm:$0xff]  }
 0x1b9   :  { %v1579_v20 = vmax.f32 %v1535_v14, 0.0  ;;  %v1487_v63 = vadd.f32 %v1348_v51, %v1229_v47  ;;  %9414 = vmatprep.mubr.msk.bf16.mxu1 %vm1723_vm2, %v11279_v15  ;;  %v1540_v30 = vadd.f32 %v11184_v17, %v1489_v43  ;;  %v13735_v43 = vld [vmem:[#allocation35_spill] sm:$0xff]  ;;  %v13737_v49 = vld [vmem:[#allocation37_spill] sm:$0xff] }
 0x1ba   :  { %v11293_v8 = vpack.c.bf16 %v1581_v0, %v1580_v26  ;;  %v9363_v16 = vpop.f32.mrf.mxu0  ;;  %9515 = vmatpush3.bf16.msra.mxu1 %v9738_v46  ;;  %v9747_v46 = vld [vmem:[%s13641_s3 + $0xa4] sm:$0xff]   ;;  %v972_v60 = vadd.f32 %v11060_v12, %v630_v28 }
 0x1bb   :  { %v11295_v58 = vpack.c.bf16 %v1579_v20, %v1578_v44  ;;  %v11297_v50 = vpack.c.bf16 %v1580_v26, %v1579_v20  ;;  %v1538_v56 = vadd.f32 %v11184_v17, %v1487_v63  ;;  %9516 = vmatprep.subr.bf16.mxu1 %v9739_v53  ;;  %9573 = vmatpush3.bf16.msra.mxu0 %v9744_v55  ;;  %v13732_v55 = vld [vmem:[#allocation34_spill] sm:$0xff]  ;;  %v13734_v26 = vld [vmem:[#allocation36_spill] sm:$0xff]  ;;  %v1584_v12 = vmax.f32 %v1540_v30, 0.0  ;;  %v13738_v28 = vld [vmem:[#allocation39_spill] sm:$0xff] }
 0x1bc   :  { %v1490_v59 = vadd.f32 %v9363_v16, %v1232_v11  ;;  %v1351_v37 = vpop.f32.mrf.mxu0  ;;  %9574 = vmatprep.subr.bf16.mxu0 %v9746_v57  ;;  %v1235_v36 = vadd.f32 %v13733_v1, %v13732_v55  ;;  %v1233_v51 = vadd.f32 %v13735_v43, %v13734_v26  ;;  %v11345_v1 = vld [vmem:[%s13641_s3 + $0x100] ss:$0 sps:$4 sm:$0x33]  }
 0x1bd   :  { %v1582_v44 = vmax.f32 %v1538_v56, 0.0  ;;  %v1488_v40 = vadd.f32 %v1351_v37, %v1230_v41  ;;  %9415 = vmatmul.mubr.msk.bf16.gmra.mxu1 %vm1723_vm2, %v11297_v50  ;;  %9473 = vmatmul.mubr.msk.bf16.gmra.mxu0 %vm1723_vm2, %v11295_v58  ;;  %v13736_v56 = vld [vmem:[#allocation38_spill] sm:$0xff] }
 0x1be   :  { %v1541_v47 = vadd.f32 %v11184_v17, %v1490_v59  ;;  %v9366_v14 = vpop.f32.mrf.mxu0  ;;  %9476 = vmatprep.mubr.msk.bf16.mxu0 %vm1723_vm2, %v11293_v8  ;;  %9517 = vmatpush3.bf16.msra.mxu1 %v9739_v53  ;;  %v9748_v53 = vld [vmem:[%s13641_s3 + $0x9c] sm:$0xff]   ;;  %v1236_v27 = vadd.f32 %v13737_v49, %v13736_v56  ;;  %v1234_v59 = vadd.f32 %v13738_v28, %v972_v60 }
 0x1bf   :  { %v11321_v20 = vpack.c.bf16 %v1582_v44, %v1581_v0  ;;  %v1539_v63 = vadd.f32 %v11184_v17, %v1488_v40  ;;  %9518 = vmatprep.subr.bf16.mxu1 %v9741_v13  ;;  %9575 = vmatpush3.bf16.msra.mxu0 %v9746_v57  ;;  %v1493_v7 = vadd.f32 %v9366_v14, %v1235_v36  ;;  %v13739_v14 = vld [vmem:[#allocation14_spill] sm:$0xff] }
 0x1c0   :  { %v1585_v11 = vmax.f32 %v1541_v47, 0.0  ;;  %v1364_v41 = vpop.f32.mrf.mxu0  ;;  %9576 = vmatprep.subr.bf16.mxu0 %v9747_v46 }
 0x1c1   :  { %v1583_v16 = vmax.f32 %v1539_v63, 0.0  ;;  %v1491_v0 = vadd.f32 %v1364_v41, %v1233_v51  ;;  %9418 = vmatprep.mubr.msk.bf16.mxu1 %vm1723_vm2, %v11321_v20  ;;  %v1544_v36 = vadd.f32 %v11184_v17, %v1493_v7  ;;  %v13742_v63 = vld [vmem:[#allocation41_spill] sm:$0xff] }
 0x1c2   :  { %v11335_v57 = vpack.c.bf16 %v1585_v11, %v1584_v12  ;;  %v9367_v30 = vpop.f32.mrf.mxu0  ;;  %9519 = vmatpush3.bf16.msra.mxu1 %v9741_v13  ;;  %v13740_v13 = vld [vmem:[#allocation15_spill] sm:$0xff] }
 0x1c3   :  { %v11337_v37 = vpack.c.bf16 %v1583_v16, %v1582_v44  ;;  %v11339_v40 = vpack.c.bf16 %v1584_v12, %v1583_v16  ;;  %v1542_v55 = vadd.f32 %v11184_v17, %v1491_v0  ;;  %9520 = vmatprep.subr.bf16.mxu1 %v9745_v52  ;;  %9577 = vmatpush3.bf16.msra.mxu0 %v9747_v46  ;;  %v13741_v46 = vld [vmem:[#allocation40_spill] sm:$0xff] }
 0x1c4   :  { %v1494_v60 = vadd.f32 %v9367_v30, %v1236_v27  ;;  %v1367_v47 = vpop.f32.mrf.mxu0  ;;  %9578 = vmatprep.subr.bf16.mxu0 %v9748_v53  ;;  %v646_v44 = vadd.f32 %v13740_v13, %v13739_v14  ;;  %v1239_v51 = vadd.f32 %v13741_v46, %v11067_v35  ;;  %v1237_v12 = vadd.f32 %v13742_v63, %v11072_v25  ;;  %v13744_v30 = vld [vmem:[#allocation42_spill] sm:$0xff]  ;;  %v13746_v46 = vld [vmem:[#allocation16_spill] sm:$0xff] }
 0x1c5   :  { %v1586_v26 = vmax.f32 %v1542_v55, 0.0  ;;  %v1492_v43 = vadd.f32 %v1367_v47, %v1234_v59  ;;  %9419 = vmatmul.mubr.msk.bf16.gmra.mxu1 %vm1723_vm2, %v11339_v40  ;;  %9477 = vmatmul.mubr.msk.bf16.gmra.mxu0 %vm1723_vm2, %v11337_v37  ;;  %v1588_v35 = vmax.f32 %v1544_v36, 0.0 }
 0x1c6   :  { %v1545_v7 = vadd.f32 %v11184_v17, %v1494_v60  ;;  %v9370_v41 = vpop.f32.mrf.mxu0  ;;  %9480 = vmatprep.mubr.msk.bf16.mxu0 %vm1723_vm2, %v11335_v57  ;;  %9521 = vmatpush3.bf16.msra.mxu1 %v9745_v52  ;;  %v976_v16 = vadd.f32 %v11079_v48, %v646_v44  ;;  %v13743_v52 = vld [vmem:[#allocation43_spill] sm:$0xff]  ;;  %v13745_v60 = vld [vmem:[#allocation44_spill] sm:$0xff] }
 0x1c7   :  { %v11362_v0 = vpack.c.bf16 %v1586_v26, %v1585_v11  ;;  %v1543_v56 = vadd.f32 %v11184_v17, %v1492_v43  ;;  %9579 = vmatpush3.bf16.msra.mxu0 %v9748_v53  ;;  %9709 = vmatprep.subr.msk.bf16.mxu1 %vm246_vm0, %v11345_v1  ;;  %v1497_v25 = vadd.f32 %v9370_v41, %v1239_v51  ;;  %v13747_v51 = vld [vmem:[#allocation17_spill] sm:$0xff] }
 0x1c8   :  { %v1589_v49 = vmax.f32 %v1545_v7, 0.0  ;;  %v1380_v27 = vpop.f32.mrf.mxu0  ;;  %v1240_v48 = vadd.f32 %v13744_v30, %v13743_v52  ;;  %v1238_v53 = vadd.f32 %v13745_v60, %v976_v16  ;;  %v662_v63 = vadd.f32 %v13747_v51, %v13746_v46 }
 0x1c9   :  { %v1587_v28 = vmax.f32 %v1543_v56, 0.0  ;;  %v1495_v59 = vadd.f32 %v1380_v27, %v1237_v12  ;;  %9422 = vmatprep.mubr.msk.bf16.mxu1 %vm1723_vm2, %v11362_v0  ;;  %v1548_v13 = vadd.f32 %v11184_v17, %v1497_v25 }
 0x1ca   :  { %v11371_v11 = vpack.c.bf16 %v1589_v49, %v1588_v35  ;;  %v9371_v55 = vpop.f32.mrf.mxu0  ;;  %v980_v27 = vadd.f32 %v11098_v54, %v662_v63  ;;  %v13752_v54 = vld [vmem:[#allocation49_spill] sm:$0xff] }
 0x1cb   :  { %v11374_v47 = vpack.c.bf16 %v1587_v28, %v1586_v26  ;;  %v11376_v14 = vpack.c.bf16 %v1588_v35, %v1587_v28  ;;  %v1546_v36 = vadd.f32 %v11184_v17, %v1495_v59  ;;  %v1498_v44 = vadd.f32 %v9371_v55, %v1240_v48  ;;  %v13748_v26 = vld [vmem:[#allocation45_spill] sm:$0xff]  ;;  %v13749_v35 = vld [vmem:[#allocation46_spill] sm:$0xff] }
 0x1cc   :  { %v1383_v43 = vpop.f32.mrf.mxu0  ;;  %v1243_v41 = vadd.f32 %v13748_v26, %v11086_v45  ;;  %v1241_v25 = vadd.f32 %v13749_v35, %v11091_v3  ;;  %v1592_v52 = vmax.f32 %v1548_v13, 0.0 }
 0x1cd   :  { %v1590_v12 = vmax.f32 %v1546_v36, 0.0  ;;  %v1496_v7 = vadd.f32 %v1383_v43, %v1238_v53  ;;  %9423 = vmatmul.mubr.msk.bf16.gmra.mxu1 %vm1723_vm2, %v11376_v14  ;;  %9481 = vmatmul.mubr.msk.bf16.gmra.mxu0 %vm1723_vm2, %v11374_v47  ;;  %v1549_v16 = vadd.f32 %v11184_v17, %v1498_v44  ;;  %v13750_v53 = vld [vmem:[#allocation48_spill] sm:$0xff]  ;;  %v13751_v36 = vld [vmem:[#allocation47_spill] sm:$0xff] }
 0x1ce   :  { %v9374_v56 = vpop.f32.mrf.mxu0  ;;  %9484 = vmatprep.mubr.msk.bf16.mxu0 %vm1723_vm2, %v11371_v11  ;;  %v1244_v44 = vadd.f32 %v13751_v36, %v13750_v53 }
 0x1cf   :  { %v11394_v28 = vpack.c.bf16 %v1590_v12, %v1589_v49  ;;  %v1547_v59 = vadd.f32 %v11184_v17, %v1496_v7  ;;  %v1593_v30 = vmax.f32 %v1549_v16, 0.0  ;;  %v1501_v48 = vadd.f32 %v9374_v56, %v1243_v41  ;;  %v13753_v41 = vld [vmem:[#allocation18_spill] sm:$0xff]  ;;  %v13754_v16 = vld [vmem:[#allocation19_spill] sm:$0xff] }
 0x1d0   :  { %v1396_v55 = vpop.f32.mrf.mxu0  ;;  %v1242_v49 = vadd.f32 %v13752_v54, %v980_v27  ;;  %v678_v56 = vadd.f32 %v13754_v16, %v13753_v41 }
 0x1d1   :  { %v1591_v45 = vmax.f32 %v1547_v59, 0.0  ;;  %v1499_v60 = vadd.f32 %v1396_v55, %v1241_v25  ;;  %9426 = vmatprep.mubr.msk.bf16.mxu1 %vm1723_vm2, %v11394_v28  ;;  %v11401_v43 = vpack.c.bf16 %v1593_v30, %v1592_v52  ;;  %v1552_v63 = vadd.f32 %v11184_v17, %v1501_v48  ;;  %v13756_v48 = vld [vmem:[#allocation51_spill] sm:$0xff] }
 0x1d2   :  { %v9375_v3 = vpop.f32.mrf.mxu0  ;;  %v1245_v55 = vadd.f32 %v13756_v48, %v11110_v39 }
 0x1d3   :  { %v11404_v46 = vpack.c.bf16 %v1591_v45, %v1590_v12  ;;  %v11406_v51 = vpack.c.bf16 %v1592_v52, %v1591_v45  ;;  %v1550_v13 = vadd.f32 %v11184_v17, %v1499_v60  ;;  %v1502_v7 = vadd.f32 %v9375_v3, %v1244_v44  ;;  %v13755_v12 = vld [vmem:[#allocation50_spill] sm:$0xff] }
 0x1d4   :  { %v1399_v26 = vpop.f32.mrf.mxu0  ;;  %v1247_v27 = vadd.f32 %v13755_v12, %v11105_v22  ;;  %v984_v45 = vadd.f32 %v11117_v32, %v678_v56  ;;  %v1596_v36 = vmax.f32 %v1552_v63, 0.0  ;;  %v13759_v32 = vld [vmem:[#allocation54_spill] sm:$0xff] }
 0x1d5   :  { %v1594_v35 = vmax.f32 %v1550_v13, 0.0  ;;  %v1500_v25 = vadd.f32 %v1399_v26, %v1242_v49  ;;  %9427 = vmatmul.mubr.msk.bf16.gmra.mxu1 %vm1723_vm2, %v11406_v51  ;;  %9485 = vmatmul.mubr.msk.bf16.gmra.mxu0 %vm1723_vm2, %v11404_v46  ;;  %v1553_v59 = vadd.f32 %v11184_v17, %v1502_v7  ;;  %v13757_v13 = vld [vmem:[#allocation53_spill] sm:$0xff]  ;;  %v13758_v7 = vld [vmem:[#allocation52_spill] sm:$0xff] }
 0x1d6   :  { %v9378_v52 = vpop.f32.mrf.mxu0  ;;  %9488 = vmatprep.mubr.msk.bf16.mxu0 %vm1723_vm2, %v11401_v43  ;;  %v1248_v26 = vadd.f32 %v13758_v7, %v13757_v13 }
 0x1d7   :  { %v11424_v60 = vpack.c.bf16 %v1594_v35, %v1593_v30  ;;  %v1551_v53 = vadd.f32 %v11184_v17, %v1500_v25  ;;  %v1597_v44 = vmax.f32 %v1553_v59, 0.0  ;;  %v1505_v3 = vadd.f32 %v9378_v52, %v1247_v27  ;;  %v13760_v59 = vld [vmem:[#allocation20_spill] sm:$0xff]  ;;  %v13761_v52 = vld [vmem:[#allocation21_spill] sm:$0xff] }
 0x1d8   :  { %v1412_v54 = vpop.f32.mrf.mxu0  ;;  %v1246_v30 = vadd.f32 %v13759_v32, %v984_v45  ;;  %v694_v48 = vadd.f32 %v13761_v52, %v13760_v59 }
 0x1d9   :  { %v1595_v22 = vmax.f32 %v1551_v53, 0.0  ;;  %v1503_v49 = vadd.f32 %v1412_v54, %v1245_v55  ;;  %9430 = vmatprep.mubr.msk.bf16.mxu1 %vm1723_vm2, %v11424_v60  ;;  %v11431_v41 = vpack.c.bf16 %v1597_v44, %v1596_v36  ;;  %v1556_v25 = vadd.f32 %v11184_v17, %v1505_v3  ;;  %v13763_v3 = vld [vmem:[#allocation56_spill] sm:$0xff] }
 0x1da   :  { %v9379_v39 = vpop.f32.mrf.mxu0 }
 0x1db   :  { %v11434_v16 = vpack.c.bf16 %v1595_v22, %v1594_v35  ;;  %v11436_v56 = vpack.c.bf16 %v1596_v36, %v1595_v22  ;;  %v1554_v63 = vadd.f32 %v11184_v17, %v1503_v49  ;;  %v1506_v12 = vadd.f32 %v9379_v39, %v1248_v26  ;;  %v13762_v35 = vld [vmem:[#allocation55_spill] sm:$0xff] }
 0x1dc   :  { %v1415_v27 = vpop.f32.mrf.mxu0  ;;  %v1251_v45 = vadd.f32 %v13762_v35, %v11124_v23  ;;  %v1249_v22 = vadd.f32 %v13763_v3, %v11129_v19  ;;  %v988_v49 = vadd.f32 %v11136_v5, %v694_v48  ;;  %v1600_v26 = vmax.f32 %v1556_v25, 0.0  ;;  %v13766_v5 = vld [vmem:[#allocation59_spill] sm:$0xff] }
 0x1dd   :  { %v1598_v55 = vmax.f32 %v1554_v63, 0.0  ;;  %v1504_v53 = vadd.f32 %v1415_v27, %v1246_v30  ;;  %9431 = vmatmul.mubr.msk.bf16.gmra.mxu1 %vm1723_vm2, %v11436_v56  ;;  %9489 = vmatmul.mubr.msk.bf16.gmra.mxu0 %vm1723_vm2, %v11434_v16  ;;  %v1557_v36 = vadd.f32 %v11184_v17, %v1506_v12  ;;  %v13764_v12 = vld [vmem:[#allocation58_spill] sm:$0xff]  ;;  %v13765_v27 = vld [vmem:[#allocation57_spill] sm:$0xff]  ;;  %v13768_v3 = vld [vmem:[#allocation23_spill] sm:$0xff] }
 0x1de   :  { %v9382_v54 = vpop.f32.mrf.mxu0  ;;  %9492 = vmatprep.mubr.msk.bf16.mxu0 %vm1723_vm2, %v11431_v41  ;;  %v1252_v59 = vadd.f32 %v13765_v27, %v13764_v12 }
 0x1df   :  { %v11454_v13 = vpack.c.bf16 %v1598_v55, %v1597_v44  ;;  %v1555_v7 = vadd.f32 %v11184_v17, %v1504_v53  ;;  %v1601_v39 = vmax.f32 %v1557_v36, 0.0  ;;  %v1509_v32 = vadd.f32 %v9382_v54, %v1251_v45  ;;  %v13767_v54 = vld [vmem:[#allocation22_spill] sm:$0xff] }
 0x1e0   :  { %v1428_v30 = vpop.f32.mrf.mxu0  ;;  %v1250_v44 = vadd.f32 %v13766_v5, %v988_v49 }
 0x1e1   :  { %v1599_v23 = vmax.f32 %v1555_v7, 0.0  ;;  %v1507_v63 = vadd.f32 %v1428_v30, %v1249_v22  ;;  %9434 = vmatprep.mubr.msk.bf16.mxu1 %vm1723_vm2, %v11454_v13  ;;  %v11461_v52 = vpack.c.bf16 %v1601_v39, %v1600_v26  ;;  %v1560_v35 = vadd.f32 %v11184_v17, %v1509_v32  ;;  %v13770_v32 = vld [vmem:[#allocation61_spill] sm:$0xff] }
 0x1e2   :  { %v9383_v19 = vpop.f32.mrf.mxu0  ;;  %v710_v22 = vadd.f32 %v13768_v3, %v13767_v54 }
 0x1e3   :  { %v11464_v48 = vpack.c.bf16 %v1599_v23, %v1598_v55  ;;  %v11466_v53 = vpack.c.bf16 %v1600_v26, %v1599_v23  ;;  %v1558_v25 = vadd.f32 %v11184_v17, %v1507_v63  ;;  %v1510_v45 = vadd.f32 %v9383_v19, %v1252_v59  ;;  %v13769_v55 = vld [vmem:[#allocation60_spill] sm:$0xff] }
 0x1e4   :  { %v1431_v36 = vpop.f32.mrf.mxu0  ;;  %v1255_v49 = vadd.f32 %v13769_v55, %v11143_v2  ;;  %v1253_v63 = vadd.f32 %v13770_v32, %v11148_v31  ;;  %v992_v12 = vadd.f32 %v11155_v38, %v710_v22  ;;  %v1604_v19 = vmax.f32 %v1560_v35, 0.0  ;;  %v13772_v38 = vld [vmem:[#allocation63_spill] sm:$0xff]  ;;  %v13774_v32 = vld [vmem:[#allocation25_spill] sm:$0xff] }
 0x1e5   :  { %v1602_v7 = vmax.f32 %v1558_v25, 0.0  ;;  %v1508_v30 = vadd.f32 %v1431_v36, %v1250_v44  ;;  %9435 = vmatmul.mubr.msk.bf16.gmra.mxu1 %vm1723_vm2, %v11466_v53  ;;  %9493 = vmatmul.mubr.msk.bf16.gmra.mxu0 %vm1723_vm2, %v11464_v48  ;;  %v1561_v26 = vadd.f32 %v11184_v17, %v1510_v45  ;;  %v13771_v45 = vld [vmem:[#allocation62_spill] sm:$0xff] }
 0x1e6   :  { %v9386_v23 = vpop.f32.mrf.mxu0  ;;  %9496 = vmatprep.mubr.msk.bf16.mxu0 %vm1723_vm2, %v11461_v52  ;;  %v1256_v54 = vadd.f32 %v13771_v45, %v11153_v33 }
 0x1e7   :  { %v11484_v27 = vpack.c.bf16 %v1602_v7, %v1601_v39  ;;  %v1559_v59 = vadd.f32 %v11184_v17, %v1508_v30  ;;  %v1605_v5 = vmax.f32 %v1561_v26, 0.0  ;;  %v1513_v44 = vadd.f32 %v9386_v23, %v1255_v49  ;;  %v13773_v23 = vld [vmem:[#allocation24_spill] sm:$0xff] }
 0x1e8   :  { %v1444_v25 = vpop.f32.mrf.mxu0  ;;  %v1254_v39 = vadd.f32 %v13772_v38, %v992_v12 }
 0x1e9   :  { %v1603_v2 = vmax.f32 %v1559_v59, 0.0  ;;  %v1511_v36 = vadd.f32 %v1444_v25, %v1253_v63  ;;  %9438 = vmatprep.mubr.msk.bf16.mxu1 %vm1723_vm2, %v11484_v27  ;;  %v11491_v3 = vpack.c.bf16 %v1605_v5, %v1604_v19  ;;  %v1564_v55 = vadd.f32 %v11184_v17, %v1513_v44  ;;  %v13776_v44 = vld [vmem:[#allocation65_spill] sm:$0xff] }
 0x1ea   :  { %v9387_v31 = vpop.f32.mrf.mxu0  ;;  %v726_v63 = vadd.f32 %v13774_v32, %v13773_v23 }
 0x1eb   :  { %v11494_v22 = vpack.c.bf16 %v1603_v2, %v1602_v7  ;;  %v11496_v30 = vpack.c.bf16 %v1604_v19, %v1603_v2  ;;  %v1562_v35 = vadd.f32 %v11184_v17, %v1511_v36  ;;  %v1514_v49 = vadd.f32 %v9387_v31, %v1256_v54  ;;  %v13775_v7 = vld [vmem:[#allocation64_spill] sm:$0xff]  ;;  %v1205_v31 = vpop.f32.mrf.mxu1 }
 0x1ec   :  { %v1447_v26 = vpop.f32.mrf.mxu0  ;;  %v1259_v12 = vadd.f32 %v13775_v7, %v11162_v6  ;;  %v1257_v2 = vadd.f32 %v13776_v44, %v11167_v18  ;;  %v996_v36 = vadd.f32 %v11170_v4, %v726_v63  ;;  %v1608_v38 = vmax.f32 %v1564_v55, 0.0 }
 0x1ed   :  { %v1606_v59 = vmax.f32 %v1562_v35, 0.0  ;;  %v1512_v33 = vadd.f32 %v1447_v26, %v1254_v39  ;;  %9439 = vmatmul.mubr.msk.bf16.gmra.mxu1 %vm1723_vm2, %v11496_v30  ;;  %9497 = vmatmul.mubr.msk.bf16.gmra.mxu0 %vm1723_vm2, %v11494_v22  ;;  %v1565_v19 = vadd.f32 %v11184_v17, %v1514_v49 }
 0x1ee   :  { %v9390_v25 = vpop.f32.mrf.mxu0  ;;  %9500 = vmatprep.mubr.msk.bf16.mxu0 %vm1723_vm2, %v11491_v3  ;;  %v1258_v18 = vadd.f32 %v1205_v31, %v996_v36 }
 0x1ef   :  { %v11514_v45 = vpack.c.bf16 %v1606_v59, %v1605_v5  ;;  %v1563_v54 = vadd.f32 %v11184_v17, %v1512_v33  ;;  %v1609_v39 = vmax.f32 %v1565_v19, 0.0  ;;  %v1517_v35 = vadd.f32 %v9390_v25, %v1259_v12 }
 0x1f0   :  { %v1460_v6 = vpop.f32.mrf.mxu0 }
 0x1f1   :  { %v1607_v26 = vmax.f32 %v1563_v54, 0.0  ;;  %v1515_v49 = vadd.f32 %v1460_v6, %v1257_v2  ;;  %9442 = vmatprep.mubr.msk.bf16.mxu1 %vm1723_vm2, %v11514_v45  ;;  %v11519_v23 = vpack.c.bf16 %v1609_v39, %v1608_v38  ;;  %v1568_v55 = vadd.f32 %v11184_v17, %v1517_v35 }
 0x1f2   :  { %v9391_v32 = vpop.f32.mrf.mxu0 }
 0x1f3   :  { %v11521_v7 = vpack.c.bf16 %v1607_v26, %v1606_v59  ;;  %v11523_v4 = vpack.c.bf16 %v1608_v38, %v1607_v26  ;;  %v1566_v5 = vadd.f32 %v11184_v17, %v1515_v49  ;;  %v1518_v63 = vadd.f32 %v9391_v32, %v11176_v10 }
 0x1f4   :  { %v1463_v33 = vpop.f32.mrf.mxu0  ;;  %v1612_v10 = vmax.f32 %v1568_v55, 0.0 }
 0x1f5   :  { %v1610_v12 = vmax.f32 %v1566_v5, 0.0  ;;  %v1516_v19 = vadd.f32 %v1463_v33, %v1258_v18  ;;  %9443 = vmatmul.mubr.msk.bf16.gmra.mxu1 %vm1723_vm2, %v11523_v4  ;;  %9501 = vmatmul.mubr.msk.bf16.gmra.mxu0 %vm1723_vm2, %v11521_v7  ;;  %v11533_v59 = vadd.f32 %v11184_v17, %v1518_v63 }
 0x1f6   :  { %9504 = vmatprep.mubr.msk.bf16.mxu0 %vm1723_vm2, %v11519_v23 }
 0x1f7   :  { %v11537_v25 = vpack.c.bf16 %v1610_v12, %v1609_v39  ;;  %v1567_v44 = vadd.f32 %v11184_v17, %v1516_v19  ;;  %v1613_v2 = vmax.f32 %v11533_v59, 0.0  ;;  %v2998_v17 = vsel %vm246_vm0, %v11345_v1, 0  ;;  %v9750_v39 = vld [vmem:[%s13641_s3 + $0xf8] sm:$0xff]  }
 0x1f8   :  { %v9764_v59 = vld [vmem:[#allocation3 + $0x98] ss:$8 sps:$4 sm:$0xff]  }
 0x1f9   :  { %v1611_v36 = vmax.f32 %v1567_v44, 0.0  ;;  %9446 = vmatprep.mubr.msk.bf16.mxu1 %vm1723_vm2, %v11537_v25  ;;  %v11545_v54 = vpack.c.bf16 %v1613_v2, %v1612_v10 }
 0x1fb   :  { %v11547_v31 = vpack.c.bf16 %v1611_v36, %v1610_v12  ;;  %v11549_v38 = vpack.c.bf16 %v1612_v10, %v1611_v36 }
 0x1fd   :  { %9447 = vmatmul.mubr.msk.bf16.gmra.mxu1 %vm1723_vm2, %v11549_v38  ;;  %9505 = vmatmul.mubr.msk.bf16.gmra.mxu0 %vm1723_vm2, %v11547_v31 }
 0x1fe   :  { %9522 = vmatprep.mubr.msk.bf16.mxu1 %vm1723_vm2, %v11209_v21  ;;  %9580 = vmatprep.mubr.msk.bf16.mxu0 %vm1723_vm2, %v11211_v62  ;;  %v9751_v21 = vld [vmem:[%s13641_s3 + $0xf0] sm:$0xff]   ;;  %v9752_v62 = vld [vmem:[%s13641_s3 + $0xe8] sm:$0xff]  }
 0x205   :  { %9523 = vmatmul.mubr.msk.bf16.vlgmr.msra.gmra.mxu1 %vm1723_vm2, %v11201_v9  ;;  %9581 = vmatmul.mubr.msk.bf16.vlgmr.msra.gmra.mxu0 %vm1723_vm2, %v11237_v34  ;;  %v9753_v34 = vld [vmem:[%s13641_s3 + $0xe0] sm:$0xff]  }
 0x206   :  { %9526 = vmatprep.mubr.msk.bf16.mxu1 %vm1723_vm2, %v11253_v24  ;;  %9584 = vmatprep.mubr.msk.bf16.mxu0 %vm1723_vm2, %v11255_v42  ;;  %v9754_v42 = vld [vmem:[%s13641_s3 + $0xd8] sm:$0xff]  }
 0x207   :  { %9625 = vmatpush3.bf16.msra.mxu1 %v2998_v17 }
 0x208   :  { %9626 = vmatprep.subr.bf16.mxu1 %v9750_v39 }
 0x20b   :  { %9627 = vmatpush3.bf16.msra.mxu1 %v9750_v39 }
 0x20c   :  { %9628 = vmatprep.subr.bf16.mxu1 %v9751_v21 }
 0x20d   :  { %9527 = vmatmul.mubr.msk.bf16.gmra.mxu1 %vm1723_vm2, %v11251_v61  ;;  %9585 = vmatmul.mubr.msk.bf16.gmra.mxu0 %vm1723_vm2, %v11279_v15  ;;  %v9755_v15 = vld [vmem:[%s13641_s3 + $0xd0] sm:$0xff]  }
 0x20e   :  { %9530 = vmatprep.mubr.msk.bf16.mxu1 %vm1723_vm2, %v11295_v58  ;;  %9588 = vmatprep.mubr.msk.bf16.mxu0 %vm1723_vm2, %v11297_v50  ;;  %v2631_v50 = vpack.c.bf16 %v13720_v29, %v1613_v2 }
 0x20f   :  { %9629 = vmatpush3.bf16.msra.mxu1 %v9751_v21 }
 0x210   :  { %9630 = vmatprep.subr.bf16.mxu1 %v9752_v62 }
 0x213   :  { %9631 = vmatpush3.bf16.msra.mxu1 %v9752_v62 }
 0x214   :  { %9632 = vmatprep.subr.bf16.mxu1 %v9753_v34 }
 0x215   :  { %9531 = vmatmul.mubr.msk.bf16.gmra.mxu1 %vm1723_vm2, %v11293_v8  ;;  %9589 = vmatmul.mubr.msk.bf16.gmra.mxu0 %vm1723_vm2, %v11321_v20  ;;  %v3461_v20 = vld [vmem:[#allocation3 + $0xc8] sm:$0x33] }
 0x216   :  { %9534 = vmatprep.mubr.msk.bf16.mxu1 %vm1723_vm2, %v11337_v37  ;;  %9592 = vmatprep.mubr.msk.bf16.mxu0 %vm1723_vm2, %v11339_v40  ;;  %v8453_v40 = vcombine.high %v3461_v20, %v3461_v20  ;;  %v8452_v1 = vcombine.low %v3461_v20, %v3461_v20 }
 0x217   :  { %9633 = vmatpush3.bf16.msra.mxu1 %v9753_v34 }
 0x218   :  { %9634 = vmatprep.subr.bf16.mxu1 %v9754_v42  ;;  %8454 = vmatprep.subr.msk.bf16.mxu0 %vm246_vm0, %v8453_v40 }
 0x21b   :  { %9635 = vmatpush3.bf16.msra.mxu1 %v9754_v42 }
 0x21c   :  { %9636 = vmatprep.subr.bf16.mxu1 %v9755_v15 }
 0x21d   :  { %9535 = vmatmul.mubr.msk.bf16.gmra.mxu1 %vm1723_vm2, %v11335_v57  ;;  %9593 = vmatmul.mubr.msk.bf16.gmra.mxu0 %vm1723_vm2, %v11362_v0  ;;  %v3561_v0 = vsel %vm246_vm0, %v8452_v1, 0 }
 0x21e   :  { %9538 = vmatprep.mubr.msk.bf16.mxu1 %vm1723_vm2, %v11374_v47  ;;  %9596 = vmatprep.mubr.msk.bf16.mxu0 %vm1723_vm2, %v11376_v14  ;;  %v9760_v14 = vld [vmem:[#allocation3 + $0xbc] ss:$8 sps:$4 sm:$0xff]  }
 0x21f   :  { %9637 = vmatpush3.bf16.msra.mxu1 %v9755_v15  ;;  %3569 = vmatpush1.bf16.msra.mxu0 %v3561_v0  ;;  %v3436_v15 = vld [vmem:[#allocation3 + $0x60] sm:$0x33] }
 0x220   :  { %3570 = vmatprep.subr.bf16.mxu0 %v9760_v14  ;;  %v8479_v20 = vcombine.high %v3436_v15, %v3436_v15  ;;  %v8478_v40 = vcombine.low %v3436_v15, %v3436_v15 }
 0x222   :  { %8480 = vmatprep.subr.msk.bf16.mxu1 %vm246_vm0, %v8479_v20 }
 0x225   :  { %9539 = vmatmul.mubr.msk.bf16.gmra.mxu1 %vm1723_vm2, %v11371_v11  ;;  %9597 = vmatmul.mubr.msk.bf16.gmra.mxu0 %vm1723_vm2, %v11394_v28 }
 0x226   :  { %9542 = vmatprep.mubr.msk.bf16.mxu1 %vm1723_vm2, %v11404_v46  ;;  %9600 = vmatprep.mubr.msk.bf16.mxu0 %vm1723_vm2, %v11406_v51 }
 0x22d   :  { %9543 = vmatmul.mubr.msk.bf16.gmra.mxu1 %vm1723_vm2, %v11401_v43  ;;  %9601 = vmatmul.mubr.msk.bf16.gmra.mxu0 %vm1723_vm2, %v11424_v60 }
 0x22e   :  { %9546 = vmatprep.mubr.msk.bf16.mxu1 %vm1723_vm2, %v11434_v16  ;;  %9604 = vmatprep.mubr.msk.bf16.mxu0 %vm1723_vm2, %v11436_v56 }
 0x235   :  { %9547 = vmatmul.mubr.msk.bf16.gmra.mxu1 %vm1723_vm2, %v11431_v41  ;;  %9605 = vmatmul.mubr.msk.bf16.gmra.mxu0 %vm1723_vm2, %v11454_v13 }
 0x236   :  { %9550 = vmatprep.mubr.msk.bf16.mxu1 %vm1723_vm2, %v11464_v48  ;;  %9608 = vmatprep.mubr.msk.bf16.mxu0 %vm1723_vm2, %v11466_v53 }
 0x23d   :  { %9551 = vmatmul.mubr.msk.bf16.gmra.mxu1 %vm1723_vm2, %v11461_v52  ;;  %9609 = vmatmul.mubr.msk.bf16.gmra.mxu0 %vm1723_vm2, %v11484_v27 }
 0x23e   :  { %9554 = vmatprep.mubr.msk.bf16.mxu1 %vm1723_vm2, %v11494_v22  ;;  %9612 = vmatprep.mubr.msk.bf16.mxu0 %vm1723_vm2, %v11496_v30  ;;  %v9761_v30 = vld [vmem:[#allocation3 + $0xa8] ss:$8 sps:$4 sm:$0xff]  }
 0x245   :  { %9555 = vmatmul.mubr.msk.bf16.gmra.mxu1 %vm1723_vm2, %v11491_v3  ;;  %9613 = vmatmul.mubr.msk.bf16.gmra.mxu0 %vm1723_vm2, %v11514_v45  ;;  %v9763_v45 = vld [vmem:[#allocation3 + $0xac] ss:$8 sps:$4 sm:$0xff]  }
 0x246   :  { %9558 = vmatprep.mubr.msk.bf16.mxu1 %vm1723_vm2, %v11521_v7  ;;  %9616 = vmatprep.mubr.msk.bf16.mxu0 %vm1723_vm2, %v11523_v4 }
 0x24d   :  { %9559 = vmatmul.mubr.msk.bf16.gmra.mxu1 %vm1723_vm2, %v11519_v23  ;;  %9617 = vmatmul.mubr.msk.bf16.gmra.mxu0 %vm1723_vm2, %v11537_v25  ;;  %v9766_v25 = vld [vmem:[#allocation3 + $0x9c] ss:$8 sps:$4 sm:$0xff]  }
 0x24e   :  { %9562 = vmatprep.mubr.msk.bf16.mxu1 %vm1723_vm2, %v11547_v31  ;;  %9620 = vmatprep.mubr.msk.bf16.mxu0 %vm1723_vm2, %v11549_v38 }
 0x255   :  { %9563 = vmatmul.mubr.msk.bf16.gmra.mxu1 %vm1723_vm2, %v11545_v54  ;;  %9621 = vmatmul.mubr.msk.bf16.gmra.mxu0 %vm1723_vm2, %v2631_v50 }
 0x256   :  { %9638 = vmatprep.mubr.msk.bf16.mxu1 %vm1723_vm2, %v11201_v9  ;;  %v9758_v9 = vld [vmem:[#allocation3 + $0xb8] ss:$8 sps:$4 sm:$0xff]  }
 0x257   :  { %3571 = vmatpush1.bf16.msra.mxu0 %v9758_v9  ;;  %v9769_v9 = vld [vmem:[#allocation3 + $0x8c] ss:$8 sps:$4 sm:$0xff]  }
 0x258   :  { %3572 = vmatprep.subr.bf16.mxu0 %v9763_v45 }
 0x25b   :  { %3573 = vmatpush1.bf16.msra.mxu0 %v9761_v30 }
 0x25c   :  { %3574 = vmatprep.subr.bf16.mxu0 %v9766_v25 }
 0x25d   :  { %9639 = vmatmul.mubr.msk.bf16.vlgmr.msra.gmra.mxu1 %vm1723_vm2, %v11253_v24 }
 0x25e   :  { %9642 = vmatprep.mubr.msk.bf16.mxu1 %vm1723_vm2, %v11251_v61 }
 0x25f   :  { %3575 = vmatpush1.bf16.msra.mxu0 %v9764_v59  ;;  %v9781_v59 = vld [vmem:[#allocation3 + $0x30] ss:$8 sps:$4 sm:$0xff]  }
 0x260   :  { %3576 = vmatprep.subr.bf16.mxu0 %v9769_v9 }
 0x265   :  { %9643 = vmatmul.mubr.msk.bf16.gmra.mxu1 %vm1723_vm2, %v11295_v58 }
 0x266   :  { %9646 = vmatprep.mubr.msk.bf16.mxu1 %vm1723_vm2, %v11293_v8 }
 0x26d   :  { %v9408_v28 = vpop.f32.mrf.mxu1  ;;  %v9466_v24 = vpop.f32.mrf.mxu0  ;;  %9647 = vmatmul.mubr.msk.bf16.gmra.mxu1 %vm1723_vm2, %v11337_v37 }
 0x26e   :  { %v11679_v51 = vadd.f32 %v9466_v24, %v9408_v28  ;;  %9650 = vmatprep.mubr.msk.bf16.mxu1 %vm1723_vm2, %v11335_v57 }
 0x26f   :  { %v1827_v61 = vpop.f32.mrf.mxu1  ;;  %v2143_v60 = vpop.f32.mrf.mxu0 }
 0x270   :  { %v11683_v58 = vadd.f32 %v2143_v60, %v1827_v61  ;;  %v9774_v61 = vld [vmem:[#allocation3 + $0x54] ss:$8 sps:$4 sm:$0xff]  }
 0x271   :  { %v9409_v56 = vpop.f32.mrf.mxu1  ;;  %v9467_v8 = vpop.f32.mrf.mxu0 }
 0x272   :  { %v11685_v13 = vadd.f32 %v9467_v8, %v9409_v56  ;;  %v9772_v8 = vld [vmem:[#allocation3 + $0x50] ss:$8 sps:$4 sm:$0xff]  }
 0x273   :  { %v11687_v53 = vpop.f32.mrf.mxu1  ;;  %v11689_v27 = vpop.f32.mrf.mxu0 }
 0x275   :  { %v9412_v37 = vpop.f32.mrf.mxu1  ;;  %v9470_v35 = vpop.f32.mrf.mxu0  ;;  %9651 = vmatmul.mubr.msk.bf16.gmra.mxu1 %vm1723_vm2, %v11374_v47 }
 0x276   :  { %v11693_v57 = vadd.f32 %v9470_v35, %v9412_v37  ;;  %9654 = vmatprep.mubr.msk.bf16.mxu1 %vm1723_vm2, %v11371_v11 }
 0x277   :  { %v1843_v6 = vpop.f32.mrf.mxu1  ;;  %v2159_v26 = vpop.f32.mrf.mxu0 }
 0x278   :  { %v11697_v49 = vadd.f32 %v2159_v26, %v1843_v6 }
 0x279   :  { %v9413_v32 = vpop.f32.mrf.mxu1  ;;  %v9471_v18 = vpop.f32.mrf.mxu0 }
 0x27a   :  { %v11699_v4 = vadd.f32 %v9471_v18, %v9413_v32 }
 0x27b   :  { %v11701_v5 = vpop.f32.mrf.mxu1  ;;  %v11703_v55 = vpop.f32.mrf.mxu0 }
 0x27d   :  { %v9416_v47 = vpop.f32.mrf.mxu1  ;;  %v9474_v63 = vpop.f32.mrf.mxu0  ;;  %9655 = vmatmul.mubr.msk.bf16.gmra.mxu1 %vm1723_vm2, %v11404_v46 }
 0x27e   :  { %v11707_v11 = vadd.f32 %v9474_v63, %v9416_v47  ;;  %9658 = vmatprep.mubr.msk.bf16.mxu1 %vm1723_vm2, %v11401_v43  ;;  %v9783_v63 = vld [vmem:[#allocation3 + $0x34] ss:$8 sps:$4 sm:$0xff]  }
 0x27f   :  { %v1859_v33 = vpop.f32.mrf.mxu1  ;;  %v2175_v12 = vpop.f32.mrf.mxu0 }
 0x280   :  { %v11711_v19 = vadd.f32 %v2175_v12, %v1859_v33 }
 0x281   :  { %v9417_v44 = vpop.f32.mrf.mxu1  ;;  %v9475_v10 = vpop.f32.mrf.mxu0 }
 0x282   :  { %v11713_v2 = vadd.f32 %v9475_v10, %v9417_v44  ;;  %v9778_v44 = vld [vmem:[#allocation3 + $0x78] ss:$8 sps:$4 sm:$0xff]   ;;  %v9780_v10 = vld [vmem:[#allocation3 + $0x7c] ss:$8 sps:$4 sm:$0xff]  }
 0x283   :  { %v11715_v36 = vpop.f32.mrf.mxu1  ;;  %v11717_v38 = vpop.f32.mrf.mxu0 }
 0x285   :  { %v9420_v46 = vpop.f32.mrf.mxu1  ;;  %v9478_v17 = vpop.f32.mrf.mxu0  ;;  %9659 = vmatmul.mubr.msk.bf16.gmra.mxu1 %vm1723_vm2, %v11434_v16  ;;  %v9767_v16 = vld [vmem:[#allocation3 + $0x88] ss:$8 sps:$4 sm:$0xff]  }
 0x286   :  { %v11721_v43 = vadd.f32 %v9478_v17, %v9420_v46  ;;  %9662 = vmatprep.mubr.msk.bf16.mxu1 %vm1723_vm2, %v11431_v41  ;;  %v3805_v41 = vsel %vm246_vm0, %v8478_v40, 0  ;;  %3577 = vmatpush1.bf16.msra.mxu0 %v9767_v16  ;;  %v9789_v40 = vld [vmem:[#allocation3 + $0x14] ss:$8 sps:$4 sm:$0xff]  }
 0x287   :  { %v1875_v39 = vpop.f32.mrf.mxu1  ;;  %v2191_v21 = vpop.f32.mrf.mxu0  ;;  %3813 = vmatpush1.bf16.msra.mxu1 %v3805_v41  ;;  %3578 = vmatprep.subr.bf16.mxu0 %v9780_v10  ;;  %v9787_v41 = vld [vmem:[#allocation3 + $0x10] ss:$8 sps:$4 sm:$0xff]  }
 0x288   :  { %v11725_v62 = vadd.f32 %v2191_v21, %v1875_v39  ;;  %3814 = vmatprep.subr.bf16.mxu1 %v9774_v61 }
 0x289   :  { %v9421_v34 = vpop.f32.mrf.mxu1  ;;  %v9479_v42 = vpop.f32.mrf.mxu0 }
 0x28a   :  { %v11727_v50 = vadd.f32 %v9479_v42, %v9421_v34  ;;  %3579 = vmatpush1.bf16.msra.mxu0 %v9778_v44  ;;  %v9792_v44 = vld [vmem:[#allocation3 + $0x6c] ss:$8 sps:$4 sm:$0xff]  }
 0x28b   :  { %v11729_v1 = vpop.f32.mrf.mxu1  ;;  %v11731_v0 = vpop.f32.mrf.mxu0  ;;  %3815 = vmatpush1.bf16.msra.mxu1 %v9772_v8  ;;  %3580 = vmatprep.subr.bf16.mxu0 %v9792_v44 }
 0x28c   :  { %13777 = vst [vmem:[#allocation27_spill] sm:$0xff] %v11729_v1  ;;  %13778 = vst [vmem:[#allocation26_spill] sm:$0xff] %v11731_v0 }
 0x28d   :  { %v9424_v14 = vpop.f32.mrf.mxu1  ;;  %v9482_v28 = vpop.f32.mrf.mxu0  ;;  %9663 = vmatmul.mubr.msk.bf16.gmra.mxu1 %vm1723_vm2, %v11464_v48  ;;  %v9777_v48 = vld [vmem:[#allocation3 + $0x44] ss:$8 sps:$4 sm:$0xff]  }
 0x28e   :  { %v11737_v24 = vadd.f32 %v9482_v28, %v9424_v14  ;;  %9666 = vmatprep.mubr.msk.bf16.mxu1 %vm1723_vm2, %v11461_v52  ;;  %v9775_v52 = vld [vmem:[#allocation3 + $0x40] ss:$8 sps:$4 sm:$0xff]   ;;  %3816 = vmatprep.subr.bf16.mxu1 %v9777_v48 }
 0x28f   :  { %v1891_v60 = vpop.f32.mrf.mxu1  ;;  %v2207_v56 = vpop.f32.mrf.mxu0  ;;  %3817 = vmatpush1.bf16.msra.mxu1 %v9775_v52 }
 0x290   :  { %v11741_v30 = vadd.f32 %v2207_v56, %v1891_v60  ;;  %3818 = vmatprep.subr.bf16.mxu1 %v9783_v63  ;;  %v9795_v56 = vld [vmem:[#allocation3 + $0x4] ss:$8 sps:$4 sm:$0xff]  }
 0x291   :  { %v9425_v45 = vpop.f32.mrf.mxu1  ;;  %v9483_v37 = vpop.f32.mrf.mxu0 }
 0x292   :  { %v11743_v35 = vadd.f32 %v9483_v37, %v9425_v45  ;;  %v9793_v45 = vld [vmem:[#allocation3] ss:$8 sps:$4 sm:$0xff]  }
 0x293   :  { %v11745_v6 = vpop.f32.mrf.mxu1  ;;  %v11747_v26 = vpop.f32.mrf.mxu0  ;;  %3819 = vmatpush1.bf16.msra.mxu1 %v9781_v59 }
 0x294   :  { %13779 = vst [vmem:[#allocation28_spill] sm:$0xff] %v11745_v6  ;;  %13780 = vst [vmem:[#allocation10_spill] sm:$0xff] %v11747_v26 }
 0x295   :  { %v9428_v32 = vpop.f32.mrf.mxu1  ;;  %v9486_v18 = vpop.f32.mrf.mxu0  ;;  %9667 = vmatmul.mubr.msk.bf16.gmra.mxu1 %vm1723_vm2, %v11494_v22  ;;  %v9786_v22 = vld [vmem:[#allocation3 + $0x24] ss:$8 sps:$4 sm:$0xff]  }
 0x296   :  { %v11751_v47 = vadd.f32 %v9486_v18, %v9428_v32  ;;  %9670 = vmatprep.mubr.msk.bf16.mxu1 %vm1723_vm2, %v11491_v3  ;;  %v9784_v3 = vld [vmem:[#allocation3 + $0x20] ss:$8 sps:$4 sm:$0xff]   ;;  %3820 = vmatprep.subr.bf16.mxu1 %v9786_v22  ;;  %v13656_v18 = vmov 0   ;;  %v13787_v22 = vmov 0.0|0.0  }
 0x297   :  { %v1907_v33 = vpop.f32.mrf.mxu1  ;;  %v2223_v12 = vpop.f32.mrf.mxu0  ;;  %3821 = vmatpush1.bf16.msra.mxu1 %v9784_v3  ;;  %3598 = vmatprep.mubr.bf16.mxu0 %v13656_v18 }
 0x298   :  { %v11755_v25 = vadd.f32 %v2223_v12, %v1907_v33  ;;  %3822 = vmatprep.subr.bf16.mxu1 %v9789_v40 }
 0x299   :  { %v9429_v46 = vpop.f32.mrf.mxu1  ;;  %v9487_v17 = vpop.f32.mrf.mxu0 }
 0x29a   :  { %v11757_v39 = vadd.f32 %v9487_v17, %v9429_v46  ;;  %v9790_v46 = vld [vmem:[#allocation3 + $0x68] ss:$8 sps:$4 sm:$0xff]  }
 0x29b   :  { %v11759_v21 = vpop.f32.mrf.mxu1  ;;  %v11761_v34 = vpop.f32.mrf.mxu0  ;;  %3823 = vmatpush1.bf16.msra.mxu1 %v9787_v41  ;;  %3581 = vmatpush1.bf16.msra.mxu0 %v9790_v46 }
 0x29c   :  { %13781 = vst [vmem:[#allocation11_spill] sm:$0xff] %v11759_v21  ;;  %13782 = vst [vmem:[#allocation29_spill] sm:$0xff] %v11761_v34  ;;  %3824 = vmatprep.subr.bf16.mxu1 %v9795_v56 }
 0x29d   :  { %v9432_v42 = vpop.f32.mrf.mxu1  ;;  %v9490_v15 = vpop.f32.mrf.mxu0  ;;  %9671 = vmatmul.mubr.msk.bf16.gmra.mxu1 %vm1723_vm2, %v11521_v7 }
 0x29e   :  { %v11765_v20 = vadd.f32 %v9490_v15, %v9432_v42  ;;  %9674 = vmatprep.mubr.msk.bf16.mxu1 %vm1723_vm2, %v11519_v23 }
 0x29f   :  { %v1923_v16 = vpop.f32.mrf.mxu1  ;;  %v2239_v9 = vpop.f32.mrf.mxu0  ;;  %3825 = vmatpush1.bf16.msra.mxu1 %v9793_v45 }
 0x2a0   :  { %v11769_v14 = vadd.f32 %v2239_v9, %v1923_v16 }
 0x2a1   :  { %v9433_v28 = vpop.f32.mrf.mxu1  ;;  %v9491_v61 = vpop.f32.mrf.mxu0 }
 0x2a2   :  { %v11771_v60 = vadd.f32 %v9491_v61, %v9433_v28 }
 0x2a3   :  { %v11773_v8 = vpop.f32.mrf.mxu1  ;;  %v11775_v7 = vpop.f32.mrf.mxu0 }
 0x2a4   :  { %13783 = vst [vmem:[#allocation30_spill] sm:$0xff] %v11773_v8  ;;  %13784 = vst [vmem:[#allocation31_spill] sm:$0xff] %v11775_v7 }
 0x2a5   :  { %v9436_v23 = vpop.f32.mrf.mxu1  ;;  %v9494_v37 = vpop.f32.mrf.mxu0  ;;  %9675 = vmatmul.mubr.msk.bf16.gmra.mxu1 %vm1723_vm2, %v11547_v31 }
 0x2a6   :  { %v11779_v48 = vadd.f32 %v9494_v37, %v9436_v23  ;;  %9678 = vmatprep.mubr.msk.bf16.mxu1 %vm1723_vm2, %v11545_v54  ;;  %v11808_v37 = vld [vmem:[#allocation3 + $0x130] sm:$0x33] }
 0x2a7   :  { %v1939_v52 = vpop.f32.mrf.mxu1  ;;  %v2255_v32 = vpop.f32.mrf.mxu0 }
 0x2a8   :  { %v11784_v63 = vadd.f32 %v2255_v32, %v1939_v52 }
 0x2a9   :  { %v9437_v33 = vpop.f32.mrf.mxu1  ;;  %v9495_v12 = vpop.f32.mrf.mxu0 }
 0x2aa   :  { %v11786_v59 = vadd.f32 %v9495_v12, %v9437_v33  ;;  %v8504_v33 = vcombine.high %v11808_v37, %v11808_v37 }
 0x2ab   :  { %v11788_v10 = vpop.f32.mrf.mxu1  ;;  %v11790_v31 = vpop.f32.mrf.mxu0 }
 0x2ac   :  { %13785 = vst [vmem:[#allocation32_spill] sm:$0xff] %v11788_v10  ;;  %13786 = vst [vmem:[#allocation12_spill] sm:$0xff] %v11790_v31  ;;  %8505 = vmatprep.subr.msk.bf16.mxu0 %vm246_vm0, %v8504_v33 }
 0x2ad   :  { %v9440_v54 = vpop.f32.mrf.mxu1  ;;  %v9498_v17 = vpop.f32.mrf.mxu0  ;;  %9679 = vmatmul.mubr.bf16.gmra.mxu1 %v13787_v22 }
 0x2ae   :  { %v11793_v3 = vadd.f32 %v9498_v17, %v9440_v54  ;;  %3842 = vmatprep.mubr.bf16.mxu1 %v13656_v18 }
 0x2af   :  { %v1955_v42 = vpop.f32.mrf.mxu1  ;;  %v2271_v15 = vpop.f32.mrf.mxu0 }
 0x2b0   :  { %v11796_v40 = vadd.f32 %v2271_v15, %v1955_v42 }
 0x2b1   :  { %v9441_v16 = vpop.f32.mrf.mxu1  ;;  %v9499_v9 = vpop.f32.mrf.mxu0 }
 0x2b2   :  { %v11798_v41 = vadd.f32 %v9499_v9, %v9441_v16 }
 0x2b3   :  { %v11800_v28 = vpop.f32.mrf.mxu1  ;;  %v11802_v61 = vpop.f32.mrf.mxu0 }
 0x2b4   :  { %13788 = vst [vmem:[#allocation13_spill] sm:$0xff] %v11800_v28  ;;  %13789 = vst [vmem:[#allocation34_spill] sm:$0xff] %v11802_v61 }
 0x2b5   :  { %v9444_v56 = vpop.f32.mrf.mxu1  ;;  %v9502_v45 = vpop.f32.mrf.mxu0  ;;  %3843 = vmatmul.mubr.bf16.vlgmr.msra.gmra.mxu1 %v13787_v22 }
 0x2b6   :  { %v11805_v23 = vadd.f32 %v9502_v45, %v9444_v56  ;;  %3852 = vmatprep.mubr.bf16.mxu1 %v13656_v18 }
 0x2b7   :  { %v1971_v52 = vpop.f32.mrf.mxu1  ;;  %v2287_v32 = vpop.f32.mrf.mxu0 }
 0x2b8   :  { %v11812_v12 = vadd.f32 %v2287_v32, %v1971_v52 }
 0x2b9   :  { %v9445_v44 = vpop.f32.mrf.mxu1  ;;  %v9503_v46 = vpop.f32.mrf.mxu0 }
 0x2ba   :  { %v11815_v54 = vadd.f32 %v9503_v46, %v9445_v44 }
 0x2bb   :  { %v11817_v17 = vpop.f32.mrf.mxu1  ;;  %v11819_v42 = vpop.f32.mrf.mxu0 }
 0x2bc   :  { %13790 = vst [vmem:[#allocation33_spill] sm:$0xff] %v11817_v17  ;;  %13791 = vst [vmem:[#allocation36_spill] sm:$0xff] %v11819_v42 }
 0x2bd   :  { %v9448_v15 = vpop.f32.mrf.mxu1  ;;  %v9506_v16 = vpop.f32.mrf.mxu0 }
 0x2be   :  { %v11821_v9 = vadd.f32 %v9506_v16, %v9448_v15 }
 0x2bf   :  { %v1987_v56 = vpop.f32.mrf.mxu1  ;;  %v2303_v45 = vpop.f32.mrf.mxu0 }
 0x2c0   :  { %v11823_v18 = vadd.f32 %v2303_v45, %v1987_v56 }
 0x2c1   :  { %v9449_v52 = vpop.f32.mrf.mxu1  ;;  %v9507_v32 = vpop.f32.mrf.mxu0 }
 0x2c2   :  { %v11825_v22 = vadd.f32 %v9507_v32, %v9449_v52 }
 0x2c3   :  { %v11827_v61 = vpop.f32.mrf.mxu1  ;;  %v11829_v33 = vpop.f32.mrf.mxu0 }
 0x2c4   :  { %13792 = vst [vmem:[#allocation35_spill] sm:$0xff] %v11827_v61  ;;  %13793 = vst [vmem:[#allocation38_spill] sm:$0xff] %v11829_v33 }
 0x2c5   :  { %v9524_v44 = vpop.f32.mrf.mxu1  ;;  %v11831_v46 = vpop.f32.mrf.mxu0 }
 0x2c6   :  { %v11834_v42 = vadd.f32 %v9524_v44, %v11679_v51 }
 0x2c7   :  { %v2412_v15 = vpop.f32.mrf.mxu1  ;;  %v11836_v16 = vpop.f32.mrf.mxu0 }
 0x2c8   :  { %v11839_v56 = vadd.f32 %v2412_v15, %v11683_v58 }
 0x2c9   :  { %v9525_v45 = vpop.f32.mrf.mxu1  ;;  %v11841_v17 = vpop.f32.mrf.mxu0 }
 0x2ca   :  { %v11844_v52 = vadd.f32 %v9525_v45, %v11685_v13 }
 0x2cb   :  { %v11846_v32 = vpop.f32.mrf.mxu1  ;;  %v11848_v33 = vpop.f32.mrf.mxu0 }
 0x2cd   :  { %v9528_v61 = vpop.f32.mrf.mxu1  ;;  %v11850_v28 = vpop.f32.mrf.mxu0 }
 0x2ce   :  { %v11853_v51 = vadd.f32 %v9528_v61, %v11693_v57 }
 0x2cf   :  { %v2428_v44 = vpop.f32.mrf.mxu1  ;;  %v11855_v31 = vpop.f32.mrf.mxu0 }
 0x2d0   :  { %v11858_v58 = vadd.f32 %v2428_v44, %v11697_v49 }
 0x2d1   :  { %v9529_v15 = vpop.f32.mrf.mxu1  ;;  %v11860_v10 = vpop.f32.mrf.mxu0 }
 0x2d2   :  { %v11863_v13 = vadd.f32 %v9529_v15, %v11699_v4 }
 0x2d3   :  { %v11865_v45 = vpop.f32.mrf.mxu1  ;;  %v11867_v7 = vpop.f32.mrf.mxu0 }
 0x2d5   :  { %v9532_v8 = vpop.f32.mrf.mxu1  ;;  %v11869_v34 = vpop.f32.mrf.mxu0 }
 0x2d6   :  { %v11872_v57 = vadd.f32 %v9532_v8, %v11707_v11 }
 0x2d7   :  { %v2444_v61 = vpop.f32.mrf.mxu1  ;;  %v11874_v21 = vpop.f32.mrf.mxu0 }
 0x2d8   :  { %v11877_v49 = vadd.f32 %v2444_v61, %v11711_v19 }
 0x2d9   :  { %v9533_v44 = vpop.f32.mrf.mxu1  ;;  %v11879_v26 = vpop.f32.mrf.mxu0 }
 0x2da   :  { %13794 = vst [vmem:[#allocation37_spill] sm:$0xff] %v11879_v26  ;;  %v11882_v4 = vadd.f32 %v9533_v44, %v11713_v2  ;;  %v4243_v2 = vld [vmem:[#allocation3 + $0x198] sm:$0x33] }
 0x2db   :  { %v11884_v15 = vpop.f32.mrf.mxu1  ;;  %v11886_v6 = vpop.f32.mrf.mxu0 }
 0x2dc   :  { %13795 = vst [vmem:[#allocation39_spill] sm:$0xff] %v11882_v4  ;;  %13796 = vst [vmem:[#allocation14_spill] sm:$0xff] %v11884_v15  ;;  %v8529_v4 = vcombine.low %v4243_v2, %v4243_v2 }
 0x2dd   :  { %13797 = vst [vmem:[#allocation15_spill] sm:$0xff] %v11886_v6  ;;  %v9536_v0 = vpop.f32.mrf.mxu1  ;;  %v11888_v1 = vpop.f32.mrf.mxu0  ;;  %v8530_v6 = vcombine.high %v4243_v2, %v4243_v2  ;;  %v9812_v2 = vld [vmem:[#allocation3 + $0x188] ss:$8 sps:$4 sm:$0xff]  }
 0x2de   :  { %13798 = vst [vmem:[#allocation40_spill] sm:$0xff] %v11888_v1  ;;  %v11891_v11 = vadd.f32 %v9536_v0, %v11721_v43  ;;  %v4313_v43 = vsel %vm246_vm0, %v8529_v4, 0 }
 0x2df   :  { %v2460_v8 = vpop.f32.mrf.mxu1  ;;  %v11893_v29 = vpop.f32.mrf.mxu0  ;;  %8531 = vmatprep.subr.msk.bf16.mxu1 %vm246_vm0, %v8530_v6 }
 0x2e0   :  { %v11896_v19 = vadd.f32 %v2460_v8, %v11725_v62  ;;  %4321 = vmatpush1.bf16.msra.mxu1 %v4313_v43  ;;  %v9817_v43 = vld [vmem:[#allocation3 + $0x17c] ss:$8 sps:$4 sm:$0xff]  }
 0x2e1   :  { %v9537_v61 = vpop.f32.mrf.mxu1  ;;  %v11898_v26 = vpop.f32.mrf.mxu0 }
 0x2e2   :  { %13799 = vst [vmem:[#allocation41_spill] sm:$0xff] %v11898_v26  ;;  %v11901_v44 = vadd.f32 %v9537_v61, %v11727_v50  ;;  %v9814_v26 = vld [vmem:[#allocation3 + $0x18c] ss:$8 sps:$4 sm:$0xff]  }
 0x2e3   :  { %v11903_v15 = vpop.f32.mrf.mxu1  ;;  %v11905_v1 = vpop.f32.mrf.mxu0  ;;  %4322 = vmatprep.subr.bf16.mxu1 %v9814_v26  ;;  %v9823_v26 = vld [vmem:[#allocation3 + $0x16c] ss:$8 sps:$4 sm:$0xff]  }
 0x2e4   :  { %13800 = vst [vmem:[#allocation43_spill] sm:$0xff] %v11901_v44  ;;  %13801 = vst [vmem:[#allocation42_spill] sm:$0xff] %v11905_v1  ;;  %4323 = vmatpush1.bf16.msra.mxu1 %v9812_v2 }
 0x2e5   :  { %v9540_v0 = vpop.f32.mrf.mxu1  ;;  %v11909_v62 = vpop.f32.mrf.mxu0  ;;  %4324 = vmatprep.subr.bf16.mxu1 %v9817_v43 }
 0x2e6   :  { %13802 = vst [vmem:[#allocation44_spill] sm:$0xff] %v11909_v62  ;;  %v11912_v8 = vadd.f32 %v9540_v0, %v11737_v24  ;;  %v9815_v0 = vld [vmem:[#allocation3 + $0x178] ss:$8 sps:$4 sm:$0xff]  }
 0x2e7   :  { %v2476_v50 = vpop.f32.mrf.mxu1  ;;  %v11914_v61 = vpop.f32.mrf.mxu0 }
 0x2e8   :  { %13803 = vst [vmem:[#allocation16_spill] sm:$0xff] %v11912_v8  ;;  %13804 = vst [vmem:[#allocation17_spill] sm:$0xff] %v11914_v61  ;;  %v11917_v44 = vadd.f32 %v2476_v50, %v11741_v30  ;;  %4325 = vmatpush1.bf16.msra.mxu1 %v9815_v0  ;;  %v9826_v0 = vld [vmem:[#allocation3 + $0x15c] ss:$8 sps:$4 sm:$0xff]  }
 0x2e9   :  { %v9541_v1 = vpop.f32.mrf.mxu1  ;;  %v11919_v6 = vpop.f32.mrf.mxu0  ;;  %4326 = vmatprep.subr.bf16.mxu1 %v9823_v26  ;;  %v9829_v26 = vld [vmem:[#allocation3 + $0x14c] ss:$8 sps:$4 sm:$0xff]  }
 0x2ea   :  { %13805 = vst [vmem:[#allocation45_spill] sm:$0xff] %v11919_v6  ;;  %v11922_v4 = vadd.f32 %v9541_v1, %v11743_v35  ;;  %v9821_v1 = vld [vmem:[#allocation3 + $0x168] ss:$8 sps:$4 sm:$0xff]  }
 0x2eb   :  { %v11924_v62 = vpop.f32.mrf.mxu1  ;;  %v11926_v24 = vpop.f32.mrf.mxu0 }
 0x2ec   :  { %13806 = vst [vmem:[#allocation46_spill] sm:$0xff] %v11926_v24  ;;  %4327 = vmatpush1.bf16.msra.mxu1 %v9821_v1 }
 0x2ed   :  { %v9544_v61 = vpop.f32.mrf.mxu1  ;;  %v11928_v8 = vpop.f32.mrf.mxu0  ;;  %4328 = vmatprep.subr.bf16.mxu1 %v9826_v0 }
 0x2ee   :  { %13807 = vst [vmem:[#allocation48_spill] sm:$0xff] %v11928_v8  ;;  %v11931_v30 = vadd.f32 %v9544_v61, %v11751_v47  ;;  %v9824_v61 = vld [vmem:[#allocation3 + $0x158] ss:$8 sps:$4 sm:$0xff]  }
 0x2ef   :  { %v2492_v50 = vpop.f32.mrf.mxu1  ;;  %v11933_v2 = vpop.f32.mrf.mxu0 }
 0x2f0   :  { %13808 = vst [vmem:[#allocation47_spill] sm:$0xff] %v11931_v30  ;;  %13809 = vst [vmem:[#allocation49_spill] sm:$0xff] %v11933_v2  ;;  %v11936_v35 = vadd.f32 %v2492_v50, %v11755_v25  ;;  %4329 = vmatpush1.bf16.msra.mxu1 %v9824_v61  ;;  %v9835_v61 = vld [vmem:[#allocation3 + $0x13c] ss:$8 sps:$4 sm:$0xff]  }
 0x2f1   :  { %v9545_v6 = vpop.f32.mrf.mxu1  ;;  %v11938_v24 = vpop.f32.mrf.mxu0  ;;  %4330 = vmatprep.subr.bf16.mxu1 %v9829_v26 }
 0x2f2   :  { %13810 = vst [vmem:[#allocation18_spill] sm:$0xff] %v11938_v24  ;;  %v11941_v43 = vadd.f32 %v9545_v6, %v11757_v39  ;;  %v9827_v39 = vld [vmem:[#allocation3 + $0x148] ss:$8 sps:$4 sm:$0xff]  }
 0x2f3   :  { %v11943_v8 = vpop.f32.mrf.mxu1  ;;  %v11945_v47 = vpop.f32.mrf.mxu0 }
 0x2f4   :  { %13811 = vst [vmem:[#allocation19_spill] sm:$0xff] %v11945_v47  ;;  %4331 = vmatpush1.bf16.msra.mxu1 %v9827_v39 }
 0x2f5   :  { %v9548_v2 = vpop.f32.mrf.mxu1  ;;  %v11947_v30 = vpop.f32.mrf.mxu0  ;;  %4332 = vmatprep.subr.bf16.mxu1 %v9835_v61 }
 0x2f6   :  { %13812 = vst [vmem:[#allocation50_spill] sm:$0xff] %v11947_v30  ;;  %v11950_v25 = vadd.f32 %v9548_v2, %v11765_v20  ;;  %v9833_v2 = vld [vmem:[#allocation3 + $0x138] ss:$8 sps:$4 sm:$0xff]  }
 0x2f7   :  { %v2508_v50 = vpop.f32.mrf.mxu1  ;;  %v11952_v1 = vpop.f32.mrf.mxu0 }
 0x2f8   :  { %13813 = vst [vmem:[#allocation51_spill] sm:$0xff] %v11950_v25  ;;  %13814 = vst [vmem:[#allocation53_spill] sm:$0xff] %v11952_v1  ;;  %v11955_v6 = vadd.f32 %v2508_v50, %v11769_v14  ;;  %4333 = vmatpush1.bf16.msra.mxu1 %v9833_v2 }
 0x2f9   :  { %v9549_v24 = vpop.f32.mrf.mxu1  ;;  %v11957_v47 = vpop.f32.mrf.mxu0 }
 0x2fa   :  { %13815 = vst [vmem:[#allocation52_spill] sm:$0xff] %v11957_v47  ;;  %v11960_v0 = vadd.f32 %v9549_v24, %v11771_v60 }
 0x2fb   :  { %v11962_v30 = vpop.f32.mrf.mxu1  ;;  %v11964_v20 = vpop.f32.mrf.mxu0 }
 0x2fc   :  { %13816 = vst [vmem:[#allocation54_spill] sm:$0xff] %v11964_v20 }
 0x2fd   :  { %v9552_v1 = vpop.f32.mrf.mxu1  ;;  %v11966_v25 = vpop.f32.mrf.mxu0 }
 0x2fe   :  { %13817 = vst [vmem:[#allocation20_spill] sm:$0xff] %v11966_v25  ;;  %v11969_v14 = vadd.f32 %v9552_v1, %v11779_v48 }
 0x2ff   :  { %v2524_v26 = vpop.f32.mrf.mxu1  ;;  %v11971_v50 = vpop.f32.mrf.mxu0 }
 0x300   :  { %13818 = vst [vmem:[#allocation21_spill] sm:$0xff] %v11971_v50  ;;  %v11974_v60 = vadd.f32 %v2524_v26, %v11784_v63 }
 0x301   :  { %v9553_v24 = vpop.f32.mrf.mxu1  ;;  %v11976_v39 = vpop.f32.mrf.mxu0 }
 0x302   :  { %13819 = vst [vmem:[#allocation55_spill] sm:$0xff] %v11976_v39  ;;  %v11979_v20 = vadd.f32 %v9553_v24, %v11786_v59 }
 0x303   :  { %v11981_v61 = vpop.f32.mrf.mxu1  ;;  %v11983_v47 = vpop.f32.mrf.mxu0 }
 0x304   :  { %13820 = vst [vmem:[#allocation56_spill] sm:$0xff] %v11979_v20  ;;  %13821 = vst [vmem:[#allocation58_spill] sm:$0xff] %v11983_v47 }
 0x305   :  { %v9556_v2 = vpop.f32.mrf.mxu1  ;;  %v11985_v25 = vpop.f32.mrf.mxu0 }
 0x306   :  { %13822 = vst [vmem:[#allocation57_spill] sm:$0xff] %v11985_v25  ;;  %v11988_v48 = vadd.f32 %v9556_v2, %v11793_v3 }
 0x307   :  { %v2540_v1 = vpop.f32.mrf.mxu1  ;;  %v11990_v50 = vpop.f32.mrf.mxu0 }
 0x308   :  { %13823 = vst [vmem:[#allocation59_spill] sm:$0xff] %v11990_v50  ;;  %v11993_v63 = vadd.f32 %v2540_v1, %v11796_v40 }
 0x309   :  { %v9557_v26 = vpop.f32.mrf.mxu1  ;;  %v11995_v39 = vpop.f32.mrf.mxu0 }
 0x30a   :  { %13824 = vst [vmem:[#allocation22_spill] sm:$0xff] %v11995_v39  ;;  %v11998_v59 = vadd.f32 %v9557_v26, %v11798_v41 }
 0x30b   :  { %v12000_v24 = vpop.f32.mrf.mxu1  ;;  %v12002_v47 = vpop.f32.mrf.mxu0 }
 0x30c   :  { %13825 = vst [vmem:[#allocation23_spill] sm:$0xff] %v11998_v59  ;;  %13826 = vst [vmem:[#allocation60_spill] sm:$0xff] %v12002_v47 }
 0x30d   :  { %v9560_v25 = vpop.f32.mrf.mxu1  ;;  %v12004_v20 = vpop.f32.mrf.mxu0 }
 0x30e   :  { %13827 = vst [vmem:[#allocation61_spill] sm:$0xff] %v12004_v20  ;;  %v12007_v3 = vadd.f32 %v9560_v25, %v11805_v23 }
 0x30f   :  { %v2556_v2 = vpop.f32.mrf.mxu1  ;;  %v12009_v50 = vpop.f32.mrf.mxu0 }
 0x310   :  { %13828 = vst [vmem:[#allocation62_spill] sm:$0xff] %v12007_v3  ;;  %13829 = vst [vmem:[#allocation63_spill] sm:$0xff] %v12009_v50  ;;  %v12012_v40 = vadd.f32 %v2556_v2, %v11812_v12 }
 0x311   :  { %v9561_v1 = vpop.f32.mrf.mxu1  ;;  %v12014_v39 = vpop.f32.mrf.mxu0 }
 0x312   :  { %13830 = vst [vmem:[#allocation24_spill] sm:$0xff] %v12014_v39  ;;  %v12017_v41 = vadd.f32 %v9561_v1, %v11815_v54 }
 0x313   :  { %v12019_v26 = vpop.f32.mrf.mxu1  ;;  %v12021_v47 = vpop.f32.mrf.mxu0 }
 0x314   :  { %13831 = vst [vmem:[#allocation25_spill] sm:$0xff] %v12021_v47  ;;  %v2147_v47 = vadd.f32 %v11689_v27, %v11687_v53  ;;  %v2903_v53 = vadd.f32 %v11841_v17, %v11844_v52  ;;  %v2904_v52 = vadd.f32 %v11855_v31, %v11858_v58 }
 0x315   :  { %v9564_v20 = vpop.f32.mrf.mxu1  ;;  %v9622_v59 = vpop.f32.mrf.mxu0 }
 0x316   :  { %v2629_v23 = vadd.f32 %v9564_v20, %v11821_v9  ;;  %v2902_v9 = vadd.f32 %v11831_v46, %v11834_v42 }
 0x317   :  { %v2572_v25 = vpop.f32.mrf.mxu1  ;;  %v12024_v3 = vpop.f32.mrf.mxu0 }
 0x318   :  { %13832 = vst [vmem:[#allocation64_spill] sm:$0xff] %v12024_v3  ;;  %v12026_v50 = vadd.f32 %v9622_v59, %v2629_v23  ;;  %v12029_v12 = vadd.f32 %v2572_v25, %v11823_v18  ;;  %v12043_v18 = vld [vmem:[%s13642_s4] ss:$0 sm:$0xff]  ;;  %v2588_v59 = vadd.f32 %v11846_v32, %v2147_v47  ;;  %v2906_v32 = vadd.f32 %v11850_v28, %v11853_v51 }
 0x319   :  { %v9565_v2 = vpop.f32.mrf.mxu1  ;;  %v9623_v1 = vpop.f32.mrf.mxu0  ;;  %v8503_v51 = vcombine.low %v11808_v37, %v11808_v37  ;;  %v2179_v37 = vadd.f32 %v11717_v38, %v11715_v36 }
 0x31a   :  { %v2630_v54 = vadd.f32 %v9565_v2, %v11825_v22  ;;  %v2900_v22 = vadd.f32 %v11836_v16, %v11839_v56  ;;  %v2901_v2 = vadd.f32 %v11848_v33, %v2588_v59 }
 0x31b   :  { %v12032_v39 = vpop.f32.mrf.mxu1 }
 0x31c   :  { %v12038_v20 = vadd.f32 %v9623_v1, %v2630_v54 }
 0x31d   :  { %v9640_v3 = vpop.f32.mrf.mxu1 }
 0x31e   :  { %13833 = vst [vmem:[#allocation65_spill] sm:$0xff] %v12038_v20  ;;  %v3211_v23 = vadd.f32 %v9640_v3, %v2902_v9  ;;  %v2163_v20 = vadd.f32 %v11703_v55, %v11701_v5  ;;  %v2907_v5 = vadd.f32 %v11860_v10, %v11863_v13 }
 0x31f   :  { %v3034_v25 = vpop.f32.mrf.mxu1 }
 0x320   :  { %v3262_v27 = vadd.f32 %v12043_v18, %v3211_v23  ;;  %v3209_v42 = vadd.f32 %v3034_v25, %v2900_v22  ;;  %v2592_v3 = vadd.f32 %v11865_v45, %v2163_v20 }
 0x321   :  { %v9641_v46 = vpop.f32.mrf.mxu1 }
 0x322   :  { %v3260_v54 = vadd.f32 %v12043_v18, %v3209_v42  ;;  %v3212_v1 = vadd.f32 %v9641_v46, %v2903_v53  ;;  %v3306_v16 = vmax.f32 %v3262_v27, 0.0  ;;  %v2905_v20 = vadd.f32 %v11867_v7, %v2592_v3 }
 0x323   :  { %v3037_v56 = vpop.f32.mrf.mxu1 }
 0x324   :  { %v3263_v47 = vadd.f32 %v12043_v18, %v3212_v1  ;;  %v3210_v17 = vadd.f32 %v3037_v56, %v2901_v2  ;;  %v3304_v9 = vmax.f32 %v3260_v54, 0.0  ;;  %v3351_v55 = vsel %vm1723_vm2, %v3306_v16, -inf }
 0x325   :  { %v9644_v33 = vpop.f32.mrf.mxu1  ;;  %v2910_v16 = vadd.f32 %v11869_v34, %v11872_v57 }
 0x326   :  { %v3307_v22 = vmax.f32 %v3263_v47, 0.0  ;;  %v3261_v59 = vadd.f32 %v12043_v18, %v3210_v17  ;;  %v3215_v23 = vadd.f32 %v9644_v33, %v2906_v32  ;;  %v3348_v42 = vsel %vm1723_vm2, %v3304_v9, -inf  ;;  %v13834_v17 = vld [vmem:[#allocation14_spill] sm:$0xff]  ;;  %v9800_v9 = vld [vmem:[#allocation3 + $0x124] ss:$8 sps:$4 sm:$0xff]  }
 0x327   :  { %v3050_v28 = vpop.f32.mrf.mxu1  ;;  %v4037_v32 = vsel %vm246_vm0, %v8503_v51, 0  ;;  %v2908_v47 = vadd.f32 %v11874_v21, %v11877_v49  ;;  %v13835_v33 = vmov 0.0  }
 0x328   :  { %v3352_v25 = vsel %vm1723_vm2, %v3307_v22, -inf  ;;  %v3305_v31 = vmax.f32 %v3261_v59, 0.0  ;;  %v3266_v58 = vadd.f32 %v12043_v18, %v3215_v23  ;;  %v3213_v45 = vadd.f32 %v3050_v28, %v2904_v52  ;;  %v13836_v23 = vld [vmem:[#allocation39_spill] sm:$0xff] }
 0x329   :  { %v3353_v53 = vmax.f32 %v3351_v55, %v3352_v25  ;;  %v9645_v27 = vpop.f32.mrf.mxu1  ;;  %v2596_v52 = vadd.f32 %v13834_v17, %v2179_v37  ;;  %v13842_v17 = vld [vmem:[#allocation40_spill] sm:$0xff] }
 0x32a   :  { %v3349_v10 = vsel %vm1723_vm2, %v3305_v31, -inf  ;;  %v3264_v13 = vadd.f32 %v12043_v18, %v3213_v45  ;;  %v3216_v46 = vadd.f32 %v9645_v27, %v2907_v5  ;;  %v3310_v54 = vmax.f32 %v3266_v58, 0.0  ;;  %v13837_v5 = vld [vmem:[#allocation37_spill] sm:$0xff]  ;;  %v9798_v45 = vld [vmem:[#allocation3 + $0x120] ss:$8 sps:$4 sm:$0xff]  }
 0x32b   :  { %v3350_v2 = vmax.f32 %v3348_v42, %v3349_v10  ;;  %v3053_v1 = vpop.f32.mrf.mxu1  ;;  %v2911_v55 = vadd.f32 %v13837_v5, %v13836_v23  ;;  %v13838_v58 = vmov 0   ;;  %v9801_v23 = vld [vmem:[#allocation3 + $0x110] ss:$8 sps:$4 sm:$0xff]  }
 0x32c   :  { %v3267_v7 = vadd.f32 %v12043_v18, %v3216_v46  ;;  %v3214_v56 = vadd.f32 %v3053_v1, %v2905_v20  ;;  %v3308_v22 = vmax.f32 %v3264_v13, 0.0  ;;  %v3357_v28 = vsel %vm1723_vm2, %v3310_v54, -inf  ;;  %v13839_v20 = vld [vmem:[#allocation15_spill] sm:$0xff]  ;;  %v9803_v13 = vld [vmem:[#allocation3 + $0x114] ss:$8 sps:$4 sm:$0xff]  }
 0x32d   :  { %v12082_v3 = vpack.c.bf16 %v3353_v53, %v3350_v2  ;;  %v3437_v36 = vpack.c.bf16 %v3350_v2, %v13835_v33  ;;  %v9648_v38 = vpop.f32.mrf.mxu1  ;;  %v2909_v27 = vadd.f32 %v13839_v20, %v2596_v52  ;;  %v13840_v1 = vld [vmem:[#allocation27_spill] sm:$0xff]  ;;  %v2914_v52 = vadd.f32 %v13842_v17, %v11891_v11  ;;  %v13845_v20 = vld [vmem:[#allocation42_spill] sm:$0xff] }
 0x32e   :  { %v3311_v59 = vmax.f32 %v3267_v7, 0.0  ;;  %v3265_v34 = vadd.f32 %v12043_v18, %v3214_v56  ;;  %v3219_v57 = vadd.f32 %v9648_v38, %v2910_v16  ;;  %v3354_v46 = vsel %vm1723_vm2, %v3308_v22, -inf  ;;  %v13841_v16 = vld [vmem:[#allocation26_spill] sm:$0xff] }
 0x32f   :  { %v3066_v51 = vpop.f32.mrf.mxu1  ;;  %8455 = vmatmul.mubr.msk.bf16.vlgmr.msra.gmra.mxu0 %vm1723_vm2, %v3437_v36  ;;  %8481 = vmatmul.mubr.msk.bf16.gmra.mxu1 %vm1723_vm2, %v12082_v3  ;;  %v2195_v7 = vadd.f32 %v13841_v16, %v13840_v1  ;;  %v9809_v16 = vld [vmem:[#allocation3 + $0xf4] ss:$8 sps:$4 sm:$0xff]  }
 0x330   :  { %v3358_v21 = vsel %vm1723_vm2, %v3311_v59, -inf  ;;  %v3309_v49 = vmax.f32 %v3265_v34, 0.0  ;;  %v3270_v25 = vadd.f32 %v12043_v18, %v3219_v57  ;;  %v3217_v31 = vadd.f32 %v3066_v51, %v2908_v47  ;;  %4045 = vmatpush1.bf16.msra.mxu0 %v4037_v32  ;;  %3608 = vmatprep.mubr.bf16.mxu0 %v13838_v58  ;;  %v9806_v51 = vld [vmem:[#allocation3 + $0x104] ss:$8 sps:$4 sm:$0xff]  }
 0x331   :  { %v3359_v42 = vmax.f32 %v3357_v28, %v3358_v21  ;;  %v9649_v10 = vpop.f32.mrf.mxu1  ;;  %3862 = vmatprep.mubr.bf16.mxu1 %v13838_v58  ;;  %4046 = vmatprep.subr.bf16.mxu0 %v9800_v9  ;;  %v2912_v9 = vadd.f32 %v11893_v29, %v11896_v19  ;;  %v2600_v22 = vadd.f32 %v11903_v15, %v2195_v7  ;;  %v13843_v21 = vld [vmem:[#allocation43_spill] sm:$0xff]  ;;  %v13846_v7 = vld [vmem:[#allocation28_spill] sm:$0xff] }
 0x332   :  { %v3355_v37 = vsel %vm1723_vm2, %v3309_v49, -inf  ;;  %v3268_v2 = vadd.f32 %v12043_v18, %v3217_v31  ;;  %v3220_v54 = vadd.f32 %v9649_v10, %v2911_v55  ;;  %v3314_v32 = vmax.f32 %v3270_v25, 0.0  ;;  %v13844_v49 = vld [vmem:[#allocation41_spill] sm:$0xff] }
 0x333   :  { %v3356_v56 = vmax.f32 %v3354_v46, %v3355_v37  ;;  %v3069_v47 = vpop.f32.mrf.mxu1  ;;  %v2915_v25 = vadd.f32 %v13844_v49, %v13843_v21  ;;  %v9804_v46 = vld [vmem:[#allocation3 + $0x100] ss:$8 sps:$4 sm:$0xff]   ;;  %v9807_v21 = vld [vmem:[#allocation3 + $0xf0] ss:$8 sps:$4 sm:$0xff]  }
 0x334   :  { %v3271_v36 = vadd.f32 %v12043_v18, %v3220_v54  ;;  %v3218_v38 = vadd.f32 %v3069_v47, %v2909_v27  ;;  %4047 = vmatpush1.bf16.msra.mxu0 %v9798_v45  ;;  %v3312_v5 = vmax.f32 %v3268_v2, 0.0  ;;  %v3363_v29 = vsel %vm1723_vm2, %v3314_v32, -inf }
 0x335   :  { %v12108_v59 = vpack.c.bf16 %v3359_v42, %v3356_v56  ;;  %v12110_v34 = vpack.c.bf16 %v3356_v56, %v3353_v53  ;;  %v9652_v57 = vpop.f32.mrf.mxu1  ;;  %4048 = vmatprep.subr.bf16.mxu0 %v9803_v13  ;;  %v2913_v27 = vadd.f32 %v13845_v20, %v2600_v22  ;;  %v13847_v56 = vld [vmem:[#allocation10_spill] sm:$0xff] }
 0x336   :  { %v3315_v55 = vmax.f32 %v3271_v36, 0.0  ;;  %v3269_v11 = vadd.f32 %v12043_v18, %v3218_v38  ;;  %v3223_v28 = vadd.f32 %v9652_v57, %v2914_v52  ;;  %v3360_v37 = vsel %vm1723_vm2, %v3312_v5, -inf  ;;  %v13848_v36 = vld [vmem:[#allocation16_spill] sm:$0xff] }
 0x337   :  { %v3082_v19 = vpop.f32.mrf.mxu1  ;;  %8456 = vmatmul.mubr.msk.bf16.gmra.mxu0 %vm1723_vm2, %v12110_v34  ;;  %8482 = vmatmul.mubr.msk.bf16.gmra.mxu1 %vm1723_vm2, %v12108_v59  ;;  %v2211_v32 = vadd.f32 %v13847_v56, %v13846_v7  ;;  %v13849_v38 = vld [vmem:[#allocation44_spill] sm:$0xff]  ;;  %v9832_v56 = vld [vmem:[#allocation3 + $0xd4] ss:$8 sps:$4 sm:$0xff]  }
 0x338   :  { %v3364_v15 = vsel %vm1723_vm2, %v3315_v55, -inf  ;;  %v3313_v53 = vmax.f32 %v3269_v11, 0.0  ;;  %v3274_v31 = vadd.f32 %v12043_v18, %v3223_v28  ;;  %v3221_v45 = vadd.f32 %v3082_v19, %v2912_v9  ;;  %3618 = vmatprep.mubr.bf16.mxu0 %v13838_v58  ;;  %3872 = vmatprep.mubr.bf16.mxu1 %v13838_v58 }
 0x339   :  { %v12125_v10 = vmax.f32 %v3363_v29, %v3364_v15  ;;  %v9653_v13 = vpop.f32.mrf.mxu1  ;;  %4049 = vmatpush1.bf16.msra.mxu0 %v9801_v23  ;;  %v2918_v9 = vadd.f32 %v13849_v38, %v13848_v36  ;;  %v13850_v23 = vld [vmem:[#allocation17_spill] sm:$0xff]  ;;  %v2604_v55 = vadd.f32 %v11924_v62, %v2211_v32  ;;  %v9820_v15 = vld [vmem:[#allocation3 + $0xe4] ss:$8 sps:$4 sm:$0xff]  }
 0x33a   :  { %v3361_v2 = vsel %vm1723_vm2, %v3313_v53, -inf  ;;  %v3272_v54 = vadd.f32 %v12043_v18, %v3221_v45  ;;  %v3224_v1 = vadd.f32 %v9653_v13, %v2915_v25  ;;  %4050 = vmatprep.subr.bf16.mxu0 %v9806_v51  ;;  %v3318_v17 = vmax.f32 %v3274_v31, 0.0  ;;  %v13851_v53 = vld [vmem:[#allocation45_spill] sm:$0xff]  ;;  %v12159_v32 = vld [vmem:[#allocation3 + $0x200] sm:$0x33] }
 0x33b   :  { %v3362_v47 = vmax.f32 %v3360_v37, %v3361_v2  ;;  %v3085_v52 = vpop.f32.mrf.mxu1  ;;  %v2916_v5 = vadd.f32 %v13850_v23, %v11917_v44  ;;  %v2919_v44 = vadd.f32 %v13851_v53, %v11922_v4  ;;  %v13852_v4 = vld [vmem:[#allocation46_spill] sm:$0xff]  ;;  %v8556_v53 = vcombine.high %v12159_v32, %v12159_v32 }
 0x33c   :  { %v3275_v22 = vadd.f32 %v12043_v18, %v3224_v1  ;;  %v3222_v57 = vadd.f32 %v3085_v52, %v2913_v27  ;;  %v3316_v49 = vmax.f32 %v3272_v54, 0.0  ;;  %v3369_v62 = vsel %vm1723_vm2, %v3318_v17, -inf  ;;  %v9818_v2 = vld [vmem:[#allocation3 + $0xe0] ss:$8 sps:$4 sm:$0xff]   ;;  %v13854_v17 = vld [vmem:[#allocation29_spill] sm:$0xff] }
 0x33d   :  { %v12139_v11 = vpack.c.bf16 %v12125_v10, %v3362_v47  ;;  %v12141_v28 = vpack.c.bf16 %v3362_v47, %v3359_v42  ;;  %v9656_v51 = vpop.f32.mrf.mxu1  ;;  %4051 = vmatpush1.bf16.msra.mxu0 %v9804_v46  ;;  %v2917_v13 = vadd.f32 %v13852_v4, %v2604_v55  ;;  %v13853_v47 = vld [vmem:[#allocation11_spill] sm:$0xff] }
 0x33e   :  { %v3319_v25 = vmax.f32 %v3275_v22, 0.0  ;;  %v3273_v29 = vadd.f32 %v12043_v18, %v3222_v57  ;;  %v3227_v19 = vadd.f32 %v9656_v51, %v2918_v9  ;;  %4052 = vmatprep.subr.bf16.mxu0 %v9809_v16  ;;  %v3366_v54 = vsel %vm1723_vm2, %v3316_v49, -inf  ;;  %v13855_v22 = vld [vmem:[#allocation47_spill] sm:$0xff]  ;;  %v13856_v57 = vld [vmem:[#allocation48_spill] sm:$0xff] }
 0x33f   :  { %v3098_v31 = vpop.f32.mrf.mxu1  ;;  %8457 = vmatmul.mubr.msk.bf16.gmra.mxu0 %vm1723_vm2, %v12141_v28  ;;  %8483 = vmatmul.mubr.msk.bf16.gmra.mxu1 %vm1723_vm2, %v12139_v11  ;;  %v2227_v52 = vadd.f32 %v13854_v17, %v13853_v47  ;;  %v2922_v23 = vadd.f32 %v13856_v57, %v13855_v22  ;;  %v13860_v47 = vld [vmem:[#allocation30_spill] sm:$0xff]  ;;  %v13861_v17 = vld [vmem:[#allocation31_spill] sm:$0xff] }
 0x340   :  { %v3370_v42 = vsel %vm1723_vm2, %v3319_v25, -inf  ;;  %v3317_v45 = vmax.f32 %v3273_v29, 0.0  ;;  %v3278_v20 = vadd.f32 %v12043_v18, %v3227_v19  ;;  %v3225_v27 = vadd.f32 %v3098_v31, %v2916_v5  ;;  %3628 = vmatprep.mubr.bf16.mxu0 %v13838_v58  ;;  %3882 = vmatprep.mubr.bf16.mxu1 %v13838_v58  ;;  %v13857_v5 = vld [vmem:[#allocation49_spill] sm:$0xff]  ;;  %v13862_v22 = vld [vmem:[#allocation51_spill] sm:$0xff]  ;;  %v13863_v57 = vld [vmem:[#allocation50_spill] sm:$0xff] }
 0x341   :  { %v3371_v46 = vmax.f32 %v3369_v62, %v3370_v42  ;;  %v9657_v37 = vpop.f32.mrf.mxu1  ;;  %4053 = vmatpush1.bf16.msra.mxu0 %v9807_v21  ;;  %v2920_v55 = vadd.f32 %v13857_v5, %v11936_v35  ;;  %v2608_v49 = vadd.f32 %v11943_v8, %v2227_v52  ;;  %v13858_v42 = vld [vmem:[#allocation18_spill] sm:$0xff]  ;;  %v2243_v52 = vadd.f32 %v13861_v17, %v13860_v47 }
 0x342   :  { %v3367_v1 = vsel %vm1723_vm2, %v3317_v45, -inf  ;;  %v3276_v16 = vadd.f32 %v12043_v18, %v3225_v27  ;;  %v3228_v7 = vadd.f32 %v9657_v37, %v2919_v44  ;;  %4054 = vmatprep.subr.bf16.mxu0 %v9820_v15  ;;  %v3322_v38 = vmax.f32 %v3278_v20, 0.0  ;;  %v9830_v15 = vld [vmem:[#allocation3 + $0xd0] ss:$8 sps:$4 sm:$0xff]  }
 0x343   :  { %v3368_v36 = vmax.f32 %v3366_v54, %v3367_v1  ;;  %v3101_v9 = vpop.f32.mrf.mxu1  ;;  %v2923_v8 = vadd.f32 %v13858_v42, %v11941_v43  ;;  %v13859_v43 = vld [vmem:[#allocation19_spill] sm:$0xff]  ;;  %v13865_v42 = vld [vmem:[#allocation52_spill] sm:$0xff] }
 0x344   :  { %v3279_v51 = vadd.f32 %v12043_v18, %v3228_v7  ;;  %v3226_v21 = vadd.f32 %v3101_v9, %v2917_v13  ;;  %v3320_v44 = vmax.f32 %v3276_v16, 0.0  ;;  %v3375_v45 = vsel %vm1723_vm2, %v3322_v38, -inf }
 0x345   :  { %v12169_v25 = vpack.c.bf16 %v3371_v46, %v3368_v36  ;;  %v12172_v29 = vpack.c.bf16 %v3368_v36, %v12125_v10  ;;  %v9660_v19 = vpop.f32.mrf.mxu1  ;;  %4055 = vmatpush1.bf16.msra.mxu0 %v9818_v2  ;;  %v2921_v37 = vadd.f32 %v13859_v43, %v2608_v49  ;;  %v2612_v49 = vadd.f32 %v11962_v30, %v2243_v52 }
 0x346   :  { %v3323_v62 = vmax.f32 %v3279_v51, 0.0  ;;  %v3277_v35 = vadd.f32 %v12043_v18, %v3226_v21  ;;  %v3231_v31 = vadd.f32 %v9660_v19, %v2922_v23  ;;  %4056 = vmatprep.subr.bf16.mxu0 %v9832_v56  ;;  %v3372_v1 = vsel %vm1723_vm2, %v3320_v44, -inf  ;;  %v13864_v51 = vld [vmem:[#allocation53_spill] sm:$0xff] }
 0x347   :  { %v3114_v20 = vpop.f32.mrf.mxu1  ;;  %8458 = vmatmul.mubr.msk.bf16.gmra.mxu0 %vm1723_vm2, %v12172_v29  ;;  %8484 = vmatmul.mubr.msk.bf16.gmra.mxu1 %vm1723_vm2, %v12169_v25  ;;  %v2926_v23 = vadd.f32 %v13863_v57, %v13862_v22  ;;  %v2924_v21 = vadd.f32 %v13864_v51, %v11955_v6  ;;  %v13870_v57 = vld [vmem:[#allocation21_spill] sm:$0xff] }
 0x348   :  { %v3376_v10 = vsel %vm1723_vm2, %v3323_v62, -inf  ;;  %v3321_v27 = vmax.f32 %v3277_v35, 0.0  ;;  %v3282_v4 = vadd.f32 %v12043_v18, %v3231_v31  ;;  %v3229_v13 = vadd.f32 %v3114_v20, %v2920_v55  ;;  %3638 = vmatprep.mubr.bf16.mxu0 %v13838_v58  ;;  %3892 = vmatprep.mubr.bf16.mxu1 %v13838_v58 }
 0x349   :  { %v3377_v2 = vmax.f32 %v3375_v45, %v3376_v10  ;;  %v9661_v54 = vpop.f32.mrf.mxu1  ;;  %4057 = vmatpush1.bf16.msra.mxu0 %v9830_v15 }
 0x34a   :  { %v3373_v16 = vsel %vm1723_vm2, %v3321_v27, -inf  ;;  %v3280_v7 = vadd.f32 %v12043_v18, %v3229_v13  ;;  %v3232_v56 = vadd.f32 %v9661_v54, %v2923_v8  ;;  %8557 = vmatprep.subr.msk.bf16.mxu0 %vm246_vm0, %v8556_v53  ;;  %v3326_v38 = vmax.f32 %v3282_v4, 0.0 }
 0x34b   :  { %v3374_v36 = vmax.f32 %v3372_v1, %v3373_v16  ;;  %v3117_v9 = vpop.f32.mrf.mxu1  ;;  %v2927_v8 = vadd.f32 %v13865_v42, %v11960_v0  ;;  %v13866_v0 = vld [vmem:[#allocation54_spill] sm:$0xff]  ;;  %v13867_v16 = vld [vmem:[#allocation32_spill] sm:$0xff] }
 0x34c   :  { %v3283_v5 = vadd.f32 %v12043_v18, %v3232_v56  ;;  %v3230_v55 = vadd.f32 %v3117_v9, %v2921_v37  ;;  %v3324_v44 = vmax.f32 %v3280_v7, 0.0  ;;  %v3381_v45 = vsel %vm1723_vm2, %v3326_v38, -inf  ;;  %v13868_v7 = vld [vmem:[#allocation12_spill] sm:$0xff] }
 0x34d   :  { %v12201_v19 = vpack.c.bf16 %v3377_v2, %v3374_v36  ;;  %v12203_v15 = vpack.c.bf16 %v3374_v36, %v3371_v46  ;;  %v9664_v53 = vpop.f32.mrf.mxu1  ;;  %v2925_v27 = vadd.f32 %v13866_v0, %v2612_v49  ;;  %v2259_v56 = vadd.f32 %v13868_v7, %v13867_v16  ;;  %v13869_v36 = vld [vmem:[#allocation20_spill] sm:$0xff] }
 0x34e   :  { %v3327_v62 = vmax.f32 %v3283_v5, 0.0  ;;  %v3281_v35 = vadd.f32 %v12043_v18, %v3230_v55  ;;  %v3235_v31 = vadd.f32 %v9664_v53, %v2926_v23  ;;  %v3378_v43 = vsel %vm1723_vm2, %v3324_v44, -inf }
 0x34f   :  { %v3130_v20 = vpop.f32.mrf.mxu1  ;;  %8459 = vmatmul.mubr.msk.bf16.gmra.mxu0 %vm1723_vm2, %v12203_v15  ;;  %8485 = vmatmul.mubr.msk.bf16.gmra.mxu1 %vm1723_vm2, %v12201_v19  ;;  %v2930_v38 = vadd.f32 %v13869_v36, %v11969_v14  ;;  %v2928_v23 = vadd.f32 %v13870_v57, %v11974_v60  ;;  %v2616_v5 = vadd.f32 %v11981_v61, %v2259_v56  ;;  %v13872_v14 = vld [vmem:[#allocation55_spill] sm:$0xff]  ;;  %v13876_v56 = vld [vmem:[#allocation57_spill] sm:$0xff] }
 0x350   :  { %v3382_v30 = vsel %vm1723_vm2, %v3327_v62, -inf  ;;  %v3325_v6 = vmax.f32 %v3281_v35, 0.0  ;;  %v3286_v46 = vadd.f32 %v12043_v18, %v3235_v31  ;;  %v3233_v10 = vadd.f32 %v3130_v20, %v2924_v21  ;;  %3648 = vmatprep.mubr.bf16.mxu0 %v13838_v58  ;;  %3902 = vmatprep.mubr.bf16.mxu1 %v13838_v58  ;;  %v13871_v35 = vld [vmem:[#allocation56_spill] sm:$0xff]  ;;  %v13873_v20 = vld [vmem:[#allocation58_spill] sm:$0xff]  ;;  %v13877_v36 = vld [vmem:[#allocation59_spill] sm:$0xff] }
 0x351   :  { %v3383_v4 = vmax.f32 %v3381_v45, %v3382_v30  ;;  %v9665_v13 = vpop.f32.mrf.mxu1  ;;  %v2931_v31 = vadd.f32 %v13872_v14, %v13871_v35  ;;  %v2929_v30 = vadd.f32 %v13873_v20, %v2616_v5 }
 0x352   :  { %v3379_v37 = vsel %vm1723_vm2, %v3325_v6, -inf  ;;  %v3284_v54 = vadd.f32 %v12043_v18, %v3233_v10  ;;  %v3236_v1 = vadd.f32 %v9665_v13, %v2927_v8  ;;  %v3330_v17 = vmax.f32 %v3286_v46, 0.0 }
 0x353   :  { %v3380_v47 = vmax.f32 %v3378_v43, %v3379_v37  ;;  %v3133_v52 = vpop.f32.mrf.mxu1  ;;  %v13874_v43 = vld [vmem:[#allocation13_spill] sm:$0xff]  ;;  %v13875_v37 = vld [vmem:[#allocation34_spill] sm:$0xff] }
 0x354   :  { %v3287_v9 = vadd.f32 %v12043_v18, %v3236_v1  ;;  %v3234_v22 = vadd.f32 %v3133_v52, %v2925_v27  ;;  %v3328_v49 = vmax.f32 %v3284_v54, 0.0  ;;  %v3387_v42 = vsel %vm1723_vm2, %v3330_v17, -inf }
 0x355   :  { %v12229_v55 = vpack.c.bf16 %v3383_v4, %v3380_v47  ;;  %v12231_v51 = vpack.c.bf16 %v3380_v47, %v3377_v2  ;;  %v9668_v21 = vpop.f32.mrf.mxu1  ;;  %v2275_v54 = vadd.f32 %v13875_v37, %v13874_v43  ;;  %v2934_v47 = vadd.f32 %v13876_v56, %v11988_v48  ;;  %v13879_v48 = vld [vmem:[#allocation22_spill] sm:$0xff]  ;;  %v13885_v56 = vld [vmem:[#allocation63_spill] sm:$0xff] }
 0x356   :  { %v3331_v53 = vmax.f32 %v3287_v9, 0.0  ;;  %v3285_v44 = vadd.f32 %v12043_v18, %v3234_v22  ;;  %v3239_v62 = vadd.f32 %v9668_v21, %v2930_v38  ;;  %v3384_v10 = vsel %vm1723_vm2, %v3328_v49, -inf  ;;  %v13883_v37 = vld [vmem:[#allocation62_spill] sm:$0xff] }
 0x357   :  { %v3146_v8 = vpop.f32.mrf.mxu1  ;;  %8460 = vmatmul.mubr.msk.bf16.gmra.mxu0 %vm1723_vm2, %v12231_v51  ;;  %8486 = vmatmul.mubr.msk.bf16.gmra.mxu1 %vm1723_vm2, %v12229_v55  ;;  %v2932_v38 = vadd.f32 %v13877_v36, %v11993_v63  ;;  %v2620_v9 = vadd.f32 %v12000_v24, %v2275_v54  ;;  %v13884_v54 = vld [vmem:[#allocation61_spill] sm:$0xff] }
 0x358   :  { %v3388_v60 = vsel %vm1723_vm2, %v3331_v53, -inf  ;;  %v3329_v61 = vmax.f32 %v3285_v44, 0.0  ;;  %v3290_v2 = vadd.f32 %v12043_v18, %v3239_v62  ;;  %v3237_v45 = vadd.f32 %v3146_v8, %v2928_v23  ;;  %3658 = vmatprep.mubr.bf16.mxu0 %v13838_v58  ;;  %3912 = vmatprep.mubr.bf16.mxu1 %v13838_v58  ;;  %v13878_v44 = vld [vmem:[#allocation23_spill] sm:$0xff] }
 0x359   :  { %v3389_v6 = vmax.f32 %v3387_v42, %v3388_v60  ;;  %v9669_v46 = vpop.f32.mrf.mxu1  ;;  %v2935_v62 = vadd.f32 %v13879_v48, %v13878_v44  ;;  %v13880_v42 = vld [vmem:[#allocation60_spill] sm:$0xff] }
 0x35a   :  { %v3385_v0 = vsel %vm1723_vm2, %v3329_v61, -inf  ;;  %v3288_v27 = vadd.f32 %v12043_v18, %v3237_v45  ;;  %v3240_v13 = vadd.f32 %v9669_v46, %v2931_v31  ;;  %v3334_v16 = vmax.f32 %v3290_v2, 0.0  ;;  %v13881_v46 = vld [vmem:[#allocation33_spill] sm:$0xff] }
 0x35b   :  { %v3386_v1 = vmax.f32 %v3384_v10, %v3385_v0  ;;  %v3149_v7 = vpop.f32.mrf.mxu1  ;;  %v2933_v8 = vadd.f32 %v13880_v42, %v2620_v9  ;;  %v13882_v10 = vld [vmem:[#allocation36_spill] sm:$0xff] }
 0x35c   :  { %v3291_v17 = vadd.f32 %v12043_v18, %v3240_v13  ;;  %v3238_v52 = vadd.f32 %v3149_v7, %v2929_v30  ;;  %v3332_v5 = vmax.f32 %v3288_v27, 0.0  ;;  %v3393_v35 = vsel %vm1723_vm2, %v3334_v16, -inf }
 0x35d   :  { %v12257_v22 = vpack.c.bf16 %v3389_v6, %v3386_v1  ;;  %v12259_v57 = vpack.c.bf16 %v3386_v1, %v3383_v4  ;;  %v9672_v23 = vpop.f32.mrf.mxu1  ;;  %v2291_v0 = vadd.f32 %v13882_v10, %v13881_v46  ;;  %v2938_v1 = vadd.f32 %v13884_v54, %v13883_v37 }
 0x35e   :  { %v3335_v21 = vmax.f32 %v3291_v17, 0.0  ;;  %v3289_v49 = vadd.f32 %v12043_v18, %v3238_v52  ;;  %v3243_v53 = vadd.f32 %v9672_v23, %v2934_v47  ;;  %v3390_v2 = vsel %vm1723_vm2, %v3332_v5, -inf }
 0x35f   :  { %v3162_v14 = vpop.f32.mrf.mxu1  ;;  %8461 = vmatmul.mubr.msk.bf16.gmra.mxu0 %vm1723_vm2, %v12259_v57  ;;  %8487 = vmatmul.mubr.msk.bf16.gmra.mxu1 %vm1723_vm2, %v12257_v22  ;;  %v2936_v47 = vadd.f32 %v13885_v56, %v12012_v40  ;;  %v2624_v17 = vadd.f32 %v12019_v26, %v2291_v0  ;;  %v13890_v0 = vld [vmem:[#allocation64_spill] sm:$0xff] }
 0x360   :  { %v3394_v63 = vsel %vm1723_vm2, %v3335_v21, -inf  ;;  %v3333_v24 = vmax.f32 %v3289_v49, 0.0  ;;  %v3294_v4 = vadd.f32 %v12043_v18, %v3243_v53  ;;  %v3241_v31 = vadd.f32 %v3162_v14, %v2932_v38  ;;  %3668 = vmatprep.mubr.bf16.mxu0 %v13838_v58  ;;  %3922 = vmatprep.mubr.bf16.mxu1 %v13838_v58  ;;  %v13886_v49 = vld [vmem:[#allocation24_spill] sm:$0xff] }
 0x361   :  { %v3395_v60 = vmax.f32 %v3393_v35, %v3394_v63  ;;  %v9673_v61 = vpop.f32.mrf.mxu1  ;;  %v2939_v53 = vadd.f32 %v13886_v49, %v12017_v41  ;;  %v13887_v41 = vld [vmem:[#allocation25_spill] sm:$0xff] }
 0x362   :  { %v3391_v45 = vsel %vm1723_vm2, %v3333_v24, -inf  ;;  %v3292_v20 = vadd.f32 %v12043_v18, %v3241_v31  ;;  %v3244_v30 = vadd.f32 %v9673_v61, %v2935_v62  ;;  %v3338_v13 = vmax.f32 %v3294_v4, 0.0  ;;  %v13889_v61 = vld [vmem:[#allocation38_spill] sm:$0xff] }
 0x363   :  { %v3392_v27 = vmax.f32 %v3390_v2, %v3391_v45  ;;  %v3165_v43 = vpop.f32.mrf.mxu1  ;;  %v2937_v35 = vadd.f32 %v13887_v41, %v2624_v17 }
 0x364   :  { %v3295_v16 = vadd.f32 %v12043_v18, %v3244_v30  ;;  %v3242_v7 = vadd.f32 %v3165_v43, %v2933_v8  ;;  %v3336_v9 = vmax.f32 %v3292_v20, 0.0  ;;  %v3399_v44 = vsel %vm1723_vm2, %v3338_v13, -inf  ;;  %v13888_v8 = vld [vmem:[#allocation35_spill] sm:$0xff] }
 0x365   :  { %v12285_v52 = vpack.c.bf16 %v3395_v60, %v3392_v27  ;;  %v12287_v36 = vpack.c.bf16 %v3392_v27, %v3389_v6  ;;  %v9676_v38 = vpop.f32.mrf.mxu1  ;;  %v2307_v2 = vadd.f32 %v13889_v61, %v13888_v8  ;;  %v2940_v27 = vadd.f32 %v13890_v0, %v12029_v12  ;;  %v9840_v0 = vld [vmem:[#allocation3 + $0x1f4] ss:$8 sps:$4 sm:$0xff]  }
 0x366   :  { %v3339_v23 = vmax.f32 %v3295_v16, 0.0  ;;  %v3293_v5 = vadd.f32 %v12043_v18, %v3242_v7  ;;  %v3247_v21 = vadd.f32 %v9676_v38, %v2938_v1  ;;  %v3396_v24 = vsel %vm1723_vm2, %v3336_v9, -inf }
 0x367   :  { %v3178_v48 = vpop.f32.mrf.mxu1  ;;  %8462 = vmatmul.mubr.msk.bf16.gmra.mxu0 %vm1723_vm2, %v12287_v36  ;;  %8488 = vmatmul.mubr.msk.bf16.gmra.mxu1 %vm1723_vm2, %v12285_v52  ;;  %v2628_v13 = vadd.f32 %v12032_v39, %v2307_v2  ;;  %v2888_v39 = vpop.f32.mrf.mxu0 }
 0x368   :  { %v3400_v40 = vsel %vm1723_vm2, %v3339_v23, -inf  ;;  %v3337_v26 = vmax.f32 %v3293_v5, 0.0  ;;  %v3298_v6 = vadd.f32 %v12043_v18, %v3247_v21  ;;  %v3245_v62 = vadd.f32 %v3178_v48, %v2936_v47  ;;  %3678 = vmatprep.mubr.bf16.mxu0 %v13838_v58  ;;  %3932 = vmatprep.mubr.bf16.mxu1 %v13838_v58 }
 0x369   :  { %v3401_v14 = vmax.f32 %v3399_v44, %v3400_v40  ;;  %v9677_v63 = vpop.f32.mrf.mxu1  ;;  %v13891_v44 = vld [vmem:[#allocation65_spill] sm:$0xff] }
 0x36a   :  { %v3397_v4 = vsel %vm1723_vm2, %v3337_v26, -inf  ;;  %v3296_v31 = vadd.f32 %v12043_v18, %v3245_v62  ;;  %v3248_v42 = vadd.f32 %v9677_v63, %v2939_v53  ;;  %v3342_v20 = vmax.f32 %v3298_v6, 0.0 }
 0x36b   :  { %v3398_v45 = vmax.f32 %v3396_v24, %v3397_v4  ;;  %v3181_v30 = vpop.f32.mrf.mxu1 }
 0x36c   :  { %v3299_v46 = vadd.f32 %v12043_v18, %v3248_v42  ;;  %v3246_v10 = vadd.f32 %v3181_v30, %v2937_v35  ;;  %v3340_v1 = vmax.f32 %v3296_v31, 0.0  ;;  %v3405_v47 = vsel %vm1723_vm2, %v3342_v20, -inf }
 0x36d   :  { %v12311_v43 = vpack.c.bf16 %v3401_v14, %v3398_v45  ;;  %v12313_v37 = vpack.c.bf16 %v3398_v45, %v3395_v60  ;;  %v9680_v54 = vpop.f32.mrf.mxu1 }
 0x36e   :  { %v3343_v16 = vmax.f32 %v3299_v46, 0.0  ;;  %v3297_v7 = vadd.f32 %v12043_v18, %v3246_v10  ;;  %v3251_v56 = vadd.f32 %v9680_v54, %v12026_v50  ;;  %v2941_v50 = vadd.f32 %v2888_v39, %v2628_v13  ;;  %v9841_v13 = vld [vmem:[#allocation3 + $0x1e0] ss:$8 sps:$4 sm:$0xff]  }
 0x36f   :  { %v3194_v17 = vpop.f32.mrf.mxu1  ;;  %8463 = vmatmul.mubr.msk.bf16.gmra.mxu0 %vm1723_vm2, %v12313_v37  ;;  %8489 = vmatmul.mubr.msk.bf16.gmra.mxu1 %vm1723_vm2, %v12311_v43  ;;  %v3402_v21 = vsel %vm1723_vm2, %v3340_v1, -inf  ;;  %v8555_v46 = vcombine.low %v12159_v32, %v12159_v32  ;;  %v9846_v32 = vld [vmem:[#allocation3 + $0x1d4] ss:$8 sps:$4 sm:$0xff]   ;;  %v9847_v54 = vld [vmem:[#allocation3 + $0x1c0] ss:$8 sps:$4 sm:$0xff]  }
 0x370   :  { %v3406_v12 = vsel %vm1723_vm2, %v3343_v16, -inf  ;;  %v3341_v60 = vmax.f32 %v3297_v7, 0.0  ;;  %v3302_v38 = vadd.f32 %v12043_v18, %v3251_v56  ;;  %v3249_v9 = vadd.f32 %v3194_v17, %v2940_v27  ;;  %3688 = vmatprep.mubr.bf16.mxu0 %v13838_v58  ;;  %3942 = vmatprep.mubr.bf16.mxu1 %v13838_v58  ;;  %v9843_v27 = vld [vmem:[#allocation3 + $0x1e4] ss:$8 sps:$4 sm:$0xff]   ;;  %v9852_v1 = vld [vmem:[#allocation3 + $0x1b4] ss:$8 sps:$4 sm:$0xff]  }
 0x371   :  { %v3407_v23 = vmax.f32 %v3405_v47, %v3406_v12  ;;  %v9681_v5 = vpop.f32.mrf.mxu1  ;;  %v4585_v10 = vsel %vm246_vm0, %v8555_v46, 0  ;;  %v9855_v16 = vld [vmem:[#allocation3 + $0x1a4] ss:$8 sps:$4 sm:$0xff]   ;;  %v9853_v7 = vld [vmem:[#allocation3 + $0x1a0] ss:$8 sps:$4 sm:$0xff]  }
 0x372   :  { %v3403_v49 = vsel %vm1723_vm2, %v3341_v60, -inf  ;;  %v3300_v53 = vadd.f32 %v12043_v18, %v3249_v9  ;;  %v3252_v48 = vadd.f32 %v9681_v5, %v13891_v44  ;;  %v3346_v6 = vmax.f32 %v3302_v38, 0.0  ;;  %v9856_v38 = vld [vmem:[#allocation5 + $0x138] ss:$8 sps:$4 sm:$0xff]   ;;  %v9858_v9 = vld [vmem:[#allocation5 + $0x13c] ss:$8 sps:$4 sm:$0xff]  }
 0x373   :  { %v3404_v40 = vmax.f32 %v3402_v21, %v3403_v49  ;;  %v3197_v26 = vpop.f32.mrf.mxu1  ;;  %5145 = vmatprep.subr.bf16.mxu1 %v9858_v9 }
 0x374   :  { %v3303_v62 = vadd.f32 %v12043_v18, %v3252_v48  ;;  %v3250_v41 = vadd.f32 %v3197_v26, %v2941_v50  ;;  %v3344_v24 = vmax.f32 %v3300_v53, 0.0  ;;  %v3411_v42 = vsel %vm1723_vm2, %v3346_v6, -inf  ;;  %v9859_v6 = vld [vmem:[#allocation5 + $0x128] ss:$8 sps:$4 sm:$0xff]  }
 0x375   :  { %v12331_v35 = vpack.c.bf16 %v3407_v23, %v3404_v40  ;;  %v12333_v63 = vpack.c.bf16 %v3404_v40, %v3401_v14 }
 0x376   :  { %v3347_v4 = vmax.f32 %v3303_v62, 0.0  ;;  %v3301_v31 = vadd.f32 %v12043_v18, %v3250_v41  ;;  %v3408_v2 = vsel %vm1723_vm2, %v3344_v24, -inf }
 0x377   :  { %8464 = vmatmul.mubr.msk.bf16.gmra.mxu0 %vm1723_vm2, %v12333_v63  ;;  %8490 = vmatmul.mubr.msk.bf16.gmra.mxu1 %vm1723_vm2, %v12331_v35 }
 0x378   :  { %v3412_v8 = vsel %vm1723_vm2, %v3347_v4, -inf  ;;  %v3345_v61 = vmax.f32 %v3301_v31, 0.0  ;;  %3698 = vmatprep.mubr.bf16.mxu0 %v13838_v58  ;;  %4350 = vmatprep.mubr.bf16.mxu1 %v13838_v58 }
 0x379   :  { %v12344_v14 = vmax.f32 %v3411_v42, %v3412_v8 }
 0x37a   :  { %v3409_v18 = vsel %vm1723_vm2, %v3345_v61, -inf }
 0x37b   :  { %v3410_v45 = vmax.f32 %v3408_v2, %v3409_v18  ;;  %v9864_v2 = vld [vmem:[#allocation5 + $0x11c] ss:$8 sps:$4 sm:$0xff]  }
 0x37d   :  { %v12348_v20 = vpack.c.bf16 %v3410_v45, %v3407_v23  ;;  %v12351_v30 = vpack.c.bf16 %v12344_v14, %v3410_v45 }
 0x37f   :  { %8465 = vmatmul.mubr.msk.bf16.gmra.mxu0 %vm1723_vm2, %v12348_v20  ;;  %8532 = vmatmul.mubr.msk.bf16.vlgmr.msra.gmra.mxu1 %vm1723_vm2, %v12110_v34  ;;  %v9838_v34 = vld [vmem:[#allocation3 + $0x1f0] ss:$8 sps:$4 sm:$0xff]  }
 0x380   :  { %4074 = vmatprep.mubr.bf16.mxu0 %v13838_v58  ;;  %4360 = vmatprep.mubr.bf16.mxu1 %v13838_v58 }
 0x381   :  { %5146 = vmatpush1.bf16.msra.mxu1 %v9856_v38 }
 0x387   :  { %8506 = vmatmul.mubr.msk.bf16.vlgmr.msra.gmra.mxu0 %vm1723_vm2, %v12082_v3  ;;  %8533 = vmatmul.mubr.msk.bf16.gmra.mxu1 %vm1723_vm2, %v12141_v28  ;;  %v9844_v3 = vld [vmem:[#allocation3 + $0x1d0] ss:$8 sps:$4 sm:$0xff]   ;;  %v9849_v28 = vld [vmem:[#allocation3 + $0x1c4] ss:$8 sps:$4 sm:$0xff]  }
 0x388   :  { %4593 = vmatpush1.bf16.msra.mxu0 %v4585_v10  ;;  %4084 = vmatprep.mubr.bf16.mxu0 %v13838_v58 }
 0x389   :  { %4370 = vmatprep.mubr.bf16.mxu1 %v13838_v58  ;;  %4594 = vmatprep.subr.bf16.mxu0 %v9840_v0 }
 0x38c   :  { %4595 = vmatpush1.bf16.msra.mxu0 %v9838_v34 }
 0x38d   :  { %4596 = vmatprep.subr.bf16.mxu0 %v9843_v27 }
 0x38f   :  { %8507 = vmatmul.mubr.msk.bf16.gmra.mxu0 %vm1723_vm2, %v12108_v59  ;;  %8534 = vmatmul.mubr.msk.bf16.gmra.mxu1 %vm1723_vm2, %v12172_v29  ;;  %v9850_v29 = vld [vmem:[#allocation3 + $0x1b0] ss:$8 sps:$4 sm:$0xff]  }
 0x390   :  { %4094 = vmatprep.mubr.bf16.mxu0 %v13838_v58  ;;  %4380 = vmatprep.mubr.bf16.mxu1 %v13838_v58 }
 0x391   :  { %4597 = vmatpush1.bf16.msra.mxu0 %v9841_v13  ;;  %v9870_v13 = vld [vmem:[#allocation5 + $0x10c] ss:$8 sps:$4 sm:$0xff]  }
 0x392   :  { %4598 = vmatprep.subr.bf16.mxu0 %v9846_v32  ;;  %v9873_v32 = vld [vmem:[#allocation5 + $0x1f4] ss:$8 sps:$4 sm:$0xff]  }
 0x395   :  { %4599 = vmatpush1.bf16.msra.mxu0 %v9844_v3 }
 0x396   :  { %4600 = vmatprep.subr.bf16.mxu0 %v9849_v28  ;;  %v9868_v28 = vld [vmem:[#allocation5 + $0x108] ss:$8 sps:$4 sm:$0xff]  }
 0x397   :  { %8508 = vmatmul.mubr.msk.bf16.gmra.mxu0 %vm1723_vm2, %v12139_v11  ;;  %8535 = vmatmul.mubr.msk.bf16.gmra.mxu1 %vm1723_vm2, %v12203_v15  ;;  %v4229_v15 = vpack.c.bf16 %v13835_v33, %v12344_v14  ;;  %v9862_v14 = vld [vmem:[#allocation5 + $0x118] ss:$8 sps:$4 sm:$0xff]  }
 0x398   :  { %4104 = vmatprep.mubr.bf16.mxu0 %v13838_v58  ;;  %4390 = vmatprep.mubr.bf16.mxu1 %v13838_v58 }
 0x399   :  { %4601 = vmatpush1.bf16.msra.mxu0 %v9847_v54  ;;  %v9871_v54 = vld [vmem:[#allocation5 + $0x1f0] ss:$8 sps:$4 sm:$0xff]  }
 0x39a   :  { %4602 = vmatprep.subr.bf16.mxu0 %v9852_v1 }
 0x39d   :  { %4603 = vmatpush1.bf16.msra.mxu0 %v9850_v29 }
 0x39e   :  { %4604 = vmatprep.subr.bf16.mxu0 %v9855_v16 }
 0x39f   :  { %8509 = vmatmul.mubr.msk.bf16.gmra.mxu0 %vm1723_vm2, %v12169_v25  ;;  %8536 = vmatmul.mubr.msk.bf16.gmra.mxu1 %vm1723_vm2, %v12231_v51  ;;  %v12427_v51 = vpop.f32.mrf.mxu1 }
 0x3a0   :  { %4114 = vmatprep.mubr.bf16.mxu0 %v13838_v58  ;;  %4400 = vmatprep.mubr.bf16.mxu1 %v13838_v58 }
 0x3a1   :  { %4605 = vmatpush1.bf16.msra.mxu0 %v9853_v7 }
 0x3a7   :  { %8510 = vmatmul.mubr.msk.bf16.gmra.mxu0 %vm1723_vm2, %v12201_v19  ;;  %8537 = vmatmul.mubr.msk.bf16.gmra.mxu1 %vm1723_vm2, %v12259_v57  ;;  %v12430_v57 = vpop.f32.mrf.mxu1 }
 0x3a8   :  { %4124 = vmatprep.mubr.bf16.mxu0 %v13838_v58  ;;  %4410 = vmatprep.mubr.bf16.mxu1 %v13838_v58 }
 0x3af   :  { %8511 = vmatmul.mubr.msk.bf16.gmra.mxu0 %vm1723_vm2, %v12229_v55  ;;  %8538 = vmatmul.mubr.msk.bf16.gmra.mxu1 %vm1723_vm2, %v12287_v36  ;;  %v12434_v36 = vpop.f32.mrf.mxu1 }
 0x3b0   :  { %4134 = vmatprep.mubr.bf16.mxu0 %v13838_v58  ;;  %4420 = vmatprep.mubr.bf16.mxu1 %v13838_v58 }
 0x3b7   :  { %8512 = vmatmul.mubr.msk.bf16.gmra.mxu0 %vm1723_vm2, %v12257_v22  ;;  %8539 = vmatmul.mubr.msk.bf16.gmra.mxu1 %vm1723_vm2, %v12313_v37  ;;  %v12437_v37 = vpop.f32.mrf.mxu1 }
 0x3b8   :  { %4144 = vmatprep.mubr.bf16.mxu0 %v13838_v58  ;;  %4430 = vmatprep.mubr.bf16.mxu1 %v13838_v58 }
 0x3bf   :  { %8513 = vmatmul.mubr.msk.bf16.gmra.mxu0 %vm1723_vm2, %v12285_v52  ;;  %8540 = vmatmul.mubr.msk.bf16.gmra.mxu1 %vm1723_vm2, %v12333_v63 }
 0x3c0   :  { %4154 = vmatprep.mubr.bf16.mxu0 %v13838_v58  ;;  %4440 = vmatprep.mubr.bf16.mxu1 %v13838_v58 }
 0x3c7   :  { %8514 = vmatmul.mubr.msk.bf16.gmra.mxu0 %vm1723_vm2, %v12311_v43  ;;  %8541 = vmatmul.mubr.msk.bf16.gmra.mxu1 %vm1723_vm2, %v12348_v20  ;;  %v9865_v20 = vld [vmem:[#allocation5 + $0x200] ss:$8 sps:$4 sm:$0xff]  }
 0x3c8   :  { %4164 = vmatprep.mubr.bf16.mxu0 %v13838_v58  ;;  %4450 = vmatprep.mubr.bf16.mxu1 %v13838_v58 }
 0x3cf   :  { %8515 = vmatmul.mubr.msk.bf16.gmra.mxu0 %vm1723_vm2, %v12331_v35  ;;  %8542 = vmatmul.mubr.msk.bf16.gmra.mxu1 %vm1723_vm2, %v4229_v15  ;;  %v9876_v15 = vld [vmem:[#allocation5 + $0xfc] ss:$8 sps:$4 sm:$0xff]  }
 0x3d0   :  { %4174 = vmatprep.mubr.bf16.mxu0 %v13838_v58 }
 0x3d7   :  { %8516 = vmatmul.mubr.msk.bf16.gmra.mxu0 %vm1723_vm2, %v12351_v30 }
 0x3d8   :  { %4622 = vmatprep.mubr.bf16.mxu0 %v13838_v58 }
 0x3df   :  { %8558 = vmatmul.mubr.msk.bf16.vlgmr.msra.gmra.mxu0 %vm1723_vm2, %v12108_v59 }
 0x3e0   :  { %4632 = vmatprep.mubr.bf16.mxu0 %v13838_v58 }
 0x3e7   :  { %8559 = vmatmul.mubr.msk.bf16.gmra.mxu0 %vm1723_vm2, %v12139_v11 }
 0x3e8   :  { %4642 = vmatprep.mubr.bf16.mxu0 %v13838_v58 }
 0x3ef   :  { %v12439_v56 = vpop.f32.mrf.mxu0  ;;  %v3854_v47 = vpop.f32.mrf.mxu1  ;;  %8560 = vmatmul.mubr.msk.bf16.gmra.mxu0 %vm1723_vm2, %v12169_v25 }
 0x3f0   :  { %4652 = vmatprep.mubr.bf16.mxu0 %v13838_v58 }
 0x3f1   :  { %v12444_v59 = vpop.f32.mrf.mxu0  ;;  %v3856_v17 = vpop.f32.mrf.mxu1 }
 0x3f3   :  { %v12446_v39 = vpop.f32.mrf.mxu0  ;;  %v3858_v11 = vpop.f32.mrf.mxu1 }
 0x3f5   :  { %v12448_v12 = vpop.f32.mrf.mxu0  ;;  %v12450_v60 = vpop.f32.mrf.mxu1 }
 0x3f7   :  { %v3610_v50 = vpop.f32.mrf.mxu0  ;;  %v3864_v23 = vpop.f32.mrf.mxu1  ;;  %8561 = vmatmul.mubr.msk.bf16.gmra.mxu0 %vm1723_vm2, %v12201_v19  ;;  %v9861_v19 = vld [vmem:[#allocation5 + $0x12c] ss:$8 sps:$4 sm:$0xff]  }
 0x3f8   :  { %v12454_v25 = vadd.f32 %v3854_v47, %v3610_v50  ;;  %4662 = vmatprep.mubr.bf16.mxu0 %v13838_v58  ;;  %5147 = vmatprep.subr.bf16.mxu1 %v9861_v19  ;;  %v9879_v47 = vld [vmem:[#allocation5 + $0x1e4] ss:$8 sps:$4 sm:$0xff]   ;;  %v9883_v19 = vld [vmem:[#allocation5 + $0x1d0] ss:$8 sps:$4 sm:$0xff]  }
 0x3f9   :  { %v3612_v5 = vpop.f32.mrf.mxu0  ;;  %v3866_v21 = vpop.f32.mrf.mxu1  ;;  %5148 = vmatpush1.bf16.msra.mxu1 %v9859_v6  ;;  %v9880_v6 = vld [vmem:[#allocation5 + $0xe8] ss:$8 sps:$4 sm:$0xff]  }
 0x3fa   :  { %v12457_v49 = vadd.f32 %v3856_v17, %v3612_v5  ;;  %5149 = vmatprep.subr.bf16.mxu1 %v9864_v2  ;;  %v9874_v17 = vld [vmem:[#allocation5 + $0xf8] ss:$8 sps:$4 sm:$0xff]  }
 0x3fb   :  { %v3614_v53 = vpop.f32.mrf.mxu0  ;;  %v3868_v44 = vpop.f32.mrf.mxu1  ;;  %v9889_v2 = vld [vmem:[#allocation5 + $0x1c0] ss:$8 sps:$4 sm:$0xff]  }
 0x3fc   :  { %v12459_v48 = vadd.f32 %v3858_v11, %v3614_v53  ;;  %v9877_v11 = vld [vmem:[#allocation5 + $0x1e0] ss:$8 sps:$4 sm:$0xff]   ;;  %v9885_v53 = vld [vmem:[#allocation5 + $0x1d4] ss:$8 sps:$4 sm:$0xff]  }
 0x3fd   :  { %v12461_v40 = vpop.f32.mrf.mxu0  ;;  %v12463_v26 = vpop.f32.mrf.mxu1  ;;  %5150 = vmatpush1.bf16.msra.mxu1 %v9862_v14  ;;  %v9886_v14 = vld [vmem:[#allocation5 + $0xd8] ss:$8 sps:$4 sm:$0xff]  }
 0x3fe   :  { %5151 = vmatprep.subr.bf16.mxu1 %v9870_v13  ;;  %v9897_v13 = vld [vmem:[#allocation5 + $0x1b4] ss:$8 sps:$4 sm:$0xff]  }
 0x3ff   :  { %v3620_v62 = vpop.f32.mrf.mxu0  ;;  %v3874_v41 = vpop.f32.mrf.mxu1  ;;  %8562 = vmatmul.mubr.msk.bf16.gmra.mxu0 %vm1723_vm2, %v12229_v55  ;;  %v9867_v55 = vld [vmem:[#allocation5 + $0x204] ss:$8 sps:$4 sm:$0xff]  }
 0x400   :  { %v12467_v63 = vadd.f32 %v3864_v23, %v3620_v62  ;;  %4672 = vmatprep.mubr.bf16.mxu0 %v13838_v58  ;;  %5642 = vmatprep.subr.bf16.mxu0 %v9867_v55 }
 0x401   :  { %v3622_v24 = vpop.f32.mrf.mxu0  ;;  %v3876_v4 = vpop.f32.mrf.mxu1  ;;  %5643 = vmatpush1.bf16.msra.mxu0 %v9865_v20  ;;  %5152 = vmatpush1.bf16.msra.mxu1 %v9868_v28  ;;  %v9892_v28 = vld [vmem:[#allocation5 + $0xc8] ss:$8 sps:$4 sm:$0xff]  }
 0x402   :  { %v12470_v31 = vadd.f32 %v3866_v21, %v3622_v24  ;;  %5644 = vmatprep.subr.bf16.mxu0 %v9873_v32  ;;  %5153 = vmatprep.subr.bf16.mxu1 %v9876_v15  ;;  %v9882_v21 = vld [vmem:[#allocation5 + $0xec] ss:$8 sps:$4 sm:$0xff]  }
 0x403   :  { %v3624_v42 = vpop.f32.mrf.mxu0  ;;  %v3878_v8 = vpop.f32.mrf.mxu1  ;;  %v4994_v15 = vld [vmem:[#allocation5 + $0x188] sm:$0xff] }
 0x404   :  { %v12472_v61 = vadd.f32 %v3868_v44, %v3624_v42  ;;  %v9888_v42 = vld [vmem:[#allocation5 + $0xdc] ss:$8 sps:$4 sm:$0xff]  }
 0x405   :  { %v12474_v18 = vpop.f32.mrf.mxu0  ;;  %v12476_v45 = vpop.f32.mrf.mxu1  ;;  %5645 = vmatpush1.bf16.msra.mxu0 %v9871_v54  ;;  %5154 = vmatpush1.bf16.msra.mxu1 %v9874_v17  ;;  %v9895_v54 = vld [vmem:[#allocation5 + $0x1b0] ss:$8 sps:$4 sm:$0xff]  }
 0x406   :  { %5646 = vmatprep.subr.bf16.mxu0 %v9879_v47  ;;  %5155 = vmatprep.subr.bf16.mxu1 %v9882_v21 }
 0x407   :  { %v3630_v46 = vpop.f32.mrf.mxu0  ;;  %v3884_v10 = vpop.f32.mrf.mxu1  ;;  %8563 = vmatmul.mubr.msk.bf16.gmra.mxu0 %vm1723_vm2, %v12257_v22 }
 0x408   :  { %v12480_v0 = vadd.f32 %v3874_v41, %v3630_v46  ;;  %4682 = vmatprep.mubr.bf16.mxu0 %v13838_v58 }
 0x409   :  { %v3632_v34 = vpop.f32.mrf.mxu0  ;;  %v3886_v27 = vpop.f32.mrf.mxu1  ;;  %5647 = vmatpush1.bf16.msra.mxu0 %v9877_v11  ;;  %5156 = vmatpush1.bf16.msra.mxu1 %v9880_v6  ;;  %v8593_v11 = vcombine.high %v4994_v15, %v4994_v15 }
 0x40a   :  { %v12483_v3 = vadd.f32 %v3876_v4, %v3632_v34  ;;  %5648 = vmatprep.subr.bf16.mxu0 %v9885_v53  ;;  %5157 = vmatprep.subr.bf16.mxu1 %v9888_v42  ;;  %v9908_v42 = vld [vmem:[#allocation5 + $0x194] ss:$8 sps:$4 sm:$0xff]  }
 0x40b   :  { %v3634_v1 = vpop.f32.mrf.mxu0  ;;  %v3888_v29 = vpop.f32.mrf.mxu1 }
 0x40c   :  { %v12485_v22 = vadd.f32 %v3878_v8, %v3634_v1  ;;  %v9891_v8 = vld [vmem:[#allocation5 + $0x1c4] ss:$8 sps:$4 sm:$0xff]  }
 0x40d   :  { %v12487_v16 = vpop.f32.mrf.mxu0  ;;  %v12489_v7 = vpop.f32.mrf.mxu1  ;;  %5649 = vmatpush1.bf16.msra.mxu0 %v9883_v19  ;;  %5158 = vmatpush1.bf16.msra.mxu1 %v9886_v14  ;;  %v9903_v14 = vld [vmem:[#allocation5 + $0x178] ss:$8 sps:$4 sm:$0xff]  }
 0x40e   :  { %13892 = vst [vmem:[#allocation14_spill] sm:$0xff] %v12489_v7  ;;  %5650 = vmatprep.subr.bf16.mxu0 %v9891_v8 }
 0x40f   :  { %v3640_v38 = vpop.f32.mrf.mxu0  ;;  %v3894_v9 = vpop.f32.mrf.mxu1  ;;  %8564 = vmatmul.mubr.msk.bf16.gmra.mxu0 %vm1723_vm2, %v12285_v52 }
 0x410   :  { %v12493_v50 = vadd.f32 %v3884_v10, %v3640_v38  ;;  %4692 = vmatprep.mubr.bf16.mxu0 %v13838_v58  ;;  %v9901_v38 = vld [vmem:[#allocation5 + $0x1a4] ss:$8 sps:$4 sm:$0xff]  }
 0x411   :  { %v3642_v23 = vpop.f32.mrf.mxu0  ;;  %v3896_v5 = vpop.f32.mrf.mxu1  ;;  %5651 = vmatpush1.bf16.msra.mxu0 %v9889_v2  ;;  %v9906_v2 = vld [vmem:[#allocation5 + $0x190] ss:$8 sps:$4 sm:$0xff]  }
 0x412   :  { %v12496_v44 = vadd.f32 %v3886_v27, %v3642_v23  ;;  %v9894_v27 = vld [vmem:[#allocation5 + $0xcc] ss:$8 sps:$4 sm:$0xff]   ;;  %5652 = vmatprep.subr.bf16.mxu0 %v9897_v13  ;;  %v9899_v23 = vld [vmem:[#allocation5 + $0x1a0] ss:$8 sps:$4 sm:$0xff]  }
 0x413   :  { %v3644_v62 = vpop.f32.mrf.mxu0  ;;  %v3898_v41 = vpop.f32.mrf.mxu1  ;;  %5159 = vmatprep.subr.bf16.mxu1 %v9894_v27 }
 0x414   :  { %v12498_v52 = vadd.f32 %v3888_v29, %v3644_v62  ;;  %5160 = vmatpush1.bf16.msra.mxu1 %v9892_v28  ;;  %v9911_v28 = vld [vmem:[#allocation5 + $0x16c] ss:$8 sps:$4 sm:$0xff]  }
 0x415   :  { %v12500_v24 = vpop.f32.mrf.mxu0  ;;  %v12502_v4 = vpop.f32.mrf.mxu1  ;;  %5653 = vmatpush1.bf16.msra.mxu0 %v9895_v54  ;;  %8594 = vmatprep.subr.msk.bf16.mxu1 %vm5138_vm3, %v8593_v11 }
 0x416   :  { %13893 = vst [vmem:[#allocation39_spill] sm:$0xff] %v12500_v24  ;;  %13894 = vst [vmem:[#allocation37_spill] sm:$0xff] %v12502_v4  ;;  %5654 = vmatprep.subr.bf16.mxu0 %v9901_v38 }
 0x417   :  { %v3650_v55 = vpop.f32.mrf.mxu0  ;;  %v3904_v20 = vpop.f32.mrf.mxu1  ;;  %8565 = vmatmul.mubr.msk.bf16.gmra.mxu0 %vm1723_vm2, %v12311_v43 }
 0x418   :  { %v12506_v46 = vadd.f32 %v3894_v9, %v3650_v55  ;;  %4702 = vmatprep.mubr.bf16.mxu0 %v13838_v58  ;;  %v8592_v9 = vcombine.low %v4994_v15, %v4994_v15 }
 0x419   :  { %v3652_v10 = vpop.f32.mrf.mxu0  ;;  %v3906_v34 = vpop.f32.mrf.mxu1  ;;  %5655 = vmatpush1.bf16.msra.mxu0 %v9899_v23 }
 0x41a   :  { %v12509_v32 = vadd.f32 %v3896_v5, %v3652_v10  ;;  %v5140_v53 = vsel %vm5138_vm3, %v8592_v9, 0  ;;  %5656 = vmatprep.subr.bf16.mxu0 %v9908_v42  ;;  %v9917_v42 = vld [vmem:[#allocation5 + $0x240] ss:$8 sps:$4 sm:$0xff]  }
 0x41b   :  { %v3654_v1 = vpop.f32.mrf.mxu0  ;;  %v3908_v29 = vpop.f32.mrf.mxu1  ;;  %5168 = vmatpush2.bf16.msra.mxu1 %v5140_v53  ;;  %v9919_v53 = vld [vmem:[#allocation5 + $0x244] ss:$8 sps:$4 sm:$0xff]  }
 0x41c   :  { %v12511_v43 = vadd.f32 %v3898_v41, %v3654_v1  ;;  %v9905_v41 = vld [vmem:[#allocation5 + $0x17c] ss:$8 sps:$4 sm:$0xff]  }
 0x41d   :  { %v12513_v47 = vpop.f32.mrf.mxu0  ;;  %v12515_v17 = vpop.f32.mrf.mxu1  ;;  %5169 = vmatprep.subr.bf16.mxu1 %v9905_v41  ;;  %5657 = vmatpush1.bf16.msra.mxu0 %v9906_v2  ;;  %v9914_v41 = vld [vmem:[#allocation5 + $0x158] ss:$8 sps:$4 sm:$0xff]  }
 0x41e   :  { %13895 = vst [vmem:[#allocation15_spill] sm:$0xff] %v12513_v47  ;;  %13896 = vst [vmem:[#allocation27_spill] sm:$0xff] %v12515_v17 }
 0x41f   :  { %v3660_v5 = vpop.f32.mrf.mxu0  ;;  %v3914_v21 = vpop.f32.mrf.mxu1  ;;  %8566 = vmatmul.mubr.msk.bf16.gmra.mxu0 %vm1723_vm2, %v12331_v35  ;;  %5170 = vmatpush2.bf16.msra.mxu1 %v9903_v14 }
 0x420   :  { %v12521_v6 = vadd.f32 %v3904_v20, %v3660_v5  ;;  %4712 = vmatprep.mubr.bf16.mxu0 %v13838_v58  ;;  %v5504_v20 = vld [vmem:[#allocation5 + $0x250] sm:$0xff]  ;;  %5171 = vmatprep.subr.bf16.mxu1 %v9911_v28  ;;  %v9916_v5 = vld [vmem:[#allocation5 + $0x15c] ss:$8 sps:$4 sm:$0xff]  }
 0x421   :  { %v3662_v19 = vpop.f32.mrf.mxu0  ;;  %v3916_v62 = vpop.f32.mrf.mxu1  ;;  %v8658_v54 = vcombine.high %v5504_v20, %v5504_v20  ;;  %v8657_v1 = vcombine.low %v5504_v20, %v5504_v20  ;;  %v9922_v20 = vld [vmem:[#allocation5 + $0x14c] ss:$8 sps:$4 sm:$0xff]  }
 0x422   :  { %v12524_v8 = vadd.f32 %v3906_v34, %v3662_v19  ;;  %v9909_v34 = vld [vmem:[#allocation5 + $0x168] ss:$8 sps:$4 sm:$0xff]   ;;  %v9925_v28 = vld [vmem:[#allocation5 + $0x234] ss:$8 sps:$4 sm:$0xff]  }
 0x423   :  { %v3664_v35 = vpop.f32.mrf.mxu0  ;;  %v3918_v55 = vpop.f32.mrf.mxu1  ;;  %8659 = vmatprep.subr.msk.bf16.mxu0 %vm5138_vm3, %v8658_v54  ;;  %5172 = vmatpush2.bf16.msra.mxu1 %v9909_v34  ;;  %v9920_v54 = vld [vmem:[#allocation5 + $0x148] ss:$8 sps:$4 sm:$0xff]  }
 0x424   :  { %v12526_v10 = vadd.f32 %v3908_v29, %v3664_v35  ;;  %v5637_v29 = vsel %vm5138_vm3, %v8657_v1, 0  ;;  %5173 = vmatprep.subr.bf16.mxu1 %v9916_v5  ;;  %v9923_v1 = vld [vmem:[#allocation5 + $0x230] ss:$8 sps:$4 sm:$0xff]   ;;  %v9928_v5 = vld [vmem:[#allocation5 + $0x224] ss:$8 sps:$4 sm:$0xff]  }
 0x425   :  { %v12528_v27 = vpop.f32.mrf.mxu0  ;;  %v12530_v13 = vpop.f32.mrf.mxu1  ;;  %5665 = vmatpush2.bf16.msra.mxu0 %v5637_v29 }
 0x426   :  { %13897 = vst [vmem:[#allocation26_spill] sm:$0xff] %v12528_v27  ;;  %13898 = vst [vmem:[#allocation40_spill] sm:$0xff] %v12530_v13  ;;  %5666 = vmatprep.subr.bf16.mxu0 %v9919_v53 }
 0x427   :  { %v3670_v15 = vpop.f32.mrf.mxu0  ;;  %v3924_v11 = vpop.f32.mrf.mxu1  ;;  %8567 = vmatmul.mubr.msk.bf16.gmra.mxu0 %vm1723_vm2, %v12351_v30  ;;  %5174 = vmatpush2.bf16.msra.mxu1 %v9914_v41  ;;  %v9926_v41 = vld [vmem:[#allocation5 + $0x220] ss:$8 sps:$4 sm:$0xff]  }
 0x428   :  { %v12535_v38 = vadd.f32 %v3914_v21, %v3670_v15  ;;  %4722 = vmatprep.mubr.bf16.mxu0 %v13838_v58  ;;  %v13901_v15 = vmov 0.0|0.0   ;;  %5175 = vmatprep.subr.bf16.mxu1 %v9922_v20  ;;  %v9929_v20 = vld [vmem:[#allocation5 + $0x210] ss:$8 sps:$4 sm:$0xff]  }
 0x429   :  { %v3672_v9 = vpop.f32.mrf.mxu0  ;;  %v3926_v23 = vpop.f32.mrf.mxu1  ;;  %5667 = vmatpush2.bf16.msra.mxu0 %v9917_v42 }
 0x42a   :  { %v12539_v19 = vadd.f32 %v3916_v62, %v3672_v9  ;;  %5668 = vmatprep.subr.bf16.mxu0 %v9925_v28 }
 0x42b   :  { %v3674_v30 = vpop.f32.mrf.mxu0  ;;  %v3928_v14 = vpop.f32.mrf.mxu1  ;;  %5176 = vmatpush2.bf16.msra.mxu1 %v9920_v54 }
 0x42c   :  { %v12541_v21 = vadd.f32 %v3918_v55, %v3674_v30 }
 0x42d   :  { %v12543_v2 = vpop.f32.mrf.mxu0  ;;  %v12545_v35 = vpop.f32.mrf.mxu1  ;;  %5669 = vmatpush2.bf16.msra.mxu0 %v9923_v1 }
 0x42e   :  { %13899 = vst [vmem:[#allocation43_spill] sm:$0xff] %v12543_v2  ;;  %13900 = vst [vmem:[#allocation41_spill] sm:$0xff] %v12545_v35  ;;  %5670 = vmatprep.subr.bf16.mxu0 %v9928_v5 }
 0x42f   :  { %v3680_v62 = vpop.f32.mrf.mxu0  ;;  %v3934_v34 = vpop.f32.mrf.mxu1  ;;  %4723 = vmatmul.mubr.bf16.gmra.mxu0 %v13901_v15 }
 0x430   :  { %v12548_v29 = vadd.f32 %v3924_v11, %v3680_v62  ;;  %v9931_v11 = vld [vmem:[#allocation5 + $0x214] ss:$8 sps:$4 sm:$0xff]  }
 0x431   :  { %v3682_v55 = vpop.f32.mrf.mxu0  ;;  %v3936_v9 = vpop.f32.mrf.mxu1  ;;  %5671 = vmatpush2.bf16.msra.mxu0 %v9926_v41 }
 0x432   :  { %v12550_v53 = vadd.f32 %v3926_v23, %v3682_v55  ;;  %5672 = vmatprep.subr.bf16.mxu0 %v9931_v11 }
 0x433   :  { %v3684_v42 = vpop.f32.mrf.mxu0  ;;  %v3938_v30 = vpop.f32.mrf.mxu1 }
 0x434   :  { %v12552_v58 = vadd.f32 %v3928_v14, %v3684_v42 }
 0x435   :  { %v12554_v35 = vpop.f32.mrf.mxu0  ;;  %v12556_v15 = vpop.f32.mrf.mxu1  ;;  %5673 = vmatpush2.bf16.msra.mxu0 %v9929_v20 }
 0x436   :  { %13902 = vst [vmem:[#allocation42_spill] sm:$0xff] %v12554_v35  ;;  %13903 = vst [vmem:[#allocation28_spill] sm:$0xff] %v12556_v15 }
 0x437   :  { %v3690_v28 = vpop.f32.mrf.mxu0  ;;  %v3944_v62 = vpop.f32.mrf.mxu1 }
 0x438   :  { %v12558_v54 = vadd.f32 %v3934_v34, %v3690_v28 }
 0x439   :  { %v3692_v23 = vpop.f32.mrf.mxu0  ;;  %v3946_v55 = vpop.f32.mrf.mxu1 }
 0x43a   :  { %v12560_v1 = vadd.f32 %v3936_v9, %v3692_v23 }
 0x43b   :  { %v3694_v5 = vpop.f32.mrf.mxu0  ;;  %v3948_v35 = vpop.f32.mrf.mxu1 }
 0x43c   :  { %v12562_v14 = vadd.f32 %v3938_v30, %v3694_v5  ;;  %v3845_v30 = vadd.f32 %v12427_v51, %v12439_v56  ;;  %v9934_v51 = vld [vmem:[#allocation5 + $0x74] ss:$8 sps:$4 sm:$0xff]  }
 0x43d   :  { %v12564_v42 = vpop.f32.mrf.mxu0  ;;  %v12568_v2 = vpop.f32.mrf.mxu1  ;;  %5384 = vmatprep.subr.bf16.mxu1 %v9934_v51 }
 0x43e   :  { %13904 = vst [vmem:[#allocation10_spill] sm:$0xff] %v12564_v42  ;;  %13905 = vst [vmem:[#allocation16_spill] sm:$0xff] %v12568_v2 }
 0x43f   :  { %v3700_v15 = vpop.f32.mrf.mxu0  ;;  %v12578_v20 = vpop.f32.mrf.mxu1 }
 0x440   :  { %v12566_v41 = vadd.f32 %v3944_v62, %v3700_v15  ;;  %v3847_v15 = vadd.f32 %v12430_v57, %v12444_v59 }
 0x441   :  { %v3702_v13 = vpop.f32.mrf.mxu0 }
 0x442   :  { %v12570_v11 = vadd.f32 %v3946_v55, %v3702_v13  ;;  %v3849_v13 = vadd.f32 %v12434_v36, %v12446_v39  ;;  %v12586_v55 = vpop.f32.mrf.mxu1 }
 0x443   :  { %v3704_v34 = vpop.f32.mrf.mxu0 }
 0x444   :  { %v12572_v28 = vadd.f32 %v3948_v35, %v3704_v34 }
 0x445   :  { %v12574_v9 = vpop.f32.mrf.mxu0 }
 0x446   :  { %13906 = vst [vmem:[#allocation44_spill] sm:$0xff] %v12574_v9  ;;  %v12594_v9 = vpop.f32.mrf.mxu1 }
 0x447   :  { %v4076_v23 = vpop.f32.mrf.mxu0 }
 0x448   :  { %v12582_v62 = vadd.f32 %v4076_v23, %v3845_v30  ;;  %v12599_v23 = vpop.f32.mrf.mxu1 }
 0x449   :  { %v4078_v5 = vpop.f32.mrf.mxu0 }
 0x44a   :  { %v12588_v35 = vadd.f32 %v4078_v5, %v3847_v15 }
 0x44b   :  { %v4080_v34 = vpop.f32.mrf.mxu0 }
 0x44c   :  { %v12590_v2 = vadd.f32 %v4080_v34, %v3849_v13  ;;  %v9943_v13 = vld [vmem:[#allocation5 + $0x394] ss:$8 sps:$4 sm:$0xff]   ;;  %v12609_v34 = vpop.f32.mrf.mxu1 }
 0x44d   :  { %v12592_v56 = vpop.f32.mrf.mxu0  ;;  %6192 = vmatprep.subr.bf16.mxu0 %v9943_v13 }
 0x44e   :  { %v12614_v42 = vpop.f32.mrf.mxu1 }
 0x44f   :  { %v4086_v57 = vpop.f32.mrf.mxu0 }
 0x450   :  { %v12597_v59 = vadd.f32 %v4086_v57, %v12454_v25  ;;  %v12624_v17 = vpop.f32.mrf.mxu1 }
 0x451   :  { %v4088_v30 = vpop.f32.mrf.mxu0 }
 0x452   :  { %v12602_v36 = vadd.f32 %v4088_v30, %v12457_v49 }
 0x453   :  { %v4090_v39 = vpop.f32.mrf.mxu0 }
 0x454   :  { %v12605_v15 = vadd.f32 %v4090_v39, %v12459_v48 }
 0x455   :  { %v12607_v5 = vpop.f32.mrf.mxu0 }
 0x457   :  { %v4096_v51 = vpop.f32.mrf.mxu0 }
 0x458   :  { %v12612_v25 = vadd.f32 %v4096_v51, %v12467_v63  ;;  %v12629_v51 = vpop.f32.mrf.mxu1 }
 0x459   :  { %v4098_v57 = vpop.f32.mrf.mxu0 }
 0x45a   :  { %v12617_v49 = vadd.f32 %v4098_v57, %v12470_v31 }
 0x45b   :  { %v4100_v30 = vpop.f32.mrf.mxu0 }
 0x45c   :  { %v12620_v48 = vadd.f32 %v4100_v30, %v12472_v61  ;;  %v12639_v30 = vpop.f32.mrf.mxu1 }
 0x45d   :  { %v12622_v39 = vpop.f32.mrf.mxu0 }
 0x45f   :  { %v4106_v27 = vpop.f32.mrf.mxu0 }
 0x460   :  { %v12627_v13 = vadd.f32 %v4106_v27, %v12480_v0  ;;  %v12644_v27 = vpop.f32.mrf.mxu1 }
 0x461   :  { %v4108_v63 = vpop.f32.mrf.mxu0 }
 0x462   :  { %v12632_v4 = vadd.f32 %v4108_v63, %v12483_v3 }
 0x463   :  { %v4110_v31 = vpop.f32.mrf.mxu0 }
 0x464   :  { %13907 = vst [vmem:[#allocation17_spill] sm:$0xff] %v12632_v4  ;;  %v12635_v57 = vadd.f32 %v4110_v31, %v12485_v22  ;;  %v12654_v31 = vpop.f32.mrf.mxu1 }
 0x465   :  { %v12637_v61 = vpop.f32.mrf.mxu0 }
 0x466   :  { %13908 = vst [vmem:[#allocation45_spill] sm:$0xff] %v12635_v57 }
 0x467   :  { %v4116_v47 = vpop.f32.mrf.mxu0 }
 0x468   :  { %v12642_v7 = vadd.f32 %v4116_v47, %v12493_v50  ;;  %v12659_v47 = vpop.f32.mrf.mxu1 }
 0x469   :  { %v4118_v0 = vpop.f32.mrf.mxu0 }
 0x46a   :  { %13909 = vst [vmem:[#allocation46_spill] sm:$0xff] %v12642_v7  ;;  %v12647_v24 = vadd.f32 %v4118_v0, %v12496_v44 }
 0x46b   :  { %v4120_v3 = vpop.f32.mrf.mxu0 }
 0x46c   :  { %13910 = vst [vmem:[#allocation11_spill] sm:$0xff] %v12647_v24  ;;  %v12650_v63 = vadd.f32 %v4120_v3, %v12498_v52  ;;  %v12669_v3 = vpop.f32.mrf.mxu1 }
 0x46d   :  { %v12652_v22 = vpop.f32.mrf.mxu0 }
 0x46e   :  { %13911 = vst [vmem:[#allocation29_spill] sm:$0xff] %v12650_v63 }
 0x46f   :  { %v4126_v57 = vpop.f32.mrf.mxu0 }
 0x470   :  { %v12657_v4 = vadd.f32 %v4126_v57, %v12506_v46  ;;  %v12674_v57 = vpop.f32.mrf.mxu1 }
 0x471   :  { %v4128_v50 = vpop.f32.mrf.mxu0 }
 0x472   :  { %13912 = vst [vmem:[#allocation47_spill] sm:$0xff] %v12657_v4  ;;  %v12662_v7 = vadd.f32 %v4128_v50, %v12509_v32 }
 0x473   :  { %v4130_v44 = vpop.f32.mrf.mxu0 }
 0x474   :  { %13913 = vst [vmem:[#allocation48_spill] sm:$0xff] %v12662_v7  ;;  %v12665_v0 = vadd.f32 %v4130_v44, %v12511_v43  ;;  %v12684_v44 = vpop.f32.mrf.mxu1 }
 0x475   :  { %v12667_v52 = vpop.f32.mrf.mxu0 }
 0x476   :  { %13914 = vst [vmem:[#allocation49_spill] sm:$0xff] %v12665_v0 }
 0x477   :  { %v4136_v63 = vpop.f32.mrf.mxu0 }
 0x478   :  { %v12672_v24 = vadd.f32 %v4136_v63, %v12521_v6  ;;  %v12689_v63 = vpop.f32.mrf.mxu1 }
 0x479   :  { %v4138_v46 = vpop.f32.mrf.mxu0 }
 0x47a   :  { %13915 = vst [vmem:[#allocation18_spill] sm:$0xff] %v12672_v24  ;;  %v12677_v4 = vadd.f32 %v4138_v46, %v12524_v8 }
 0x47b   :  { %v4140_v32 = vpop.f32.mrf.mxu0 }
 0x47c   :  { %13916 = vst [vmem:[#allocation19_spill] sm:$0xff] %v12677_v4  ;;  %v12680_v50 = vadd.f32 %v4140_v32, %v12526_v10  ;;  %v12699_v32 = vpop.f32.mrf.mxu1 }
 0x47d   :  { %v12682_v43 = vpop.f32.mrf.mxu0 }
 0x47e   :  { %13917 = vst [vmem:[#allocation30_spill] sm:$0xff] %v12680_v50 }
 0x47f   :  { %v4146_v0 = vpop.f32.mrf.mxu0 }
 0x480   :  { %v12687_v7 = vadd.f32 %v4146_v0, %v12535_v38  ;;  %v12704_v0 = vpop.f32.mrf.mxu1 }
 0x481   :  { %v4148_v6 = vpop.f32.mrf.mxu0 }
 0x482   :  { %13918 = vst [vmem:[#allocation31_spill] sm:$0xff] %v12687_v7  ;;  %v12692_v24 = vadd.f32 %v4148_v6, %v12539_v19 }
 0x483   :  { %v4150_v8 = vpop.f32.mrf.mxu0 }
 0x484   :  { %13919 = vst [vmem:[#allocation51_spill] sm:$0xff] %v12692_v24  ;;  %v12695_v46 = vadd.f32 %v4150_v8, %v12541_v21  ;;  %v12714_v8 = vpop.f32.mrf.mxu1 }
 0x485   :  { %v12697_v10 = vpop.f32.mrf.mxu0 }
 0x486   :  { %13920 = vst [vmem:[#allocation50_spill] sm:$0xff] %v12695_v46 }
 0x487   :  { %v4156_v50 = vpop.f32.mrf.mxu0 }
 0x488   :  { %v12702_v4 = vadd.f32 %v4156_v50, %v12548_v29  ;;  %v12719_v50 = vpop.f32.mrf.mxu1 }
 0x489   :  { %v4158_v38 = vpop.f32.mrf.mxu0 }
 0x48a   :  { %13921 = vst [vmem:[#allocation53_spill] sm:$0xff] %v12702_v4  ;;  %v12707_v7 = vadd.f32 %v4158_v38, %v12550_v53  ;;  %v4779_v38 = vlaneseq }
 0x48b   :  { %v4160_v19 = vpop.f32.mrf.mxu0 }
 0x48c   :  { %13922 = vst [vmem:[#allocation52_spill] sm:$0xff] %v12707_v7  ;;  %v12710_v6 = vadd.f32 %v4160_v19, %v12552_v58  ;;  %v12729_v19 = vpop.f32.mrf.mxu1 }
 0x48d   :  { %v12712_v21 = vpop.f32.mrf.mxu0 }
 0x48e   :  { %13923 = vst [vmem:[#allocation54_spill] sm:$0xff] %v12710_v6  ;;  %13924 = vst [vmem:[#allocation32_spill] sm:$0xff] %v12712_v21  ;;  %v12731_v21 = vshrl.u32 %v4779_v38, 7  ;;  %v4777_v38 = vld [vmem:[%s13644_s6] sm:$0x3] }
 0x48f   :  { %v4166_v46 = vpop.f32.mrf.mxu0 }
 0x490   :  { %v12717_v24 = vadd.f32 %v4166_v46, %v12558_v54 }
 0x491   :  { %v4168_v29 = vpop.f32.mrf.mxu0 }
 0x492   :  { %13925 = vst [vmem:[#allocation12_spill] sm:$0xff] %v12717_v24  ;;  %v12722_v4 = vadd.f32 %v4168_v29, %v12560_v1  ;;  %v12736_v24 = vpop.f32.mrf.mxu1 }
 0x493   :  { %v4170_v53 = vpop.f32.mrf.mxu0 }
 0x494   :  { %13926 = vst [vmem:[#allocation20_spill] sm:$0xff] %v12722_v4  ;;  %v12725_v7 = vadd.f32 %v4170_v53, %v12562_v14  ;;  %v13661_v14 = vsub.s32 0, %v12731_v21 }
 0x495   :  { %v12727_v58 = vpop.f32.mrf.mxu0 }
 0x496   :  { %13927 = vst [vmem:[#allocation21_spill] sm:$0xff] %v12725_v7  ;;  %v4462_v7 = vadd.f32 %v12586_v55, %v12588_v35  ;;  %v3861_v55 = vadd.f32 %v12450_v60, %v12461_v40 }
 0x497   :  { %v4176_v6 = vpop.f32.mrf.mxu0 }
 0x498   :  { %v12734_v54 = vadd.f32 %v4176_v6, %v12566_v41  ;;  %v3851_v6 = vadd.f32 %v12437_v37, %v12448_v12 }
 0x499   :  { %v4178_v46 = vpop.f32.mrf.mxu0 }
 0x49a   :  { %13928 = vst [vmem:[#allocation56_spill] sm:$0xff] %v12734_v54  ;;  %v12739_v1 = vadd.f32 %v4178_v46, %v12570_v11  ;;  %v12753_v54 = vpop.f32.mrf.mxu1  ;;  %v4461_v11 = vadd.f32 %v12578_v20, %v12582_v62  ;;  %v4463_v20 = vadd.f32 %v12594_v9, %v12590_v2  ;;  %v4465_v2 = vadd.f32 %v12609_v34, %v12597_v59 }
 0x49b   :  { %v4180_v29 = vpop.f32.mrf.mxu0  ;;  %v4467_v59 = vadd.f32 %v12624_v17, %v12605_v15  ;;  %v4469_v15 = vadd.f32 %v12639_v30, %v12612_v25 }
 0x49c   :  { %13929 = vst [vmem:[#allocation55_spill] sm:$0xff] %v12739_v1  ;;  %v12743_v53 = vadd.f32 %v4180_v29, %v12572_v28  ;;  %v12759_v28 = vrot.slane %v4777_v38, %v13661_v14  ;;  %v4188_v29 = vadd.f32 %v12592_v56, %v3851_v6  ;;  %v13932_v1 = vsub.s32 1, %v12731_v21  ;;  %v12768_v12 = vpop.f32.mrf.mxu1 }
 0x49d   :  { %v12749_v41 = vpop.f32.mrf.mxu0 }
 0x49e   :  { %13930 = vst [vmem:[#allocation58_spill] sm:$0xff] %v12743_v53  ;;  %13931 = vst [vmem:[#allocation13_spill] sm:$0xff] %v12749_v41  ;;  %v12766_v41 = vrot.slane %v4777_v38, %v13932_v1  ;;  %v12777_v1 = vpop.f32.mrf.mxu1 }
 0x49f   :  { %v4624_v46 = vpop.f32.mrf.mxu0 }
 0x4a0   :  { %v4733_v53 = vadd.f32 %v4624_v46, %v4461_v11  ;;  %v4464_v11 = vadd.f32 %v12599_v23, %v4188_v29  ;;  %v4192_v46 = vadd.f32 %v12607_v5, %v3861_v55 }
 0x4a1   :  { %v4626_v37 = vpop.f32.mrf.mxu0 }
 0x4a2   :  { %v4734_v4 = vadd.f32 %v4626_v37, %v4462_v7  ;;  %v4789_v14 = vadd.f32 %v12759_v28, %v4733_v53 }
 0x4a3   :  { %v4628_v62 = vpop.f32.mrf.mxu0 }
 0x4a4   :  { %v4790_v56 = vadd.f32 %v12766_v41, %v4734_v4  ;;  %v4735_v6 = vadd.f32 %v4628_v62, %v4463_v20  ;;  %v4466_v4 = vadd.f32 %v12614_v42, %v12602_v36  ;;  %v4833_v53 = vmax.f32 %v4789_v14, 0.0  ;;  %v12786_v20 = vpop.f32.mrf.mxu1 }
 0x4a5   :  { %v4630_v35 = vpop.f32.mrf.mxu0  ;;  %v4468_v14 = vadd.f32 %v12629_v51, %v4192_v46 }
 0x4a6   :  { %v4791_v38 = vadd.f32 %v12759_v28, %v4735_v6  ;;  %v4736_v7 = vadd.f32 %v4630_v35, %v4464_v11  ;;  %v4834_v23 = vmax.f32 %v4790_v56, 0.0  ;;  %v3871_v56 = vadd.f32 %v12463_v26, %v12474_v18  ;;  %v9932_v26 = vld [vmem:[#allocation5 + $0x70] ss:$8 sps:$4 sm:$0xff]  }
 0x4a7   :  { %v4634_v9 = vpop.f32.mrf.mxu0 }
 0x4a8   :  { %v4835_v29 = vmax.f32 %v4791_v38, 0.0  ;;  %v4792_v60 = vadd.f32 %v12766_v41, %v4736_v7  ;;  %v4737_v40 = vadd.f32 %v4634_v9, %v4465_v2  ;;  %v4879_v11 = vsel %vm4878_vm4, %v4834_v23, -inf  ;;  %v12797_v2 = vpop.f32.mrf.mxu1 }
 0x4a9   :  { %v4636_v37 = vpop.f32.mrf.mxu0  ;;  %v4196_v9 = vadd.f32 %v12622_v39, %v3871_v56 }
 0x4aa   :  { %v4877_v62 = vmax.f32 %v4833_v53, %v4835_v29  ;;  %v4836_v6 = vmax.f32 %v4792_v60, 0.0  ;;  %v4738_v5 = vadd.f32 %v4636_v37, %v4466_v4  ;;  %v4793_v35 = vadd.f32 %v12759_v28, %v4737_v40  ;;  %v9937_v40 = vld [vmem:[#allocation5 + $0x64] ss:$8 sps:$4 sm:$0xff]   ;;  %v12809_v39 = vpop.f32.mrf.mxu1 }
 0x4ab   :  { %v4638_v34 = vpop.f32.mrf.mxu0  ;;  %v4470_v60 = vadd.f32 %v12644_v27, %v12617_v49  ;;  %v4472_v49 = vadd.f32 %v12659_v47, %v4196_v9  ;;  %v9935_v27 = vld [vmem:[#allocation5 + $0x60] ss:$8 sps:$4 sm:$0xff]  }
 0x4ac   :  { %v4880_v42 = vsel %vm4878_vm4, %v4836_v6, -inf  ;;  %v4794_v36 = vadd.f32 %v12766_v41, %v4738_v5  ;;  %v4739_v38 = vadd.f32 %v4638_v34, %v4467_v59  ;;  %v4957_v18 = vpack.c.bf16 %v4877_v62, %v13835_v33 }
 0x4ad   :  { %v4881_v55 = vmax.f32 %v4879_v11, %v4880_v42  ;;  %v4640_v7 = vpop.f32.mrf.mxu0  ;;  %v4837_v37 = vmax.f32 %v4793_v35, 0.0  ;;  %v4471_v59 = vadd.f32 %v12654_v31, %v12620_v48  ;;  %v3881_v48 = vadd.f32 %v12476_v45, %v12487_v16  ;;  %v9938_v45 = vld [vmem:[#allocation5 + $0x50] ss:$8 sps:$4 sm:$0xff]  }
 0x4ae   :  { %v4740_v17 = vadd.f32 %v4640_v7, %v4468_v14  ;;  %v4838_v4 = vmax.f32 %v4794_v36, 0.0  ;;  %v4795_v53 = vadd.f32 %v12759_v28, %v4739_v38  ;;  %v9940_v38 = vld [vmem:[#allocation5 + $0x54] ss:$8 sps:$4 sm:$0xff]   ;;  %v9941_v16 = vld [vmem:[#allocation5 + $0x390] ss:$8 sps:$4 sm:$0xff]  }
 0x4af   :  { %v4644_v51 = vpop.f32.mrf.mxu0  ;;  %v4958_v46 = vpack.c.bf16 %v4881_v55, %v13835_v33 }
 0x4b0   :  { %v4796_v23 = vadd.f32 %v12766_v41, %v4740_v17  ;;  %v4741_v29 = vadd.f32 %v4644_v51, %v4469_v15  ;;  %v4839_v25 = vmax.f32 %v4795_v53, 0.0  ;;  %v4883_v34 = vsel %vm4878_vm4, %v4838_v4, -inf  ;;  %v12822_v15 = vpop.f32.mrf.mxu1 }
 0x4b1   :  { %v4646_v30 = vpop.f32.mrf.mxu0  ;;  %8595 = vmatprep.mubr.msk.bf16.mxu1 %vm4878_vm4, %v4958_v46  ;;  %v4200_v4 = vadd.f32 %v12637_v61, %v3881_v48  ;;  %v4473_v53 = vadd.f32 %v12669_v3, %v12627_v13  ;;  %v13933_v46 = vld [vmem:[#allocation17_spill] sm:$0xff] }
 0x4b2   :  { %v4840_v6 = vmax.f32 %v4796_v23, 0.0  ;;  %v4742_v5 = vadd.f32 %v4646_v30, %v4470_v60  ;;  %5178 = vmatmul.mubr.bf16.vlgmr.msra.gmra.mxu1 %v4957_v18  ;;  %v4882_v11 = vmax.f32 %v4837_v37, %v4839_v25  ;;  %v4797_v14 = vadd.f32 %v12759_v28, %v4741_v29  ;;  %v9949_v61 = vld [vmem:[#allocation5 + $0x384] ss:$8 sps:$4 sm:$0xff]   ;;  %v12835_v13 = vpop.f32.mrf.mxu1 }
 0x4b3   :  { %v4648_v42 = vpop.f32.mrf.mxu0  ;;  %5385 = vmatpush1.bf16.msra.mxu1 %v9932_v26  ;;  %v4474_v26 = vadd.f32 %v12674_v57, %v13933_v46  ;;  %v13934_v30 = vld [vmem:[#allocation45_spill] sm:$0xff] }
 0x4b4   :  { %v4884_v36 = vsel %vm4878_vm4, %v4840_v6, -inf  ;;  %v4798_v56 = vadd.f32 %v12766_v41, %v4742_v5  ;;  %v4743_v35 = vadd.f32 %v4648_v42, %v4471_v59  ;;  %5386 = vmatprep.subr.bf16.mxu1 %v9937_v40  ;;  %v12820_v31 = vpack.c.bf16 %v4882_v11, %v4877_v62  ;;  %v9946_v62 = vld [vmem:[#allocation5 + $0x44] ss:$8 sps:$4 sm:$0xff]   ;;  %v9947_v42 = vld [vmem:[#allocation5 + $0x380] ss:$8 sps:$4 sm:$0xff]  }
 0x4b5   :  { %v4885_v7 = vmax.f32 %v4883_v34, %v4884_v36  ;;  %v4650_v17 = vpop.f32.mrf.mxu0  ;;  %v4841_v23 = vmax.f32 %v4797_v14, 0.0  ;;  %v4475_v6 = vadd.f32 %v12684_v44, %v13934_v30  ;;  %v4476_v59 = vadd.f32 %v12689_v63, %v4200_v4  ;;  %v9944_v34 = vld [vmem:[#allocation5 + $0x40] ss:$8 sps:$4 sm:$0xff]   ;;  %v9955_v44 = vld [vmem:[#allocation5 + $0x374] ss:$8 sps:$4 sm:$0xff]   ;;  %v12852_v4 = vpop.f32.mrf.mxu1 }
 0x4b6   :  { %v4799_v47 = vadd.f32 %v12759_v28, %v4743_v35  ;;  %v4744_v9 = vadd.f32 %v4650_v17, %v4472_v49  ;;  %v4842_v29 = vmax.f32 %v4798_v56, 0.0  ;;  %v9952_v56 = vld [vmem:[#allocation5 + $0x34] ss:$8 sps:$4 sm:$0xff]  }
 0x4b7   :  { %v4654_v51 = vpop.f32.mrf.mxu0  ;;  %v12830_v18 = vpack.c.bf16 %v4885_v7, %v4881_v55  ;;  %5387 = vmatpush1.bf16.msra.mxu1 %v9935_v27  ;;  %v13935_v35 = vld [vmem:[#allocation39_spill] sm:$0xff] }
 0x4b8   :  { %v4843_v60 = vmax.f32 %v4799_v47, 0.0  ;;  %v4800_v40 = vadd.f32 %v12766_v41, %v4744_v9  ;;  %5388 = vmatprep.subr.bf16.mxu1 %v9940_v38  ;;  %v4745_v37 = vadd.f32 %v4654_v51, %v4473_v53  ;;  %v4887_v49 = vsel %vm4878_vm4, %v4842_v29, -inf  ;;  %v13936_v38 = vld [vmem:[#allocation14_spill] sm:$0xff] }
 0x4b9   :  { %v4656_v25 = vpop.f32.mrf.mxu0  ;;  %8660 = vmatprep.mubr.msk.bf16.mxu0 %vm4878_vm4, %v12830_v18  ;;  %v3891_v63 = vadd.f32 %v13936_v38, %v13935_v35  ;;  %v13937_v53 = vld [vmem:[#allocation46_spill] sm:$0xff] }
 0x4ba   :  { %v12837_v3 = vmax.f32 %v4841_v23, %v4843_v60  ;;  %v4844_v57 = vmax.f32 %v4800_v40, 0.0  ;;  %v4746_v55 = vadd.f32 %v4656_v25, %v4474_v26  ;;  %5675 = vmatmul.mubr.bf16.vlgmr.msra.gmra.mxu0 %v12820_v31  ;;  %v4801_v17 = vadd.f32 %v12759_v28, %v4745_v37  ;;  %v9950_v23 = vld [vmem:[#allocation5 + $0x30] ss:$8 sps:$4 sm:$0xff]  }
 0x4bb   :  { %v4658_v5 = vpop.f32.mrf.mxu0  ;;  %5389 = vmatpush1.bf16.msra.mxu1 %v9938_v45  ;;  %6193 = vmatpush1.bf16.msra.mxu0 %v9941_v16  ;;  %v4477_v51 = vadd.f32 %v12699_v32, %v13937_v53  ;;  %v4204_v46 = vadd.f32 %v12652_v22, %v3891_v63  ;;  %v9953_v29 = vld [vmem:[#allocation5 + $0x370] ss:$8 sps:$4 sm:$0xff]   ;;  %v9958_v32 = vld [vmem:[#allocation5 + $0x24] ss:$8 sps:$4 sm:$0xff]   ;;  %v9967_v63 = vld [vmem:[#allocation5 + $0x354] ss:$8 sps:$4 sm:$0xff]  }
 0x4bc   :  { %v12845_v27 = vpack.c.bf16 %v12837_v3, %v4882_v11  ;;  %v4888_v36 = vsel %vm4878_vm4, %v4844_v57, -inf  ;;  %v4802_v14 = vadd.f32 %v12766_v41, %v4746_v55  ;;  %5390 = vmatprep.subr.bf16.mxu1 %v9946_v62  ;;  %6194 = vmatprep.subr.bf16.mxu0 %v9949_v61  ;;  %v4747_v47 = vadd.f32 %v4658_v5, %v4475_v6  ;;  %v13938_v61 = vld [vmem:[#allocation11_spill] sm:$0xff]  ;;  %v9961_v22 = vld [vmem:[#allocation5 + $0x364] ss:$8 sps:$4 sm:$0xff]  }
 0x4bd   :  { %v4889_v48 = vmax.f32 %v4887_v49, %v4888_v36  ;;  %v4660_v9 = vpop.f32.mrf.mxu0  ;;  %v4478_v37 = vadd.f32 %v12704_v0, %v13938_v61  ;;  %v4845_v25 = vmax.f32 %v4801_v17, 0.0  ;;  %v13939_v5 = vld [vmem:[#allocation29_spill] sm:$0xff]  ;;  %v4480_v49 = vadd.f32 %v12719_v50, %v4204_v46  ;;  %v9956_v36 = vld [vmem:[#allocation5 + $0x20] ss:$8 sps:$4 sm:$0xff]  }
 0x4be   :  { %v4748_v11 = vadd.f32 %v4660_v9, %v4476_v59  ;;  %v4846_v26 = vmax.f32 %v4802_v14, 0.0  ;;  %v4803_v45 = vadd.f32 %v12759_v28, %v4747_v47  ;;  %v4479_v59 = vadd.f32 %v12714_v8, %v13939_v5  ;;  %v9959_v14 = vld [vmem:[#allocation5 + $0x360] ss:$8 sps:$4 sm:$0xff]   ;;  %v9964_v8 = vld [vmem:[#allocation5 + $0x14] ss:$8 sps:$4 sm:$0xff]   ;;  %v13941_v47 = vld [vmem:[#allocation37_spill] sm:$0xff] }
 0x4bf   :  { %v4664_v16 = vpop.f32.mrf.mxu0  ;;  %v12858_v62 = vpack.c.bf16 %v4889_v48, %v4885_v7  ;;  %5391 = vmatpush1.bf16.msra.mxu1 %v9944_v34  ;;  %6195 = vmatpush1.bf16.msra.mxu0 %v9947_v42  ;;  %v12865_v7 = vpop.f32.mrf.mxu1  ;;  %v13940_v17 = vld [vmem:[#allocation15_spill] sm:$0xff] }
 0x4c0   :  { %v4804_v60 = vadd.f32 %v12766_v41, %v4748_v11  ;;  %v4749_v40 = vadd.f32 %v4664_v16, %v4477_v51  ;;  %5392 = vmatprep.subr.bf16.mxu1 %v9952_v56  ;;  %6196 = vmatprep.subr.bf16.mxu0 %v9955_v44  ;;  %v4847_v57 = vmax.f32 %v4803_v45, 0.0  ;;  %v4891_v0 = vsel %vm4878_vm4, %v4846_v26, -inf  ;;  %v13942_v45 = vld [vmem:[#allocation47_spill] sm:$0xff] }
 0x4c1   :  { %v4666_v55 = vpop.f32.mrf.mxu0  ;;  %8596 = vmatprep.mubr.msk.bf16.mxu1 %vm4878_vm4, %v12858_v62  ;;  %v3901_v9 = vadd.f32 %v13941_v47, %v13940_v17  ;;  %v12880_v51 = vpop.f32.mrf.mxu1  ;;  %v4481_v16 = vadd.f32 %v12729_v19, %v13942_v45  ;;  %v9973_v19 = vld [vmem:[#allocation5 + $0x344] ss:$8 sps:$4 sm:$0xff]   ;;  %v13945_v47 = vld [vmem:[#allocation26_spill] sm:$0xff] }
 0x4c2   :  { %v4848_v30 = vmax.f32 %v4804_v60, 0.0  ;;  %v4750_v6 = vadd.f32 %v4666_v55, %v4478_v37  ;;  %5188 = vmatmul.mubr.bf16.gmra.mxu1 %v12845_v27  ;;  %v4890_v34 = vmax.f32 %v4845_v25, %v4847_v57  ;;  %v4805_v44 = vadd.f32 %v12759_v28, %v4749_v40  ;;  %v13943_v40 = vld [vmem:[#allocation48_spill] sm:$0xff] }
 0x4c3   :  { %v4668_v42 = vpop.f32.mrf.mxu0  ;;  %5393 = vmatpush1.bf16.msra.mxu1 %v9950_v23  ;;  %6197 = vmatpush1.bf16.msra.mxu0 %v9953_v29  ;;  %v9962_v23 = vld [vmem:[#allocation5 + $0x10] ss:$8 sps:$4 sm:$0xff]   ;;  %v4208_v29 = vadd.f32 %v12667_v52, %v3901_v9  ;;  %v4482_v61 = vadd.f32 %v12736_v24, %v13943_v40  ;;  %v12893_v24 = vpop.f32.mrf.mxu1  ;;  %v13946_v9 = vld [vmem:[#allocation27_spill] sm:$0xff] }
 0x4c4   :  { %v4892_v56 = vsel %vm4878_vm4, %v4848_v30, -inf  ;;  %v4806_v35 = vadd.f32 %v12766_v41, %v4750_v6  ;;  %v4751_v38 = vadd.f32 %v4668_v42, %v4479_v59  ;;  %5394 = vmatprep.subr.bf16.mxu1 %v9958_v32  ;;  %6198 = vmatprep.subr.bf16.mxu0 %v9961_v22  ;;  %v12878_v50 = vpack.c.bf16 %v4890_v34, %v12837_v3  ;;  %v9965_v3 = vld [vmem:[#allocation5 + $0x350] ss:$8 sps:$4 sm:$0xff]   ;;  %v9970_v32 = vld [vmem:[#allocation5 + $0x4] ss:$8 sps:$4 sm:$0xff]  }
 0x4c5   :  { %v4893_v11 = vmax.f32 %v4891_v0, %v4892_v56  ;;  %v4670_v53 = vpop.f32.mrf.mxu0  ;;  %v4956_v22 = vld [vmem:[#allocation5 + $0xc0] sm:$0xff]  ;;  %v4849_v25 = vmax.f32 %v4805_v44, 0.0  ;;  %v13944_v42 = vld [vmem:[#allocation49_spill] sm:$0xff] }
 0x4c6   :  { %v4807_v46 = vadd.f32 %v12759_v28, %v4751_v38  ;;  %v4752_v26 = vadd.f32 %v4670_v53, %v4480_v49  ;;  %v4850_v57 = vmax.f32 %v4806_v35, 0.0  ;;  %v8626_v0 = vcombine.high %v4956_v22, %v4956_v22  ;;  %v9968_v56 = vld [vmem:[#allocation5] ss:$8 sps:$4 sm:$0xff]  }
 0x4c7   :  { %v4674_v60 = vpop.f32.mrf.mxu0  ;;  %v12888_v37 = vpack.c.bf16 %v4893_v11, %v4889_v48  ;;  %5395 = vmatpush1.bf16.msra.mxu1 %v9956_v36  ;;  %6199 = vmatpush1.bf16.msra.mxu0 %v9959_v14  ;;  %v4483_v49 = vadd.f32 %v12753_v54, %v13944_v42  ;;  %v4484_v14 = vadd.f32 %v12768_v12, %v4208_v29  ;;  %v9971_v44 = vld [vmem:[#allocation5 + $0x340] ss:$8 sps:$4 sm:$0xff]   ;;  %v9978_v54 = vld [vmem:[#allocation5 + $0x334] ss:$8 sps:$4 sm:$0xff]  }
 0x4c8   :  { %v4851_v55 = vmax.f32 %v4807_v46, 0.0  ;;  %v4808_v30 = vadd.f32 %v12766_v41, %v4752_v26  ;;  %5396 = vmatprep.subr.bf16.mxu1 %v9964_v8  ;;  %6200 = vmatprep.subr.bf16.mxu0 %v9967_v63  ;;  %v4753_v52 = vadd.f32 %v4674_v60, %v4481_v16  ;;  %v8625_v35 = vcombine.low %v4956_v22, %v4956_v22  ;;  %v12910_v16 = vpop.f32.mrf.mxu1  ;;  %v9976_v22 = vld [vmem:[#allocation5 + $0x330] ss:$8 sps:$4 sm:$0xff]  }
 0x4c9   :  { %v4676_v6 = vpop.f32.mrf.mxu0  ;;  %8661 = vmatprep.mubr.msk.bf16.mxu0 %vm4878_vm4, %v12888_v37  ;;  %v4895_v38 = vsel %vm4878_vm4, %v4850_v57, -inf  ;;  %v3911_v12 = vadd.f32 %v13946_v9, %v13945_v47 }
 0x4ca   :  { %v12895_v48 = vmax.f32 %v4849_v25, %v4851_v55  ;;  %v4852_v5 = vmax.f32 %v4808_v30, 0.0  ;;  %v4754_v59 = vadd.f32 %v4676_v6, %v4482_v61  ;;  %5685 = vmatmul.mubr.bf16.gmra.mxu0 %v12878_v50  ;;  %v4809_v46 = vadd.f32 %v12759_v28, %v4753_v52  ;;  %v6057_v25 = vld [vmem:[#allocation5 + $0x3e0] sm:$0xff] }
 0x4cb   :  { %v4678_v36 = vpop.f32.mrf.mxu0  ;;  %5397 = vmatpush1.bf16.msra.mxu1 %v9962_v23  ;;  %6201 = vmatpush1.bf16.msra.mxu0 %v9965_v3  ;;  %v4212_v60 = vadd.f32 %v12682_v43, %v3911_v12  ;;  %v13948_v30 = vld [vmem:[#allocation19_spill] sm:$0xff]  ;;  %v5379_v43 = vsel %vm5138_vm3, %v8625_v35, 0  ;;  %v9984_v52 = vld [vmem:[#allocation5 + $0x324] ss:$8 sps:$4 sm:$0xff]  }
 0x4cc   :  { %v12903_v8 = vpack.c.bf16 %v12895_v48, %v4890_v34  ;;  %v4896_v63 = vsel %vm4878_vm4, %v4852_v5, -inf  ;;  %v4810_v17 = vadd.f32 %v12766_v41, %v4754_v59  ;;  %5398 = vmatprep.subr.bf16.mxu1 %v9970_v32  ;;  %6202 = vmatprep.subr.bf16.mxu0 %v9973_v19  ;;  %v4755_v26 = vadd.f32 %v4678_v36, %v4483_v49  ;;  %v13947_v34 = vld [vmem:[#allocation18_spill] sm:$0xff]  ;;  %v12925_v59 = vpop.f32.mrf.mxu1 }
 0x4cd   :  { %v4897_v53 = vmax.f32 %v4895_v38, %v4896_v63  ;;  %v4680_v45 = vpop.f32.mrf.mxu0  ;;  %v4485_v29 = vadd.f32 %v12777_v1, %v13947_v34  ;;  %v4486_v19 = vadd.f32 %v12786_v20, %v13948_v30  ;;  %v9981_v1 = vld [vmem:[#allocation5 + $0xb4] ss:$8 sps:$4 sm:$0xff]   ;;  %v4853_v6 = vmax.f32 %v4809_v46, 0.0  ;;  %v9979_v38 = vld [vmem:[#allocation5 + $0xb0] ss:$8 sps:$4 sm:$0xff]  }
 0x4ce   :  { %v4756_v23 = vadd.f32 %v4680_v45, %v4484_v14  ;;  %v4854_v40 = vmax.f32 %v4810_v17, 0.0  ;;  %v4811_v61 = vadd.f32 %v12759_v28, %v4755_v26  ;;  %v13949_v20 = vld [vmem:[#allocation30_spill] sm:$0xff]  ;;  %v8723_v36 = vcombine.high %v6057_v25, %v6057_v25  ;;  %v9982_v63 = vld [vmem:[#allocation5 + $0x320] ss:$8 sps:$4 sm:$0xff]  }
 0x4cf   :  { %v4684_v3 = vpop.f32.mrf.mxu0  ;;  %v12916_v32 = vpack.c.bf16 %v4897_v53, %v4893_v11  ;;  %5399 = vmatpush1.bf16.msra.mxu1 %v9968_v56  ;;  %6203 = vmatpush1.bf16.msra.mxu0 %v9971_v44  ;;  %v4488_v35 = vadd.f32 %v12809_v39, %v4212_v60  ;;  %v8722_v17 = vcombine.low %v6057_v25, %v6057_v25  ;;  %v13950_v46 = vld [vmem:[#allocation43_spill] sm:$0xff]  ;;  %v13951_v26 = vld [vmem:[#allocation40_spill] sm:$0xff] }
 0x4d0   :  { %v4812_v57 = vadd.f32 %v12766_v41, %v4756_v23  ;;  %v4757_v55 = vadd.f32 %v4684_v3, %v4485_v29  ;;  %8627 = vmatprep.subr.msk.bf16.mxu1 %vm5138_vm3, %v8626_v0  ;;  %6204 = vmatprep.subr.bf16.mxu0 %v9978_v54  ;;  %v4855_v11 = vmax.f32 %v4811_v61, 0.0  ;;  %v4487_v0 = vadd.f32 %v12797_v2, %v13949_v20  ;;  %v9987_v2 = vld [vmem:[#allocation5 + $0xa4] ss:$8 sps:$4 sm:$0xff]   ;;  %v12940_v29 = vpop.f32.mrf.mxu1  ;;  %v13952_v61 = vld [vmem:[#allocation31_spill] sm:$0xff]  ;;  %v13954_v20 = vld [vmem:[#allocation50_spill] sm:$0xff] }
 0x4d1   :  { %v4686_v5 = vpop.f32.mrf.mxu0  ;;  %8597 = vmatprep.mubr.msk.bf16.mxu1 %vm4878_vm4, %v12916_v32  ;;  %v4899_v14 = vsel %vm4878_vm4, %v4854_v40, -inf  ;;  %v3921_v45 = vadd.f32 %v13951_v26, %v13950_v46  ;;  %v4489_v3 = vadd.f32 %v12822_v15, %v13952_v61  ;;  %v13958_v61 = vld [vmem:[#allocation32_spill] sm:$0xff] }
 0x4d2   :  { %v4856_v42 = vmax.f32 %v4812_v57, 0.0  ;;  %v4758_v49 = vadd.f32 %v4686_v5, %v4486_v19  ;;  %5198 = vmatmul.mubr.bf16.gmra.mxu1 %v12903_v8  ;;  %v4898_v56 = vmax.f32 %v4853_v6, %v4855_v11  ;;  %v4813_v47 = vadd.f32 %v12759_v28, %v4757_v55  ;;  %v13953_v57 = vld [vmem:[#allocation51_spill] sm:$0xff] }
 0x4d3   :  { %v4688_v44 = vpop.f32.mrf.mxu0  ;;  %5407 = vmatpush2.bf16.msra.mxu1 %v5379_v43  ;;  %6205 = vmatpush1.bf16.msra.mxu0 %v9976_v22  ;;  %v4216_v22 = vadd.f32 %v12697_v10, %v3921_v45  ;;  %v4490_v55 = vadd.f32 %v12835_v13, %v13953_v57  ;;  %v6187_v19 = vsel %vm5138_vm3, %v8722_v17, 0  ;;  %v9992_v43 = vld [vmem:[#allocation5 + $0x94] ss:$8 sps:$4 sm:$0xff]   ;;  %v12955_v13 = vpop.f32.mrf.mxu1 }
 0x4d4   :  { %v4900_v54 = vsel %vm4878_vm4, %v4856_v42, -inf  ;;  %v4814_v9 = vadd.f32 %v12766_v41, %v4758_v49  ;;  %v4759_v12 = vadd.f32 %v4688_v44, %v4487_v0  ;;  %5408 = vmatprep.subr.bf16.mxu1 %v9981_v1  ;;  %6206 = vmatprep.subr.bf16.mxu0 %v9984_v52  ;;  %v12938_v39 = vpack.c.bf16 %v4898_v56, %v12895_v48  ;;  %v9985_v48 = vld [vmem:[#allocation5 + $0xa0] ss:$8 sps:$4 sm:$0xff]   ;;  %v9995_v10 = vld [vmem:[#allocation5 + $0x3d4] ss:$8 sps:$4 sm:$0xff]  }
 0x4d5   :  { %v4901_v23 = vmax.f32 %v4899_v14, %v4900_v54  ;;  %v4690_v34 = vpop.f32.mrf.mxu0  ;;  %v4857_v1 = vmax.f32 %v4813_v47, 0.0  ;;  %v4491_v0 = vadd.f32 %v12852_v4, %v13954_v20  ;;  %v9990_v44 = vld [vmem:[#allocation5 + $0x90] ss:$8 sps:$4 sm:$0xff]   ;;  %v9998_v47 = vld [vmem:[#allocation5 + $0x84] ss:$8 sps:$4 sm:$0xff]  }
 0x4d6   :  { %v4815_v60 = vadd.f32 %v12759_v28, %v4759_v12  ;;  %v4760_v40 = vadd.f32 %v4690_v34, %v4488_v35  ;;  %v4858_v52 = vmax.f32 %v4814_v9, 0.0  ;;  %v9993_v35 = vld [vmem:[#allocation5 + $0x3d0] ss:$8 sps:$4 sm:$0xff]   ;;  %v10001_v4 = vld [vmem:[#allocation5 + $0x3c4] ss:$8 sps:$4 sm:$0xff]   ;;  %v12972_v34 = vpop.f32.mrf.mxu1 }
 0x4d7   :  { %v4694_v25 = vpop.f32.mrf.mxu0  ;;  %v12948_v30 = vpack.c.bf16 %v4901_v23, %v4897_v53  ;;  %5409 = vmatpush2.bf16.msra.mxu1 %v9979_v38  ;;  %6207 = vmatpush1.bf16.msra.mxu0 %v9982_v63  ;;  %v13955_v9 = vld [vmem:[#allocation42_spill] sm:$0xff]  ;;  %v13956_v12 = vld [vmem:[#allocation41_spill] sm:$0xff] }
 0x4d8   :  { %v4859_v6 = vmax.f32 %v4815_v60, 0.0  ;;  %v4816_v11 = vadd.f32 %v12766_v41, %v4760_v40  ;;  %5410 = vmatprep.subr.bf16.mxu1 %v9987_v2  ;;  %8724 = vmatprep.subr.msk.bf16.mxu0 %vm5138_vm3, %v8723_v36  ;;  %v4761_v15 = vadd.f32 %v4694_v25, %v4489_v3  ;;  %v4492_v36 = vadd.f32 %v12865_v7, %v4216_v22  ;;  %v13957_v60 = vld [vmem:[#allocation53_spill] sm:$0xff]  ;;  %v13960_v20 = vld [vmem:[#allocation54_spill] sm:$0xff] }
 0x4d9   :  { %v4696_v5 = vpop.f32.mrf.mxu0  ;;  %8662 = vmatprep.mubr.msk.bf16.mxu0 %vm4878_vm4, %v12948_v30  ;;  %v4903_v38 = vsel %vm4878_vm4, %v4858_v52, -inf  ;;  %v3931_v7 = vadd.f32 %v13956_v12, %v13955_v9  ;;  %v4493_v40 = vadd.f32 %v12880_v51, %v13957_v60  ;;  %v13959_v52 = vld [vmem:[#allocation52_spill] sm:$0xff]  ;;  %v10004_v51 = vld [vmem:[#allocation5 + $0x2cc] ss:$8 sps:$4 sm:$0xff]  }
 0x4da   :  { %v12957_v53 = vmax.f32 %v4857_v1, %v4859_v6  ;;  %v4860_v42 = vmax.f32 %v4816_v11, 0.0  ;;  %v4762_v49 = vadd.f32 %v4696_v5, %v4490_v55  ;;  %5695 = vmatmul.mubr.bf16.gmra.mxu0 %v12938_v39  ;;  %v4817_v46 = vadd.f32 %v12759_v28, %v4761_v15  ;;  %v9996_v55 = vld [vmem:[#allocation5 + $0x80] ss:$8 sps:$4 sm:$0xff]   ;;  %v10007_v11 = vld [vmem:[#allocation5 + $0x3b4] ss:$8 sps:$4 sm:$0xff]  }
 0x4db   :  { %v4698_v14 = vpop.f32.mrf.mxu0  ;;  %5411 = vmatpush2.bf16.msra.mxu1 %v9985_v48  ;;  %6215 = vmatpush2.bf16.msra.mxu0 %v6187_v19  ;;  %v4220_v3 = vadd.f32 %v13958_v61, %v3931_v7  ;;  %v9999_v48 = vld [vmem:[#allocation5 + $0x3c0] ss:$8 sps:$4 sm:$0xff]   ;;  %v4494_v6 = vadd.f32 %v12893_v24, %v13959_v52 }
 0x4dc   :  { %v12965_v63 = vpack.c.bf16 %v12957_v53, %v4898_v56  ;;  %v4904_v17 = vsel %vm4878_vm4, %v4860_v42, -inf  ;;  %v4818_v54 = vadd.f32 %v12766_v41, %v4762_v49  ;;  %5412 = vmatprep.subr.bf16.mxu1 %v9992_v43  ;;  %6216 = vmatprep.subr.bf16.mxu0 %v9995_v10  ;;  %v4763_v26 = vadd.f32 %v4698_v14, %v4491_v0  ;;  %v13962_v9 = vld [vmem:[#allocation28_spill] sm:$0xff] }
 0x4dd   :  { %v4905_v2 = vmax.f32 %v4903_v38, %v4904_v17  ;;  %v4700_v45 = vpop.f32.mrf.mxu0  ;;  %v4861_v10 = vmax.f32 %v4817_v46, 0.0  ;;  %v4495_v0 = vadd.f32 %v12910_v16, %v13960_v20  ;;  %v13961_v16 = vld [vmem:[#allocation10_spill] sm:$0xff]  ;;  %v13963_v60 = vld [vmem:[#allocation12_spill] sm:$0xff] }
 0x4de   :  { %v4764_v56 = vadd.f32 %v4700_v45, %v4492_v36  ;;  %v4819_v22 = vadd.f32 %v12759_v28, %v4763_v26  ;;  %v4862_v19 = vmax.f32 %v4818_v54, 0.0  ;;  %v3941_v12 = vadd.f32 %v13962_v9, %v13961_v16  ;;  %v13970_v9 = vld [vmem:[#allocation13_spill] sm:$0xff] }
 0x4df   :  { %v4704_v25 = vpop.f32.mrf.mxu0  ;;  %v12978_v57 = vpack.c.bf16 %v4905_v2, %v4901_v23  ;;  %5413 = vmatpush2.bf16.msra.mxu1 %v9990_v44  ;;  %6217 = vmatpush2.bf16.msra.mxu0 %v9993_v35  ;;  %v4448_v23 = vpop.f32.mrf.mxu1  ;;  %v4496_v44 = vadd.f32 %v12925_v59, %v4220_v3  ;;  %v10005_v35 = vld [vmem:[#allocation5 + $0x3b0] ss:$8 sps:$4 sm:$0xff]  }
 0x4e0   :  { %v4820_v43 = vadd.f32 %v12766_v41, %v4764_v56  ;;  %v4765_v1 = vadd.f32 %v4704_v25, %v4493_v40  ;;  %5414 = vmatprep.subr.bf16.mxu1 %v9998_v47  ;;  %6218 = vmatprep.subr.bf16.mxu0 %v10001_v4  ;;  %v4863_v15 = vmax.f32 %v4819_v22, 0.0  ;;  %v4907_v38 = vsel %vm4878_vm4, %v4862_v19, -inf  ;;  %v10013_v4 = vld [vmem:[#allocation5 + $0x3a4] ss:$8 sps:$4 sm:$0xff]  }
 0x4e1   :  { %v4706_v5 = vpop.f32.mrf.mxu0  ;;  %8598 = vmatprep.mubr.msk.bf16.mxu1 %vm4878_vm4, %v12978_v57  ;;  %v4452_v26 = vpop.f32.mrf.mxu1  ;;  %v4497_v40 = vadd.f32 %v12940_v29, %v13963_v60  ;;  %v4224_v61 = vadd.f32 %v12727_v58, %v3941_v12  ;;  %v13964_v25 = vld [vmem:[#allocation20_spill] sm:$0xff] }
 0x4e2   :  { %v4864_v42 = vmax.f32 %v4820_v43, 0.0  ;;  %v4766_v49 = vadd.f32 %v4706_v5, %v4494_v6  ;;  %5208 = vmatmul.mubr.bf16.gmra.mxu1 %v12965_v63  ;;  %v4906_v14 = vmax.f32 %v4861_v10, %v4863_v15  ;;  %v4821_v24 = vadd.f32 %v12759_v28, %v4765_v1 }
 0x4e3   :  { %v4708_v36 = vpop.f32.mrf.mxu0  ;;  %5415 = vmatpush2.bf16.msra.mxu1 %v9996_v55  ;;  %6219 = vmatpush2.bf16.msra.mxu0 %v9999_v48  ;;  %v4498_v55 = vadd.f32 %v12955_v13, %v13964_v25  ;;  %v4454_v58 = vpop.f32.mrf.mxu1  ;;  %v13965_v13 = vld [vmem:[#allocation21_spill] sm:$0xff]  ;;  %v4500_v5 = vadd.f32 %v4448_v23, %v4224_v61 }
 0x4e4   :  { %v4908_v17 = vsel %vm4878_vm4, %v4864_v42, -inf  ;;  %v4822_v54 = vadd.f32 %v12766_v41, %v4766_v49  ;;  %v4767_v47 = vadd.f32 %v4708_v36, %v4495_v0  ;;  %5917 = vmatprep.subr.bf16.mxu1 %v10004_v51  ;;  %6220 = vmatprep.subr.bf16.mxu0 %v10007_v11  ;;  %v12996_v7 = vpack.c.bf16 %v4906_v14, %v12957_v53  ;;  %v10011_v53 = vld [vmem:[#allocation5 + $0x3a0] ss:$8 sps:$4 sm:$0xff]  }
 0x4e5   :  { %v4909_v59 = vmax.f32 %v4907_v38, %v4908_v17  ;;  %v4710_v46 = vpop.f32.mrf.mxu0  ;;  %v4865_v3 = vmax.f32 %v4821_v24, 0.0  ;;  %v13966_v24 = vmov 0   ;;  %v13967_v36 = vld [vmem:[#allocation44_spill] sm:$0xff]  ;;  %v4456_v23 = vpop.f32.mrf.mxu1 }
 0x4e6   :  { %v4823_v45 = vadd.f32 %v12759_v28, %v4767_v47  ;;  %v4768_v56 = vadd.f32 %v4710_v46, %v4496_v44  ;;  %v4866_v19 = vmax.f32 %v4822_v54, 0.0  ;;  %v13968_v44 = vld [vmem:[#allocation16_spill] sm:$0xff] }
 0x4e7   :  { %v4714_v22 = vpop.f32.mrf.mxu0  ;;  %v13004_v48 = vpack.c.bf16 %v4909_v59, %v4905_v2  ;;  %6221 = vmatpush2.bf16.msra.mxu0 %v10005_v35  ;;  %v4499_v2 = vadd.f32 %v12972_v34, %v13965_v13  ;;  %v3951_v35 = vadd.f32 %v13968_v44, %v13967_v36 }
 0x4e8   :  { %v4867_v43 = vmax.f32 %v4823_v45, 0.0  ;;  %v4824_v1 = vadd.f32 %v12766_v41, %v4768_v56  ;;  %v4769_v52 = vadd.f32 %v4714_v22, %v4497_v40  ;;  %6222 = vmatprep.subr.bf16.mxu0 %v10013_v4  ;;  %v4911_v42 = vsel %vm4878_vm4, %v4866_v19, -inf  ;;  %v13969_v4 = vld [vmem:[#allocation56_spill] sm:$0xff]  ;;  %v13971_v56 = vld [vmem:[#allocation55_spill] sm:$0xff] }
 0x4e9   :  { %v4716_v6 = vpop.f32.mrf.mxu0  ;;  %8663 = vmatprep.mubr.msk.bf16.mxu0 %vm4878_vm4, %v13004_v48  ;;  %v4501_v16 = vadd.f32 %v4452_v26, %v13969_v4  ;;  %v4228_v12 = vadd.f32 %v13970_v9, %v3951_v35  ;;  %v4502_v60 = vadd.f32 %v4454_v58, %v13971_v56  ;;  %v10010_v56 = vld [vmem:[#allocation5 + $0x2bc] ss:$8 sps:$4 sm:$0xff]  }
 0x4ea   :  { %v13009_v29 = vmax.f32 %v4865_v3, %v4867_v43  ;;  %v4868_v51 = vmax.f32 %v4824_v1, 0.0  ;;  %v4770_v11 = vadd.f32 %v4716_v6, %v4498_v55  ;;  %5705 = vmatmul.mubr.bf16.gmra.mxu0 %v12996_v7  ;;  %v4825_v10 = vadd.f32 %v12759_v28, %v4769_v52  ;;  %v4458_v55 = vpop.f32.mrf.mxu1  ;;  %v13972_v43 = vld [vmem:[#allocation58_spill] sm:$0xff] }
 0x4eb   :  { %v4718_v15 = vpop.f32.mrf.mxu0  ;;  %6223 = vmatpush2.bf16.msra.mxu0 %v10011_v53  ;;  %v4503_v1 = vadd.f32 %v4456_v23, %v13972_v43  ;;  %v4504_v6 = vadd.f32 %v4458_v55, %v4228_v12  ;;  %v10002_v12 = vld [vmem:[#allocation5 + $0x2c8] ss:$8 sps:$4 sm:$0xff]   ;;  %v10025_v55 = vld [vmem:[#allocation5 + $0x27c] ss:$8 sps:$4 sm:$0xff]  }
 0x4ec   :  { %v4912_v49 = vsel %vm4878_vm4, %v4868_v51, -inf  ;;  %v4826_v20 = vadd.f32 %v12766_v41, %v4770_v11  ;;  %v4771_v0 = vadd.f32 %v4718_v15, %v4499_v2  ;;  %6618 = vmatprep.subr.bf16.mxu0 %v13966_v24  ;;  %v13024_v17 = vpack.c.bf16 %v13009_v29, %v4906_v14  ;;  %v5782_v43 = vld [vmem:[#allocation5 + $0x318] sm:$0xff] }
 0x4ed   :  { %v13021_v38 = vmax.f32 %v4911_v42, %v4912_v49  ;;  %v4720_v34 = vpop.f32.mrf.mxu0  ;;  %v4869_v46 = vmax.f32 %v4825_v10, 0.0 }
 0x4ee   :  { %v4827_v54 = vadd.f32 %v12759_v28, %v4771_v0  ;;  %v4772_v47 = vadd.f32 %v4720_v34, %v4500_v5  ;;  %v4870_v61 = vmax.f32 %v4826_v20, 0.0 }
 0x4ef   :  { %v4724_v45 = vpop.f32.mrf.mxu0  ;;  %v13031_v40 = vpack.c.bf16 %v13021_v38, %v4909_v59 }
 0x4f0   :  { %v4871_v3 = vmax.f32 %v4827_v54, 0.0  ;;  %v4828_v14 = vadd.f32 %v12766_v41, %v4772_v47  ;;  %v4773_v22 = vadd.f32 %v4724_v45, %v4501_v16  ;;  %v4915_v58 = vsel %vm4878_vm4, %v4870_v61, -inf  ;;  %v10016_v61 = vld [vmem:[#allocation5 + $0x2ac] ss:$8 sps:$4 sm:$0xff]  }
 0x4f1   :  { %v4726_v25 = vpop.f32.mrf.mxu0  ;;  %8599 = vmatprep.mubr.msk.bf16.mxu1 %vm4878_vm4, %v13031_v40  ;;  %v13973_v54 = vmov 0.0|0.0  }
 0x4f2   :  { %v13036_v26 = vmax.f32 %v4869_v46, %v4871_v3  ;;  %v4872_v53 = vmax.f32 %v4828_v14, 0.0  ;;  %v4774_v19 = vadd.f32 %v4726_v25, %v4502_v60  ;;  %5218 = vmatmul.mubr.bf16.gmra.mxu1 %v13024_v17  ;;  %v4829_v59 = vadd.f32 %v12759_v28, %v4773_v22  ;;  %v10008_v60 = vld [vmem:[#allocation5 + $0x2b8] ss:$8 sps:$4 sm:$0xff]   ;;  %v10014_v3 = vld [vmem:[#allocation5 + $0x2a8] ss:$8 sps:$4 sm:$0xff]  }
 0x4f3   :  { %v4728_v52 = vpop.f32.mrf.mxu0  ;;  %v10019_v14 = vld [vmem:[#allocation5 + $0x29c] ss:$8 sps:$4 sm:$0xff]   ;;  %v10017_v22 = vld [vmem:[#allocation5 + $0x298] ss:$8 sps:$4 sm:$0xff]   ;;  %v10020_v25 = vld [vmem:[#allocation5 + $0x288] ss:$8 sps:$4 sm:$0xff]  }
 0x4f4   :  { %v4916_v51 = vsel %vm4878_vm4, %v4872_v53, -inf  ;;  %v4830_v11 = vadd.f32 %v12766_v41, %v4774_v19  ;;  %v4775_v13 = vadd.f32 %v4728_v52, %v4503_v1  ;;  %v13048_v15 = vpack.c.bf16 %v13036_v26, %v13009_v29  ;;  %v10026_v53 = vld [vmem:[#allocation5 + $0x268] ss:$8 sps:$4 sm:$0xff]   ;;  %v10031_v19 = vld [vmem:[#allocation5 + $0x25c] ss:$8 sps:$4 sm:$0xff]  }
 0x4f5   :  { %v13044_v2 = vmax.f32 %v4915_v58, %v4916_v51  ;;  %v4730_v10 = vpop.f32.mrf.mxu0  ;;  %v4873_v49 = vmax.f32 %v4829_v59, 0.0  ;;  %v4967_v34 = vpack.c.bf16 %v13036_v26, %v13036_v26  ;;  %v8690_v1 = vcombine.low %v5782_v43, %v5782_v43  ;;  %v10036_v52 = vld [vmem:[#allocation5 + $0x30c] ss:$8 sps:$4 sm:$0xff]   ;;  %v10039_v58 = vld [vmem:[#allocation5 + $0x2fc] ss:$8 sps:$4 sm:$0xff]  }
 0x4f6   :  { %v4831_v5 = vadd.f32 %v12759_v28, %v4775_v13  ;;  %v4776_v42 = vadd.f32 %v4730_v10, %v4504_v6  ;;  %v4874_v36 = vmax.f32 %v4830_v11, 0.0  ;;  %v10034_v6 = vld [vmem:[#allocation5 + $0x308] ss:$8 sps:$4 sm:$0xff]   ;;  %v10037_v51 = vld [vmem:[#allocation5 + $0x2f8] ss:$8 sps:$4 sm:$0xff]  }
 0x4f7   :  { %v4968_v20 = vpack.c.bf16 %v13044_v2, %v13044_v2  ;;  %v13055_v0 = vpack.c.bf16 %v13044_v2, %v13021_v38  ;;  %v5912_v59 = vsel %vm5138_vm3, %v8690_v1, 0  ;;  %v10042_v11 = vld [vmem:[#allocation5 + $0x2ec] ss:$8 sps:$4 sm:$0xff]   ;;  %v10040_v13 = vld [vmem:[#allocation5 + $0x2e8] ss:$8 sps:$4 sm:$0xff]  }
 0x4f8   :  { %v4875_v44 = vmax.f32 %v4831_v5, 0.0  ;;  %v4832_v35 = vadd.f32 %v12766_v41, %v4776_v42  ;;  %v4919_v47 = vsel %vm4878_vm4, %v4874_v36, -inf  ;;  %v10045_v10 = vld [vmem:[#allocation5 + $0x2dc] ss:$8 sps:$4 sm:$0xff]   ;;  %v10058_v42 = vld [vmem:[#allocation7 + $0x8] sm:$0xff]  }
 0x4f9   :  { %8600 = vmatprep.mubr.msk.bf16.mxu1 %vm4878_vm4, %v4968_v20  ;;  %8664 = vmatprep.mubr.msk.bf16.mxu0 %vm4878_vm4, %v13055_v0  ;;  %v10057_v5 = vld [vmem:[#allocation7 + $0x74] sm:$0xff]   ;;  %v10060_v20 = vld [vmem:[#allocation7] sm:$0xff]  }
 0x4fa   :  { %v13063_v28 = vmax.f32 %v4873_v49, %v4875_v44  ;;  %v4876_v23 = vmax.f32 %v4832_v35, 0.0  ;;  %5228 = vmatmul.mubr.bf16.gmra.mxu1 %v4967_v34  ;;  %5715 = vmatmul.mubr.bf16.gmra.mxu0 %v13048_v15  ;;  %v10059_v49 = vld [vmem:[#allocation7 + $0x6c] sm:$0xff]   ;;  %v10061_v36 = vld [vmem:[#allocation7 + $0x64] sm:$0xff]   ;;  %v10064_v34 = vld [vmem:[#allocation7 + $0x58] sm:$0xff]  }
 0x4fb   :  { %5416 = vmatprep.mubr.bf16.mxu1 %v13973_v54  ;;  %v10063_v35 = vld [vmem:[#allocation7 + $0xc4] ss:$0 sps:$4 sm:$0xff]  }
 0x4fc   :  { %v4920_v41 = vsel %vm4878_vm4, %v4876_v23, -inf  ;;  %v5755_v4 = vpack.c.bf16 %v13063_v28, %v13036_v26  ;;  %v5477_v45 = vpack.c.bf16 %v13063_v28, %v13063_v28  ;;  %v10055_v26 = vld [vmem:[#allocation7 + $0x7c] sm:$0xff]  }
 0x4fd   :  { %v13071_v16 = vmax.f32 %v4919_v47, %v4920_v41  ;;  %v10065_v23 = vld [vmem:[#allocation7 + $0xbc] sm:$0xff]   ;;  %v10067_v41 = vld [vmem:[#allocation7 + $0xb4] sm:$0xff]  }
 0x4ff   :  { %v5478_v9 = vpack.c.bf16 %v13071_v16, %v13071_v16  ;;  %v5756_v46 = vpack.c.bf16 %v13071_v16, %v13044_v2  ;;  %v10056_v2 = vld [vmem:[#allocation7 + $0x10] sm:$0xff]  }
 0x501   :  { %8665 = vmatprep.mubr.msk.bf16.mxu0 %vm4878_vm4, %v5478_v9  ;;  %v10069_v9 = vld [vmem:[#allocation7 + $0xac] sm:$0xff]  }
 0x502   :  { %5417 = vmatmul.mubr.bf16.vlgmr.msra.gmra.mxu1 %v13973_v54  ;;  %5725 = vmatmul.mubr.bf16.gmra.mxu0 %v5477_v45 }
 0x503   :  { %5918 = vmatpush1.bf16.msra.mxu1 %v10002_v12  ;;  %8628 = vmatprep.mubr.msk.bf16.mxu1 %vm4878_vm4, %v12830_v18  ;;  %v10022_v18 = vld [vmem:[#allocation5 + $0x28c] ss:$8 sps:$4 sm:$0xff]  }
 0x504   :  { %8725 = vmatprep.mubr.msk.bf16.mxu0 %vm4878_vm4, %v12888_v37  ;;  %5919 = vmatprep.subr.bf16.mxu1 %v10010_v56  ;;  %v10070_v12 = vld [vmem:[#allocation7 + $0x40] sm:$0xff]  }
 0x505   :  { %v10071_v56 = vld [vmem:[#allocation7 + $0xa4] sm:$0xff]  }
 0x507   :  { %5920 = vmatpush1.bf16.msra.mxu1 %v10008_v60 }
 0x508   :  { %5921 = vmatprep.subr.bf16.mxu1 %v10016_v61 }
 0x50a   :  { %5427 = vmatmul.mubr.bf16.gmra.mxu1 %v12820_v31  ;;  %6225 = vmatmul.mubr.bf16.vlgmr.msra.gmra.mxu0 %v12878_v50  ;;  %v10023_v31 = vld [vmem:[#allocation5 + $0x278] ss:$8 sps:$4 sm:$0xff]  }
 0x50b   :  { %5922 = vmatpush1.bf16.msra.mxu1 %v10014_v3  ;;  %8629 = vmatprep.mubr.msk.bf16.mxu1 %vm4878_vm4, %v12888_v37  ;;  %v10028_v37 = vld [vmem:[#allocation5 + $0x26c] ss:$8 sps:$4 sm:$0xff]  }
 0x50c   :  { %8726 = vmatprep.mubr.msk.bf16.mxu0 %vm4878_vm4, %v12948_v30  ;;  %5923 = vmatprep.subr.bf16.mxu1 %v10019_v14 }
 0x50f   :  { %5924 = vmatpush1.bf16.msra.mxu1 %v10017_v22 }
 0x510   :  { %5925 = vmatprep.subr.bf16.mxu1 %v10022_v18 }
 0x512   :  { %5437 = vmatmul.mubr.bf16.gmra.mxu1 %v12878_v50  ;;  %6235 = vmatmul.mubr.bf16.gmra.mxu0 %v12938_v39  ;;  %v10029_v50 = vld [vmem:[#allocation5 + $0x258] ss:$8 sps:$4 sm:$0xff]  }
 0x513   :  { %5926 = vmatpush1.bf16.msra.mxu1 %v10020_v25  ;;  %8630 = vmatprep.mubr.msk.bf16.mxu1 %vm4878_vm4, %v12948_v30  ;;  %v8691_v30 = vcombine.high %v5782_v43, %v5782_v43 }
 0x514   :  { %8727 = vmatprep.mubr.msk.bf16.mxu0 %vm4878_vm4, %v13004_v48  ;;  %5927 = vmatprep.subr.bf16.mxu1 %v10025_v55 }
 0x517   :  { %5928 = vmatpush1.bf16.msra.mxu1 %v10023_v31 }
 0x518   :  { %5929 = vmatprep.subr.bf16.mxu1 %v10028_v37 }
 0x51a   :  { %5447 = vmatmul.mubr.bf16.gmra.mxu1 %v12938_v39  ;;  %6245 = vmatmul.mubr.bf16.gmra.mxu0 %v12996_v7  ;;  %v4931_v39 = vpack.c.bf16 %v13021_v38, %v13021_v38  ;;  %v4930_v38 = vpack.c.bf16 %v13009_v29, %v13009_v29  ;;  %v10052_v29 = vld [vmem:[#allocation7 + $0x20] sm:$0xff]  }
 0x51b   :  { %5930 = vmatpush1.bf16.msra.mxu1 %v10026_v53  ;;  %8631 = vmatprep.mubr.msk.bf16.mxu1 %vm4878_vm4, %v13004_v48  ;;  %v6031_v48 = vpack.c.bf16 %v13835_v33, %v13071_v16 }
 0x51c   :  { %8728 = vmatprep.mubr.msk.bf16.mxu0 %vm4878_vm4, %v13055_v0  ;;  %5931 = vmatprep.subr.bf16.mxu1 %v10031_v19  ;;  %v10062_v0 = vld [vmem:[#allocation7 + $0x60] ss:$0 sps:$4 sm:$0xff]  }
 0x51d   :  { %v6616_v44 = vsel %vm5138_vm3, %v10062_v0, 0 }
 0x51f   :  { %5932 = vmatpush1.bf16.msra.mxu1 %v10029_v50 }
 0x520   :  { %8692 = vmatprep.subr.msk.bf16.mxu1 %vm5138_vm3, %v8691_v30 }
 0x522   :  { %5457 = vmatmul.mubr.bf16.gmra.mxu1 %v12996_v7  ;;  %6255 = vmatmul.mubr.bf16.gmra.mxu0 %v13048_v15  ;;  %v6030_v7 = vpack.c.bf16 %v13835_v33, %v13063_v28  ;;  %v10043_v15 = vld [vmem:[#allocation5 + $0x2d8] ss:$8 sps:$4 sm:$0xff]   ;;  %v6495_v28 = vsel %vm5138_vm3, %v10063_v35, 0 }
 0x523   :  { %5940 = vmatpush2.bf16.msra.mxu1 %v5912_v59  ;;  %8632 = vmatprep.mubr.msk.bf16.mxu1 %vm4878_vm4, %v4931_v39 }
 0x524   :  { %8729 = vmatprep.mubr.msk.bf16.mxu0 %vm4878_vm4, %v6031_v48  ;;  %5941 = vmatprep.subr.bf16.mxu1 %v10036_v52 }
 0x527   :  { %5942 = vmatpush2.bf16.msra.mxu1 %v10034_v6 }
 0x528   :  { %5943 = vmatprep.subr.bf16.mxu1 %v10039_v58 }
 0x52a   :  { %5467 = vmatmul.mubr.bf16.gmra.mxu1 %v4930_v38  ;;  %6265 = vmatmul.mubr.bf16.gmra.mxu0 %v6030_v7 }
 0x52b   :  { %5944 = vmatpush2.bf16.msra.mxu1 %v10037_v51  ;;  %8693 = vmatprep.mubr.msk.bf16.mxu1 %vm4878_vm4, %v12858_v62  ;;  %v10046_v62 = vld [vmem:[#allocation7 + $0x38] sm:$0xff]  }
 0x52c   :  { %5945 = vmatprep.subr.bf16.mxu1 %v10042_v11  ;;  %6274 = vmatprep.mubr.bf16.mxu0 %v13973_v54 }
 0x52d   :  { %6619 = vmatpush1.bf16.msra.mxu0 %v10046_v62 }
 0x52e   :  { %6620 = vmatprep.subr.bf16.mxu0 %v13966_v24 }
 0x52f   :  { %5946 = vmatpush2.bf16.msra.mxu1 %v10040_v13 }
 0x530   :  { %5947 = vmatprep.subr.bf16.mxu1 %v10045_v10 }
 0x532   :  { %6275 = vmatmul.mubr.bf16.gmra.mxu0 %v13973_v54 }
 0x533   :  { %5948 = vmatpush2.bf16.msra.mxu1 %v10043_v15 }
 0x534   :  { %6497 = vmatprep.subr.bf16.mxu1 %v13966_v24 }
 0x536   :  { %5950 = vmatmul.mubr.bf16.vlgmr.msra.gmra.mxu1 %v12845_v27  ;;  %v10047_v27 = vld [vmem:[#allocation7 + $0x9c] sm:$0xff]  }
 0x537   :  { %8694 = vmatprep.mubr.msk.bf16.mxu1 %vm4878_vm4, %v12916_v32  ;;  %6498 = vmatpush1.bf16.msra.mxu1 %v10047_v27  ;;  %v10049_v32 = vld [vmem:[#allocation7 + $0x94] sm:$0xff]  }
 0x538   :  { %6499 = vmatprep.subr.bf16.mxu1 %v13966_v24 }
 0x53b   :  { %6500 = vmatpush1.bf16.msra.mxu1 %v10049_v32 }
 0x53c   :  { %6501 = vmatprep.subr.bf16.mxu1 %v13966_v24 }
 0x53e   :  { %5960 = vmatmul.mubr.bf16.gmra.mxu1 %v12903_v8  ;;  %v10048_v8 = vld [vmem:[#allocation7 + $0x30] sm:$0xff]  }
 0x53f   :  { %8695 = vmatprep.mubr.msk.bf16.mxu1 %vm4878_vm4, %v12978_v57  ;;  %6621 = vmatpush1.bf16.msra.mxu0 %v10048_v8  ;;  %v10051_v57 = vld [vmem:[#allocation7 + $0x8c] sm:$0xff]  }
 0x540   :  { %6622 = vmatprep.subr.bf16.mxu0 %v13966_v24  ;;  %6502 = vmatpush1.bf16.msra.mxu1 %v10051_v57 }
 0x541   :  { %6503 = vmatprep.subr.bf16.mxu1 %v13966_v24 }
 0x546   :  { %5970 = vmatmul.mubr.bf16.gmra.mxu1 %v12965_v63  ;;  %v10050_v63 = vld [vmem:[#allocation7 + $0x28] sm:$0xff]  }
 0x547   :  { %8696 = vmatprep.mubr.msk.bf16.mxu1 %vm4878_vm4, %v13031_v40  ;;  %6623 = vmatpush1.bf16.msra.mxu0 %v10050_v63  ;;  %v10054_v40 = vld [vmem:[#allocation7 + $0x18] sm:$0xff]  }
 0x548   :  { %6624 = vmatprep.subr.bf16.mxu0 %v13966_v24 }
 0x54b   :  { %6625 = vmatpush1.bf16.msra.mxu0 %v10052_v29 }
 0x54c   :  { %6626 = vmatprep.subr.bf16.mxu0 %v13966_v24 }
 0x54e   :  { %5980 = vmatmul.mubr.bf16.gmra.mxu1 %v13024_v17  ;;  %v10053_v17 = vld [vmem:[#allocation7 + $0x84] sm:$0xff]  }
 0x54f   :  { %8697 = vmatprep.mubr.msk.bf16.mxu1 %vm4878_vm4, %v5756_v46  ;;  %6504 = vmatpush1.bf16.msra.mxu1 %v10053_v17 }
 0x550   :  { %6627 = vmatpush1.bf16.msra.mxu0 %v10054_v40  ;;  %6505 = vmatprep.subr.bf16.mxu1 %v13966_v24 }
 0x551   :  { %6628 = vmatprep.subr.bf16.mxu0 %v13966_v24 }
 0x553   :  { %6506 = vmatpush1.bf16.msra.mxu1 %v10055_v26 }
 0x554   :  { %6629 = vmatpush1.bf16.msra.mxu0 %v10056_v2  ;;  %6507 = vmatprep.subr.bf16.mxu1 %v13966_v24 }
 0x555   :  { %6630 = vmatprep.subr.bf16.mxu0 %v13966_v24 }
 0x556   :  { %5990 = vmatmul.mubr.bf16.gmra.mxu1 %v5755_v4  ;;  %v10068_v4 = vld [vmem:[#allocation7 + $0x48] sm:$0xff]  }
 0x557   :  { %5999 = vmatprep.mubr.bf16.mxu1 %v13973_v54  ;;  %6508 = vmatpush1.bf16.msra.mxu1 %v10057_v5 }
 0x558   :  { %6631 = vmatpush1.bf16.msra.mxu0 %v10058_v42  ;;  %6509 = vmatprep.subr.bf16.mxu1 %v13966_v24 }
 0x559   :  { %6632 = vmatprep.subr.bf16.mxu0 %v13966_v24 }
 0x55b   :  { %6510 = vmatpush1.bf16.msra.mxu1 %v10059_v49 }
 0x55c   :  { %6633 = vmatpush1.bf16.msra.mxu0 %v10060_v20  ;;  %6511 = vmatprep.subr.bf16.mxu1 %v13966_v24 }
 0x55d   :  { %6640 = vmatprep.subr.bf16.mxu0 %v13966_v24 }
 0x55e   :  { %6000 = vmatmul.mubr.bf16.gmra.mxu1 %v13973_v54  ;;  %v10066_v54 = vld [vmem:[#allocation7 + $0x50] sm:$0xff]  }
 0x55f   :  { %6512 = vmatpush1.bf16.msra.mxu1 %v10061_v36 }
 0x560   :  { %6641 = vmatpush2.bf16.msra.mxu0 %v6616_v44  ;;  %6519 = vmatprep.subr.bf16.mxu1 %v13966_v24 }
 0x561   :  { %6642 = vmatprep.subr.bf16.mxu0 %v13966_v24 }
 0x563   :  { %6520 = vmatpush2.bf16.msra.mxu1 %v6495_v28 }
 0x564   :  { %6643 = vmatpush2.bf16.msra.mxu0 %v10064_v34  ;;  %6521 = vmatprep.subr.bf16.mxu1 %v13966_v24 }
 0x565   :  { %6644 = vmatprep.subr.bf16.mxu0 %v13966_v24 }
 0x567   :  { %6522 = vmatpush2.bf16.msra.mxu1 %v10065_v23 }
 0x568   :  { %6645 = vmatpush2.bf16.msra.mxu0 %v10066_v54  ;;  %6523 = vmatprep.subr.bf16.mxu1 %v13966_v24 }
 0x569   :  { %6646 = vmatprep.subr.bf16.mxu0 %v13966_v24 }
 0x56b   :  { %6524 = vmatpush2.bf16.msra.mxu1 %v10067_v41 }
 0x56c   :  { %6647 = vmatpush2.bf16.msra.mxu0 %v10068_v4  ;;  %6525 = vmatprep.subr.bf16.mxu1 %v13966_v24 }
 0x56d   :  { %6648 = vmatprep.subr.bf16.mxu0 %v13966_v24 }
 0x56f   :  { %6526 = vmatpush2.bf16.msra.mxu1 %v10069_v9 }
 0x570   :  { %6649 = vmatpush2.bf16.msra.mxu0 %v10070_v12  ;;  %6527 = vmatprep.subr.bf16.mxu1 %v13966_v24 }
 0x571   :  { %6917 = vmatprep.subr.bf16.mxu0 %v13966_v24 }
 0x572   :  { %v13164_v47 = vpop.f32.mrf.mxu1 }
 0x573   :  { %6528 = vmatpush2.bf16.msra.mxu1 %v10071_v56 }
 0x574   :  { %v13168_v16 = vpop.f32.mrf.mxu1  ;;  %6767 = vmatprep.subr.bf16.mxu1 %v13966_v24 }
 0x576   :  { %v13170_v46 = vpop.f32.mrf.mxu1 }
 0x578   :  { %v13176_v60 = vpop.f32.mrf.mxu1 }
 0x57a   :  { %v13172_v45 = vpop.f32.mrf.mxu0 }
 0x57c   :  { %v13178_v61 = vpop.f32.mrf.mxu0 }
 0x57e   :  { %v13183_v14 = vpop.f32.mrf.mxu0 }
 0x580   :  { %v13187_v18 = vpop.f32.mrf.mxu0 }
 0x582   :  { %v13181_v3 = vpop.f32.mrf.mxu1 }
 0x584   :  { %v13185_v22 = vpop.f32.mrf.mxu1 }
 0x586   :  { %v13189_v25 = vpop.f32.mrf.mxu1 }
 0x587   :  { %13974 = vst [vmem:[#allocation34_spill] sm:$0xff] %v13189_v25 }
 0x588   :  { %v5195_v31 = vpop.f32.mrf.mxu1 }
 0x58a   :  { %v13191_v55 = vpop.f32.mrf.mxu0 }
 0x58b   :  { %13975 = vst [vmem:[#allocation57_spill] sm:$0xff] %v13191_v55 }
 0x58c   :  { %v13193_v37 = vpop.f32.mrf.mxu0 }
 0x58d   :  { %13976 = vst [vmem:[#allocation59_spill] sm:$0xff] %v13193_v37 }
 0x58e   :  { %v13195_v19 = vpop.f32.mrf.mxu0 }
 0x58f   :  { %13977 = vst [vmem:[#allocation23_spill] sm:$0xff] %v13195_v19 }
 0x590   :  { %v5692_v50 = vpop.f32.mrf.mxu0 }
 0x592   :  { %v5199_v53 = vpop.f32.mrf.mxu1 }
 0x594   :  { %v5201_v43 = vpop.f32.mrf.mxu1 }
 0x596   :  { %v5203_v30 = vpop.f32.mrf.mxu1 }
 0x598   :  { %v5205_v59 = vpop.f32.mrf.mxu1 }
 0x59a   :  { %v5696_v1 = vpop.f32.mrf.mxu0 }
 0x59c   :  { %v5698_v52 = vpop.f32.mrf.mxu0 }
 0x59e   :  { %v5700_v48 = vpop.f32.mrf.mxu0 }
 0x5a0   :  { %v5702_v58 = vpop.f32.mrf.mxu0 }
 0x5a2   :  { %v5209_v39 = vpop.f32.mrf.mxu1 }
 0x5a4   :  { %v5211_v6 = vpop.f32.mrf.mxu1 }
 0x5a6   :  { %v5213_v51 = vpop.f32.mrf.mxu1 }
 0x5a8   :  { %v13197_v7 = vpop.f32.mrf.mxu1 }
 0x5aa   :  { %v5706_v38 = vpop.f32.mrf.mxu0 }
 0x5ac   :  { %v5708_v11 = vpop.f32.mrf.mxu0 }
 0x5ae   :  { %v5710_v10 = vpop.f32.mrf.mxu0 }
 0x5b0   :  { %v5712_v27 = vpop.f32.mrf.mxu0 }
 0x5b2   :  { %v13199_v13 = vpop.f32.mrf.mxu1 }
 0x5b4   :  { %v13201_v15 = vpop.f32.mrf.mxu1 }
 0x5b6   :  { %v13203_v62 = vpop.f32.mrf.mxu1 }
 0x5b8   :  { %v13205_v8 = vpop.f32.mrf.mxu1 }
 0x5ba   :  { %v13207_v32 = vpop.f32.mrf.mxu1  ;;  %v13209_v63 = vpop.f32.mrf.mxu0 }
 0x5bc   :  { %v13211_v57 = vpop.f32.mrf.mxu1  ;;  %v13213_v29 = vpop.f32.mrf.mxu0 }
 0x5be   :  { %v5233_v17 = vpop.f32.mrf.mxu1  ;;  %v13215_v40 = vpop.f32.mrf.mxu0 }
 0x5c0   :  { %v5234_v26 = vpop.f32.mrf.mxu1  ;;  %v13217_v2 = vpop.f32.mrf.mxu0 }
 0x5c2   :  { %v13219_v5 = vpop.f32.mrf.mxu1  ;;  %v13221_v42 = vpop.f32.mrf.mxu0 }
 0x5c4   :  { %v13223_v49 = vpop.f32.mrf.mxu1  ;;  %v13225_v20 = vpop.f32.mrf.mxu0 }
 0x5c6   :  { %v13227_v0 = vpop.f32.mrf.mxu1  ;;  %v5730_v36 = vpop.f32.mrf.mxu0 }
 0x5c8   :  { %v13229_v44 = vpop.f32.mrf.mxu1  ;;  %v5731_v35 = vpop.f32.mrf.mxu0 }
 0x5ca   :  { %v13231_v34 = vpop.f32.mrf.mxu1  ;;  %v13233_v28 = vpop.f32.mrf.mxu0 }
 0x5cc   :  { %v13235_v23 = vpop.f32.mrf.mxu1  ;;  %v13237_v54 = vpop.f32.mrf.mxu0 }
 0x5ce   :  { %v13239_v41 = vpop.f32.mrf.mxu1  ;;  %v13241_v4 = vpop.f32.mrf.mxu0 }
 0x5cf   :  { %13978 = vst [vmem:[#allocation22_spill] sm:$0xff] %v13239_v41  ;;  %13979 = vst [vmem:[#allocation60_spill] sm:$0xff] %v13241_v4 }
 0x5d0   :  { %v5434_v9 = vpop.f32.mrf.mxu1  ;;  %v13243_v12 = vpop.f32.mrf.mxu0 }
 0x5d1   :  { %13980 = vst [vmem:[#allocation33_spill] sm:$0xff] %v13243_v12  ;;  %v5435_v56 = vadd.f32 %v5434_v9, %v5195_v31 }
 0x5d2   :  { %v5438_v17 = vpop.f32.mrf.mxu1  ;;  %v13245_v26 = vpop.f32.mrf.mxu0 }
 0x5d3   :  { %13981 = vst [vmem:[#allocation36_spill] sm:$0xff] %v13245_v26  ;;  %v5439_v36 = vadd.f32 %v5438_v17, %v5199_v53  ;;  %v13247_v35 = vadd.f32 %v5692_v50, %v5435_v56 }
 0x5d4   :  { %v5440_v33 = vpop.f32.mrf.mxu1  ;;  %v13249_v24 = vpop.f32.mrf.mxu0 }
 0x5d5   :  { %v5441_v19 = vadd.f32 %v5440_v33, %v5201_v43  ;;  %v13251_v37 = vadd.f32 %v5696_v1, %v5439_v36 }
 0x5d6   :  { %v5442_v55 = vpop.f32.mrf.mxu1  ;;  %v13253_v41 = vpop.f32.mrf.mxu0 }
 0x5d7   :  { %v5443_v4 = vadd.f32 %v5442_v55, %v5203_v30  ;;  %v13255_v25 = vadd.f32 %v5698_v52, %v5441_v19 }
 0x5d8   :  { %v5444_v12 = vpop.f32.mrf.mxu1  ;;  %v13257_v31 = vpop.f32.mrf.mxu0 }
 0x5d9   :  { %v5445_v9 = vadd.f32 %v5444_v12, %v5205_v59  ;;  %v13259_v26 = vadd.f32 %v5700_v48, %v5443_v4 }
 0x5da   :  { %v5448_v53 = vpop.f32.mrf.mxu1  ;;  %v13261_v50 = vpop.f32.mrf.mxu0 }
 0x5db   :  { %v5449_v56 = vadd.f32 %v5448_v53, %v5209_v39  ;;  %v13263_v17 = vadd.f32 %v5702_v58, %v5445_v9 }
 0x5dc   :  { %v5450_v33 = vpop.f32.mrf.mxu1  ;;  %v13265_v43 = vpop.f32.mrf.mxu0 }
 0x5dd   :  { %v5451_v1 = vadd.f32 %v5450_v33, %v5211_v6  ;;  %v13267_v36 = vadd.f32 %v5706_v38, %v5449_v56 }
 0x5de   :  { %v5452_v55 = vpop.f32.mrf.mxu1  ;;  %v13269_v19 = vpop.f32.mrf.mxu0 }
 0x5df   :  { %v5453_v30 = vadd.f32 %v5452_v55, %v5213_v51  ;;  %v13271_v52 = vadd.f32 %v5708_v11, %v5451_v1 }
 0x5e0   :  { %v5454_v59 = vpop.f32.mrf.mxu1  ;;  %v13273_v48 = vpop.f32.mrf.mxu0 }
 0x5e1   :  { %v5455_v4 = vadd.f32 %v5454_v59, %v13197_v7  ;;  %v13276_v39 = vadd.f32 %v5710_v10, %v5453_v30 }
 0x5e2   :  { %v5458_v58 = vpop.f32.mrf.mxu1  ;;  %v13278_v12 = vpop.f32.mrf.mxu0 }
 0x5e3   :  { %v5459_v6 = vadd.f32 %v5458_v58, %v13199_v13  ;;  %v13281_v38 = vadd.f32 %v5712_v27, %v5455_v4 }
 0x5e4   :  { %v5460_v9 = vpop.f32.mrf.mxu1  ;;  %v13283_v53 = vpop.f32.mrf.mxu0 }
 0x5e5   :  { %v5461_v51 = vadd.f32 %v5460_v9, %v13201_v15  ;;  %v13287_v11 = vadd.f32 %v13209_v63, %v5459_v6 }
 0x5e6   :  { %v5462_v56 = vpop.f32.mrf.mxu1  ;;  %v13289_v33 = vpop.f32.mrf.mxu0 }
 0x5e7   :  { %v5463_v7 = vadd.f32 %v5462_v56, %v13203_v62  ;;  %v13293_v10 = vadd.f32 %v13213_v29, %v5461_v51 }
 0x5e8   :  { %v5464_v1 = vpop.f32.mrf.mxu1  ;;  %v13295_v13 = vpop.f32.mrf.mxu0 }
 0x5e9   :  { %v5465_v27 = vadd.f32 %v5464_v1, %v13205_v8  ;;  %v13299_v55 = vadd.f32 %v13215_v40, %v5463_v7  ;;  %v5425_v1 = vadd.f32 %v13229_v44, %v13176_v60 }
 0x5ea   :  { %v5468_v15 = vpop.f32.mrf.mxu1  ;;  %v13301_v30 = vpop.f32.mrf.mxu0 }
 0x5eb   :  { %v5469_v63 = vadd.f32 %v5468_v15, %v13207_v32  ;;  %v13305_v59 = vadd.f32 %v13217_v2, %v5465_v27  ;;  %v5419_v32 = vadd.f32 %v13219_v5, %v13164_v47  ;;  %v13982_v15 = vsub.s32 0, %v12731_v21 }
 0x5ec   :  { %v5470_v62 = vpop.f32.mrf.mxu1  ;;  %v13307_v4 = vpop.f32.mrf.mxu0 }
 0x5ed   :  { %v5471_v29 = vadd.f32 %v5470_v62, %v13211_v57  ;;  %v13311_v58 = vadd.f32 %v13221_v42, %v5469_v63  ;;  %v5421_v57 = vadd.f32 %v13223_v49, %v13168_v16  ;;  %v6305_v42 = vld [vmem:[%s13646_s8] sm:$0x3]  ;;  %v5733_v7 = vadd.f32 %v13172_v45, %v5419_v32 }
 0x5ee   :  { %v5472_v8 = vpop.f32.mrf.mxu1  ;;  %v13313_v6 = vpop.f32.mrf.mxu0  ;;  %v13338_v16 = vrot.slane %v6305_v42, %v13982_v15 }
 0x5ef   :  { %v13316_v40 = vadd.f32 %v13225_v20, %v5471_v29  ;;  %v5423_v20 = vadd.f32 %v13227_v0, %v13170_v46  ;;  %v5734_v49 = vadd.f32 %v13178_v61, %v5421_v57  ;;  %v13983_v46 = vsub.s32 1, %v12731_v21  ;;  %v13984_v21 = vld [vmem:[#allocation34_spill] sm:$0xff] }
 0x5f0   :  { %v5473_v9 = vpop.f32.mrf.mxu1  ;;  %v13318_v51 = vpop.f32.mrf.mxu0  ;;  %v5429_v0 = vadd.f32 %v13231_v34, %v13181_v3  ;;  %v5431_v61 = vadd.f32 %v13235_v23, %v13185_v22  ;;  %v13988_v23 = vld [vmem:[#allocation33_spill] sm:$0xff] }
 0x5f1   :  { %v13344_v45 = vrot.slane %v6305_v42, %v13983_v46  ;;  %v5735_v60 = vadd.f32 %v13183_v14, %v5423_v20  ;;  %v5736_v9 = vadd.f32 %v13187_v18, %v5425_v1  ;;  %v13985_v42 = vld [vmem:[#allocation22_spill] sm:$0xff]  ;;  %v13986_v20 = vld [vmem:[#allocation60_spill] sm:$0xff] }
 0x5f2   :  { %v13322_v2 = vpop.f32.mrf.mxu0 }
 0x5f4   :  { %v13329_v56 = vpop.f32.mrf.mxu0 }
 0x5f6   :  { %v5951_v47 = vpop.f32.mrf.mxu1  ;;  %v6280_v5 = vpop.f32.mrf.mxu0 }
 0x5f7   :  { %v6008_v27 = vadd.f32 %v5951_v47, %v5733_v7  ;;  %v5433_v47 = vadd.f32 %v13985_v42, %v13984_v21 }
 0x5f8   :  { %v5953_v63 = vpop.f32.mrf.mxu1  ;;  %v6281_v62 = vpop.f32.mrf.mxu0 }
 0x5f9   :  { %v6283_v29 = vadd.f32 %v13233_v28, %v6008_v27  ;;  %v6009_v8 = vadd.f32 %v5953_v63, %v5734_v49  ;;  %v13987_v27 = vld [vmem:[#allocation57_spill] sm:$0xff] }
 0x5fa   :  { %v5955_v44 = vpop.f32.mrf.mxu1  ;;  %v5737_v18 = vadd.f32 %v13987_v27, %v5429_v0  ;;  %v13991_v0 = vld [vmem:[#allocation36_spill] sm:$0xff] }
 0x5fb   :  { %v6317_v32 = vadd.f32 %v13338_v16, %v6283_v29  ;;  %v6284_v28 = vadd.f32 %v13237_v54, %v6009_v8  ;;  %v6010_v57 = vadd.f32 %v5955_v44, %v5735_v60  ;;  %v13989_v54 = vld [vmem:[#allocation59_spill] sm:$0xff]  ;;  %v10073_v27 = vld [vmem:[#allocation7 + $0x100] sm:$0xff]  }
 0x5fc   :  { %v5957_v7 = vpop.f32.mrf.mxu1  ;;  %v5738_v63 = vadd.f32 %v13989_v54, %v5431_v61  ;;  %v13990_v44 = vld [vmem:[#allocation23_spill] sm:$0xff] }
 0x5fd   :  { %v6318_v14 = vadd.f32 %v13344_v45, %v6284_v28  ;;  %v6285_v5 = vadd.f32 %v13986_v20, %v6010_v57  ;;  %v6011_v3 = vadd.f32 %v5957_v7, %v5736_v9  ;;  %v6339_v34 = vmax.f32 %v6317_v32, 0.0  ;;  %v10072_v9 = vld [vmem:[#allocation7 + $0x164] sm:$0xff]  }
 0x5fe   :  { %v5961_v1 = vpop.f32.mrf.mxu1  ;;  %v5739_v28 = vadd.f32 %v13990_v44, %v5433_v47 }
 0x5ff   :  { %v6340_v15 = vmax.f32 %v6318_v14, 0.0  ;;  %v6319_v22 = vadd.f32 %v13338_v16, %v6285_v5  ;;  %v6286_v49 = vadd.f32 %v13988_v23, %v6011_v3  ;;  %v6012_v62 = vadd.f32 %v5961_v1, %v5737_v18  ;;  %v10074_v18 = vld [vmem:[#allocation7 + $0x15c] sm:$0xff]  }
 0x600   :  { %v5963_v29 = vpop.f32.mrf.mxu1  ;;  %v6361_v32 = vpack.c.bf16 %v6339_v34, %v6339_v34 }
 0x601   :  { %v6362_v8 = vpack.c.bf16 %v6340_v15, %v6340_v15  ;;  %v6320_v46 = vadd.f32 %v13344_v45, %v6286_v49  ;;  %v6013_v60 = vadd.f32 %v5963_v29, %v5738_v63  ;;  %v6341_v57 = vmax.f32 %v6319_v22, 0.0  ;;  %v10076_v29 = vld [vmem:[#allocation7 + $0x154] sm:$0xff]  }
 0x602   :  { %v13365_v7 = vadd.f32 %v13991_v0, %v6012_v62  ;;  %v5965_v21 = vpop.f32.mrf.mxu1  ;;  %v13992_v22 = vmov 0   ;;  %v10075_v62 = vld [vmem:[#allocation7 + $0xf8] sm:$0xff]  }
 0x603   :  { %v6342_v42 = vmax.f32 %v6320_v46, 0.0  ;;  %v6288_v14 = vadd.f32 %v13249_v24, %v6013_v60  ;;  %v6014_v20 = vadd.f32 %v5965_v21, %v5739_v28  ;;  %8757 = vmatprep.mubr.msk.bf16.mxu0 %vm4878_vm4, %v6362_v8  ;;  %v6388_v1 = vpack.c.bf16 %v6341_v57, %v6341_v57  ;;  %v10078_v57 = vld [vmem:[#allocation7 + $0x14c] sm:$0xff]  }
 0x604   :  { %v5967_v61 = vpop.f32.mrf.mxu1  ;;  %6651 = vmatmul.mubr.bf16.vlgmr.msra.gmra.mxu0 %v6361_v32  ;;  %v10077_v32 = vld [vmem:[#allocation7 + $0xf0] sm:$0xff]  }
 0x605   :  { %v6389_v5 = vpack.c.bf16 %v6342_v42, %v6342_v42  ;;  %v6322_v3 = vadd.f32 %v13344_v45, %v6288_v14  ;;  %v13371_v47 = vadd.f32 %v13253_v41, %v6014_v20  ;;  %v6015_v34 = vadd.f32 %v5967_v61, %v13247_v35  ;;  %6918 = vmatpush1.bf16.msra.mxu0 %v10072_v9  ;;  %v10079_v14 = vld [vmem:[#allocation7 + $0xe8] sm:$0xff]  }
 0x606   :  { %v5971_v15 = vpop.f32.mrf.mxu1  ;;  %6919 = vmatprep.subr.bf16.mxu0 %v13992_v22  ;;  %v10080_v20 = vld [vmem:[#allocation7 + $0x144] sm:$0xff]  }
 0x607   :  { %v6344_v24 = vmax.f32 %v6322_v3, 0.0  ;;  %v6290_v23 = vadd.f32 %v13257_v31, %v6015_v34  ;;  %v6016_v49 = vadd.f32 %v5971_v15, %v13251_v37  ;;  %8743 = vmatprep.mubr.msk.bf16.mxu1 %vm4878_vm4, %v6389_v5  ;;  %v10081_v34 = vld [vmem:[#allocation7 + $0xe0] sm:$0xff]  }
 0x608   :  { %v5973_v54 = vpop.f32.mrf.mxu1  ;;  %6530 = vmatmul.mubr.bf16.vlgmr.msra.gmra.mxu1 %v6388_v1  ;;  %v10082_v1 = vld [vmem:[#allocation7 + $0x13c] sm:$0xff]  }
 0x609   :  { %v6659_v41 = vpack.c.bf16 %v6344_v24, %v6344_v24  ;;  %v6324_v63 = vadd.f32 %v13344_v45, %v6290_v23  ;;  %v6291_v35 = vadd.f32 %v13261_v50, %v6016_v49  ;;  %6768 = vmatpush1.bf16.msra.mxu1 %v10073_v27  ;;  %6920 = vmatpush1.bf16.msra.mxu0 %v10074_v18  ;;  %v10083_v49 = vld [vmem:[#allocation7 + $0xd8] sm:$0xff]  }
 0x60a   :  { %v6017_v8 = vadd.f32 %v5973_v54, %v13255_v25  ;;  %v5975_v46 = vpop.f32.mrf.mxu1  ;;  %6769 = vmatprep.subr.bf16.mxu1 %v13992_v22  ;;  %6921 = vmatprep.subr.bf16.mxu0 %v13992_v22 }
 0x60b   :  { %v6346_v37 = vmax.f32 %v6324_v63, 0.0  ;;  %v13384_v31 = vadd.f32 %v13338_v16, %v6291_v35  ;;  %v6018_v60 = vadd.f32 %v5975_v46, %v13259_v26  ;;  %8771 = vmatprep.mubr.msk.bf16.mxu1 %vm4878_vm4, %v6659_v41  ;;  %v10086_v46 = vld [vmem:[#allocation7 + $0x12c] sm:$0xff]  }
 0x60c   :  { %v13389_v50 = vadd.f32 %v13265_v43, %v6017_v8  ;;  %v5977_v44 = vpop.f32.mrf.mxu1 }
 0x60d   :  { %v6809_v28 = vpack.c.bf16 %v6346_v37, %v6346_v37  ;;  %v6293_v25 = vadd.f32 %v13269_v19, %v6018_v60  ;;  %v6019_v9 = vadd.f32 %v5977_v44, %v13263_v17  ;;  %6770 = vmatpush1.bf16.msra.mxu1 %v10075_v62  ;;  %6922 = vmatpush1.bf16.msra.mxu0 %v10076_v29  ;;  %v10085_v62 = vld [vmem:[#allocation7 + $0xd0] sm:$0xff]   ;;  %v10088_v37 = vld [vmem:[#allocation7 + $0x18c] ss:$0 sps:$4 sm:$0xff]  }
 0x60e   :  { %v5981_v0 = vpop.f32.mrf.mxu1  ;;  %6771 = vmatprep.subr.bf16.mxu1 %v13992_v22  ;;  %6923 = vmatprep.subr.bf16.mxu0 %v13992_v22 }
 0x60f   :  { %v13396_v26 = vadd.f32 %v13338_v16, %v6293_v25  ;;  %v13399_v43 = vadd.f32 %v13273_v48, %v6019_v9  ;;  %v6020_v21 = vadd.f32 %v5981_v0, %v13267_v36  ;;  %8785 = vmatprep.mubr.msk.bf16.mxu0 %vm4878_vm4, %v6809_v28  ;;  %v10087_v28 = vld [vmem:[#allocation7 + $0xc8] sm:$0xff]  }
 0x610   :  { %v5983_v17 = vpop.f32.mrf.mxu1  ;;  %v10089_v9 = vld [vmem:[#allocation7 + $0x128] ss:$0 sps:$4 sm:$0xff]  }
 0x611   :  { %v6295_v19 = vadd.f32 %v13278_v12, %v6020_v21  ;;  %v6021_v42 = vadd.f32 %v5983_v17, %v13271_v52  ;;  %6772 = vmatpush1.bf16.msra.mxu1 %v10077_v32  ;;  %6924 = vmatpush1.bf16.msra.mxu0 %v10078_v57  ;;  %v6765_v0 = vsel %vm5138_vm3, %v10089_v9, 0  ;;  %v10090_v21 = vld [vmem:[#allocation7 + $0x184] sm:$0xff]   ;;  %v10121_v9 = vld [vmem:[#allocation7 + $0x1d8] sm:$0xff]  }
 0x612   :  { %v5985_v61 = vpop.f32.mrf.mxu1  ;;  %6773 = vmatprep.subr.bf16.mxu1 %v13992_v22  ;;  %6925 = vmatprep.subr.bf16.mxu0 %v13992_v22  ;;  %v10091_v17 = vld [vmem:[#allocation7 + $0x120] sm:$0xff]  }
 0x613   :  { %v13408_v48 = vadd.f32 %v13338_v16, %v6295_v19  ;;  %v6296_v36 = vadd.f32 %v13283_v53, %v6021_v42  ;;  %v6022_v5 = vadd.f32 %v5985_v61, %v13276_v39  ;;  %v10093_v19 = vld [vmem:[#allocation7 + $0x118] sm:$0xff]   ;;  %v10095_v61 = vld [vmem:[#allocation7 + $0x110] sm:$0xff]  }
 0x614   :  { %v5987_v3 = vpop.f32.mrf.mxu1  ;;  %v10094_v42 = vld [vmem:[#allocation7 + $0x174] sm:$0xff]  }
 0x615   :  { %v13413_v12 = vadd.f32 %v13344_v45, %v6296_v36  ;;  %v6023_v52 = vadd.f32 %v5987_v3, %v13281_v38  ;;  %6774 = vmatpush1.bf16.msra.mxu1 %v10079_v14  ;;  %6926 = vmatpush1.bf16.msra.mxu0 %v10080_v20  ;;  %v6297_v27 = vadd.f32 %v13289_v33, %v6022_v5  ;;  %v10096_v5 = vld [vmem:[#allocation7 + $0x16c] sm:$0xff]  }
 0x616   :  { %v5991_v18 = vpop.f32.mrf.mxu1  ;;  %6775 = vmatprep.subr.bf16.mxu1 %v13992_v22  ;;  %6927 = vmatprep.subr.bf16.mxu0 %v13992_v22  ;;  %v6323_v14 = vadd.f32 %v13338_v16, %v13371_v47  ;;  %v6328_v20 = vadd.f32 %v13344_v45, %v13399_v43  ;;  %v6321_v36 = vadd.f32 %v13338_v16, %v13365_v7  ;;  %v10098_v43 = vld [vmem:[#allocation7 + $0x22c] sm:$0xff]  }
 0x617   :  { %v6298_v53 = vadd.f32 %v13295_v13, %v6023_v52  ;;  %v6024_v39 = vadd.f32 %v5991_v18, %v13287_v11  ;;  %v13422_v15 = vadd.f32 %v13338_v16, %v6297_v27  ;;  %v10084_v13 = vld [vmem:[#allocation7 + $0x134] sm:$0xff]   ;;  %v6326_v52 = vadd.f32 %v13344_v45, %v13389_v50 }
 0x618   :  { %v5993_v24 = vpop.f32.mrf.mxu1  ;;  %v6345_v3 = vmax.f32 %v6323_v14, 0.0  ;;  %v6350_v47 = vmax.f32 %v6328_v20, 0.0  ;;  %v6343_v27 = vmax.f32 %v6321_v36, 0.0  ;;  %v10129_v20 = vld [vmem:[#allocation7 + $0x280] sm:$0xff]   ;;  %v10131_v36 = vld [vmem:[#allocation7 + $0x278] sm:$0xff]  }
 0x619   :  { %v13425_v38 = vadd.f32 %v13344_v45, %v6298_v53  ;;  %v6299_v23 = vadd.f32 %v13301_v30, %v6024_v39  ;;  %v6025_v33 = vadd.f32 %v5993_v24, %v13293_v10  ;;  %6776 = vmatpush1.bf16.msra.mxu1 %v10081_v34  ;;  %6928 = vmatpush1.bf16.msra.mxu0 %v10082_v1  ;;  %v10097_v34 = vld [vmem:[#allocation7 + $0x108] sm:$0xff]   ;;  %v10101_v39 = vld [vmem:[#allocation7 + $0x1c0] sm:$0xff]  }
 0x61a   :  { %v5995_v54 = vpop.f32.mrf.mxu1  ;;  %6777 = vmatprep.subr.bf16.mxu1 %v13992_v22  ;;  %6929 = vmatprep.subr.bf16.mxu0 %v13992_v22  ;;  %v6808_v18 = vpack.c.bf16 %v6345_v3, %v6345_v3  ;;  %v7109_v7 = vpack.c.bf16 %v6350_v47, %v6350_v47  ;;  %v10099_v1 = vld [vmem:[#allocation7 + $0x1c8] sm:$0xff]   ;;  %v6658_v53 = vpack.c.bf16 %v6343_v27, %v6343_v27  ;;  %v10102_v24 = vld [vmem:[#allocation7 + $0x21c] sm:$0xff]   ;;  %v10133_v3 = vld [vmem:[#allocation7 + $0x270] sm:$0xff]  }
 0x61b   :  { %v13431_v11 = vadd.f32 %v13338_v16, %v6299_v23  ;;  %v6300_v41 = vadd.f32 %v13307_v4, %v6025_v33  ;;  %v6026_v63 = vadd.f32 %v5995_v54, %v13299_v55  ;;  %v10103_v23 = vld [vmem:[#allocation7 + $0x1b8] sm:$0xff]   ;;  %v10106_v54 = vld [vmem:[#allocation7 + $0x20c] sm:$0xff]   ;;  %v10137_v27 = vld [vmem:[#allocation7 + $0x260] sm:$0xff]  }
 0x61c   :  { %v5997_v35 = vpop.f32.mrf.mxu1  ;;  %v10104_v33 = vld [vmem:[#allocation7 + $0x214] sm:$0xff]   ;;  %v10135_v47 = vld [vmem:[#allocation7 + $0x268] sm:$0xff]  }
 0x61d   :  { %v13437_v30 = vadd.f32 %v13344_v45, %v6300_v41  ;;  %v6301_v10 = vadd.f32 %v13313_v6, %v6026_v63  ;;  %6778 = vmatpush1.bf16.msra.mxu1 %v10083_v49  ;;  %v6027_v29 = vadd.f32 %v5997_v35, %v13305_v59  ;;  %6930 = vmatpush1.bf16.msra.mxu0 %v10084_v13  ;;  %v10105_v49 = vld [vmem:[#allocation7 + $0x1b0] sm:$0xff]   ;;  %v10107_v13 = vld [vmem:[#allocation7 + $0x1a8] sm:$0xff]   ;;  %v10109_v63 = vld [vmem:[#allocation7 + $0x1a0] sm:$0xff]  }
 0x61e   :  { %v6001_v8 = vpop.f32.mrf.mxu1  ;;  %6779 = vmatprep.subr.bf16.mxu1 %v13992_v22  ;;  %6931 = vmatprep.subr.bf16.mxu0 %v13992_v22  ;;  %v10108_v41 = vld [vmem:[#allocation7 + $0x204] sm:$0xff]   ;;  %v10110_v35 = vld [vmem:[#allocation7 + $0x1fc] sm:$0xff]  }
 0x61f   :  { %v13443_v4 = vadd.f32 %v13338_v16, %v6301_v10  ;;  %v6028_v55 = vadd.f32 %v6001_v8, %v13311_v58  ;;  %v6302_v60 = vadd.f32 %v13318_v51, %v6027_v29  ;;  %v10111_v10 = vld [vmem:[#allocation7 + $0x198] sm:$0xff]   ;;  %v10114_v29 = vld [vmem:[#allocation7 + $0x254] ss:$0 sps:$4 sm:$0xff]  }
 0x620   :  { %v6003_v6 = vpop.f32.mrf.mxu1  ;;  %v10113_v8 = vld [vmem:[#allocation7 + $0x190] sm:$0xff]  }
 0x621   :  { %v6029_v44 = vadd.f32 %v6003_v6, %v13316_v40  ;;  %v6303_v59 = vadd.f32 %v13322_v2, %v6028_v55  ;;  %6780 = vmatpush1.bf16.msra.mxu1 %v10085_v62  ;;  %v13451_v25 = vadd.f32 %v13344_v45, %v6302_v60  ;;  %6932 = vmatpush1.bf16.msra.mxu0 %v10086_v46  ;;  %v6915_v40 = vsel %vm5138_vm3, %v10088_v37, 0  ;;  %v10112_v62 = vld [vmem:[#allocation7 + $0x1f4] sm:$0xff]   ;;  %v10115_v46 = vld [vmem:[#allocation7 + $0x1f0] ss:$0 sps:$4 sm:$0xff]   ;;  %v10117_v6 = vld [vmem:[#allocation7 + $0x1e8] sm:$0xff]  }
 0x622   :  { %6781 = vmatprep.subr.bf16.mxu1 %v13992_v22  ;;  %v6005_v58 = vpop.f32.mrf.mxu1  ;;  %6939 = vmatprep.subr.bf16.mxu0 %v13992_v22  ;;  %v7215_v55 = vsel %vm5138_vm3, %v10114_v29, 0  ;;  %v7065_v37 = vsel %vm5138_vm3, %v10115_v46, 0  ;;  %v10116_v60 = vld [vmem:[#allocation7 + $0x24c] sm:$0xff]  }
 0x623   :  { %v13455_v32 = vadd.f32 %v13338_v16, %v6303_v59  ;;  %v6304_v51 = vadd.f32 %v13329_v56, %v6029_v44  ;;  %v10092_v56 = vld [vmem:[#allocation7 + $0x17c] sm:$0xff]   ;;  %v6348_v16 = vmax.f32 %v6326_v52, 0.0  ;;  %v10118_v44 = vld [vmem:[#allocation7 + $0x244] sm:$0xff]   ;;  %v10122_v58 = vld [vmem:[#allocation7 + $0x234] sm:$0xff]  }
 0x624   :  { %v6006_v2 = vpop.f32.mrf.mxu1  ;;  %v10119_v59 = vld [vmem:[#allocation7 + $0x1e0] sm:$0xff]   ;;  %v10134_v52 = vld [vmem:[#allocation7 + $0x2cc] sm:$0xff]  }
 0x625   :  { %v13461_v57 = vadd.f32 %v13344_v45, %v6304_v51  ;;  %6782 = vmatpush1.bf16.msra.mxu1 %v10087_v28  ;;  %6940 = vmatpush2.bf16.msra.mxu0 %v6915_v40  ;;  %v10100_v45 = vld [vmem:[#allocation7 + $0x224] sm:$0xff]   ;;  %v6959_v50 = vpack.c.bf16 %v6348_v16, %v6348_v16  ;;  %v10120_v28 = vld [vmem:[#allocation7 + $0x23c] sm:$0xff]   ;;  %v6349_v51 = vmax.f32 %v13396_v26, 0.0  ;;  %v6354_v40 = vmax.f32 %v13425_v38, 0.0  ;;  %v10123_v2 = vld [vmem:[#allocation7 + $0x1d0] sm:$0xff]  }
 0x626   :  { %6789 = vmatprep.subr.bf16.mxu1 %v13992_v22  ;;  %6941 = vmatprep.subr.bf16.mxu0 %v13992_v22  ;;  %v10125_v26 = vld [vmem:[#allocation7 + $0x290] sm:$0xff]   ;;  %v10139_v16 = vld [vmem:[#allocation7 + $0x258] sm:$0xff]  }
 0x627   :  { %v10126_v38 = vld [vmem:[#allocation7 + $0x2ec] sm:$0xff]  }
 0x629   :  { %6790 = vmatpush2.bf16.msra.mxu1 %v6765_v0  ;;  %6942 = vmatpush2.bf16.msra.mxu0 %v10090_v21  ;;  %v6347_v0 = vmax.f32 %v13384_v31, 0.0  ;;  %v10124_v21 = vld [vmem:[#allocation7 + $0x2f4] sm:$0xff]   ;;  %v10127_v31 = vld [vmem:[#allocation7 + $0x288] sm:$0xff]  }
 0x62a   :  { %6791 = vmatprep.subr.bf16.mxu1 %v13992_v22  ;;  %6943 = vmatprep.subr.bf16.mxu0 %v13992_v22 }
 0x62d   :  { %6792 = vmatpush2.bf16.msra.mxu1 %v10091_v17  ;;  %6944 = vmatpush2.bf16.msra.mxu0 %v10092_v56  ;;  %v7108_v17 = vpack.c.bf16 %v6349_v51, %v6349_v51  ;;  %v6352_v56 = vmax.f32 %v13413_v12, 0.0  ;;  %v10128_v12 = vld [vmem:[#allocation7 + $0x2e4] sm:$0xff]  }
 0x62e   :  { %6793 = vmatprep.subr.bf16.mxu1 %v13992_v22  ;;  %6945 = vmatprep.subr.bf16.mxu0 %v13992_v22  ;;  %v10164_v51 = vld [vmem:[#allocation7 + $0x384] sm:$0xff]  }
 0x62f   :  { %v7259_v14 = vpack.c.bf16 %v6352_v56, %v6352_v56  ;;  %v10168_v56 = vld [vmem:[#allocation7 + $0x3dc] sm:$0xff]  }
 0x631   :  { %6794 = vmatpush2.bf16.msra.mxu1 %v10093_v19  ;;  %6946 = vmatpush2.bf16.msra.mxu0 %v10094_v42  ;;  %v7409_v19 = vpack.c.bf16 %v6354_v40, %v6354_v40  ;;  %v6958_v42 = vpack.c.bf16 %v6347_v0, %v6347_v0  ;;  %v10166_v40 = vld [vmem:[#allocation7 + $0x3e4] ss:$0 sps:$4 sm:$0xff]   ;;  %v10167_v0 = vld [vmem:[#allocation7 + $0x380] ss:$0 sps:$4 sm:$0xff]  }
 0x632   :  { %6795 = vmatprep.subr.bf16.mxu1 %v13992_v22  ;;  %6947 = vmatprep.subr.bf16.mxu0 %v13992_v22 }
 0x635   :  { %6796 = vmatpush2.bf16.msra.mxu1 %v10095_v61  ;;  %6948 = vmatpush2.bf16.msra.mxu0 %v10096_v5  ;;  %v10130_v61 = vld [vmem:[#allocation7 + $0x2dc] sm:$0xff]   ;;  %v10132_v5 = vld [vmem:[#allocation7 + $0x2d4] sm:$0xff]  }
 0x636   :  { %6797 = vmatprep.subr.bf16.mxu1 %v13992_v22  ;;  %7217 = vmatprep.subr.bf16.mxu0 %v13992_v22 }
 0x638   :  { %6950 = vmatmul.mubr.bf16.vlgmr.msra.gmra.mxu0 %v6808_v18  ;;  %v10140_v18 = vld [vmem:[#allocation7 + $0x31c] ss:$0 sps:$4 sm:$0xff]  }
 0x639   :  { %6798 = vmatpush2.bf16.msra.mxu1 %v10097_v34  ;;  %7218 = vmatpush1.bf16.msra.mxu0 %v10098_v43  ;;  %v10136_v34 = vld [vmem:[#allocation7 + $0x2c4] sm:$0xff]   ;;  %v10138_v43 = vld [vmem:[#allocation7 + $0x2bc] sm:$0xff]  }
 0x63a   :  { %8813 = vmatprep.mubr.msk.bf16.mxu0 %vm4878_vm4, %v7109_v7  ;;  %7067 = vmatprep.subr.bf16.mxu1 %v13992_v22  ;;  %v10141_v7 = vld [vmem:[#allocation7 + $0x2b8] ss:$0 sps:$4 sm:$0xff]  }
 0x63b   :  { %7219 = vmatprep.subr.bf16.mxu0 %v13992_v22 }
 0x63c   :  { %6800 = vmatmul.mubr.bf16.vlgmr.msra.gmra.mxu1 %v6658_v53  ;;  %v7365_v53 = vsel %vm5138_vm3, %v10141_v7, 0  ;;  %v6360_v7 = vmax.f32 %v13461_v57, 0.0  ;;  %v10179_v57 = vld [vmem:[#allocation7 + $0x408] sm:$0xff]  }
 0x63d   :  { %7068 = vmatpush1.bf16.msra.mxu1 %v10099_v1  ;;  %8799 = vmatprep.mubr.msk.bf16.mxu1 %vm4878_vm4, %v6959_v50  ;;  %v7515_v1 = vsel %vm5138_vm3, %v10140_v18, 0  ;;  %v10143_v50 = vld [vmem:[#allocation7 + $0x2b0] sm:$0xff]   ;;  %v6355_v18 = vmax.f32 %v13431_v11, 0.0  ;;  %v10177_v11 = vld [vmem:[#allocation7 + $0x418] sm:$0xff]  }
 0x63e   :  { %7220 = vmatpush1.bf16.msra.mxu0 %v10100_v45  ;;  %7069 = vmatprep.subr.bf16.mxu1 %v13992_v22  ;;  %v10142_v45 = vld [vmem:[#allocation7 + $0x314] sm:$0xff]  }
 0x63f   :  { %7221 = vmatprep.subr.bf16.mxu0 %v13992_v22 }
 0x641   :  { %7070 = vmatpush1.bf16.msra.mxu1 %v10101_v39  ;;  %v10144_v39 = vld [vmem:[#allocation7 + $0x30c] sm:$0xff]  }
 0x642   :  { %7222 = vmatpush1.bf16.msra.mxu0 %v10102_v24  ;;  %7071 = vmatprep.subr.bf16.mxu1 %v13992_v22  ;;  %v10145_v24 = vld [vmem:[#allocation7 + $0x2a8] sm:$0xff]  }
 0x643   :  { %7223 = vmatprep.subr.bf16.mxu0 %v13992_v22 }
 0x645   :  { %7072 = vmatpush1.bf16.msra.mxu1 %v10103_v23  ;;  %v10146_v23 = vld [vmem:[#allocation7 + $0x304] sm:$0xff]  }
 0x646   :  { %7224 = vmatpush1.bf16.msra.mxu0 %v10104_v33  ;;  %7073 = vmatprep.subr.bf16.mxu1 %v13992_v22  ;;  %v10147_v33 = vld [vmem:[#allocation7 + $0x2a0] sm:$0xff]  }
 0x647   :  { %7225 = vmatprep.subr.bf16.mxu0 %v13992_v22 }
 0x649   :  { %7074 = vmatpush1.bf16.msra.mxu1 %v10105_v49  ;;  %v10148_v49 = vld [vmem:[#allocation7 + $0x2fc] sm:$0xff]  }
 0x64a   :  { %7226 = vmatpush1.bf16.msra.mxu0 %v10106_v54  ;;  %7075 = vmatprep.subr.bf16.mxu1 %v13992_v22  ;;  %v6353_v54 = vmax.f32 %v13422_v15, 0.0  ;;  %v10151_v15 = vld [vmem:[#allocation7 + $0x358] sm:$0xff]  }
 0x64b   :  { %7227 = vmatprep.subr.bf16.mxu0 %v13992_v22 }
 0x64d   :  { %7076 = vmatpush1.bf16.msra.mxu1 %v10107_v13  ;;  %v6358_v13 = vmax.f32 %v13451_v25, 0.0  ;;  %v10152_v25 = vld [vmem:[#allocation7 + $0x3b4] sm:$0xff]  }
 0x64e   :  { %7228 = vmatpush1.bf16.msra.mxu0 %v10108_v41  ;;  %7077 = vmatprep.subr.bf16.mxu1 %v13992_v22  ;;  %v10149_v41 = vld [vmem:[#allocation7 + $0x298] sm:$0xff]  }
 0x64f   :  { %7229 = vmatprep.subr.bf16.mxu0 %v13992_v22  ;;  %v7709_v29 = vpack.c.bf16 %v6358_v13, %v6358_v13 }
 0x651   :  { %7078 = vmatpush1.bf16.msra.mxu1 %v10109_v63  ;;  %v6351_v63 = vmax.f32 %v13408_v48, 0.0  ;;  %v10153_v48 = vld [vmem:[#allocation7 + $0x350] sm:$0xff]  }
 0x652   :  { %7230 = vmatpush1.bf16.msra.mxu0 %v10110_v35  ;;  %7079 = vmatprep.subr.bf16.mxu1 %v13992_v22  ;;  %v10150_v35 = vld [vmem:[#allocation7 + $0x3bc] sm:$0xff]  }
 0x653   :  { %7231 = vmatprep.subr.bf16.mxu0 %v13992_v22 }
 0x655   :  { %7080 = vmatpush1.bf16.msra.mxu1 %v10111_v10  ;;  %v7408_v10 = vpack.c.bf16 %v6353_v54, %v6353_v54 }
 0x656   :  { %7232 = vmatpush1.bf16.msra.mxu0 %v10112_v62  ;;  %7081 = vmatprep.subr.bf16.mxu1 %v13992_v22  ;;  %v6356_v62 = vmax.f32 %v13437_v30, 0.0  ;;  %v10154_v30 = vld [vmem:[#allocation7 + $0x3ac] sm:$0xff]  }
 0x657   :  { %7239 = vmatprep.subr.bf16.mxu0 %v13992_v22 }
 0x658   :  { %v7559_v46 = vpack.c.bf16 %v6356_v62, %v6356_v62 }
 0x659   :  { %7082 = vmatpush1.bf16.msra.mxu1 %v10113_v8  ;;  %v7258_v8 = vpack.c.bf16 %v6351_v63, %v6351_v63 }
 0x65a   :  { %7240 = vmatpush2.bf16.msra.mxu0 %v7215_v55  ;;  %7089 = vmatprep.subr.bf16.mxu1 %v13992_v22  ;;  %v10155_v55 = vld [vmem:[#allocation7 + $0x348] sm:$0xff]  }
 0x65b   :  { %7241 = vmatprep.subr.bf16.mxu0 %v13992_v22 }
 0x65d   :  { %7090 = vmatpush2.bf16.msra.mxu1 %v7065_v37  ;;  %v10156_v37 = vld [vmem:[#allocation7 + $0x3a4] sm:$0xff]  }
 0x65e   :  { %7242 = vmatpush2.bf16.msra.mxu0 %v10116_v60  ;;  %7091 = vmatprep.subr.bf16.mxu1 %v13992_v22  ;;  %v10157_v60 = vld [vmem:[#allocation7 + $0x340] sm:$0xff]  }
 0x65f   :  { %7243 = vmatprep.subr.bf16.mxu0 %v13992_v22 }
 0x661   :  { %7092 = vmatpush2.bf16.msra.mxu1 %v10117_v6  ;;  %v10158_v6 = vld [vmem:[#allocation7 + $0x39c] sm:$0xff]  }
 0x662   :  { %7244 = vmatpush2.bf16.msra.mxu0 %v10118_v44  ;;  %7093 = vmatprep.subr.bf16.mxu1 %v13992_v22  ;;  %v10159_v44 = vld [vmem:[#allocation7 + $0x338] sm:$0xff]  }
 0x663   :  { %7245 = vmatprep.subr.bf16.mxu0 %v13992_v22 }
 0x665   :  { %7094 = vmatpush2.bf16.msra.mxu1 %v10119_v59  ;;  %v10160_v59 = vld [vmem:[#allocation7 + $0x394] sm:$0xff]  }
 0x666   :  { %7246 = vmatpush2.bf16.msra.mxu0 %v10120_v28  ;;  %7095 = vmatprep.subr.bf16.mxu1 %v13992_v22  ;;  %v10161_v28 = vld [vmem:[#allocation7 + $0x330] sm:$0xff]  }
 0x667   :  { %7247 = vmatprep.subr.bf16.mxu0 %v13992_v22 }
 0x669   :  { %7096 = vmatpush2.bf16.msra.mxu1 %v10121_v9  ;;  %v10162_v9 = vld [vmem:[#allocation7 + $0x38c] sm:$0xff]  }
 0x66a   :  { %7248 = vmatpush2.bf16.msra.mxu0 %v10122_v58  ;;  %7097 = vmatprep.subr.bf16.mxu1 %v13992_v22  ;;  %v10163_v58 = vld [vmem:[#allocation7 + $0x328] sm:$0xff]  }
 0x66b   :  { %7517 = vmatprep.subr.bf16.mxu0 %v13992_v22 }
 0x66d   :  { %7250 = vmatmul.mubr.bf16.vlgmr.msra.gmra.mxu0 %v7108_v17  ;;  %7098 = vmatpush2.bf16.msra.mxu1 %v10123_v2  ;;  %v10165_v2 = vld [vmem:[#allocation7 + $0x320] sm:$0xff]   ;;  %v7665_v17 = vsel %vm5138_vm3, %v10167_v0, 0 }
 0x66e   :  { %7518 = vmatpush1.bf16.msra.mxu0 %v10124_v21  ;;  %8841 = vmatprep.mubr.msk.bf16.mxu0 %vm4878_vm4, %v7409_v19  ;;  %v7815_v21 = vsel %vm5138_vm3, %v10166_v40, 0 }
 0x66f   :  { %7367 = vmatprep.subr.bf16.mxu1 %v13992_v22  ;;  %7519 = vmatprep.subr.bf16.mxu0 %v13992_v22 }
 0x670   :  { %7100 = vmatmul.mubr.bf16.vlgmr.msra.gmra.mxu1 %v6958_v42 }
 0x671   :  { %7368 = vmatpush1.bf16.msra.mxu1 %v10125_v26  ;;  %8827 = vmatprep.mubr.msk.bf16.mxu1 %vm4878_vm4, %v7259_v14  ;;  %v10169_v26 = vld [vmem:[#allocation7 + $0x378] sm:$0xff]  }
 0x672   :  { %7520 = vmatpush1.bf16.msra.mxu0 %v10126_v38  ;;  %7369 = vmatprep.subr.bf16.mxu1 %v13992_v22  ;;  %v10170_v38 = vld [vmem:[#allocation7 + $0x3d4] sm:$0xff]  }
 0x673   :  { %7521 = vmatprep.subr.bf16.mxu0 %v13992_v22 }
 0x675   :  { %7370 = vmatpush1.bf16.msra.mxu1 %v10127_v31 }
 0x676   :  { %7522 = vmatpush1.bf16.msra.mxu0 %v10128_v12  ;;  %7371 = vmatprep.subr.bf16.mxu1 %v13992_v22 }
 0x677   :  { %7523 = vmatprep.subr.bf16.mxu0 %v13992_v22 }
 0x679   :  { %7372 = vmatpush1.bf16.msra.mxu1 %v10129_v20  ;;  %v10171_v20 = vld [vmem:[#allocation7 + $0x370] sm:$0xff]  }
 0x67a   :  { %7524 = vmatpush1.bf16.msra.mxu0 %v10130_v61  ;;  %7373 = vmatprep.subr.bf16.mxu1 %v13992_v22 }
 0x67b   :  { %7525 = vmatprep.subr.bf16.mxu0 %v13992_v22 }
 0x67d   :  { %7374 = vmatpush1.bf16.msra.mxu1 %v10131_v36 }
 0x67e   :  { %7526 = vmatpush1.bf16.msra.mxu0 %v10132_v5  ;;  %7375 = vmatprep.subr.bf16.mxu1 %v13992_v22  ;;  %v10172_v5 = vld [vmem:[#allocation7 + $0x3cc] sm:$0xff]  }
 0x67f   :  { %7527 = vmatprep.subr.bf16.mxu0 %v13992_v22 }
 0x681   :  { %7376 = vmatpush1.bf16.msra.mxu1 %v10133_v3 }
 0x682   :  { %7528 = vmatpush1.bf16.msra.mxu0 %v10134_v52  ;;  %7377 = vmatprep.subr.bf16.mxu1 %v13992_v22  ;;  %v10173_v52 = vld [vmem:[#allocation7 + $0x368] sm:$0xff]  }
 0x683   :  { %7529 = vmatprep.subr.bf16.mxu0 %v13992_v22 }
 0x685   :  { %7378 = vmatpush1.bf16.msra.mxu1 %v10135_v47 }
 0x686   :  { %7530 = vmatpush1.bf16.msra.mxu0 %v10136_v34  ;;  %7379 = vmatprep.subr.bf16.mxu1 %v13992_v22  ;;  %v10174_v34 = vld [vmem:[#allocation7 + $0x3c4] sm:$0xff]  }
 0x687   :  { %7531 = vmatprep.subr.bf16.mxu0 %v13992_v22 }
 0x689   :  { %7380 = vmatpush1.bf16.msra.mxu1 %v10137_v27  ;;  %v6357_v27 = vmax.f32 %v13443_v4, 0.0  ;;  %v7859_v4 = vpack.c.bf16 %v6360_v7, %v6360_v7 }
 0x68a   :  { %7532 = vmatpush1.bf16.msra.mxu0 %v10138_v43  ;;  %7381 = vmatprep.subr.bf16.mxu1 %v13992_v22  ;;  %v10175_v43 = vld [vmem:[#allocation7 + $0x360] sm:$0xff]  }
 0x68b   :  { %7539 = vmatprep.subr.bf16.mxu0 %v13992_v22 }
 0x68d   :  { %7382 = vmatpush1.bf16.msra.mxu1 %v10139_v16  ;;  %v7708_v16 = vpack.c.bf16 %v6357_v27, %v6357_v27 }
 0x68e   :  { %7540 = vmatpush2.bf16.msra.mxu0 %v7515_v1  ;;  %7389 = vmatprep.subr.bf16.mxu1 %v13992_v22  ;;  %v13993_v1 = vmov 0.0  }
 0x68f   :  { %7541 = vmatprep.subr.bf16.mxu0 %v13992_v22 }
 0x691   :  { %7390 = vmatpush2.bf16.msra.mxu1 %v7365_v53  ;;  %v10176_v53 = vld [vmem:[#allocation7 + $0x420] sm:$0xff]  }
 0x692   :  { %7542 = vmatpush2.bf16.msra.mxu0 %v10142_v45  ;;  %7391 = vmatprep.subr.bf16.mxu1 %v13992_v22  ;;  %v7558_v45 = vpack.c.bf16 %v6355_v18, %v6355_v18 }
 0x693   :  { %7543 = vmatprep.subr.bf16.mxu0 %v13992_v22 }
 0x695   :  { %7392 = vmatpush2.bf16.msra.mxu1 %v10143_v50  ;;  %v10178_v50 = vld [vmem:[#allocation7 + $0x410] sm:$0xff]  }
 0x696   :  { %7544 = vmatpush2.bf16.msra.mxu0 %v10144_v39  ;;  %7393 = vmatprep.subr.bf16.mxu1 %v13992_v22  ;;  %v10180_v39 = vld [vmem:[#allocation7 + $0x400] sm:$0xff]  }
 0x697   :  { %7545 = vmatprep.subr.bf16.mxu0 %v13992_v22 }
 0x699   :  { %7394 = vmatpush2.bf16.msra.mxu1 %v10145_v24  ;;  %v10181_v24 = vld [vmem:[#allocation7 + $0x3f8] sm:$0xff]  }
 0x69a   :  { %7546 = vmatpush2.bf16.msra.mxu0 %v10146_v23  ;;  %7395 = vmatprep.subr.bf16.mxu1 %v13992_v22  ;;  %v10182_v23 = vld [vmem:[#allocation7 + $0x3f0] sm:$0xff]  }
 0x69b   :  { %7547 = vmatprep.subr.bf16.mxu0 %v13992_v22 }
 0x69d   :  { %7396 = vmatpush2.bf16.msra.mxu1 %v10147_v33  ;;  %v10183_v33 = vld [vmem:[#allocation7 + $0x3e8] sm:$0xff]  }
 0x69e   :  { %7548 = vmatpush2.bf16.msra.mxu0 %v10148_v49  ;;  %7397 = vmatprep.subr.bf16.mxu1 %v13992_v22  ;;  %v10184_v49 = vld [vmem:[#allocation7 + $0x448] ss:$0 sps:$4 sm:$0xff]  }
 0x69f   :  { %7817 = vmatprep.subr.bf16.mxu0 %v13992_v22  ;;  %v7965_v54 = vsel %vm5138_vm3, %v10184_v49, 0 }
 0x6a1   :  { %7550 = vmatmul.mubr.bf16.vlgmr.msra.gmra.mxu0 %v7408_v10  ;;  %7398 = vmatpush2.bf16.msra.mxu1 %v10149_v41  ;;  %v10185_v41 = vld [vmem:[#allocation7 + $0x440] sm:$0xff]  }
 0x6a2   :  { %7818 = vmatpush1.bf16.msra.mxu0 %v10150_v35  ;;  %8869 = vmatprep.mubr.msk.bf16.mxu0 %vm4878_vm4, %v7709_v29  ;;  %v10186_v29 = vld [vmem:[#allocation7 + $0x438] sm:$0xff]  }
 0x6a3   :  { %7667 = vmatprep.subr.bf16.mxu1 %v13992_v22  ;;  %7819 = vmatprep.subr.bf16.mxu0 %v13992_v22 }
 0x6a4   :  { %7400 = vmatmul.mubr.bf16.vlgmr.msra.gmra.mxu1 %v7258_v8 }
 0x6a5   :  { %7668 = vmatpush1.bf16.msra.mxu1 %v10151_v15  ;;  %8855 = vmatprep.mubr.msk.bf16.mxu1 %vm4878_vm4, %v7559_v46 }
 0x6a6   :  { %7820 = vmatpush1.bf16.msra.mxu0 %v10152_v25  ;;  %7669 = vmatprep.subr.bf16.mxu1 %v13992_v22 }
 0x6a7   :  { %7821 = vmatprep.subr.bf16.mxu0 %v13992_v22 }
 0x6a9   :  { %7670 = vmatpush1.bf16.msra.mxu1 %v10153_v48  ;;  %v10187_v48 = vld [vmem:[#allocation7 + $0x430] sm:$0xff]  }
 0x6aa   :  { %7822 = vmatpush1.bf16.msra.mxu0 %v10154_v30  ;;  %7671 = vmatprep.subr.bf16.mxu1 %v13992_v22 }
 0x6ab   :  { %7823 = vmatprep.subr.bf16.mxu0 %v13992_v22 }
 0x6ad   :  { %7672 = vmatpush1.bf16.msra.mxu1 %v10155_v55  ;;  %v10188_v55 = vld [vmem:[#allocation7 + $0x428] sm:$0xff]  }
 0x6ae   :  { %7824 = vmatpush1.bf16.msra.mxu0 %v10156_v37  ;;  %7673 = vmatprep.subr.bf16.mxu1 %v13992_v22  ;;  %v6359_v37 = vmax.f32 %v13455_v32, 0.0  ;;  %v10192_v32 = vld [vmem:[%s13649_s11 + $0x18] sm:$0xff]  }
 0x6af   :  { %7825 = vmatprep.subr.bf16.mxu0 %v13992_v22 }
 0x6b1   :  { %7674 = vmatpush1.bf16.msra.mxu1 %v10157_v60  ;;  %v7858_v60 = vpack.c.bf16 %v6359_v37, %v6359_v37 }
 0x6b2   :  { %7826 = vmatpush1.bf16.msra.mxu0 %v10158_v6  ;;  %7675 = vmatprep.subr.bf16.mxu1 %v13992_v22  ;;  %v10189_v6 = vld [vmem:[%s13649_s11 + $0x30] ss:$0 sps:$4 sm:$0x33]  }
 0x6b3   :  { %7827 = vmatprep.subr.bf16.mxu0 %v13992_v22 }
 0x6b5   :  { %7676 = vmatpush1.bf16.msra.mxu1 %v10159_v44  ;;  %v8081_v44 = vsel %vm246_vm0, %v10189_v6, 0 }
 0x6b6   :  { %7828 = vmatpush1.bf16.msra.mxu0 %v10160_v59  ;;  %7677 = vmatprep.subr.bf16.mxu1 %v13992_v22  ;;  %v10190_v59 = vld [vmem:[%s13649_s11 + $0x28] sm:$0xff]  }
 0x6b7   :  { %7829 = vmatprep.subr.bf16.mxu0 %v13992_v22 }
 0x6b9   :  { %7678 = vmatpush1.bf16.msra.mxu1 %v10161_v28 }
 0x6ba   :  { %7830 = vmatpush1.bf16.msra.mxu0 %v10162_v9  ;;  %7679 = vmatprep.subr.bf16.mxu1 %v13992_v22  ;;  %v10193_v9 = vld [vmem:[%s13649_s11 + $0x10] sm:$0xff]  }
 0x6bb   :  { %7831 = vmatprep.subr.bf16.mxu0 %v13992_v22 }
 0x6bd   :  { %7680 = vmatpush1.bf16.msra.mxu1 %v10163_v58 }
 0x6be   :  { %7832 = vmatpush1.bf16.msra.mxu0 %v10164_v51  ;;  %7681 = vmatprep.subr.bf16.mxu1 %v13992_v22 }
 0x6bf   :  { %7839 = vmatprep.subr.bf16.mxu0 %v13992_v22 }
 0x6c1   :  { %7682 = vmatpush1.bf16.msra.mxu1 %v10165_v2 }
 0x6c2   :  { %7840 = vmatpush2.bf16.msra.mxu0 %v7815_v21  ;;  %7689 = vmatprep.subr.bf16.mxu1 %v13992_v22 }
 0x6c3   :  { %7841 = vmatprep.subr.bf16.mxu0 %v13992_v22 }
 0x6c4   :  { %v6652_v19 = vpop.f32.mrf.mxu0 }
 0x6c5   :  { %7690 = vmatpush2.bf16.msra.mxu1 %v7665_v17 }
 0x6c6   :  { %7842 = vmatpush2.bf16.msra.mxu0 %v10168_v56  ;;  %v6654_v42 = vpop.f32.mrf.mxu0  ;;  %7691 = vmatprep.subr.bf16.mxu1 %v13992_v22 }
 0x6c7   :  { %7843 = vmatprep.subr.bf16.mxu0 %v13992_v22  ;;  %v10195_v42 = vld [vmem:[%s13649_s11] sm:$0xff]  }
 0x6c8   :  { %v6531_v14 = vpop.f32.mrf.mxu1  ;;  %v6655_v31 = vpop.f32.mrf.mxu0 }
 0x6c9   :  { %v13574_v12 = vadd.f32 %v6652_v19, %v6531_v14  ;;  %7692 = vmatpush2.bf16.msra.mxu1 %v10169_v26  ;;  %v10194_v26 = vld [vmem:[%s13649_s11 + $0x8] sm:$0xff]  }
 0x6ca   :  { %7844 = vmatpush2.bf16.msra.mxu0 %v10170_v38  ;;  %v6533_v61 = vpop.f32.mrf.mxu1  ;;  %v6656_v36 = vpop.f32.mrf.mxu0  ;;  %7693 = vmatprep.subr.bf16.mxu1 %v13992_v22 }
 0x6cb   :  { %7845 = vmatprep.subr.bf16.mxu0 %v13992_v22 }
 0x6cc   :  { %v6534_v3 = vpop.f32.mrf.mxu1 }
 0x6cd   :  { %7694 = vmatpush2.bf16.msra.mxu1 %v10171_v20 }
 0x6ce   :  { %7846 = vmatpush2.bf16.msra.mxu0 %v10172_v5  ;;  %v6535_v47 = vpop.f32.mrf.mxu1  ;;  %7695 = vmatprep.subr.bf16.mxu1 %v13992_v22 }
 0x6cf   :  { %7847 = vmatprep.subr.bf16.mxu0 %v13992_v22 }
 0x6d1   :  { %7696 = vmatpush2.bf16.msra.mxu1 %v10173_v52 }
 0x6d2   :  { %7848 = vmatpush2.bf16.msra.mxu0 %v10174_v34  ;;  %7697 = vmatprep.subr.bf16.mxu1 %v13992_v22 }
 0x6d3   :  { %9682 = vmatprep.subr.bf16.mxu0 %v13993_v1 }
 0x6d5   :  { %7850 = vmatmul.mubr.bf16.vlgmr.msra.gmra.mxu0 %v7708_v16  ;;  %7698 = vmatpush2.bf16.msra.mxu1 %v10175_v43 }
 0x6d6   :  { %7967 = vmatprep.subr.bf16.mxu1 %v13992_v22  ;;  %9683 = vmatpush3.bf16.msra.mxu0 %v8081_v44 }
 0x6d7   :  { %9684 = vmatprep.subr.bf16.mxu0 %v13993_v1  ;;  %9696 = vmatprep.mubr.msk.bf16.mxu0 %vm10270_vm5, %v13993_v1 }
 0x6d8   :  { %7700 = vmatmul.mubr.bf16.vlgmr.msra.gmra.mxu1 %v7558_v45 }
 0x6d9   :  { %7968 = vmatpush1.bf16.msra.mxu1 %v10176_v53  ;;  %8883 = vmatprep.mubr.msk.bf16.mxu1 %vm4878_vm4, %v7859_v4 }
 0x6da   :  { %7969 = vmatprep.subr.bf16.mxu1 %v13992_v22  ;;  %9685 = vmatpush3.bf16.msra.mxu0 %v10190_v59 }
 0x6db   :  { %9686 = vmatprep.subr.bf16.mxu0 %v13993_v1 }
 0x6dd   :  { %7970 = vmatpush1.bf16.msra.mxu1 %v10177_v11  ;;  %v8884_v11 = vld [vmem:[%s13648_s10] ss:$0 sm:$0xff] }
 0x6de   :  { %7971 = vmatprep.subr.bf16.mxu1 %v13992_v22 }
 0x6e1   :  { %7972 = vmatpush1.bf16.msra.mxu1 %v10178_v50 }
 0x6e2   :  { %7973 = vmatprep.subr.bf16.mxu1 %v13992_v22 }
 0x6e5   :  { %7974 = vmatpush1.bf16.msra.mxu1 %v10179_v57 }
 0x6e6   :  { %7975 = vmatprep.subr.bf16.mxu1 %v13992_v22 }
 0x6e9   :  { %7976 = vmatpush1.bf16.msra.mxu1 %v10180_v39 }
 0x6ea   :  { %7977 = vmatprep.subr.bf16.mxu1 %v13992_v22 }
 0x6ed   :  { %7978 = vmatpush1.bf16.msra.mxu1 %v10181_v24 }
 0x6ee   :  { %7979 = vmatprep.subr.bf16.mxu1 %v13992_v22 }
 0x6f1   :  { %7980 = vmatpush1.bf16.msra.mxu1 %v10182_v23 }
 0x6f2   :  { %7981 = vmatprep.subr.bf16.mxu1 %v13992_v22 }
 0x6f5   :  { %7982 = vmatpush1.bf16.msra.mxu1 %v10183_v33 }
 0x6f6   :  { %7989 = vmatprep.subr.bf16.mxu1 %v13992_v22 }
 0x6f8   :  { %v6951_v13 = vpop.f32.mrf.mxu0 }
 0x6f9   :  { %7990 = vmatpush2.bf16.msra.mxu1 %v7965_v54  ;;  %v8885_v54 = vld [vmem:[#allocation2] ss:$0 sm:$0xff] }
 0x6fa   :  { %7991 = vmatprep.subr.bf16.mxu1 %v13992_v22  ;;  %v6953_v63 = vpop.f32.mrf.mxu0 }
 0x6fc   :  { %v6801_v35 = vpop.f32.mrf.mxu1  ;;  %v6954_v62 = vpop.f32.mrf.mxu0 }
 0x6fd   :  { %v6807_v10 = vadd.f32 %v6801_v35, %v13574_v12  ;;  %7992 = vmatpush2.bf16.msra.mxu1 %v10185_v41 }
 0x6fe   :  { %v6803_v15 = vpop.f32.mrf.mxu1  ;;  %7993 = vmatprep.subr.bf16.mxu1 %v13992_v22  ;;  %v6955_v8 = vpop.f32.mrf.mxu0 }
 0x6ff   :  { %v6957_v25 = vadd.f32 %v6951_v13, %v6807_v10 }
 0x700   :  { %v6804_v46 = vpop.f32.mrf.mxu1 }
 0x701   :  { %7994 = vmatpush2.bf16.msra.mxu1 %v10186_v29 }
 0x702   :  { %v6805_v30 = vpop.f32.mrf.mxu1  ;;  %7995 = vmatprep.subr.bf16.mxu1 %v13992_v22 }
 0x705   :  { %7996 = vmatpush2.bf16.msra.mxu1 %v10187_v48 }
 0x706   :  { %7997 = vmatprep.subr.bf16.mxu1 %v13992_v22  ;;  %v10191_v22 = vld [vmem:[%s13649_s11 + $0x20] sm:$0xff]  }
 0x707   :  { %9687 = vmatpush3.bf16.msra.mxu0 %v10191_v22 }
 0x708   :  { %9688 = vmatprep.subr.bf16.mxu0 %v13993_v1 }
 0x709   :  { %7998 = vmatpush2.bf16.msra.mxu1 %v10188_v55 }
 0x70b   :  { %9689 = vmatpush3.bf16.msra.mxu0 %v10192_v32 }
 0x70c   :  { %8000 = vmatmul.mubr.bf16.vlgmr.msra.gmra.mxu1 %v7858_v60  ;;  %9690 = vmatprep.subr.bf16.mxu0 %v13993_v1 }
 0x70f   :  { %9691 = vmatpush3.bf16.msra.mxu0 %v10193_v9 }
 0x710   :  { %9692 = vmatprep.subr.bf16.mxu0 %v13993_v1 }
 0x713   :  { %9693 = vmatpush3.bf16.msra.mxu0 %v10194_v26 }
 0x714   :  { %9694 = vmatprep.subr.bf16.mxu0 %v13993_v1 }
 0x717   :  { %9695 = vmatpush3.bf16.msra.mxu0 %v10195_v42 }
 0x72d   :  { %v7251_v28 = vpop.f32.mrf.mxu0 }
 0x72f   :  { %v7253_v58 = vpop.f32.mrf.mxu0 }
 0x730   :  { %v7101_v51 = vpop.f32.mrf.mxu1 }
 0x731   :  { %v7107_v40 = vadd.f32 %v7101_v51, %v6957_v25  ;;  %v7254_v2 = vpop.f32.mrf.mxu0 }
 0x732   :  { %v7103_v0 = vpop.f32.mrf.mxu1 }
 0x733   :  { %v7255_v21 = vpop.f32.mrf.mxu0  ;;  %v7257_v17 = vadd.f32 %v7251_v28, %v7107_v40 }
 0x734   :  { %v7104_v56 = vpop.f32.mrf.mxu1 }
 0x736   :  { %v7105_v19 = vpop.f32.mrf.mxu1 }
 0x761   :  { %v7551_v38 = vpop.f32.mrf.mxu0 }
 0x763   :  { %v7553_v14 = vpop.f32.mrf.mxu0 }
 0x764   :  { %v7401_v31 = vpop.f32.mrf.mxu1 }
 0x765   :  { %v7407_v12 = vadd.f32 %v7401_v31, %v7257_v17  ;;  %v7554_v20 = vpop.f32.mrf.mxu0 }
 0x766   :  { %v7403_v61 = vpop.f32.mrf.mxu1 }
 0x767   :  { %v7555_v36 = vpop.f32.mrf.mxu0  ;;  %v7557_v5 = vadd.f32 %v7551_v38, %v7407_v12 }
 0x768   :  { %v7404_v3 = vpop.f32.mrf.mxu1 }
 0x76a   :  { %v7405_v52 = vpop.f32.mrf.mxu1 }
 0x795   :  { %v7851_v47 = vpop.f32.mrf.mxu0 }
 0x797   :  { %v7853_v34 = vpop.f32.mrf.mxu0 }
 0x798   :  { %v7701_v27 = vpop.f32.mrf.mxu1 }
 0x799   :  { %v7854_v43 = vpop.f32.mrf.mxu0  ;;  %v7707_v45 = vadd.f32 %v7701_v27, %v7557_v5 }
 0x79a   :  { %v7703_v18 = vpop.f32.mrf.mxu1 }
 0x79b   :  { %v7855_v16 = vpop.f32.mrf.mxu0  ;;  %v7857_v1 = vadd.f32 %v7851_v47, %v7707_v45 }
 0x79c   :  { %v7704_v7 = vpop.f32.mrf.mxu1 }
 0x79e   :  { %v7705_v53 = vpop.f32.mrf.mxu1 }
 0x7cc   :  { %v8001_v4 = vpop.f32.mrf.mxu1 }
 0x7cd   :  { %v8007_v50 = vadd.f32 %v8001_v4, %v7857_v1 }
 0x7ce   :  { %v8003_v57 = vpop.f32.mrf.mxu1 }
 0x7cf   :  { %v8015_v39 = vadd.f32 %v8884_v11, %v8007_v50 }
 0x7d0   :  { %v8004_v24 = vpop.f32.mrf.mxu1 }
 0x7d1   :  { %v8016_v23 = vmax.f32 %v8015_v39, 0.0 }
 0x7d2   :  { %v8005_v33 = vpop.f32.mrf.mxu1 }
 0x7d3   :  { %v8017_v49 = vpack.c.bf16 %v8016_v23, %v8016_v23 }
 0x7d5   :  { %9697 = vmatmul.mubr.msk.bf16.vlgmr.msra.gmra.mxu0 %vm1723_vm2, %v8017_v49 }
 0x895   :  { %v8117_v13 = vpop.f32.mrf.mxu0 }
 0x896   :  { %v8118_v41 = vadd.f32 %v8885_v54, %v8117_v13 }
 0x897   :  { %v9698_v63 = vpop.f32.mrf.mxu0 }
 0x898   :  { %8124 = vst.msk [vmem:[%s13651_s13] sm:$0xff] %vm8123_vm6, %v8118_v41 }
 0x899   :  { %v8120_v35 = vpop.f32.mrf.mxu0 }
 0x89b   :  { %v9699_v10 = vpop.f32.mrf.mxu0 }
 0x89c   :  { %8129 = vsyncpa [#allocation4], 1 }
 0x89d   :  { %8130 = vsyncpa [#allocation6], 1 }

</bundles_post_ra>
